<compile_context>
chip_gen: v7x
topology: tpu7x:2x2x1
jax: 0.10.0
libtpu: 0.0.40
codegen_flags: <defaults>
</compile_context>

<pallas_src>
import functools
import math

import jax
import jax.numpy as jnp
from jax import lax
from jax.experimental import pallas as pl
from jax.experimental.pallas import tpu as pltpu

EPS = 1e-6
# Explicit, modest VMEM request: far above actual usage (<2 MiB scratch +
# ~0.4 MiB bf16 weights) and safely inside v7x's 64 MiB/TC.
VMEM_LIMIT_BYTES = 40 * 1024 * 1024


# ------------------------------- kernel math --------------------------------

def _layernorm_f32(x):
    """Annotated-Transformer LayerNorm with a=1, b=0: unbiased std (D-1),
    eps added to the std, f32 math, EUP reciprocal."""
    d = x.shape[-1]
    mean = jnp.mean(x, axis=-1, keepdims=True)
    var = jnp.sum((x - mean) ** 2, axis=-1, keepdims=True) * (1.0 / (d - 1))
    inv = pl.reciprocal(jnp.sqrt(var) + EPS, approx=True)   # EUP slot
    return (x - mean) * inv


def encoder_kernel(x_ref, wqkv_ref, bqkv_ref, wo_ref, bo_ref,
                   w1_ref, b1_ref, w2_ref, b2_ref,
                   o_ref,
                   resid_ref, qkv_ref, ctx_ref, hid_ref,
                   *, num_layers, num_heads):
    """All N encoder layers + final LayerNorm for one batch element (S, D)."""
    d_model = resid_ref.shape[1]
    dk = d_model // num_heads
    scale = 1.0 / math.sqrt(dk)

    # Residual stream lives in VMEM scratch for the whole call.
    resid_ref[...] = x_ref[...]

    # Hoist bias loads out of the layer loop (a handful of vregs total).
    bqkv = bqkv_ref[...]          # (1, 3D) f32
    bo = bo_ref[...]              # (1, D)  f32
    b1 = b1_ref[...]              # (1, Dff) f32
    b2 = b2_ref[...]              # (1, D)  f32

    @pl.loop(0, num_layers, unroll=True)      # deepcopy => layers share params
    def _(_layer):
        # ---------------- attention sublayer: x + Wo(MHA(LN(x))) -------------
        x = resid_ref[...]
        xn = _layernorm_f32(x)
        # Fused QKV projection (bf16 MXU, f32 acc), staged through VMEM scratch
        # to bound vreg live ranges.
        qkv_ref[...] = jnp.dot(xn.astype(jnp.bfloat16), wqkv_ref[...],
                               preferred_element_type=jnp.float32) + bqkv

        for h in range(num_heads):            # static unrolled head loop
            q0 = h * dk
            # Windowed loads from the scratch ref (not slices of a live value).
            qh = qkv_ref[:, q0:q0 + dk].astype(jnp.bfloat16)
            kh = qkv_ref[:, d_model + q0:d_model + q0 + dk].astype(jnp.bfloat16)
            vh = qkv_ref[:, 2 * d_model + q0:2 * d_model + q0 + dk].astype(jnp.bfloat16)

            sc = lax.dot_general(qh, kh, (((1,), (1,)), ((), ())),
                                 preferred_element_type=jnp.float32) * scale
            sc = sc - jnp.max(sc, axis=-1, keepdims=True)
            p = jnp.exp(sc)
            p = p * pl.reciprocal(jnp.sum(p, axis=-1, keepdims=True), approx=True)
            # Write this head's context straight into the (S, D) ctx scratch at
            # lane offset h*dk (no concatenate, no retained head temporaries).
            ctx_ref[:, q0:q0 + dk] = jnp.dot(p.astype(jnp.bfloat16), vh,
                                             preferred_element_type=jnp.float32)

        out = jnp.dot(ctx_ref[...].astype(jnp.bfloat16), wo_ref[...],
                      preferred_element_type=jnp.float32) + bo
        resid_ref[...] = x + out

        # ---------------- FFN sublayer: x + W2(relu(W1(LN(x)))) --------------
        x2 = resid_ref[...]
        xn2 = _layernorm_f32(x2)
        hid_ref[...] = jnp.maximum(
            jnp.dot(xn2.astype(jnp.bfloat16), w1_ref[...],
                    preferred_element_type=jnp.float32) + b1, 0.0)
        y = jnp.dot(hid_ref[...].astype(jnp.bfloat16), w2_ref[...],
                    preferred_element_type=jnp.float32) + b2
        resid_ref[...] = x2 + y

    # Final LayerNorm fused into the same call (one HBM write total).
    o_ref[...] = _layernorm_f32(resid_ref[...])


# ------------------------------ pallas wrapper -------------------------------

def encoder_forward(x, params, *, num_layers, num_heads):
    b, s, d = x.shape
    d_ff = params["w1"].shape[1]
    assert d % 128 == 0 and s % 8 == 0, "lane/sublane-aligned shapes required"
    x2d = x.reshape(b * s, d)                      # lane-dense (rows, D) layout

    kernel = functools.partial(encoder_kernel,
                               num_layers=num_layers, num_heads=num_heads)

    def const_spec(shape):
        # Constant block index -> weights/biases DMA'd once, VMEM-resident.
        return pl.BlockSpec(shape, lambda i: (0, 0))

    out = pl.pallas_call(
        kernel,
        out_shape=jax.ShapeDtypeStruct((b * s, d), jnp.float32),
        grid=(b,),                                 # one batch element per step
        in_specs=[
            pl.BlockSpec((s, d), lambda i: (i, 0)),
            const_spec(params["wqkv"].shape),
            const_spec(params["bqkv"].shape),
            const_spec(params["wo"].shape),
            const_spec(params["bo"].shape),
            const_spec(params["w1"].shape),
            const_spec(params["b1"].shape),
            const_spec(params["w2"].shape),
            const_spec(params["b2"].shape),
        ],
        out_specs=pl.BlockSpec((s, d), lambda i: (i, 0)),
        scratch_shapes=[
            pltpu.VMEM((s, d), jnp.float32),        # residual stream
            pltpu.VMEM((s, 3 * d), jnp.float32),    # staged QKV
            pltpu.VMEM((s, d), jnp.float32),        # per-head context
            pltpu.VMEM((s, d_ff), jnp.float32),     # FFN hidden
        ],
        compiler_params=pltpu.CompilerParams(
            dimension_semantics=("parallel",),      # megacore: batch across TCs
            vmem_limit_bytes=VMEM_LIMIT_BYTES,
        ),
    )(x2d, params["wqkv"], params["bqkv"], params["wo"], params["bo"],
      params["w1"], params["b1"], params["w2"], params["b2"])
    return out.reshape(b, s, d)


# --------------------------------- parameters --------------------------------

def init_params(key, d_model, d_ff):
    keys = jax.random.split(key, 12)
    s_d = 1.0 / math.sqrt(d_model)
    s_f = 1.0 / math.sqrt(d_ff)
    u = jax.random.uniform
    return {
        "wq": u(keys[0], (d_model, d_model), jnp.float32, -s_d, s_d),
        "bq": u(keys[1], (1, d_model), jnp.float32, -s_d, s_d),
        "wk": u(keys[2], (d_model, d_model), jnp.float32, -s_d, s_d),
        "bk": u(keys[3], (1, d_model), jnp.float32, -s_d, s_d),
        "wv": u(keys[4], (d_model, d_model), jnp.float32, -s_d, s_d),
        "bv": u(keys[5], (1, d_model), jnp.float32, -s_d, s_d),
        "wo": u(keys[6], (d_model, d_model), jnp.float32, -s_d, s_d),
        "bo": u(keys[7], (1, d_model), jnp.float32, -s_d, s_d),
        "w1": u(keys[8], (d_model, d_ff), jnp.float32, -s_d, s_d),
        "b1": u(keys[9], (1, d_ff), jnp.float32, -s_d, s_d),
        "w2": u(keys[10], (d_ff, d_model), jnp.float32, -s_f, s_f),
        "b2": u(keys[11], (1, d_model), jnp.float32, -s_f, s_f),
    }


def pack_params(p):
    """Concatenate QKV weights and cast matmul weights to bf16 (biases stay f32)."""
    wqkv = jnp.concatenate([p["wq"], p["wk"], p["wv"]], axis=1)
    bqkv = jnp.concatenate([p["bq"], p["bk"], p["bv"]], axis=1)
    return {
        "wqkv": wqkv.astype(jnp.bfloat16),
        "bqkv": bqkv,
        "wo": p["wo"].astype(jnp.bfloat16),
        "bo": p["bo"],
        "w1": p["w1"].astype(jnp.bfloat16),
        "b1": p["b1"],
        "w2": p["w2"].astype(jnp.bfloat16),
        "b2": p["b2"],
    }


# ------------------------- pure-JAX reference (check) -------------------------

def reference_forward(x, p, *, num_layers, num_heads):
    """Mirrors the kernel's precision choices (bf16 MXU operands, f32 math)."""
    def ln(t):
        d = t.shape[-1]
        mean = t.mean(-1, keepdims=True)
        var = jnp.sum((t - mean) ** 2, -1, keepdims=True) / (d - 1)
        return (t - mean) / (jnp.sqrt(var) + EPS)

    def mm(a, w):
        return jnp.dot(a.astype(jnp.bfloat16), w.astype(jnp.bfloat16),
                       preferred_element_type=jnp.float32)

    b, s, d = x.shape
    dk = d // num_heads
    wqkv = jnp.concatenate([p["wq"], p["wk"], p["wv"]], axis=1)
    bqkv = jnp.concatenate([p["bq"], p["bk"], p["bv"]], axis=1)
    for _ in range(num_layers):
        xn = ln(x)
        qkv = mm(xn.reshape(b * s, d), wqkv).reshape(b, s, 3 * d) + bqkv
        q, k, v = qkv[..., :d], qkv[..., d:2 * d], qkv[..., 2 * d:]
        q = q.reshape(b, s, num_heads, dk).transpose(0, 2, 1, 3)
        k = k.reshape(b, s, num_heads, dk).transpose(0, 2, 1, 3)
        v = v.reshape(b, s, num_heads, dk).transpose(0, 2, 1, 3)
        sc = jnp.einsum("bhqd,bhkd->bhqk", q.astype(jnp.bfloat16),
                        k.astype(jnp.bfloat16),
                        preferred_element_type=jnp.float32) / math.sqrt(dk)
        pr = jax.nn.softmax(sc, axis=-1)
        ctx = jnp.einsum("bhqk,bhkd->bhqd", pr.astype(jnp.bfloat16),
                         v.astype(jnp.bfloat16),
                         preferred_element_type=jnp.float32)
        ctx = ctx.transpose(0, 2, 1, 3).reshape(b * s, d)
        x = x + (mm(ctx, p["wo"]) + p["bo"]).reshape(b, s, d)
        xn = ln(x)
        h = jnp.maximum(mm(xn.reshape(b * s, d), p["w1"]) + p["b1"], 0.0)
        x = x + (mm(h, p["w2"]) + p["b2"]).reshape(b, s, d)
    return ln(x)


# ----------------------------------- driver -----------------------------------

if __name__ == "__main__":
    B, S, D, H, DFF, N_LAYERS = 2, 128, 128, 4, 512, 2

    key = jax.random.PRNGKey(0)
    k_x, k_p = jax.random.split(key)
    x = jax.random.normal(k_x, (B, S, D), jnp.float32)
    raw_params = init_params(k_p, D, DFF)
    params = pack_params(raw_params)

    fwd = jax.jit(lambda xx, pp: encoder_forward(
        xx, pp, num_layers=N_LAYERS, num_heads=H))
    out = jax.block_until_ready(fwd(x, params))

    ref = jax.block_until_ready(
        jax.jit(lambda xx, pp: reference_forward(
            xx, pp, num_layers=N_LAYERS, num_heads=H))(x, raw_params))

    assert out.shape == (B, S, D)
    assert bool(jnp.all(jnp.isfinite(out)))
    max_err = float(jnp.max(jnp.abs(out - ref)))
    assert max_err < 5e-2, f"max |pallas - reference| = {max_err}"
    print("KERNEL_OK")
</pallas_src>

<mosaic_0001>
module attributes {stable_mosaic.version = 11 : i64} {
  func.func @encoder_kernel(%arg0: i32, %arg1: memref<128x128xf32, #tpu.memory_space<vmem>>, %arg2: memref<128x384xbf16, #tpu.memory_space<vmem>>, %arg3: memref<1x384xf32, #tpu.memory_space<vmem>>, %arg4: memref<128x128xbf16, #tpu.memory_space<vmem>>, %arg5: memref<1x128xf32, #tpu.memory_space<vmem>>, %arg6: memref<128x512xbf16, #tpu.memory_space<vmem>>, %arg7: memref<1x512xf32, #tpu.memory_space<vmem>>, %arg8: memref<512x128xbf16, #tpu.memory_space<vmem>>, %arg9: memref<1x128xf32, #tpu.memory_space<vmem>>, %arg10: memref<128x128xf32, #tpu.memory_space<vmem>>, %arg11: memref<128x128xf32, #tpu.memory_space<vmem>>, %arg12: memref<128x384xf32, #tpu.memory_space<vmem>>, %arg13: memref<128x128xf32, #tpu.memory_space<vmem>>, %arg14: memref<128x512xf32, #tpu.memory_space<vmem>>) attributes {dimension_semantics = [#tpu.dimension_semantics<parallel>], iteration_bounds = array<i64: 2>, scalar_prefetch = 0 : i64, scratch_operands = 4 : i64, tpu.core_type = #tpu.core_type<tc>, window_params = [{transform_indices = @transform_0, window_bounds = array<i64: 128, 128>}, {pipeline_mode = #tpu.pipeline_mode<synchronous>, transform_indices = @transform_1, window_bounds = array<i64: 128, 384>}, {pipeline_mode = #tpu.pipeline_mode<synchronous>, transform_indices = @transform_2, window_bounds = array<i64: 1, 384>}, {pipeline_mode = #tpu.pipeline_mode<synchronous>, transform_indices = @transform_3, window_bounds = array<i64: 128, 128>}, {pipeline_mode = #tpu.pipeline_mode<synchronous>, transform_indices = @transform_4, window_bounds = array<i64: 1, 128>}, {pipeline_mode = #tpu.pipeline_mode<synchronous>, transform_indices = @transform_5, window_bounds = array<i64: 128, 512>}, {pipeline_mode = #tpu.pipeline_mode<synchronous>, transform_indices = @transform_6, window_bounds = array<i64: 1, 512>}, {pipeline_mode = #tpu.pipeline_mode<synchronous>, transform_indices = @transform_7, window_bounds = array<i64: 512, 128>}, {pipeline_mode = #tpu.pipeline_mode<synchronous>, transform_indices = @transform_8, window_bounds = array<i64: 1, 128>}, {transform_indices = @transform_9, window_bounds = array<i64: 128, 128>}]} {
    %c0 = arith.constant 0 : index
    %c0_0 = arith.constant 0 : index
    %0 = vector.load %arg1[%c0, %c0_0] : memref<128x128xf32, #tpu.memory_space<vmem>>, vector<128x128xf32>
    %c0_1 = arith.constant 0 : index
    %c0_2 = arith.constant 0 : index
    %1 = vector.load %arg11[%c0_1, %c0_2] : memref<128x128xf32, #tpu.memory_space<vmem>>, vector<128x128xf32>
    tpu.vector_store %arg11[%c0_1, %c0_2], %0 {strides = array<i32>} : memref<128x128xf32, #tpu.memory_space<vmem>>, vector<128x128xf32>,
    %c0_3 = arith.constant 0 : index
    %c0_4 = arith.constant 0 : index
    %2 = vector.load %arg3[%c0_3, %c0_4] : memref<1x384xf32, #tpu.memory_space<vmem>>, vector<1x384xf32>
    %c0_5 = arith.constant 0 : index
    %c0_6 = arith.constant 0 : index
    %3 = vector.load %arg5[%c0_5, %c0_6] : memref<1x128xf32, #tpu.memory_space<vmem>>, vector<1x128xf32>
    %c0_7 = arith.constant 0 : index
    %c0_8 = arith.constant 0 : index
    %4 = vector.load %arg7[%c0_7, %c0_8] : memref<1x512xf32, #tpu.memory_space<vmem>>, vector<1x512xf32>
    %c0_9 = arith.constant 0 : index
    %c0_10 = arith.constant 0 : index
    %5 = vector.load %arg9[%c0_9, %c0_10] : memref<1x128xf32, #tpu.memory_space<vmem>>, vector<1x128xf32>
    %c0_i32 = arith.constant 0 : i32
    %c0_11 = arith.constant 0 : index
    %c0_12 = arith.constant 0 : index
    %6 = vector.load %arg11[%c0_11, %c0_12] : memref<128x128xf32, #tpu.memory_space<vmem>>, vector<128x128xf32>
    %cst = arith.constant dense<0.000000e+00> : vector<128xf32>
    %7 = vector.multi_reduction <add>, %6, %cst [1] : vector<128x128xf32> to vector<128xf32>
    %8 = vector.shape_cast %7 : vector<128xf32> to vector<128x1xf32>
    %cst_13 = arith.constant 1.280000e+02 : f32
    %9 = vector.broadcast %cst_13 : f32 to vector<128x1xf32>
    %10 = arith.divf %8, %9 : vector<128x1xf32>
    %11 = vector.broadcast %10 : vector<128x1xf32> to vector<128x128xf32>
    %12 = arith.subf %6, %11 : vector<128x128xf32>
    %13 = arith.mulf %12, %12 : vector<128x128xf32>
    %cst_14 = arith.constant dense<0.000000e+00> : vector<128xf32>
    %14 = vector.multi_reduction <add>, %13, %cst_14 [1] : vector<128x128xf32> to vector<128xf32>
    %15 = vector.shape_cast %14 : vector<128xf32> to vector<128x1xf32>
    %cst_15 = arith.constant 0.00787401571 : f32
    %16 = vector.broadcast %cst_15 : f32 to vector<128x1xf32>
    %17 = arith.mulf %15, %16 : vector<128x1xf32>
    %18 = math.sqrt %17 : vector<128x1xf32>
    %cst_16 = arith.constant 9.99999997E-7 : f32
    %19 = vector.broadcast %cst_16 : f32 to vector<128x1xf32>
    %20 = arith.addf %18, %19 : vector<128x1xf32>
    %21 = tpu.reciprocal %20 {approx = true} : vector<128x1xf32> -> vector<128x1xf32>
    %22 = vector.broadcast %10 : vector<128x1xf32> to vector<128x128xf32>
    %23 = arith.subf %6, %22 : vector<128x128xf32>
    %24 = vector.broadcast %21 : vector<128x1xf32> to vector<128x128xf32>
    %25 = arith.mulf %23, %24 : vector<128x128xf32>
    %26 = arith.truncf %25 : vector<128x128xf32> to vector<128x128xbf16>
    %c0_17 = arith.constant 0 : index
    %c0_18 = arith.constant 0 : index
    %27 = vector.load %arg2[%c0_17, %c0_18] : memref<128x384xbf16, #tpu.memory_space<vmem>>, vector<128x384xbf16>
    %cst_19 = arith.constant dense<0.000000e+00> : vector<128x384xf32>
    %28 = tpu.matmul %26, %27, %cst_19 {dimension_numbers = #tpu.dot_dimension_numbers<[1], [0], [0], [1], [0, 0, 1, 1], [], []>} : vector<128x128xbf16>, vector<128x384xbf16>, vector<128x384xf32> -> vector<128x384xf32>
    %29 = vector.broadcast %2 : vector<1x384xf32> to vector<128x384xf32>
    %30 = arith.addf %28, %29 : vector<128x384xf32>
    %c0_20 = arith.constant 0 : index
    %c0_21 = arith.constant 0 : index
    %31 = vector.load %arg12[%c0_20, %c0_21] : memref<128x384xf32, #tpu.memory_space<vmem>>, vector<128x384xf32>
    tpu.vector_store %arg12[%c0_20, %c0_21], %30 {strides = array<i32>} : memref<128x384xf32, #tpu.memory_space<vmem>>, vector<128x384xf32>,
    %c0_22 = arith.constant 0 : index
    %c0_23 = arith.constant 0 : index
    %32 = vector.load %arg12[%c0_22, %c0_23] : memref<128x384xf32, #tpu.memory_space<vmem>>, vector<128x32xf32>
    %33 = arith.truncf %32 : vector<128x32xf32> to vector<128x32xbf16>
    %c0_24 = arith.constant 0 : index
    %c128 = arith.constant 128 : index
    %34 = vector.load %arg12[%c0_24, %c128] : memref<128x384xf32, #tpu.memory_space<vmem>>, vector<128x32xf32>
    %35 = arith.truncf %34 : vector<128x32xf32> to vector<128x32xbf16>
    %c0_25 = arith.constant 0 : index
    %c256 = arith.constant 256 : index
    %36 = vector.load %arg12[%c0_25, %c256] : memref<128x384xf32, #tpu.memory_space<vmem>>, vector<128x32xf32>
    %37 = arith.truncf %36 : vector<128x32xf32> to vector<128x32xbf16>
    %cst_26 = arith.constant dense<0.000000e+00> : vector<128x128xf32>
    %38 = tpu.matmul %33, %35, %cst_26 {dimension_numbers = #tpu.dot_dimension_numbers<[1], [1], [0], [0], [0, 0, 1, 0], [], []>} : vector<128x32xbf16>, vector<128x32xbf16>, vector<128x128xf32> -> vector<128x128xf32>
    %cst_27 = arith.constant 0.176776692 : f32
    %39 = vector.broadcast %cst_27 : f32 to vector<128x128xf32>
    %40 = arith.mulf %38, %39 : vector<128x128xf32>
    %cst_28 = arith.constant dense<0xFF800000> : vector<128xf32>
    %41 = vector.multi_reduction <maximumf>, %40, %cst_28 [1] : vector<128x128xf32> to vector<128xf32>
    %42 = vector.shape_cast %41 : vector<128xf32> to vector<128x1xf32>
    %43 = vector.broadcast %42 : vector<128x1xf32> to vector<128x128xf32>
    %44 = arith.subf %40, %43 : vector<128x128xf32>
    %45 = math.exp %44 : vector<128x128xf32>
    %cst_29 = arith.constant dense<0.000000e+00> : vector<128xf32>
    %46 = vector.multi_reduction <add>, %45, %cst_29 [1] : vector<128x128xf32> to vector<128xf32>
    %47 = vector.shape_cast %46 : vector<128xf32> to vector<128x1xf32>
    %48 = tpu.reciprocal %47 {approx = true} : vector<128x1xf32> -> vector<128x1xf32>
    %49 = vector.broadcast %48 : vector<128x1xf32> to vector<128x128xf32>
    %50 = arith.mulf %45, %49 : vector<128x128xf32>
    %51 = arith.truncf %50 : vector<128x128xf32> to vector<128x128xbf16>
    %cst_30 = arith.constant dense<0.000000e+00> : vector<128x32xf32>
    %52 = tpu.matmul %51, %37, %cst_30 {dimension_numbers = #tpu.dot_dimension_numbers<[1], [0], [0], [1], [0, 0, 1, 1], [], []>} : vector<128x128xbf16>, vector<128x32xbf16>, vector<128x32xf32> -> vector<128x32xf32>
    %c0_31 = arith.constant 0 : index
    %c0_32 = arith.constant 0 : index
    %53 = vector.load %arg13[%c0_31, %c0_32] : memref<128x128xf32, #tpu.memory_space<vmem>>, vector<128x32xf32>
    tpu.vector_store %arg13[%c0_31, %c0_32], %52 {strides = array<i32>} : memref<128x128xf32, #tpu.memory_space<vmem>>, vector<128x32xf32>,
    %c0_33 = arith.constant 0 : index
    %c32 = arith.constant 32 : index
    %54 = vector.load %arg12[%c0_33, %c32] : memref<128x384xf32, #tpu.memory_space<vmem>>, vector<128x32xf32>
    %55 = arith.truncf %54 : vector<128x32xf32> to vector<128x32xbf16>
    %c0_34 = arith.constant 0 : index
    %c160 = arith.constant 160 : index
    %56 = vector.load %arg12[%c0_34, %c160] : memref<128x384xf32, #tpu.memory_space<vmem>>, vector<128x32xf32>
    %57 = arith.truncf %56 : vector<128x32xf32> to vector<128x32xbf16>
    %c0_35 = arith.constant 0 : index
    %c288 = arith.constant 288 : index
    %58 = vector.load %arg12[%c0_35, %c288] : memref<128x384xf32, #tpu.memory_space<vmem>>, vector<128x32xf32>
    %59 = arith.truncf %58 : vector<128x32xf32> to vector<128x32xbf16>
    %cst_36 = arith.constant dense<0.000000e+00> : vector<128x128xf32>
    %60 = tpu.matmul %55, %57, %cst_36 {dimension_numbers = #tpu.dot_dimension_numbers<[1], [1], [0], [0], [0, 0, 1, 0], [], []>} : vector<128x32xbf16>, vector<128x32xbf16>, vector<128x128xf32> -> vector<128x128xf32>
    %cst_37 = arith.constant 0.176776692 : f32
    %61 = vector.broadcast %cst_37 : f32 to vector<128x128xf32>
    %62 = arith.mulf %60, %61 : vector<128x128xf32>
    %cst_38 = arith.constant dense<0xFF800000> : vector<128xf32>
    %63 = vector.multi_reduction <maximumf>, %62, %cst_38 [1] : vector<128x128xf32> to vector<128xf32>
    %64 = vector.shape_cast %63 : vector<128xf32> to vector<128x1xf32>
    %65 = vector.broadcast %64 : vector<128x1xf32> to vector<128x128xf32>
    %66 = arith.subf %62, %65 : vector<128x128xf32>
    %67 = math.exp %66 : vector<128x128xf32>
    %cst_39 = arith.constant dense<0.000000e+00> : vector<128xf32>
    %68 = vector.multi_reduction <add>, %67, %cst_39 [1] : vector<128x128xf32> to vector<128xf32>
    %69 = vector.shape_cast %68 : vector<128xf32> to vector<128x1xf32>
    %70 = tpu.reciprocal %69 {approx = true} : vector<128x1xf32> -> vector<128x1xf32>
    %71 = vector.broadcast %70 : vector<128x1xf32> to vector<128x128xf32>
    %72 = arith.mulf %67, %71 : vector<128x128xf32>
    %73 = arith.truncf %72 : vector<128x128xf32> to vector<128x128xbf16>
    %cst_40 = arith.constant dense<0.000000e+00> : vector<128x32xf32>
    %74 = tpu.matmul %73, %59, %cst_40 {dimension_numbers = #tpu.dot_dimension_numbers<[1], [0], [0], [1], [0, 0, 1, 1], [], []>} : vector<128x128xbf16>, vector<128x32xbf16>, vector<128x32xf32> -> vector<128x32xf32>
    %c0_41 = arith.constant 0 : index
    %c32_42 = arith.constant 32 : index
    %75 = vector.load %arg13[%c0_41, %c32_42] : memref<128x128xf32, #tpu.memory_space<vmem>>, vector<128x32xf32>
    tpu.vector_store %arg13[%c0_41, %c32_42], %74 {strides = array<i32>} : memref<128x128xf32, #tpu.memory_space<vmem>>, vector<128x32xf32>,
    %c0_43 = arith.constant 0 : index
    %c64 = arith.constant 64 : index
    %76 = vector.load %arg12[%c0_43, %c64] : memref<128x384xf32, #tpu.memory_space<vmem>>, vector<128x32xf32>
    %77 = arith.truncf %76 : vector<128x32xf32> to vector<128x32xbf16>
    %c0_44 = arith.constant 0 : index
    %c192 = arith.constant 192 : index
    %78 = vector.load %arg12[%c0_44, %c192] : memref<128x384xf32, #tpu.memory_space<vmem>>, vector<128x32xf32>
    %79 = arith.truncf %78 : vector<128x32xf32> to vector<128x32xbf16>
    %c0_45 = arith.constant 0 : index
    %c320 = arith.constant 320 : index
    %80 = vector.load %arg12[%c0_45, %c320] : memref<128x384xf32, #tpu.memory_space<vmem>>, vector<128x32xf32>
    %81 = arith.truncf %80 : vector<128x32xf32> to vector<128x32xbf16>
    %cst_46 = arith.constant dense<0.000000e+00> : vector<128x128xf32>
    %82 = tpu.matmul %77, %79, %cst_46 {dimension_numbers = #tpu.dot_dimension_numbers<[1], [1], [0], [0], [0, 0, 1, 0], [], []>} : vector<128x32xbf16>, vector<128x32xbf16>, vector<128x128xf32> -> vector<128x128xf32>
    %cst_47 = arith.constant 0.176776692 : f32
    %83 = vector.broadcast %cst_47 : f32 to vector<128x128xf32>
    %84 = arith.mulf %82, %83 : vector<128x128xf32>
    %cst_48 = arith.constant dense<0xFF800000> : vector<128xf32>
    %85 = vector.multi_reduction <maximumf>, %84, %cst_48 [1] : vector<128x128xf32> to vector<128xf32>
    %86 = vector.shape_cast %85 : vector<128xf32> to vector<128x1xf32>
    %87 = vector.broadcast %86 : vector<128x1xf32> to vector<128x128xf32>
    %88 = arith.subf %84, %87 : vector<128x128xf32>
    %89 = math.exp %88 : vector<128x128xf32>
    %cst_49 = arith.constant dense<0.000000e+00> : vector<128xf32>
    %90 = vector.multi_reduction <add>, %89, %cst_49 [1] : vector<128x128xf32> to vector<128xf32>
    %91 = vector.shape_cast %90 : vector<128xf32> to vector<128x1xf32>
    %92 = tpu.reciprocal %91 {approx = true} : vector<128x1xf32> -> vector<128x1xf32>
    %93 = vector.broadcast %92 : vector<128x1xf32> to vector<128x128xf32>
    %94 = arith.mulf %89, %93 : vector<128x128xf32>
    %95 = arith.truncf %94 : vector<128x128xf32> to vector<128x128xbf16>
    %cst_50 = arith.constant dense<0.000000e+00> : vector<128x32xf32>
    %96 = tpu.matmul %95, %81, %cst_50 {dimension_numbers = #tpu.dot_dimension_numbers<[1], [0], [0], [1], [0, 0, 1, 1], [], []>} : vector<128x128xbf16>, vector<128x32xbf16>, vector<128x32xf32> -> vector<128x32xf32>
    %c0_51 = arith.constant 0 : index
    %c64_52 = arith.constant 64 : index
    %97 = vector.load %arg13[%c0_51, %c64_52] : memref<128x128xf32, #tpu.memory_space<vmem>>, vector<128x32xf32>
    tpu.vector_store %arg13[%c0_51, %c64_52], %96 {strides = array<i32>} : memref<128x128xf32, #tpu.memory_space<vmem>>, vector<128x32xf32>,
    %c0_53 = arith.constant 0 : index
    %c96 = arith.constant 96 : index
    %98 = vector.load %arg12[%c0_53, %c96] : memref<128x384xf32, #tpu.memory_space<vmem>>, vector<128x32xf32>
    %99 = arith.truncf %98 : vector<128x32xf32> to vector<128x32xbf16>
    %c0_54 = arith.constant 0 : index
    %c224 = arith.constant 224 : index
    %100 = vector.load %arg12[%c0_54, %c224] : memref<128x384xf32, #tpu.memory_space<vmem>>, vector<128x32xf32>
    %101 = arith.truncf %100 : vector<128x32xf32> to vector<128x32xbf16>
    %c0_55 = arith.constant 0 : index
    %c352 = arith.constant 352 : index
    %102 = vector.load %arg12[%c0_55, %c352] : memref<128x384xf32, #tpu.memory_space<vmem>>, vector<128x32xf32>
    %103 = arith.truncf %102 : vector<128x32xf32> to vector<128x32xbf16>
    %cst_56 = arith.constant dense<0.000000e+00> : vector<128x128xf32>
    %104 = tpu.matmul %99, %101, %cst_56 {dimension_numbers = #tpu.dot_dimension_numbers<[1], [1], [0], [0], [0, 0, 1, 0], [], []>} : vector<128x32xbf16>, vector<128x32xbf16>, vector<128x128xf32> -> vector<128x128xf32>
    %cst_57 = arith.constant 0.176776692 : f32
    %105 = vector.broadcast %cst_57 : f32 to vector<128x128xf32>
    %106 = arith.mulf %104, %105 : vector<128x128xf32>
    %cst_58 = arith.constant dense<0xFF800000> : vector<128xf32>
    %107 = vector.multi_reduction <maximumf>, %106, %cst_58 [1] : vector<128x128xf32> to vector<128xf32>
    %108 = vector.shape_cast %107 : vector<128xf32> to vector<128x1xf32>
    %109 = vector.broadcast %108 : vector<128x1xf32> to vector<128x128xf32>
    %110 = arith.subf %106, %109 : vector<128x128xf32>
    %111 = math.exp %110 : vector<128x128xf32>
    %cst_59 = arith.constant dense<0.000000e+00> : vector<128xf32>
    %112 = vector.multi_reduction <add>, %111, %cst_59 [1] : vector<128x128xf32> to vector<128xf32>
    %113 = vector.shape_cast %112 : vector<128xf32> to vector<128x1xf32>
    %114 = tpu.reciprocal %113 {approx = true} : vector<128x1xf32> -> vector<128x1xf32>
    %115 = vector.broadcast %114 : vector<128x1xf32> to vector<128x128xf32>
    %116 = arith.mulf %111, %115 : vector<128x128xf32>
    %117 = arith.truncf %116 : vector<128x128xf32> to vector<128x128xbf16>
    %cst_60 = arith.constant dense<0.000000e+00> : vector<128x32xf32>
    %118 = tpu.matmul %117, %103, %cst_60 {dimension_numbers = #tpu.dot_dimension_numbers<[1], [0], [0], [1], [0, 0, 1, 1], [], []>} : vector<128x128xbf16>, vector<128x32xbf16>, vector<128x32xf32> -> vector<128x32xf32>
    %c0_61 = arith.constant 0 : index
    %c96_62 = arith.constant 96 : index
    %119 = vector.load %arg13[%c0_61, %c96_62] : memref<128x128xf32, #tpu.memory_space<vmem>>, vector<128x32xf32>
    tpu.vector_store %arg13[%c0_61, %c96_62], %118 {strides = array<i32>} : memref<128x128xf32, #tpu.memory_space<vmem>>, vector<128x32xf32>,
    %c0_63 = arith.constant 0 : index
    %c0_64 = arith.constant 0 : index
    %120 = vector.load %arg13[%c0_63, %c0_64] : memref<128x128xf32, #tpu.memory_space<vmem>>, vector<128x128xf32>
    %121 = arith.truncf %120 : vector<128x128xf32> to vector<128x128xbf16>
    %c0_65 = arith.constant 0 : index
    %c0_66 = arith.constant 0 : index
    %122 = vector.load %arg4[%c0_65, %c0_66] : memref<128x128xbf16, #tpu.memory_space<vmem>>, vector<128x128xbf16>
    %cst_67 = arith.constant dense<0.000000e+00> : vector<128x128xf32>
    %123 = tpu.matmul %121, %122, %cst_67 {dimension_numbers = #tpu.dot_dimension_numbers<[1], [0], [0], [1], [0, 0, 1, 1], [], []>} : vector<128x128xbf16>, vector<128x128xbf16>, vector<128x128xf32> -> vector<128x128xf32>
    %124 = vector.broadcast %3 : vector<1x128xf32> to vector<128x128xf32>
    %125 = arith.addf %123, %124 : vector<128x128xf32>
    %126 = arith.addf %6, %125 : vector<128x128xf32>
    %c0_68 = arith.constant 0 : index
    %c0_69 = arith.constant 0 : index
    %127 = vector.load %arg11[%c0_68, %c0_69] : memref<128x128xf32, #tpu.memory_space<vmem>>, vector<128x128xf32>
    tpu.vector_store %arg11[%c0_68, %c0_69], %126 {strides = array<i32>} : memref<128x128xf32, #tpu.memory_space<vmem>>, vector<128x128xf32>,
    %c0_70 = arith.constant 0 : index
    %c0_71 = arith.constant 0 : index
    %128 = vector.load %arg11[%c0_70, %c0_71] : memref<128x128xf32, #tpu.memory_space<vmem>>, vector<128x128xf32>
    %cst_72 = arith.constant dense<0.000000e+00> : vector<128xf32>
    %129 = vector.multi_reduction <add>, %128, %cst_72 [1] : vector<128x128xf32> to vector<128xf32>
    %130 = vector.shape_cast %129 : vector<128xf32> to vector<128x1xf32>
    %cst_73 = arith.constant 1.280000e+02 : f32
    %131 = vector.broadcast %cst_73 : f32 to vector<128x1xf32>
    %132 = arith.divf %130, %131 : vector<128x1xf32>
    %133 = vector.broadcast %132 : vector<128x1xf32> to vector<128x128xf32>
    %134 = arith.subf %128, %133 : vector<128x128xf32>
    %135 = arith.mulf %134, %134 : vector<128x128xf32>
    %cst_74 = arith.constant dense<0.000000e+00> : vector<128xf32>
    %136 = vector.multi_reduction <add>, %135, %cst_74 [1] : vector<128x128xf32> to vector<128xf32>
    %137 = vector.shape_cast %136 : vector<128xf32> to vector<128x1xf32>
    %cst_75 = arith.constant 0.00787401571 : f32
    %138 = vector.broadcast %cst_75 : f32 to vector<128x1xf32>
    %139 = arith.mulf %137, %138 : vector<128x1xf32>
    %140 = math.sqrt %139 : vector<128x1xf32>
    %cst_76 = arith.constant 9.99999997E-7 : f32
    %141 = vector.broadcast %cst_76 : f32 to vector<128x1xf32>
    %142 = arith.addf %140, %141 : vector<128x1xf32>
    %143 = tpu.reciprocal %142 {approx = true} : vector<128x1xf32> -> vector<128x1xf32>
    %144 = vector.broadcast %132 : vector<128x1xf32> to vector<128x128xf32>
    %145 = arith.subf %128, %144 : vector<128x128xf32>
    %146 = vector.broadcast %143 : vector<128x1xf32> to vector<128x128xf32>
    %147 = arith.mulf %145, %146 : vector<128x128xf32>
    %148 = arith.truncf %147 : vector<128x128xf32> to vector<128x128xbf16>
    %c0_77 = arith.constant 0 : index
    %c0_78 = arith.constant 0 : index
    %149 = vector.load %arg6[%c0_77, %c0_78] : memref<128x512xbf16, #tpu.memory_space<vmem>>, vector<128x512xbf16>
    %cst_79 = arith.constant dense<0.000000e+00> : vector<128x512xf32>
    %150 = tpu.matmul %148, %149, %cst_79 {dimension_numbers = #tpu.dot_dimension_numbers<[1], [0], [0], [1], [0, 0, 1, 1], [], []>} : vector<128x128xbf16>, vector<128x512xbf16>, vector<128x512xf32> -> vector<128x512xf32>
    %151 = vector.broadcast %4 : vector<1x512xf32> to vector<128x512xf32>
    %152 = arith.addf %150, %151 : vector<128x512xf32>
    %cst_80 = arith.constant 0.000000e+00 : f32
    %153 = vector.broadcast %cst_80 : f32 to vector<128x512xf32>
    %154 = arith.maximumf %152, %153 : vector<128x512xf32>
    %c0_81 = arith.constant 0 : index
    %c0_82 = arith.constant 0 : index
    %155 = vector.load %arg14[%c0_81, %c0_82] : memref<128x512xf32, #tpu.memory_space<vmem>>, vector<128x512xf32>
    tpu.vector_store %arg14[%c0_81, %c0_82], %154 {strides = array<i32>} : memref<128x512xf32, #tpu.memory_space<vmem>>, vector<128x512xf32>,
    %c0_83 = arith.constant 0 : index
    %c0_84 = arith.constant 0 : index
    %156 = vector.load %arg14[%c0_83, %c0_84] : memref<128x512xf32, #tpu.memory_space<vmem>>, vector<128x512xf32>
    %157 = arith.truncf %156 : vector<128x512xf32> to vector<128x512xbf16>
    %c0_85 = arith.constant 0 : index
    %c0_86 = arith.constant 0 : index
    %158 = vector.load %arg8[%c0_85, %c0_86] : memref<512x128xbf16, #tpu.memory_space<vmem>>, vector<512x128xbf16>
    %cst_87 = arith.constant dense<0.000000e+00> : vector<128x128xf32>
    %159 = tpu.matmul %157, %158, %cst_87 {dimension_numbers = #tpu.dot_dimension_numbers<[1], [0], [0], [1], [0, 0, 1, 1], [], []>} : vector<128x512xbf16>, vector<512x128xbf16>, vector<128x128xf32> -> vector<128x128xf32>
    %160 = vector.broadcast %5 : vector<1x128xf32> to vector<128x128xf32>
    %161 = arith.addf %159, %160 : vector<128x128xf32>
    %162 = arith.addf %128, %161 : vector<128x128xf32>
    %c0_88 = arith.constant 0 : index
    %c0_89 = arith.constant 0 : index
    %163 = vector.load %arg11[%c0_88, %c0_89] : memref<128x128xf32, #tpu.memory_space<vmem>>, vector<128x128xf32>
    tpu.vector_store %arg11[%c0_88, %c0_89], %162 {strides = array<i32>} : memref<128x128xf32, #tpu.memory_space<vmem>>, vector<128x128xf32>,
    %c1_i32 = arith.constant 1 : i32
    %c0_90 = arith.constant 0 : index
    %c0_91 = arith.constant 0 : index
    %164 = vector.load %arg11[%c0_90, %c0_91] : memref<128x128xf32, #tpu.memory_space<vmem>>, vector<128x128xf32>
    %cst_92 = arith.constant dense<0.000000e+00> : vector<128xf32>
    %165 = vector.multi_reduction <add>, %164, %cst_92 [1] : vector<128x128xf32> to vector<128xf32>
    %166 = vector.shape_cast %165 : vector<128xf32> to vector<128x1xf32>
    %cst_93 = arith.constant 1.280000e+02 : f32
    %167 = vector.broadcast %cst_93 : f32 to vector<128x1xf32>
    %168 = arith.divf %166, %167 : vector<128x1xf32>
    %169 = vector.broadcast %168 : vector<128x1xf32> to vector<128x128xf32>
    %170 = arith.subf %164, %169 : vector<128x128xf32>
    %171 = arith.mulf %170, %170 : vector<128x128xf32>
    %cst_94 = arith.constant dense<0.000000e+00> : vector<128xf32>
    %172 = vector.multi_reduction <add>, %171, %cst_94 [1] : vector<128x128xf32> to vector<128xf32>
    %173 = vector.shape_cast %172 : vector<128xf32> to vector<128x1xf32>
    %cst_95 = arith.constant 0.00787401571 : f32
    %174 = vector.broadcast %cst_95 : f32 to vector<128x1xf32>
    %175 = arith.mulf %173, %174 : vector<128x1xf32>
    %176 = math.sqrt %175 : vector<128x1xf32>
    %cst_96 = arith.constant 9.99999997E-7 : f32
    %177 = vector.broadcast %cst_96 : f32 to vector<128x1xf32>
    %178 = arith.addf %176, %177 : vector<128x1xf32>
    %179 = tpu.reciprocal %178 {approx = true} : vector<128x1xf32> -> vector<128x1xf32>
    %180 = vector.broadcast %168 : vector<128x1xf32> to vector<128x128xf32>
    %181 = arith.subf %164, %180 : vector<128x128xf32>
    %182 = vector.broadcast %179 : vector<128x1xf32> to vector<128x128xf32>
    %183 = arith.mulf %181, %182 : vector<128x128xf32>
    %184 = arith.truncf %183 : vector<128x128xf32> to vector<128x128xbf16>
    %c0_97 = arith.constant 0 : index
    %c0_98 = arith.constant 0 : index
    %185 = vector.load %arg2[%c0_97, %c0_98] : memref<128x384xbf16, #tpu.memory_space<vmem>>, vector<128x384xbf16>
    %cst_99 = arith.constant dense<0.000000e+00> : vector<128x384xf32>
    %186 = tpu.matmul %184, %185, %cst_99 {dimension_numbers = #tpu.dot_dimension_numbers<[1], [0], [0], [1], [0, 0, 1, 1], [], []>} : vector<128x128xbf16>, vector<128x384xbf16>, vector<128x384xf32> -> vector<128x384xf32>
    %187 = vector.broadcast %2 : vector<1x384xf32> to vector<128x384xf32>
    %188 = arith.addf %186, %187 : vector<128x384xf32>
    %c0_100 = arith.constant 0 : index
    %c0_101 = arith.constant 0 : index
    %189 = vector.load %arg12[%c0_100, %c0_101] : memref<128x384xf32, #tpu.memory_space<vmem>>, vector<128x384xf32>
    tpu.vector_store %arg12[%c0_100, %c0_101], %188 {strides = array<i32>} : memref<128x384xf32, #tpu.memory_space<vmem>>, vector<128x384xf32>,
    %c0_102 = arith.constant 0 : index
    %c0_103 = arith.constant 0 : index
    %190 = vector.load %arg12[%c0_102, %c0_103] : memref<128x384xf32, #tpu.memory_space<vmem>>, vector<128x32xf32>
    %191 = arith.truncf %190 : vector<128x32xf32> to vector<128x32xbf16>
    %c0_104 = arith.constant 0 : index
    %c128_105 = arith.constant 128 : index
    %192 = vector.load %arg12[%c0_104, %c128_105] : memref<128x384xf32, #tpu.memory_space<vmem>>, vector<128x32xf32>
    %193 = arith.truncf %192 : vector<128x32xf32> to vector<128x32xbf16>
    %c0_106 = arith.constant 0 : index
    %c256_107 = arith.constant 256 : index
    %194 = vector.load %arg12[%c0_106, %c256_107] : memref<128x384xf32, #tpu.memory_space<vmem>>, vector<128x32xf32>
    %195 = arith.truncf %194 : vector<128x32xf32> to vector<128x32xbf16>
    %cst_108 = arith.constant dense<0.000000e+00> : vector<128x128xf32>
    %196 = tpu.matmul %191, %193, %cst_108 {dimension_numbers = #tpu.dot_dimension_numbers<[1], [1], [0], [0], [0, 0, 1, 0], [], []>} : vector<128x32xbf16>, vector<128x32xbf16>, vector<128x128xf32> -> vector<128x128xf32>
    %cst_109 = arith.constant 0.176776692 : f32
    %197 = vector.broadcast %cst_109 : f32 to vector<128x128xf32>
    %198 = arith.mulf %196, %197 : vector<128x128xf32>
    %cst_110 = arith.constant dense<0xFF800000> : vector<128xf32>
    %199 = vector.multi_reduction <maximumf>, %198, %cst_110 [1] : vector<128x128xf32> to vector<128xf32>
    %200 = vector.shape_cast %199 : vector<128xf32> to vector<128x1xf32>
    %201 = vector.broadcast %200 : vector<128x1xf32> to vector<128x128xf32>
    %202 = arith.subf %198, %201 : vector<128x128xf32>
    %203 = math.exp %202 : vector<128x128xf32>
    %cst_111 = arith.constant dense<0.000000e+00> : vector<128xf32>
    %204 = vector.multi_reduction <add>, %203, %cst_111 [1] : vector<128x128xf32> to vector<128xf32>
    %205 = vector.shape_cast %204 : vector<128xf32> to vector<128x1xf32>
    %206 = tpu.reciprocal %205 {approx = true} : vector<128x1xf32> -> vector<128x1xf32>
    %207 = vector.broadcast %206 : vector<128x1xf32> to vector<128x128xf32>
    %208 = arith.mulf %203, %207 : vector<128x128xf32>
    %209 = arith.truncf %208 : vector<128x128xf32> to vector<128x128xbf16>
    %cst_112 = arith.constant dense<0.000000e+00> : vector<128x32xf32>
    %210 = tpu.matmul %209, %195, %cst_112 {dimension_numbers = #tpu.dot_dimension_numbers<[1], [0], [0], [1], [0, 0, 1, 1], [], []>} : vector<128x128xbf16>, vector<128x32xbf16>, vector<128x32xf32> -> vector<128x32xf32>
    %c0_113 = arith.constant 0 : index
    %c0_114 = arith.constant 0 : index
    %211 = vector.load %arg13[%c0_113, %c0_114] : memref<128x128xf32, #tpu.memory_space<vmem>>, vector<128x32xf32>
    tpu.vector_store %arg13[%c0_113, %c0_114], %210 {strides = array<i32>} : memref<128x128xf32, #tpu.memory_space<vmem>>, vector<128x32xf32>,
    %c0_115 = arith.constant 0 : index
    %c32_116 = arith.constant 32 : index
    %212 = vector.load %arg12[%c0_115, %c32_116] : memref<128x384xf32, #tpu.memory_space<vmem>>, vector<128x32xf32>
    %213 = arith.truncf %212 : vector<128x32xf32> to vector<128x32xbf16>
    %c0_117 = arith.constant 0 : index
    %c160_118 = arith.constant 160 : index
    %214 = vector.load %arg12[%c0_117, %c160_118] : memref<128x384xf32, #tpu.memory_space<vmem>>, vector<128x32xf32>
    %215 = arith.truncf %214 : vector<128x32xf32> to vector<128x32xbf16>
    %c0_119 = arith.constant 0 : index
    %c288_120 = arith.constant 288 : index
    %216 = vector.load %arg12[%c0_119, %c288_120] : memref<128x384xf32, #tpu.memory_space<vmem>>, vector<128x32xf32>
    %217 = arith.truncf %216 : vector<128x32xf32> to vector<128x32xbf16>
    %cst_121 = arith.constant dense<0.000000e+00> : vector<128x128xf32>
    %218 = tpu.matmul %213, %215, %cst_121 {dimension_numbers = #tpu.dot_dimension_numbers<[1], [1], [0], [0], [0, 0, 1, 0], [], []>} : vector<128x32xbf16>, vector<128x32xbf16>, vector<128x128xf32> -> vector<128x128xf32>
    %cst_122 = arith.constant 0.176776692 : f32
    %219 = vector.broadcast %cst_122 : f32 to vector<128x128xf32>
    %220 = arith.mulf %218, %219 : vector<128x128xf32>
    %cst_123 = arith.constant dense<0xFF800000> : vector<128xf32>
    %221 = vector.multi_reduction <maximumf>, %220, %cst_123 [1] : vector<128x128xf32> to vector<128xf32>
    %222 = vector.shape_cast %221 : vector<128xf32> to vector<128x1xf32>
    %223 = vector.broadcast %222 : vector<128x1xf32> to vector<128x128xf32>
    %224 = arith.subf %220, %223 : vector<128x128xf32>
    %225 = math.exp %224 : vector<128x128xf32>
    %cst_124 = arith.constant dense<0.000000e+00> : vector<128xf32>
    %226 = vector.multi_reduction <add>, %225, %cst_124 [1] : vector<128x128xf32> to vector<128xf32>
    %227 = vector.shape_cast %226 : vector<128xf32> to vector<128x1xf32>
    %228 = tpu.reciprocal %227 {approx = true} : vector<128x1xf32> -> vector<128x1xf32>
    %229 = vector.broadcast %228 : vector<128x1xf32> to vector<128x128xf32>
    %230 = arith.mulf %225, %229 : vector<128x128xf32>
    %231 = arith.truncf %230 : vector<128x128xf32> to vector<128x128xbf16>
    %cst_125 = arith.constant dense<0.000000e+00> : vector<128x32xf32>
    %232 = tpu.matmul %231, %217, %cst_125 {dimension_numbers = #tpu.dot_dimension_numbers<[1], [0], [0], [1], [0, 0, 1, 1], [], []>} : vector<128x128xbf16>, vector<128x32xbf16>, vector<128x32xf32> -> vector<128x32xf32>
    %c0_126 = arith.constant 0 : index
    %c32_127 = arith.constant 32 : index
    %233 = vector.load %arg13[%c0_126, %c32_127] : memref<128x128xf32, #tpu.memory_space<vmem>>, vector<128x32xf32>
    tpu.vector_store %arg13[%c0_126, %c32_127], %232 {strides = array<i32>} : memref<128x128xf32, #tpu.memory_space<vmem>>, vector<128x32xf32>,
    %c0_128 = arith.constant 0 : index
    %c64_129 = arith.constant 64 : index
    %234 = vector.load %arg12[%c0_128, %c64_129] : memref<128x384xf32, #tpu.memory_space<vmem>>, vector<128x32xf32>
    %235 = arith.truncf %234 : vector<128x32xf32> to vector<128x32xbf16>
    %c0_130 = arith.constant 0 : index
    %c192_131 = arith.constant 192 : index
    %236 = vector.load %arg12[%c0_130, %c192_131] : memref<128x384xf32, #tpu.memory_space<vmem>>, vector<128x32xf32>
    %237 = arith.truncf %236 : vector<128x32xf32> to vector<128x32xbf16>
    %c0_132 = arith.constant 0 : index
    %c320_133 = arith.constant 320 : index
    %238 = vector.load %arg12[%c0_132, %c320_133] : memref<128x384xf32, #tpu.memory_space<vmem>>, vector<128x32xf32>
    %239 = arith.truncf %238 : vector<128x32xf32> to vector<128x32xbf16>
    %cst_134 = arith.constant dense<0.000000e+00> : vector<128x128xf32>
    %240 = tpu.matmul %235, %237, %cst_134 {dimension_numbers = #tpu.dot_dimension_numbers<[1], [1], [0], [0], [0, 0, 1, 0], [], []>} : vector<128x32xbf16>, vector<128x32xbf16>, vector<128x128xf32> -> vector<128x128xf32>
    %cst_135 = arith.constant 0.176776692 : f32
    %241 = vector.broadcast %cst_135 : f32 to vector<128x128xf32>
    %242 = arith.mulf %240, %241 : vector<128x128xf32>
    %cst_136 = arith.constant dense<0xFF800000> : vector<128xf32>
    %243 = vector.multi_reduction <maximumf>, %242, %cst_136 [1] : vector<128x128xf32> to vector<128xf32>
    %244 = vector.shape_cast %243 : vector<128xf32> to vector<128x1xf32>
    %245 = vector.broadcast %244 : vector<128x1xf32> to vector<128x128xf32>
    %246 = arith.subf %242, %245 : vector<128x128xf32>
    %247 = math.exp %246 : vector<128x128xf32>
    %cst_137 = arith.constant dense<0.000000e+00> : vector<128xf32>
    %248 = vector.multi_reduction <add>, %247, %cst_137 [1] : vector<128x128xf32> to vector<128xf32>
    %249 = vector.shape_cast %248 : vector<128xf32> to vector<128x1xf32>
    %250 = tpu.reciprocal %249 {approx = true} : vector<128x1xf32> -> vector<128x1xf32>
    %251 = vector.broadcast %250 : vector<128x1xf32> to vector<128x128xf32>
    %252 = arith.mulf %247, %251 : vector<128x128xf32>
    %253 = arith.truncf %252 : vector<128x128xf32> to vector<128x128xbf16>
    %cst_138 = arith.constant dense<0.000000e+00> : vector<128x32xf32>
    %254 = tpu.matmul %253, %239, %cst_138 {dimension_numbers = #tpu.dot_dimension_numbers<[1], [0], [0], [1], [0, 0, 1, 1], [], []>} : vector<128x128xbf16>, vector<128x32xbf16>, vector<128x32xf32> -> vector<128x32xf32>
    %c0_139 = arith.constant 0 : index
    %c64_140 = arith.constant 64 : index
    %255 = vector.load %arg13[%c0_139, %c64_140] : memref<128x128xf32, #tpu.memory_space<vmem>>, vector<128x32xf32>
    tpu.vector_store %arg13[%c0_139, %c64_140], %254 {strides = array<i32>} : memref<128x128xf32, #tpu.memory_space<vmem>>, vector<128x32xf32>,
    %c0_141 = arith.constant 0 : index
    %c96_142 = arith.constant 96 : index
    %256 = vector.load %arg12[%c0_141, %c96_142] : memref<128x384xf32, #tpu.memory_space<vmem>>, vector<128x32xf32>
    %257 = arith.truncf %256 : vector<128x32xf32> to vector<128x32xbf16>
    %c0_143 = arith.constant 0 : index
    %c224_144 = arith.constant 224 : index
    %258 = vector.load %arg12[%c0_143, %c224_144] : memref<128x384xf32, #tpu.memory_space<vmem>>, vector<128x32xf32>
    %259 = arith.truncf %258 : vector<128x32xf32> to vector<128x32xbf16>
    %c0_145 = arith.constant 0 : index
    %c352_146 = arith.constant 352 : index
    %260 = vector.load %arg12[%c0_145, %c352_146] : memref<128x384xf32, #tpu.memory_space<vmem>>, vector<128x32xf32>
    %261 = arith.truncf %260 : vector<128x32xf32> to vector<128x32xbf16>
    %cst_147 = arith.constant dense<0.000000e+00> : vector<128x128xf32>
    %262 = tpu.matmul %257, %259, %cst_147 {dimension_numbers = #tpu.dot_dimension_numbers<[1], [1], [0], [0], [0, 0, 1, 0], [], []>} : vector<128x32xbf16>, vector<128x32xbf16>, vector<128x128xf32> -> vector<128x128xf32>
    %cst_148 = arith.constant 0.176776692 : f32
    %263 = vector.broadcast %cst_148 : f32 to vector<128x128xf32>
    %264 = arith.mulf %262, %263 : vector<128x128xf32>
    %cst_149 = arith.constant dense<0xFF800000> : vector<128xf32>
    %265 = vector.multi_reduction <maximumf>, %264, %cst_149 [1] : vector<128x128xf32> to vector<128xf32>
    %266 = vector.shape_cast %265 : vector<128xf32> to vector<128x1xf32>
    %267 = vector.broadcast %266 : vector<128x1xf32> to vector<128x128xf32>
    %268 = arith.subf %264, %267 : vector<128x128xf32>
    %269 = math.exp %268 : vector<128x128xf32>
    %cst_150 = arith.constant dense<0.000000e+00> : vector<128xf32>
    %270 = vector.multi_reduction <add>, %269, %cst_150 [1] : vector<128x128xf32> to vector<128xf32>
    %271 = vector.shape_cast %270 : vector<128xf32> to vector<128x1xf32>
    %272 = tpu.reciprocal %271 {approx = true} : vector<128x1xf32> -> vector<128x1xf32>
    %273 = vector.broadcast %272 : vector<128x1xf32> to vector<128x128xf32>
    %274 = arith.mulf %269, %273 : vector<128x128xf32>
    %275 = arith.truncf %274 : vector<128x128xf32> to vector<128x128xbf16>
    %cst_151 = arith.constant dense<0.000000e+00> : vector<128x32xf32>
    %276 = tpu.matmul %275, %261, %cst_151 {dimension_numbers = #tpu.dot_dimension_numbers<[1], [0], [0], [1], [0, 0, 1, 1], [], []>} : vector<128x128xbf16>, vector<128x32xbf16>, vector<128x32xf32> -> vector<128x32xf32>
    %c0_152 = arith.constant 0 : index
    %c96_153 = arith.constant 96 : index
    %277 = vector.load %arg13[%c0_152, %c96_153] : memref<128x128xf32, #tpu.memory_space<vmem>>, vector<128x32xf32>
    tpu.vector_store %arg13[%c0_152, %c96_153], %276 {strides = array<i32>} : memref<128x128xf32, #tpu.memory_space<vmem>>, vector<128x32xf32>,
    %c0_154 = arith.constant 0 : index
    %c0_155 = arith.constant 0 : index
    %278 = vector.load %arg13[%c0_154, %c0_155] : memref<128x128xf32, #tpu.memory_space<vmem>>, vector<128x128xf32>
    %279 = arith.truncf %278 : vector<128x128xf32> to vector<128x128xbf16>
    %c0_156 = arith.constant 0 : index
    %c0_157 = arith.constant 0 : index
    %280 = vector.load %arg4[%c0_156, %c0_157] : memref<128x128xbf16, #tpu.memory_space<vmem>>, vector<128x128xbf16>
    %cst_158 = arith.constant dense<0.000000e+00> : vector<128x128xf32>
    %281 = tpu.matmul %279, %280, %cst_158 {dimension_numbers = #tpu.dot_dimension_numbers<[1], [0], [0], [1], [0, 0, 1, 1], [], []>} : vector<128x128xbf16>, vector<128x128xbf16>, vector<128x128xf32> -> vector<128x128xf32>
    %282 = vector.broadcast %3 : vector<1x128xf32> to vector<128x128xf32>
    %283 = arith.addf %281, %282 : vector<128x128xf32>
    %284 = arith.addf %164, %283 : vector<128x128xf32>
    %c0_159 = arith.constant 0 : index
    %c0_160 = arith.constant 0 : index
    %285 = vector.load %arg11[%c0_159, %c0_160] : memref<128x128xf32, #tpu.memory_space<vmem>>, vector<128x128xf32>
    tpu.vector_store %arg11[%c0_159, %c0_160], %284 {strides = array<i32>} : memref<128x128xf32, #tpu.memory_space<vmem>>, vector<128x128xf32>,
    %c0_161 = arith.constant 0 : index
    %c0_162 = arith.constant 0 : index
    %286 = vector.load %arg11[%c0_161, %c0_162] : memref<128x128xf32, #tpu.memory_space<vmem>>, vector<128x128xf32>
    %cst_163 = arith.constant dense<0.000000e+00> : vector<128xf32>
    %287 = vector.multi_reduction <add>, %286, %cst_163 [1] : vector<128x128xf32> to vector<128xf32>
    %288 = vector.shape_cast %287 : vector<128xf32> to vector<128x1xf32>
    %cst_164 = arith.constant 1.280000e+02 : f32
    %289 = vector.broadcast %cst_164 : f32 to vector<128x1xf32>
    %290 = arith.divf %288, %289 : vector<128x1xf32>
    %291 = vector.broadcast %290 : vector<128x1xf32> to vector<128x128xf32>
    %292 = arith.subf %286, %291 : vector<128x128xf32>
    %293 = arith.mulf %292, %292 : vector<128x128xf32>
    %cst_165 = arith.constant dense<0.000000e+00> : vector<128xf32>
    %294 = vector.multi_reduction <add>, %293, %cst_165 [1] : vector<128x128xf32> to vector<128xf32>
    %295 = vector.shape_cast %294 : vector<128xf32> to vector<128x1xf32>
    %cst_166 = arith.constant 0.00787401571 : f32
    %296 = vector.broadcast %cst_166 : f32 to vector<128x1xf32>
    %297 = arith.mulf %295, %296 : vector<128x1xf32>
    %298 = math.sqrt %297 : vector<128x1xf32>
    %cst_167 = arith.constant 9.99999997E-7 : f32
    %299 = vector.broadcast %cst_167 : f32 to vector<128x1xf32>
    %300 = arith.addf %298, %299 : vector<128x1xf32>
    %301 = tpu.reciprocal %300 {approx = true} : vector<128x1xf32> -> vector<128x1xf32>
    %302 = vector.broadcast %290 : vector<128x1xf32> to vector<128x128xf32>
    %303 = arith.subf %286, %302 : vector<128x128xf32>
    %304 = vector.broadcast %301 : vector<128x1xf32> to vector<128x128xf32>
    %305 = arith.mulf %303, %304 : vector<128x128xf32>
    %306 = arith.truncf %305 : vector<128x128xf32> to vector<128x128xbf16>
    %c0_168 = arith.constant 0 : index
    %c0_169 = arith.constant 0 : index
    %307 = vector.load %arg6[%c0_168, %c0_169] : memref<128x512xbf16, #tpu.memory_space<vmem>>, vector<128x512xbf16>
    %cst_170 = arith.constant dense<0.000000e+00> : vector<128x512xf32>
    %308 = tpu.matmul %306, %307, %cst_170 {dimension_numbers = #tpu.dot_dimension_numbers<[1], [0], [0], [1], [0, 0, 1, 1], [], []>} : vector<128x128xbf16>, vector<128x512xbf16>, vector<128x512xf32> -> vector<128x512xf32>
    %309 = vector.broadcast %4 : vector<1x512xf32> to vector<128x512xf32>
    %310 = arith.addf %308, %309 : vector<128x512xf32>
    %cst_171 = arith.constant 0.000000e+00 : f32
    %311 = vector.broadcast %cst_171 : f32 to vector<128x512xf32>
    %312 = arith.maximumf %310, %311 : vector<128x512xf32>
    %c0_172 = arith.constant 0 : index
    %c0_173 = arith.constant 0 : index
    %313 = vector.load %arg14[%c0_172, %c0_173] : memref<128x512xf32, #tpu.memory_space<vmem>>, vector<128x512xf32>
    tpu.vector_store %arg14[%c0_172, %c0_173], %312 {strides = array<i32>} : memref<128x512xf32, #tpu.memory_space<vmem>>, vector<128x512xf32>,
    %c0_174 = arith.constant 0 : index
    %c0_175 = arith.constant 0 : index
    %314 = vector.load %arg14[%c0_174, %c0_175] : memref<128x512xf32, #tpu.memory_space<vmem>>, vector<128x512xf32>
    %315 = arith.truncf %314 : vector<128x512xf32> to vector<128x512xbf16>
    %c0_176 = arith.constant 0 : index
    %c0_177 = arith.constant 0 : index
    %316 = vector.load %arg8[%c0_176, %c0_177] : memref<512x128xbf16, #tpu.memory_space<vmem>>, vector<512x128xbf16>
    %cst_178 = arith.constant dense<0.000000e+00> : vector<128x128xf32>
    %317 = tpu.matmul %315, %316, %cst_178 {dimension_numbers = #tpu.dot_dimension_numbers<[1], [0], [0], [1], [0, 0, 1, 1], [], []>} : vector<128x512xbf16>, vector<512x128xbf16>, vector<128x128xf32> -> vector<128x128xf32>
    %318 = vector.broadcast %5 : vector<1x128xf32> to vector<128x128xf32>
    %319 = arith.addf %317, %318 : vector<128x128xf32>
    %320 = arith.addf %286, %319 : vector<128x128xf32>
    %c0_179 = arith.constant 0 : index
    %c0_180 = arith.constant 0 : index
    %321 = vector.load %arg11[%c0_179, %c0_180] : memref<128x128xf32, #tpu.memory_space<vmem>>, vector<128x128xf32>
    tpu.vector_store %arg11[%c0_179, %c0_180], %320 {strides = array<i32>} : memref<128x128xf32, #tpu.memory_space<vmem>>, vector<128x128xf32>,
    %c0_181 = arith.constant 0 : index
    %c0_182 = arith.constant 0 : index
    %322 = vector.load %arg11[%c0_181, %c0_182] : memref<128x128xf32, #tpu.memory_space<vmem>>, vector<128x128xf32>
    %cst_183 = arith.constant dense<0.000000e+00> : vector<128xf32>
    %323 = vector.multi_reduction <add>, %322, %cst_183 [1] : vector<128x128xf32> to vector<128xf32>
    %324 = vector.shape_cast %323 : vector<128xf32> to vector<128x1xf32>
    %cst_184 = arith.constant 1.280000e+02 : f32
    %325 = vector.broadcast %cst_184 : f32 to vector<128x1xf32>
    %326 = arith.divf %324, %325 : vector<128x1xf32>
    %327 = vector.broadcast %326 : vector<128x1xf32> to vector<128x128xf32>
    %328 = arith.subf %322, %327 : vector<128x128xf32>
    %329 = arith.mulf %328, %328 : vector<128x128xf32>
    %cst_185 = arith.constant dense<0.000000e+00> : vector<128xf32>
    %330 = vector.multi_reduction <add>, %329, %cst_185 [1] : vector<128x128xf32> to vector<128xf32>
    %331 = vector.shape_cast %330 : vector<128xf32> to vector<128x1xf32>
    %cst_186 = arith.constant 0.00787401571 : f32
    %332 = vector.broadcast %cst_186 : f32 to vector<128x1xf32>
    %333 = arith.mulf %331, %332 : vector<128x1xf32>
    %334 = math.sqrt %333 : vector<128x1xf32>
    %cst_187 = arith.constant 9.99999997E-7 : f32
    %335 = vector.broadcast %cst_187 : f32 to vector<128x1xf32>
    %336 = arith.addf %334, %335 : vector<128x1xf32>
    %337 = tpu.reciprocal %336 {approx = true} : vector<128x1xf32> -> vector<128x1xf32>
    %338 = vector.broadcast %326 : vector<128x1xf32> to vector<128x128xf32>
    %339 = arith.subf %322, %338 : vector<128x128xf32>
    %340 = vector.broadcast %337 : vector<128x1xf32> to vector<128x128xf32>
    %341 = arith.mulf %339, %340 : vector<128x128xf32>
    %c0_188 = arith.constant 0 : index
    %c0_189 = arith.constant 0 : index
    %342 = vector.load %arg10[%c0_188, %c0_189] : memref<128x128xf32, #tpu.memory_space<vmem>>, vector<128x128xf32>
    tpu.vector_store %arg10[%c0_188, %c0_189], %341 {strides = array<i32>} : memref<128x128xf32, #tpu.memory_space<vmem>>, vector<128x128xf32>,
    return
  }
  func.func @transform_0(%arg0: i32) -> (i32, i32) {
    %c0_i32 = arith.constant 0 : i32
    %c0_i32_0 = arith.constant 0 : i32
    return %arg0, %c0_i32 : i32, i32
  }
  func.func @transform_1(%arg0: i32) -> (i32, i32) {
    %c0_i32 = arith.constant 0 : i32
    %c0_i32_0 = arith.constant 0 : i32
    %c0_i32_1 = arith.constant 0 : i32
    return %c0_i32, %c0_i32_0 : i32, i32
  }
  func.func @transform_2(%arg0: i32) -> (i32, i32) {
    %c0_i32 = arith.constant 0 : i32
    %c0_i32_0 = arith.constant 0 : i32
    %c0_i32_1 = arith.constant 0 : i32
    return %c0_i32, %c0_i32_0 : i32, i32
  }
  func.func @transform_3(%arg0: i32) -> (i32, i32) {
    %c0_i32 = arith.constant 0 : i32
    %c0_i32_0 = arith.constant 0 : i32
    %c0_i32_1 = arith.constant 0 : i32
    return %c0_i32, %c0_i32_0 : i32, i32
  }
  func.func @transform_4(%arg0: i32) -> (i32, i32) {
    %c0_i32 = arith.constant 0 : i32
    %c0_i32_0 = arith.constant 0 : i32
    %c0_i32_1 = arith.constant 0 : i32
    return %c0_i32, %c0_i32_0 : i32, i32
  }
  func.func @transform_5(%arg0: i32) -> (i32, i32) {
    %c0_i32 = arith.constant 0 : i32
    %c0_i32_0 = arith.constant 0 : i32
    %c0_i32_1 = arith.constant 0 : i32
    return %c0_i32, %c0_i32_0 : i32, i32
  }
  func.func @transform_6(%arg0: i32) -> (i32, i32) {
    %c0_i32 = arith.constant 0 : i32
    %c0_i32_0 = arith.constant 0 : i32
    %c0_i32_1 = arith.constant 0 : i32
    return %c0_i32, %c0_i32_0 : i32, i32
  }
  func.func @transform_7(%arg0: i32) -> (i32, i32) {
    %c0_i32 = arith.constant 0 : i32
    %c0_i32_0 = arith.constant 0 : i32
    %c0_i32_1 = arith.constant 0 : i32
    return %c0_i32, %c0_i32_0 : i32, i32
  }
  func.func @transform_8(%arg0: i32) -> (i32, i32) {
    %c0_i32 = arith.constant 0 : i32
    %c0_i32_0 = arith.constant 0 : i32
    %c0_i32_1 = arith.constant 0 : i32
    return %c0_i32, %c0_i32_0 : i32, i32
  }
  func.func @transform_9(%arg0: i32) -> (i32, i32) {
    %c0_i32 = arith.constant 0 : i32
    %c0_i32_0 = arith.constant 0 : i32
    return %arg0, %c0_i32 : i32, i32
  }
}

</mosaic_0001>

<bundles_post_ra>
// kernel: _lambda_.1
= control target key start
LH: loop header
LB: loop body
LE: loop exit
PB: predicated region body
PF: predicated region fallthrough
CT: control target
= control target key end

     0   :  { %s17252_s0 = inlined_call_operand.hbm [shape: f32[256,128], index: 0, kind: input, shape index: {}]   ;;  %s17253_s1 = inlined_call_operand.hbm [shape: bf16[128,384], index: 1, kind: input, shape index: {}]   ;;  %s17254_s2 = inlined_call_operand.vmem [shape: f32[1,384], index: 2, kind: input, shape index: {}]   ;;  %s17255_s3 = inlined_call_operand.hbm [shape: bf16[128,128], index: 3, kind: input, shape index: {}]   ;;  %s17256_s4 = inlined_call_operand.vmem [shape: f32[1,128], index: 4, kind: input, shape index: {}]   ;;  %s17257_s5 = inlined_call_operand.hbm [shape: bf16[128,512], index: 5, kind: input, shape index: {}]   ;;  %s17258_s6 = inlined_call_operand.vmem [shape: f32[1,512], index: 6, kind: input, shape index: {}]   ;;  %s17259_s7 = inlined_call_operand.hbm [shape: bf16[512,128], index: 7, kind: input, shape index: {}]   ;;  %s17260_s8 = inlined_call_operand.vmem [shape: f32[1,128], index: 8, kind: input, shape index: {}]   ;;  %s17261_s9 = inlined_call_operand.hbm [shape: f32[256,128], index: 9, kind: output, shape index: {}]  }
   0x1   :  { %17304 = sst [smem:[#allocation49_spill]] %s17253_s1 }
   0x2   :  { %14 = vsyncpa [#allocation7], 0 }
   0x3   :  { %16 = vsyncpa [#allocation7 + $0x1], 0 }
   0x4   :  { %17 = vsyncpa [#allocation10], 0 }
   0x5   :  { %18 = vsyncpa [#allocation13], 0 }
   0x6   :  { %19 = vsyncpa [#allocation8], 0 }
   0x7   :  { %21 = vsyncpa [#allocation8 + $0x1], 0  ;;  %s13602_s30 = smov 0   ;;  %s13604_s10 = smov 0  }
   0x8   :  { %s13606_s11 = smov 0   ;;  %s13608_s12 = smov 0  }
   0x9 LB: > { %17305 = sst [smem:[#allocation20_spill]] %s13518_s30  ;;  %s13623_s13 = sadd.s32 4294967295, %s13530_s12   ;;  %s13530_s12 = sphi %s13608_s12, %s17408_s12   ;;  %s13526_s11 = sphi %s13606_s11, %s17407_s11   ;;  %s13522_s10 = sphi %s13604_s10, %s17406_s10   ;;  %s13518_s30 = sphi %s13602_s30, %s17405_s30  }
   0xa   : > { %s10561_s14 = sadd.s32 4294967294, %s13530_s12   ;;  %p47_p0 = scmp.ne.s32.totalorder %s13522_s10, %s13518_s30 }
   0xb   : > { %p17262_p1 = scmp.eq.s32.totalorder %s13623_s13, 0  ;;  %p245_p3 = scmp.eq.s32.totalorder %s10561_s14, 1 }
   0xc   : > { %p10562_p5 = scmp.ge.s32.totalorder %s13530_s12, 1  ;;  %p252_p7 = scmp.lt.s32.totalorder %s13530_s12, 3 }
   0xd   : > { %p13632_p4 = por %p17262_p1, %p47_p0  ;;  %p13637_p6 = por %p245_p3, %p47_p0 }
   0xe   : > { %p13642_p8 = pnand %p10562_p5, %p252_p7  ;;  %s13532_s18 = smov [#allocation9]  }
   0xf   : > { %s17306_s15 = scalar_select %p13632_p4, 1, 0 }
  0x10   : > { %s17307_s16 = scalar_select %p13637_p6, 1, 0 }
  0x11   : > { %s17309_s17 = scalar_select %p13642_p8, 1, 0 }
  0x12   : > { %17308 = sst [smem:[#allocation21_spill]] %s17307_s16  ;;  %s264_s19 = sshll.u32 %s13532_s18, 4  ;;  %s13646_s19 = int_to_ptr.vmem [resolvable:$true] %s264_s19 }
  0x13   : > { %p12143_p9 = pneg %p13642_p8  ;;  %s13533_s21 = smov [#allocation12]  }
  0x14   : > { %s296_s22 = sshll.u32 %s13533_s21, 4  ;;  %s17311_s1 = sld [smem:[#allocation49_spill]]  ;;  %s13657_s22 = int_to_ptr.vmem [resolvable:$true] %s296_s22 }
  0x15   : > { %p13653_p11 = pnand %p12143_p9, %p17262_p1 }
  0x17   : > { %p13667_p13 = pneg %p13653_p11 }
  0x1a   : > { %s13314_s25 = scalar_lea.hbm %s17311_s1, 3072 }
  0x1b   : > { %p13315_p12 = scmp.ne.s32.totalorder %s17311_s1, %s13314_s25  ;;  %p13321_p5 = scmp.lt.u32.totalorder %s13314_s25, %s17311_s1 }
  0x1d   : > { %p13317_p0 = pnand %p13667_p13, %p13315_p12 }
  0x1f   : > { %p13318_p3 = pneg %p13317_p0 }
  0x21   : > { %p13323_p7 = pnand %p13321_p5, %p13318_p3 }
  0x23   : > { %13326 = shalt.err (!%p13323_p7)
}
  0x24   : > { %s13327_s18 = scalar_lea.vmem %s13646_s19, 3072  ;;  %p13335_p2 = scmp.lt.s32.totalorder %s13646_s19, %s13646_s19 }
  0x25   : > { %p13328_p9 = scmp.ne.s32.totalorder %s13646_s19, %s13327_s18  ;;  %p13336_p6 = scmp.lt.s32.totalorder %s13327_s18, %s13327_s18 }
  0x27   : > { %p13330_p10 = pnand %p13328_p9, %p13667_p13  ;;  %p13337_p12 = por %p13336_p6, %p13335_p2 }
  0x29   : > { %p13331_p1 = pneg %p13330_p10 }
  0x2b   : > { %p13338_p0 = pnand %p13337_p12, %p13331_p1 }
  0x2d   : > { %13341 = shalt.err (!%p13338_p0)
}
  0x2e   : > { %s13534_s21 = smov 192   ;;  %s13535_s23 = smov 12  }
  0x2f   : > { %12146 = dma.hbm_to_vmem [thread:$0]  (!%p13653_p11), %s17311_s1, 3072, %s13646_s19, [#allocation10], %s13534_s21, %s13534_s21, %s13535_s23  }
  0x30   : > { %s13342_s29 = scalar_lea.hbm %s17257_s5, 4096 }
  0x31   : > { %p13343_p2 = scmp.ne.s32.totalorder %s17257_s5, %s13342_s29  ;;  %p13349_p10 = scmp.lt.u32.totalorder %s13342_s29, %s17257_s5 }
  0x33   : > { %p13345_p1 = pnand %p13343_p2, %p13667_p13 }
  0x35   : > { %p13346_p6 = pneg %p13345_p1 }
  0x37   : > { %p13351_p3 = pnand %p13349_p10, %p13346_p6 }
  0x39   : > { %13354 = shalt.err (!%p13351_p3)
}
  0x3a   : > { %s13355_s19 = scalar_lea.vmem %s13657_s22, 4096  ;;  %p13363_p12 = scmp.lt.s32.totalorder %s13657_s22, %s13657_s22 }
  0x3b   : > { %p13356_p5 = scmp.ne.s32.totalorder %s13657_s22, %s13355_s19  ;;  %p13364_p0 = scmp.lt.s32.totalorder %s13355_s19, %s13355_s19 }
  0x3d   : > { %p13358_p7 = pnand %p13356_p5, %p13667_p13  ;;  %p13365_p2 = por %p13364_p0, %p13363_p12 }
  0x3f   : > { %p13359_p9 = pneg %p13358_p7 }
  0x41   : > { %p13366_p1 = pnand %p13365_p2, %p13359_p9 }
  0x43   : > { %13369 = shalt.err (!%p13366_p1)
}
  0x44   : > { %s13536_s16 = smov 256   ;;  %s13537_s30 = smov 16  }
  0x45   : > { %12152 = dma.hbm_to_vmem [thread:$0]  (!%p13653_p11), %s17257_s5, 4096, %s13657_s22, [#allocation13], %s13536_s16, %s13536_s16, %s13537_s30  }
  0x46   : > { %s13538_s24 = smov [#allocation11]   ;;  %s13370_s29 = scalar_lea.hbm %s17255_s3, 1024 }
  0x47   : > { %s280_s25 = sshll.u32 %s13538_s24, 4  ;;  %p13371_p6 = scmp.ne.s32.totalorder %s17255_s3, %s13370_s29  ;;  %s281_s25 = int_to_ptr.vmem [resolvable:$true] %s280_s25 }
  0x48   : > { %p13377_p5 = scmp.lt.u32.totalorder %s13370_s29, %s17255_s3 }
  0x49   : > { %p13373_p10 = pnand %p13371_p6, %p13667_p13 }
  0x4b   : > { %p13374_p3 = pneg %p13373_p10 }
  0x4d   : > { %p13379_p7 = pnand %p13377_p5, %p13374_p3 }
  0x4f   : > { %13382 = shalt.err (!%p13379_p7)
}
  0x50   : > { %s13383_s22 = scalar_lea.vmem %s281_s25, 1024  ;;  %p13391_p2 = scmp.lt.s32.totalorder %s281_s25, %s281_s25 }
  0x51   : > { %p13384_p9 = scmp.ne.s32.totalorder %s281_s25, %s13383_s22  ;;  %p13392_p1 = scmp.lt.s32.totalorder %s13383_s22, %s13383_s22 }
  0x53   : > { %p13386_p12 = pnand %p13384_p9, %p13667_p13  ;;  %p13393_p4 = por %p13392_p1, %p13391_p2 }
  0x55   : > { %p13387_p0 = pneg %p13386_p12 }
  0x57   : > { %p13394_p8 = pnand %p13393_p4, %p13387_p0 }
  0x59   : > { %13397 = shalt.err (!%p13394_p8)
}
  0x5a   : > { %s13539_s16 = smov 64   ;;  %s13540_s30 = smov 4  }
  0x5b   : > { %12149 = dma.hbm_to_vmem [thread:$0]  (!%p13653_p11), %s17255_s3, 1024, %s281_s25, [#allocation10], %s13539_s16, %s13539_s16, %s13540_s30  }
  0x5c   : > { %s13541_s23 = smov [#allocation14]   ;;  %s13398_s29 = scalar_lea.hbm %s17259_s7, 4096 }
  0x5d   : > { %s312_s24 = sshll.u32 %s13541_s23, 4  ;;  %p13399_p4 = scmp.ne.s32.totalorder %s17259_s7, %s13398_s29  ;;  %s313_s24 = int_to_ptr.vmem [resolvable:$true] %s312_s24 }
  0x5e   : > { %p13405_p10 = scmp.lt.u32.totalorder %s13398_s29, %s17259_s7 }
  0x5f   : > { %p13401_p8 = pnand %p13399_p4, %p13667_p13 }
  0x61   : > { %p13402_p6 = pneg %p13401_p8 }
  0x63   : > { %p13407_p3 = pnand %p13405_p10, %p13402_p6 }
  0x65   : > { %13410 = shalt.err (!%p13407_p3)
}
  0x66   : > { %s13411_s25 = scalar_lea.vmem %s313_s24, 4096  ;;  %p13419_p12 = scmp.lt.s32.totalorder %s313_s24, %s313_s24 }
  0x67   : > { %p13412_p5 = scmp.ne.s32.totalorder %s313_s24, %s13411_s25  ;;  %p13420_p0 = scmp.lt.s32.totalorder %s13411_s25, %s13411_s25 }
  0x69   : > { %p13414_p7 = pnand %p13412_p5, %p13667_p13  ;;  %p13421_p2 = por %p13420_p0, %p13419_p12 }
  0x6b   : > { %p13415_p9 = pneg %p13414_p7 }
  0x6d   : > { %p13422_p1 = pnand %p13421_p2, %p13415_p9 }
  0x6f   : > { %13425 = shalt.err (!%p13422_p1)
}
  0x70   : > { %12155 = dma.hbm_to_vmem [thread:$0]  (!%p13653_p11), %s17259_s7, 4096, %s313_s24, [#allocation13], %s13539_s16, %s13539_s16, %s13540_s30  }
  0x71   : > { %s13748_s28 = sadd.s32 1, %s13530_s12   ;;  %s34_s23 = sadd.s32 1, %s13526_s11 }
  0x72   : > { %s31_s20 = ssub.s32 %s13530_s12, %s13748_s28  ;;  %p41_p13 = scmp.ne.s32.totalorder %s13526_s11, %s13522_s10 }
  0x73   : > { %p32_p4 = scmp.eq.s32.totalorder %s31_s20, 0  ;;  %p42_p8 = scmp.eq.s32.totalorder %s13530_s12, 0 }
  0x74   : > { %p17313_p6 = scmp.eq.s32.totalorder %s13623_s13, 1  ;;  %p12168_p3 = scmp.lt.s32.totalorder %s13530_s12, 2 }
  0x75   : > { %s13764_s27 = scalar_select %p32_p4, %s13526_s11, %s34_s23  }
  0x76   : > { %p13758_p10 = por %p17313_p6, %p41_p13  ;;  %p43_p5 = por %p42_p8, %p41_p13 }
  0x77   : > { %s329_s29 = sand.u32 1, %s13526_s11   ;;  %s10841_s16 = sshll.u32 %s13530_s12, 11 }
  0x78   : > { %s10568_s14 = sshll.u32 %s329_s29, 7  ;;  %s13771_s18 = scalar_lea.hbm %s17252_s0, %s10841_s16 }
  0x79   : > { %s333_s19 = scalar_lea.vmem [#allocation6], %s10568_s14  ;;  %p13775_p11 = pnand %p12168_p3, %p43_p5 }
  0x7a   : > { %s340_s22 = sshll.u32 %s333_s19, 4  ;;  %s13779_s1 = scalar_lea.sflag [#allocation7], %s329_s29  ;;  %s13773_s22 = int_to_ptr.vmem [resolvable:$true] %s340_s22 }
  0x7b   : > { %s13426_s21 = scalar_lea.hbm %s13771_s18, 2048  ;;  %p13428_p9 = pneg %p13775_p11 }
  0x7c   : > { %p13427_p7 = scmp.ne.s32.totalorder %s13771_s18, %s13426_s21  ;;  %s13431_s14 = scalar_lea.hbm %s17252_s0, 4096 }
  0x7d   : > { %p13432_p2 = scmp.lt.u32.totalorder %s13771_s18, %s17252_s0  ;;  %p13433_p1 = scmp.lt.u32.totalorder %s13431_s14, %s13426_s21 }
  0x7e   : > { %p13429_p12 = pnand %p13428_p9, %p13427_p7  ;;  %p13435_p4 = scmp.lt.u32.totalorder %s13426_s21, %s13771_s18 }
  0x7f   : > { %p13434_p13 = por %p13433_p1, %p13432_p2 }
  0x80   : > { %p13430_p0 = pneg %p13429_p12 }
  0x81   : > { %p13436_p8 = por %p13435_p4, %p13434_p13 }
  0x83   : > { %p13437_p6 = pnand %p13436_p8, %p13430_p0 }
  0x85   : > { %13440 = shalt.err (!%p13437_p6)
}
  0x86   : > { %s13441_s29 = scalar_lea.vmem %s13773_s22, 2048  ;;  %s13542_s24 = smov [#allocation6]  }
  0x87   : > { %p13442_p3 = scmp.ne.s32.totalorder %s13773_s22, %s13441_s29  ;;  %s13446_s19 = sshll.u32 %s13542_s24, 4  ;;  %s13447_s19 = int_to_ptr.vmem [resolvable:$false] %s13446_s19 }
  0x88   : > { %s13448_s23 = scalar_lea.vmem %s13447_s19, 4096  ;;  %p13449_p12 = scmp.lt.s32.totalorder %s13773_s22, %s13447_s19 }
  0x89   : > { %p13444_p5 = pnand %p13442_p3, %p13428_p9  ;;  %p13450_p2 = scmp.lt.s32.totalorder %s13448_s23, %s13441_s29 }
  0x8b   : > { %p13445_p7 = pneg %p13444_p5  ;;  %p13451_p1 = por %p13450_p2, %p13449_p12 }
  0x8d   : > { %p13452_p13 = pnand %p13451_p1, %p13445_p7 }
  0x8f   : > { %13455 = shalt.err (!%p13452_p13)
}
  0x90   : > { %s13543_s21 = smov 128   ;;  %s13544_s20 = smov 8  }
  0x91   : > { %12159 = dma.hbm_to_vmem [thread:$0]  (!%p13775_p11), %s13771_s18, 2048, %s13773_s22, %s13779_s1, %s13543_s21, %s13543_s21, %s13544_s20  }
  0x92   : > { %p17316_p9 = scmp.ne.s32.totalorder %s17309_s17, 0 }
  0x94   : > { %352 = sbr.rel (%p17316_p9) target bundleno = 9336 (0x2478), region = 56 }
  0x9b   : > { %s13810_s14 = sand.u32 1, %s13522_s10   ;;  %p17317_p0 = scmp.ne.s32.totalorder %s17306_s15, 0 }
  0x9c   : > { %s10572_s16 = sshll.u32 %s13810_s14, 7  ;;  %s355_s30 = scalar_lea.sflag [#allocation7], %s13810_s14 }
  0x9d   : > { %s13816_s29 = scalar_lea.vmem [#allocation6], %s10572_s16 }
  0x9e   : > { %13501 = dma.done.wait (%p17317_p0), %s355_s30, 2048  }
  0x9f   : > { %13503 = vsyncadd (%p17317_p0), %s355_s30, 4294965248  ;;  %p17318_p11 = scmp.eq.s32.totalorder %s13623_s13, 0 }
  0xa1   : > { %13505 = dma.done.wait (%p17318_p11), [#allocation10], 4096   ;;  %p17319_p4 = pmov %p17318_p11 }
  0xa3   : > { %13507 = vsyncadd (%p17319_p4), [#allocation10], 4294963200  ;;  %p17320_p8 = pmov %p17319_p4 }
  0xa4   : > { %p17321_p6 = pmov %p17319_p4 }
  0xa5   : > { %13509 = dma.done.wait (%p17320_p8), [#allocation13], 8192  }
  0xa6   : > { %13511 = vsyncadd (%p17321_p6), [#allocation13], 4294959104  ;;  %v412_v0 = vld [vmem:[%s13816_s29] sm:$0xff]  ;;  %v414_v1 = vld [vmem:[%s13816_s29 + $0x10] sm:$0xff]  ;;  %s13546_s18 = smov 96   ;;  %s13547_s22 = smov 64  }
  0xa7   : > { %464 = vadd.xlane.f32.xlu0 %v412_v0  ;;  %468 = vadd.xlane.f32.xlu1 %v414_v1  ;;  %v413_v2 = vld [vmem:[%s13816_s29 + $0x8] sm:$0xff]  ;;  %v415_v3 = vld [vmem:[%s13816_s29 + $0x18] sm:$0xff]  ;;  %v416_v4 = vld [vmem:[%s13816_s29 + $0x20] sm:$0xff]  ;;  %s13548_s25 = smov 32   ;;  %s10437_s19 = scalar_lea.sflag [#allocation8], %s13810_s14 }
  0xa8   : > { %v417_v5 = vld [vmem:[%s13816_s29 + $0x28] sm:$0xff]  ;;  %v418_v6 = vld [vmem:[%s13816_s29 + $0x30] sm:$0xff]  ;;  %v419_v7 = vld [vmem:[%s13816_s29 + $0x38] sm:$0xff]  ;;  %s13549_s23 = smov [#allocation15]  }
  0xa9   : > { %v420_v8 = vld [vmem:[%s13816_s29 + $0x40] sm:$0xff]  ;;  %v421_v9 = vld [vmem:[%s13816_s29 + $0x48] sm:$0xff]  ;;  %v13841_v10 = vld [vmem:[%s13816_s29 + $0x50] sm:$0xff]  ;;  %s13460_s21 = sshll.u32 %s13549_s23, 4  ;;  %s13461_s21 = int_to_ptr.vmem [resolvable:$false] %s13460_s21 }
  0xaa   : > { %v13844_v11 = vld [vmem:[%s13816_s29 + $0x58] sm:$0xff]  ;;  %v13847_v12 = vld [vmem:[%s13816_s29 + $0x60] sm:$0xff]  ;;  %v13850_v13 = vld [vmem:[%s13816_s29 + $0x68] sm:$0xff]  ;;  %s13462_s20 = scalar_lea.vmem %s13461_s21, 4096 }
  0xab   : > { %466 = vadd.xlane.f32.xlu0 %v413_v2  ;;  %470 = vadd.xlane.f32.xlu1 %v415_v3  ;;  %v13855_v14 = vld [vmem:[%s13816_s29 + $0x70] sm:$0xff]  ;;  %v13858_v15 = vld [vmem:[%s13816_s29 + $0x78] sm:$0xff] }
  0xaf   : > { %472 = vadd.xlane.f32.xlu0 %v416_v4  ;;  %474 = vadd.xlane.f32.xlu1 %v417_v5 }
  0xb3   : > { %476 = vadd.xlane.f32.xlu0 %v418_v6  ;;  %478 = vadd.xlane.f32.xlu1 %v419_v7 }
  0xb7   : > { %480 = vadd.xlane.f32.xlu0 %v420_v8  ;;  %482 = vadd.xlane.f32.xlu1 %v421_v9 }
  0xbb   : > { %484 = vadd.xlane.f32.xlu0 %v13841_v10  ;;  %486 = vadd.xlane.f32.xlu1 %v13844_v11 }
  0xbf   : > { %488 = vadd.xlane.f32.xlu0 %v13847_v12  ;;  %490 = vadd.xlane.f32.xlu1 %v13850_v13 }
  0xc3   : > { %492 = vadd.xlane.f32.xlu0 %v13855_v14  ;;  %494 = vadd.xlane.f32.xlu1 %v13858_v15 }
 0x134   : > { %v465_v16 = vpop.xlane.xlu0 %464  ;;  %v469_v17 = vpop.xlane.xlu1 %468 }
 0x135   : > { %v497_v18 = vmul.f32 0.0078125, %v465_v16  ;;  %v499_v19 = vmul.f32 0.0078125, %v469_v17  ;;  %v12227_v17 = vld [vmem:[#allocation9 + $0x1c] ss:$12 sps:$4 sm:$0xff]  }
 0x137   : > { %v13864_v20 = vsub.f32 %v412_v0, %v497_v18  ;;  %v13866_v21 = vsub.f32 %v414_v1, %v499_v19  ;;  %v12229_v18 = vld [vmem:[#allocation9 + $0x8] ss:$12 sps:$4 sm:$0xff]  }
 0x138   : > { %v467_v22 = vpop.xlane.xlu0 %466  ;;  %v471_v23 = vpop.xlane.xlu1 %470  ;;  %11419 = vmatprep.subr.bf16.mxu1 %v12229_v18 }
 0x139   : > { %v498_v24 = vmul.f32 0.0078125, %v467_v22  ;;  %v529_v25 = vmul.f32 %v13864_v20, %v13864_v20  ;;  %v500_v26 = vmul.f32 0.0078125, %v471_v23  ;;  %v531_v27 = vmul.f32 %v13866_v21, %v13866_v21  ;;  %v12230_v22 = vld [vmem:[#allocation9 + $0x18] ss:$12 sps:$4 sm:$0xff]   ;;  %11420 = vmatpush3.bf16.msra.mxu1 %v12229_v18 }
 0x13b   : > { %545 = vadd.xlane.f32.xlu0 %v529_v25  ;;  %v13872_v28 = vsub.f32 %v413_v2, %v498_v24  ;;  %v13874_v29 = vsub.f32 %v415_v3, %v500_v26  ;;  %v12224_v3 = vld [vmem:[#allocation9 + $0x4] ss:$12 sps:$4 sm:$0xff]   ;;  %v12231_v24 = vld [vmem:[#allocation9 + $0x34] ss:$12 sps:$4 sm:$0xff]  }
 0x13c   : > { %v473_v30 = vpop.xlane.xlu0 %472  ;;  %v475_v31 = vpop.xlane.xlu1 %474  ;;  %937 = vmatprep.subr.bf16.mxu0 %v12224_v3  ;;  %v12233_v25 = vld [vmem:[#allocation9 + $0x20] ss:$12 sps:$4 sm:$0xff]  }
 0x13d   : > { %v501_v32 = vmul.f32 0.0078125, %v473_v30  ;;  %v530_v33 = vmul.f32 %v13872_v28, %v13872_v28  ;;  %v502_v34 = vmul.f32 0.0078125, %v475_v31  ;;  %v532_v35 = vmul.f32 %v13874_v29, %v13874_v29  ;;  %11421 = vmatprep.subr.bf16.mxu1 %v12233_v25  ;;  %v12238_v30 = vld [vmem:[#allocation9 + $0x48] ss:$12 sps:$4 sm:$0xff]   ;;  %v12239_v31 = vld [vmem:[#allocation9 + $0x64] ss:$12 sps:$4 sm:$0xff]  }
 0x13e   : > { %11422 = vmatpush3.bf16.msra.mxu1 %v12233_v25 }
 0x13f   : > { %549 = vadd.xlane.f32.xlu0 %v531_v27  ;;  %547 = vadd.xlane.f32.xlu1 %v530_v33  ;;  %v13880_v36 = vsub.f32 %v416_v4, %v501_v32  ;;  %v13882_v37 = vsub.f32 %v417_v5, %v502_v34  ;;  %v12237_v27 = vld [vmem:[#allocation9 + $0x38] ss:$12 sps:$4 sm:$0xff]   ;;  %v12241_v32 = vld [vmem:[#allocation9 + $0x50] ss:$12 sps:$4 sm:$0xff]   ;;  %v12242_v33 = vld [vmem:[#allocation9 + $0x60] ss:$12 sps:$4 sm:$0xff]  }
 0x140   : > { %v477_v38 = vpop.xlane.xlu0 %476  ;;  %v479_v39 = vpop.xlane.xlu1 %478  ;;  %11423 = vmatprep.subr.bf16.mxu1 %v12237_v27  ;;  %v12243_v34 = vld [vmem:[#allocation9 + $0x7c] ss:$12 sps:$4 sm:$0xff]  }
 0x141   : > { %v503_v40 = vmul.f32 0.0078125, %v477_v38  ;;  %v533_v41 = vmul.f32 %v13880_v36, %v13880_v36  ;;  %v504_v42 = vmul.f32 0.0078125, %v479_v39  ;;  %v534_v43 = vmul.f32 %v13882_v37, %v13882_v37  ;;  %v12246_v38 = vld [vmem:[#allocation9 + $0x78] ss:$12 sps:$4 sm:$0xff]   ;;  %v12247_v39 = vld [vmem:[#allocation9 + $0x94] ss:$12 sps:$4 sm:$0xff]  }
 0x142   : > { %11424 = vmatpush3.bf16.msra.mxu1 %v12237_v27 }
 0x143   : > { %551 = vadd.xlane.f32.xlu1 %v532_v35  ;;  %553 = vadd.xlane.f32.xlu0 %v533_v41  ;;  %v13888_v44 = vsub.f32 %v418_v6, %v503_v40  ;;  %v13890_v45 = vsub.f32 %v419_v7, %v504_v42  ;;  %v12226_v7 = vld [vmem:[#allocation9] ss:$12 sps:$4 sm:$0xff]   ;;  %v12245_v35 = vld [vmem:[#allocation9 + $0x68] ss:$12 sps:$4 sm:$0xff]   ;;  %v12250_v41 = vld [vmem:[#allocation9 + $0x90] ss:$12 sps:$4 sm:$0xff]  }
 0x144   : > { %v481_v46 = vpop.xlane.xlu0 %480  ;;  %v483_v47 = vpop.xlane.xlu1 %482  ;;  %938 = vmatpush1.bf16.msra.mxu0 %v12226_v7  ;;  %11425 = vmatprep.subr.bf16.mxu1 %v12241_v32  ;;  %v12249_v40 = vld [vmem:[#allocation9 + $0x80] ss:$12 sps:$4 sm:$0xff]  }
 0x145   : > { %v505_v48 = vmul.f32 0.0078125, %v481_v46  ;;  %v535_v49 = vmul.f32 %v13888_v44, %v13888_v44  ;;  %v506_v50 = vmul.f32 0.0078125, %v483_v47  ;;  %v536_v51 = vmul.f32 %v13890_v45, %v13890_v45  ;;  %939 = vmatprep.subr.bf16.mxu0 %v12227_v17  ;;  %v12251_v42 = vld [vmem:[#allocation9 + $0xac] ss:$12 sps:$4 sm:$0xff]   ;;  %v12254_v46 = vld [vmem:[#allocation9 + $0xa8] ss:$12 sps:$4 sm:$0xff]  }
 0x146   : > { %11426 = vmatpush3.bf16.msra.mxu1 %v12241_v32  ;;  %v17270_v47 = vmov 0  }
 0x147   : > { %555 = vadd.xlane.f32.xlu1 %v534_v43  ;;  %557 = vadd.xlane.f32.xlu0 %v535_v49  ;;  %v13896_v52 = vsub.f32 %v420_v8, %v505_v48  ;;  %v13898_v53 = vsub.f32 %v421_v9, %v506_v50  ;;  %v12253_v43 = vld [vmem:[#allocation9 + $0x98] ss:$12 sps:$4 sm:$0xff]   ;;  %v12255_v48 = vld [vmem:[#allocation9 + $0xb0] ss:$12 sps:$4 sm:$0xff]  }
 0x148   : > { %v485_v54 = vpop.xlane.xlu0 %484  ;;  %v487_v55 = vpop.xlane.xlu1 %486  ;;  %940 = vmatpush1.bf16.msra.mxu0 %v12230_v22  ;;  %11427 = vmatprep.subr.bf16.mxu1 %v12245_v35 }
 0x149   : > { %v507_v56 = vmul.f32 0.0078125, %v485_v54  ;;  %v537_v57 = vmul.f32 %v13896_v52, %v13896_v52  ;;  %v508_v58 = vmul.f32 0.0078125, %v487_v55  ;;  %v538_v59 = vmul.f32 %v13898_v53, %v13898_v53  ;;  %941 = vmatprep.subr.bf16.mxu0 %v12231_v24  ;;  %969 = vmatprep.mubr.bf16.mxu0 %v17270_v47 }
 0x14a   : > { %11428 = vmatpush3.bf16.msra.mxu1 %v12245_v35 }
 0x14b   : > { %559 = vadd.xlane.f32.xlu1 %v536_v51  ;;  %561 = vadd.xlane.f32.xlu0 %v537_v57  ;;  %v13905_v60 = vsub.f32 %v13841_v10, %v507_v56  ;;  %v13908_v61 = vsub.f32 %v13844_v11, %v508_v58 }
 0x14c   : > { %v489_v62 = vpop.xlane.xlu0 %488  ;;  %v491_v63 = vpop.xlane.xlu1 %490  ;;  %11429 = vmatprep.subr.bf16.mxu1 %v12249_v40 }
 0x14d   : > { %v509_v0 = vmul.f32 0.0078125, %v489_v62  ;;  %v539_v1 = vmul.f32 %v13905_v60, %v13905_v60  ;;  %v510_v2 = vmul.f32 0.0078125, %v491_v63  ;;  %v540_v4 = vmul.f32 %v13908_v61, %v13908_v61 }
 0x14e   : > { %11430 = vmatpush3.bf16.msra.mxu1 %v12249_v40 }
 0x14f   : > { %563 = vadd.xlane.f32.xlu1 %v538_v59  ;;  %565 = vadd.xlane.f32.xlu0 %v539_v1  ;;  %v13915_v5 = vsub.f32 %v13847_v12, %v509_v0  ;;  %v13918_v6 = vsub.f32 %v13850_v13, %v510_v2 }
 0x150   : > { %v493_v8 = vpop.xlane.xlu0 %492  ;;  %v495_v9 = vpop.xlane.xlu1 %494  ;;  %11431 = vmatprep.subr.bf16.mxu1 %v12253_v43 }
 0x151   : > { %v511_v10 = vmul.f32 0.0078125, %v493_v8  ;;  %v541_v11 = vmul.f32 %v13915_v5, %v13915_v5  ;;  %v512_v16 = vmul.f32 0.0078125, %v495_v9  ;;  %v542_v12 = vmul.f32 %v13918_v6, %v13918_v6 }
 0x152   : > { %11432 = vmatpush3.bf16.msra.mxu1 %v12253_v43 }
 0x153   : > { %567 = vadd.xlane.f32.xlu1 %v540_v4  ;;  %569 = vadd.xlane.f32.xlu0 %v541_v11  ;;  %v13925_v13 = vsub.f32 %v13855_v14, %v511_v10  ;;  %v13928_v19 = vsub.f32 %v13858_v15, %v512_v16  ;;  %v12234_v14 = vld [vmem:[#allocation9 + $0x30] ss:$12 sps:$4 sm:$0xff]   ;;  %v12235_v15 = vld [vmem:[#allocation9 + $0x4c] ss:$12 sps:$4 sm:$0xff]  }
 0x154   : > { %942 = vmatpush1.bf16.msra.mxu0 %v12234_v14  ;;  %11433 = vmatprep.subr.bf16.mxu1 %v12255_v48 }
 0x155   : > { %v543_v23 = vmul.f32 %v13925_v13, %v13925_v13  ;;  %v544_v26 = vmul.f32 %v13928_v19, %v13928_v19  ;;  %943 = vmatprep.subr.bf16.mxu0 %v12235_v15 }
 0x156   : > { %11434 = vmatpush3.bf16.msra.mxu1 %v12255_v48 }
 0x157   : > { %571 = vadd.xlane.f32.xlu1 %v542_v12  ;;  %573 = vadd.xlane.f32.xlu0 %v543_v23 }
 0x158   : > { %944 = vmatpush1.bf16.msra.mxu0 %v12238_v30 }
 0x159   : > { %945 = vmatprep.subr.bf16.mxu0 %v12239_v31 }
 0x15b   : > { %575 = vadd.xlane.f32.xlu1 %v544_v26 }
 0x15c   : > { %946 = vmatpush1.bf16.msra.mxu0 %v12242_v33 }
 0x15d   : > { %947 = vmatprep.subr.bf16.mxu0 %v12243_v34 }
 0x160   : > { %948 = vmatpush1.bf16.msra.mxu0 %v12246_v38 }
 0x161   : > { %949 = vmatprep.subr.bf16.mxu0 %v12247_v39 }
 0x164   : > { %950 = vmatpush1.bf16.msra.mxu0 %v12250_v41 }
 0x165   : > { %951 = vmatprep.subr.bf16.mxu0 %v12251_v42 }
 0x168   : > { %952 = vmatpush1.bf16.msra.mxu0 %v12254_v46 }
 0x1c8   : > { %v546_v49 = vpop.xlane.xlu0 %545 }
 0x1c9   : > { %v577_v50 = vmul.f32 0.007874016, %v546_v49 }
 0x1cb   : > { %12464 = vrsqrt.f32 %v577_v50  ;;  %vm595_vm0 = vcmp.eq.f32.partialorder %v577_v50, inf  ;;  %v598_v7 = vand.u32 2147483648, %v577_v50  ;;  %vm597_vm1 = vcmp.eq.f32.partialorder %v577_v50, 0.0 }
 0x1cc   : > { %v548_v51 = vpop.xlane.xlu1 %547  ;;  %v550_v54 = vpop.xlane.xlu0 %549 }
 0x1cd   : > { %v578_v55 = vmul.f32 0.007874016, %v548_v51  ;;  %v13935_v56 = vmul.f32 0.007874016, %v550_v54 }
 0x1cf   : > { %12466 = vrsqrt.f32 %v578_v55  ;;  %vm602_vm2 = vcmp.eq.f32.partialorder %v578_v55, inf  ;;  %vm604_vm3 = vcmp.eq.f32.partialorder %v578_v55, 0.0  ;;  %v605_v24 = vand.u32 2147483648, %v578_v55 }
 0x1d0   : > { %v552_v57 = vpop.xlane.xlu1 %551  ;;  %v554_v58 = vpop.xlane.xlu0 %553  ;;  %12468 = vrsqrt.f32 %v13935_v56  ;;  %vm609_vm4 = vcmp.eq.f32.partialorder %v13935_v56, inf  ;;  %vm611_vm5 = vcmp.eq.f32.partialorder %v13935_v56, 0.0  ;;  %v612_v26 = vand.u32 2147483648, %v13935_v56 }
 0x1d1   : > { %v13938_v59 = vmul.f32 0.007874016, %v552_v57  ;;  %v13940_v62 = vmul.f32 0.007874016, %v554_v58 }
 0x1d3   : > { %12470 = vrsqrt.f32 %v13938_v59  ;;  %vm616_vm6 = vcmp.eq.f32.partialorder %v13938_v59, inf  ;;  %v619_v30 = vand.u32 2147483648, %v13938_v59  ;;  %vm623_vm7 = vcmp.eq.f32.partialorder %v13940_v62, inf }
 0x1d4   : > { %12472 = vrsqrt.f32 %v13940_v62  ;;  %v556_v63 = vpop.xlane.xlu1 %555  ;;  %v558_v0 = vpop.xlane.xlu0 %557  ;;  %v626_v31 = vand.u32 2147483648, %v13940_v62  ;;  %vm618_vm8 = vcmp.eq.f32.partialorder %v13938_v59, 0.0  ;;  %vm625_vm12 = vcmp.eq.f32.partialorder %v13940_v62, 0.0 }
 0x1d5   : > { %v12465_v1 = vpop.eup %12464  ;;  %v13944_v2 = vmul.f32 0.007874016, %v556_v63  ;;  %v13946_v3 = vmul.f32 0.007874016, %v558_v0 }
 0x1d6   : > { %v594_v4 = vmul.f32 %v12465_v1, %v577_v50 }
 0x1d7   : > { %12474 = vrsqrt.f32 %v13944_v2  ;;  %vm630_vm9 = vcmp.eq.f32.partialorder %v13944_v2, inf  ;;  %v633_v39 = vand.u32 2147483648, %v13944_v2  ;;  %vm637_vm10 = vcmp.eq.f32.partialorder %v13946_v3, inf }
 0x1d8   : > { %v596_v8 = vsel %vm595_vm0, %v577_v50, %v594_v4  ;;  %12476 = vrsqrt.f32 %v13946_v3  ;;  %v560_v9 = vpop.xlane.xlu1 %559  ;;  %v562_v10 = vpop.xlane.xlu0 %561  ;;  %v640_v41 = vand.u32 2147483648, %v13946_v3  ;;  %vm639_vm14 = vcmp.eq.f32.partialorder %v13946_v3, 0.0 }
 0x1d9   : > { %v12467_v11 = vpop.eup %12466  ;;  %v13950_v16 = vmul.f32 0.007874016, %v560_v9  ;;  %v13952_v17 = vmul.f32 0.007874016, %v562_v10  ;;  %v599_v18 = vsel %vm597_vm1, %v598_v7, %v596_v8  ;;  %vm632_vm1 = vcmp.eq.f32.partialorder %v13944_v2, 0.0 }
 0x1da   : > { %v601_v12 = vmul.f32 %v12467_v11, %v578_v55  ;;  %v705_v22 = vadd.f32 1e-06, %v599_v18  ;;  %v12469_v23 = vpop.eup %12468 }
 0x1db   : > { %12478 = vrsqrt.f32 %v13950_v16  ;;  %v608_v34 = vmul.f32 %v12469_v23, %v13935_v56  ;;  %vm644_vm11 = vcmp.eq.f32.partialorder %v13950_v16, inf  ;;  %v647_v49 = vand.u32 2147483648, %v13950_v16 }
 0x1dc   : > { %v603_v25 = vsel %vm602_vm2, %v578_v55, %v601_v12  ;;  %12480 = vrsqrt.f32 %v13952_v17  ;;  %v564_v14 = vpop.xlane.xlu1 %563  ;;  %v566_v15 = vpop.xlane.xlu0 %565  ;;  %vm651_vm13 = vcmp.eq.f32.partialorder %v13952_v17, inf  ;;  %v654_v55 = vand.u32 2147483648, %v13952_v17 }
 0x1dd   : > { %v12471_v27 = vpop.eup %12470  ;;  %v13963_v32 = vmul.f32 0.007874016, %v564_v14  ;;  %v13968_v35 = vmul.f32 0.007874016, %v566_v15  ;;  %12482 = vrcp.f32 %v705_v22  ;;  %v606_v40 = vsel %vm604_vm3, %v605_v24, %v603_v25 }
 0x1de   : > { %v12473_v33 = vpop.eup %12472  ;;  %v615_v38 = vmul.f32 %v12471_v27, %v13938_v59  ;;  %v610_v54 = vsel %vm609_vm4, %v13935_v56, %v608_v34  ;;  %v706_v58 = vadd.f32 1e-06, %v606_v40  ;;  %vm646_vm15 = vcmp.eq.f32.partialorder %v13950_v16, 0.0 }
 0x1df   : > { %12484 = vrsqrt.f32 %v13963_v32  ;;  %v622_v48 = vmul.f32 %v12473_v33, %v13940_v62  ;;  %vm658_vm0 = vcmp.eq.f32.partialorder %v13963_v32, inf  ;;  %v661_v4 = vand.u32 2147483648, %v13963_v32 }
 0x1e0   : > { %12486 = vrsqrt.f32 %v13968_v35  ;;  %v568_v42 = vpop.xlane.xlu1 %567  ;;  %v570_v43 = vpop.xlane.xlu0 %569  ;;  %v617_v63 = vsel %vm616_vm6, %v13938_v59, %v615_v38  ;;  %vm665_vm2 = vcmp.eq.f32.partialorder %v13968_v35, inf  ;;  %vm653_vm3 = vcmp.eq.f32.partialorder %v13952_v17, 0.0 }
 0x1e1   : > { %v12475_v46 = vpop.eup %12474  ;;  %v13982_v50 = vmul.f32 0.007874016, %v568_v42  ;;  %v13988_v57 = vmul.f32 0.007874016, %v570_v43  ;;  %v624_v10 = vsel %vm623_vm7, %v13940_v62, %v622_v48  ;;  %vm660_vm4 = vcmp.eq.f32.partialorder %v13963_v32, 0.0 }
 0x1e2   : > { %v12477_v51 = vpop.eup %12476  ;;  %v629_v0 = vmul.f32 %v12475_v46, %v13944_v2  ;;  %v668_v11 = vand.u32 2147483648, %v13968_v35  ;;  %v613_v12 = vsel %vm611_vm5, %v612_v26, %v610_v54  ;;  %vm667_vm7 = vcmp.eq.f32.partialorder %v13968_v35, 0.0 }
 0x1e3   : > { %12488 = vrsqrt.f32 %v13982_v50  ;;  %v636_v1 = vmul.f32 %v12477_v51, %v13946_v3  ;;  %vm672_vm6 = vcmp.eq.f32.partialorder %v13982_v50, inf  ;;  %v620_v56 = vsel %vm618_vm8, %v619_v30, %v617_v63 }
 0x1e4   : > { %12490 = vrsqrt.f32 %v13988_v57  ;;  %v572_v7 = vpop.xlane.xlu1 %571  ;;  %v574_v8 = vpop.xlane.xlu0 %573  ;;  %v631_v25 = vsel %vm630_vm9, %v13944_v2, %v629_v0  ;;  %v675_v27 = vand.u32 2147483648, %v13982_v50  ;;  %vm679_vm9 = vcmp.eq.f32.partialorder %v13988_v57, inf }
 0x1e5   : > { %v12479_v9 = vpop.eup %12478  ;;  %v14009_v18 = vmul.f32 0.007874016, %v572_v7  ;;  %v14015_v24 = vmul.f32 0.007874016, %v574_v8  ;;  %12492 = vrcp.f32 %v706_v58  ;;  %v638_v15 = vsel %vm637_vm10, %v13946_v3, %v636_v1 }
 0x1e6   : > { %v12481_v22 = vpop.eup %12480  ;;  %v643_v23 = vmul.f32 %v12479_v9, %v13950_v16  ;;  %v682_v30 = vand.u32 2147483648, %v13988_v57  ;;  %vm681_vm10 = vcmp.eq.f32.partialorder %v13988_v57, 0.0  ;;  %v707_v46 = vadd.f32 1e-06, %v613_v12 }
 0x1e7   : > { %v650_v14 = vmul.f32 %v12481_v22, %v13952_v17  ;;  %12494 = vrsqrt.f32 %v14009_v18  ;;  %v12483_v26 = vpop.eup %12482  ;;  %vm686_vm8 = vcmp.eq.f32.partialorder %v14009_v18, inf  ;;  %vm688_vm5 = vcmp.eq.f32.partialorder %v14009_v18, 0.0 }
 0x1e8   : > { %12496 = vrsqrt.f32 %v14015_v24  ;;  %v576_v33 = vpop.xlane.xlu1 %575  ;;  %v645_v59 = vsel %vm644_vm11, %v13950_v16, %v643_v23  ;;  %v689_v43 = vand.u32 2147483648, %v14009_v18  ;;  %v708_v48 = vadd.f32 1e-06, %v620_v56 }
 0x1e9   : > { %v12485_v34 = vpop.eup %12484  ;;  %v14037_v38 = vmul.f32 0.007874016, %v576_v33  ;;  %v652_v51 = vsel %vm651_vm13, %v13952_v17, %v650_v14  ;;  %v696_v58 = vand.u32 2147483648, %v14015_v24  ;;  %vm693_vm11 = vcmp.eq.f32.partialorder %v14015_v24, inf }
 0x1ea   : > { %v12487_v40 = vpop.eup %12486  ;;  %v657_v42 = vmul.f32 %v12485_v34, %v13963_v32  ;;  %v737_v0 = vmul.f32 %v12483_v26, %v13864_v20  ;;  %v627_v1 = vsel %vm625_vm12, %v626_v31, %v624_v10  ;;  %v634_v9 = vsel %vm632_vm1, %v633_v39, %v631_v25 }
 0x1eb   : > { %v664_v54 = vmul.f32 %v12487_v40, %v13968_v35  ;;  %12498 = vrsqrt.f32 %v14037_v38  ;;  %v709_v12 = vadd.f32 1e-06, %v627_v1  ;;  %v710_v23 = vadd.f32 1e-06, %v634_v9 }
 0x1ec   : > { %v659_v63 = vsel %vm658_vm0, %v13963_v32, %v657_v42  ;;  %12500 = vrcp.f32 %v707_v46  ;;  %v641_v62 = vsel %vm639_vm14, %v640_v41, %v638_v15  ;;  %v648_v31 = vsel %vm646_vm15, %v647_v49, %v645_v59 }
 0x1ed   : > { %v12489_v7 = vpop.eup %12488  ;;  %v666_v8 = vsel %vm665_vm2, %v13968_v35, %v664_v54  ;;  %12502 = vrcp.f32 %v708_v48  ;;  %v711_v2 = vadd.f32 1e-06, %v641_v62  ;;  %v712_v39 = vadd.f32 1e-06, %v648_v31 }
 0x1ee   : > { %v12491_v22 = vpop.eup %12490  ;;  %v671_v20 = vmul.f32 %v12489_v7, %v13982_v50  ;;  %12504 = vrcp.f32 %v709_v12  ;;  %v655_v3 = vsel %vm653_vm3, %v654_v55, %v652_v51  ;;  %v662_v16 = vsel %vm660_vm4, %v661_v4, %v659_v63 }
 0x1ef   : > { %v678_v10 = vmul.f32 %v12491_v22, %v13988_v57  ;;  %v12493_v25 = vpop.eup %12492  ;;  %12506 = vrcp.f32 %v710_v23  ;;  %v713_v26 = vadd.f32 1e-06, %v655_v3  ;;  %v714_v17 = vadd.f32 1e-06, %v662_v16 }
 0x1f0   : > { %v673_v14 = vsel %vm672_vm6, %v13982_v50, %v671_v20  ;;  %v738_v56 = vmul.f32 %v12493_v25, %v13872_v28  ;;  %12508 = vrcp.f32 %v711_v2  ;;  %v669_v32 = vsel %vm667_vm7, %v668_v11, %v666_v8 }
 0x1f1   : > { %v12495_v41 = vpop.eup %12494  ;;  %v680_v49 = vsel %vm679_vm9, %v13988_v57, %v678_v10  ;;  %12510 = vrcp.f32 %v712_v39  ;;  %vm17322_vm12 = vcmp.eq.f32.partialorder %v13982_v50, 0.0  ;;  %v715_v59 = vadd.f32 1e-06, %v669_v32 }
 0x1f2   : > { %v12497_v15 = vpop.eup %12496  ;;  %v685_v33 = vmul.f32 %v12495_v41, %v14009_v18  ;;  %v753_v4 = vpack.c.bf16 %v738_v56, %v737_v0  ;;  %12512 = vrcp.f32 %v713_v26  ;;  %v676_v34 = vsel %vm17322_vm12, %v675_v27, %v673_v14 }
 0x1f3   : > { %v692_v55 = vmul.f32 %v12497_v15, %v14015_v24  ;;  %12514 = vrcp.f32 %v714_v17  ;;  %v716_v40 = vadd.f32 1e-06, %v676_v34  ;;  %vm700_vm13 = vcmp.eq.f32.partialorder %v14037_v38, inf }
 0x1f4   : > { %v687_v28 = vsel %vm686_vm8, %v14009_v18, %v685_v33  ;;  %v703_v35 = vand.u32 2147483648, %v14037_v38  ;;  %970 = vmatmul.mubr.bf16.vlgmr.msra.gmra.mrb[0].mxu0 %v753_v4  ;;  %11435 = vmatprep.mubr.bf16.mxu1 %v753_v4  ;;  %v683_v11 = vsel %vm681_vm10, %v682_v30, %v680_v49  ;;  %vm702_vm14 = vcmp.eq.f32.partialorder %v14037_v38, 0.0 }
 0x1f5   : > { %v12499_v42 = vpop.eup %12498  ;;  %v690_v50 = vsel %vm688_vm5, %v689_v43, %v687_v28  ;;  %979 = vmatprep.mubr.bf16.mxu0 %v17270_v47  ;;  %v717_v48 = vadd.f32 1e-06, %v683_v11  ;;  %v694_v63 = vsel %vm693_vm11, %v14015_v24, %v692_v55  ;;  %vm695_vm15 = vcmp.eq.f32.partialorder %v14015_v24, 0.0 }
 0x1f6   : > { %v12501_v27 = vpop.eup %12500  ;;  %v699_v46 = vmul.f32 %v12499_v42, %v14037_v38  ;;  %v718_v51 = vadd.f32 1e-06, %v690_v50  ;;  %12516 = vrcp.f32 %v716_v40  ;;  %v697_v8 = vsel %vm695_vm15, %v696_v58, %v694_v63 }
 0x1f7   : > { %v12503_v54 = vpop.eup %12502  ;;  %v739_v18 = vmul.f32 %v12501_v27, %v13866_v21  ;;  %12518 = vrcp.f32 %v715_v59  ;;  %v719_v62 = vadd.f32 1e-06, %v697_v8  ;;  %vm1267_vm0 = vcmask 261120  }
 0x1f8   : > { %v701_v57 = vsel %vm700_vm13, %v14037_v38, %v699_v46  ;;  %v740_v30 = vmul.f32 %v12503_v54, %v13874_v29  ;;  %v12505_v43 = vpop.eup %12504  ;;  %12520 = vrcp.f32 %v718_v51  ;;  %vm2320_vm1 = vcmask 523520  }
 0x1f9   : > { %v704_v0 = vsel %vm702_vm14, %v703_v35, %v701_v57  ;;  %v12507_v1 = vpop.eup %12506  ;;  %12522 = vrcp.f32 %v717_v48  ;;  %v741_v12 = vmul.f32 %v12505_v43, %v13880_v36  ;;  %vm2963_vm2 = vcmask 785920  }
 0x1fa   : > { %v754_v7 = vpack.c.bf16 %v740_v30, %v739_v18  ;;  %v12509_v9 = vpop.eup %12508  ;;  %v742_v22 = vmul.f32 %v12507_v1, %v13882_v37  ;;  %v720_v38 = vadd.f32 1e-06, %v704_v0  ;;  %vm3606_vm3 = vcmask 1048320  }
 0x1fb   : > { %v12511_v20 = vpop.eup %12510  ;;  %v743_v10 = vmul.f32 %v12509_v9, %v13888_v44 }
 0x1fc   : > { %11436 = vmatmul.mubr.bf16.vlgmr.msra.gmra.mrb[0].mxu1 %v754_v7  ;;  %v12513_v21 = vpop.eup %12512  ;;  %980 = vmatmul.mubr.bf16.gmra.mrb[4].mxu0 %v754_v7  ;;  %v755_v29 = vpack.c.bf16 %v742_v22, %v741_v12  ;;  %v744_v23 = vmul.f32 %v12511_v20, %v13890_v45  ;;  %12524 = vrcp.f32 %v720_v38 }
 0x1fd   : > { %v12515_v31 = vpop.eup %12514  ;;  %989 = vmatprep.mubr.bf16.mxu0 %v17270_v47  ;;  %v745_v24 = vmul.f32 %v12513_v21, %v13896_v52  ;;  %12526 = vrcp.f32 %v719_v62 }
 0x1fe   : > { %11439 = vmatprep.mubr.bf16.mxu1 %v755_v29  ;;  %v746_v36 = vmul.f32 %v12515_v31, %v13898_v53  ;;  %v756_v37 = vpack.c.bf16 %v744_v23, %v743_v10 }
 0x200   : > { %v12517_v58 = vpop.eup %12516  ;;  %v757_v2 = vpack.c.bf16 %v746_v36, %v745_v24 }
 0x201   : > { %v12519_v39 = vpop.eup %12518  ;;  %v748_v45 = vmul.f32 %v12517_v58, %v13908_v61 }
 0x202   : > { %v12521_v25 = vpop.eup %12520  ;;  %v747_v3 = vmul.f32 %v12519_v39, %v13905_v60  ;;  %v794_v60 = vlaneseq }
 0x203   : > { %v12523_v14 = vpop.eup %12522  ;;  %v750_v44 = vmul.f32 %v12521_v25, %v13918_v6 }
 0x204   : > { %11440 = vmatmul.mubr.bf16.gmra.mrb[4].mxu1 %v756_v37  ;;  %990 = vmatmul.mubr.bf16.gmra.mrb[8].mxu0 %v755_v29  ;;  %v749_v52 = vmul.f32 %v12523_v14, %v13915_v5  ;;  %v758_v53 = vpack.c.bf16 %v748_v45, %v747_v3  ;;  %v14139_v5 = vshrl.u32 %v794_v60, 7 }
 0x205   : > { %11443 = vmatprep.mubr.bf16.mxu1 %v757_v2  ;;  %999 = vmatprep.mubr.bf16.mxu0 %v17270_v47 }
 0x206   : > { %v12525_v16 = vpop.eup %12524  ;;  %v759_v41 = vpack.c.bf16 %v750_v44, %v749_v52  ;;  %17323 = vst [vmem:[#allocation22_spill] sm:$0xff] %v14139_v5  ;;  %v17267_v26 = vsub.s32 1, %v14139_v5  ;;  %v17268_v4 = vsub.s32 2, %v14139_v5 }
 0x207   : > { %v12527_v49 = vpop.eup %12526  ;;  %v752_v56 = vmul.f32 %v12525_v16, %v13928_v19  ;;  %v17269_v19 = vsub.s32 0, %v14139_v5 }
 0x208   : > { %v751_v61 = vmul.f32 %v12527_v49, %v13925_v13  ;;  %v444_v13 = vld [vmem:[%s17254_s2] sm:$0x7] }
 0x209   : > { %v14148_v15 = vrot.slane %v444_v13, %v17269_v19  ;;  %v14152_v17 = vrot.slane %v444_v13, %v17267_v26  ;;  %v14165_v50 = vrot.slane %v444_v13, %v17268_v4 }
 0x20a   : > { %v760_v6 = vpack.c.bf16 %v752_v56, %v751_v61 }
 0x20b   : > { %17324 = vst [vmem:[#allocation23_spill] sm:$0xff] %v14148_v15  ;;  %17325 = vst [vmem:[#allocation24_spill] sm:$0xff] %v14152_v17 }
 0x20c   : > { %11444 = vmatmul.mubr.bf16.gmra.mrb[8].mxu1 %v758_v53  ;;  %1000 = vmatmul.mubr.bf16.gmra.mrb[12].mxu0 %v756_v37  ;;  %17326 = vst [vmem:[#allocation25_spill] sm:$0xff] %v14165_v50 }
 0x20d   : > { %11447 = vmatprep.mubr.bf16.mxu1 %v759_v41  ;;  %1009 = vmatprep.mubr.bf16.mxu0 %v17270_v47 }
 0x214   : > { %11448 = vmatmul.mubr.bf16.gmra.mrb[12].mxu1 %v760_v6  ;;  %1010 = vmatmul.mubr.bf16.gmra.mrb[16].mxu0 %v757_v2 }
 0x215   : > { %1019 = vmatprep.mubr.bf16.mxu0 %v17270_v47 }
 0x21c   : > { %1020 = vmatmul.mubr.bf16.gmra.mrb[20].mxu0 %v758_v53 }
 0x21d   : > { %1029 = vmatprep.mubr.bf16.mxu0 %v17270_v47 }
 0x224   : > { %1030 = vmatmul.mubr.bf16.gmra.mrb[24].mxu0 %v759_v41 }
 0x225   : > { %1039 = vmatprep.mubr.bf16.mxu0 %v17270_v47 }
 0x22c   : > { %1040 = vmatmul.mubr.bf16.gmra.mrb[28].mxu0 %v760_v6 }
 0x2c7   : > { %v971_v33 = vpop.f32.mrb[0].mxu0 }
 0x2c8   : > { %v973_v32 = vpop.f32.mrb[1].mxu0  ;;  %v972_v34 = vadd.f32 %v971_v33, %v14148_v15 }
 0x2c9   : > { %v975_v55 = vpop.f32.mrb[2].mxu0  ;;  %v974_v40 = vadd.f32 %v973_v32, %v14152_v17 }
 0x2ca   : > { %v976_v28 = vadd.f32 %v975_v55, %v14148_v15  ;;  %v977_v59 = vpop.f32.mrb[3].mxu0 }
 0x2cb   : > { %v978_v42 = vadd.f32 %v977_v59, %v14152_v17 }
 0x2cc   : > { %v14159_v35 = vpack.c.bf16 %v976_v28, %v972_v34 }
 0x2cd   : > { %v14161_v11 = vpack.c.bf16 %v978_v42, %v974_v40 }
 0x2ce   : > { %11467 = vmatprep.mubr.msk.bf16.mxu0 %vm1267_vm0, %v14159_v35 }
 0x2cf   : > { %v11437_v27 = vpop.f32.mrb[0].mxu1  ;;  %1798 = vrot.lane.b32.xlu0 %v14161_v11, %s13546_s18  ;;  %v981_v48 = vpop.f32.mrb[4].mxu0  ;;  %12059 = vmatprep.subr.msk.bf16.mxu0 %vm1267_vm0, %v14161_v11  ;;  %v1293_v51 = vsel %vm1267_vm0, %v14161_v11, 0 }
 0x2d0   : > { %v1084_v46 = vpop.f32.mrb[1].mxu1  ;;  %v983_v63 = vpop.f32.mrb[5].mxu0  ;;  %11452 = vmatpush3.bf16.xpose.msra.mxu0 %v1293_v51  ;;  %v1093_v57 = vadd.f32 %v11437_v27, %v14165_v50  ;;  %v982_v7 = vadd.f32 %v981_v48, %v14148_v15 }
 0x2d1   : > { %v11438_v54 = vpop.f32.mrb[2].mxu1  ;;  %v985_v43 = vpop.f32.mrb[6].mxu0  ;;  %v1085_v0 = vadd.f32 %v1084_v46, %v14165_v50  ;;  %v984_v22 = vadd.f32 %v983_v63, %v14152_v17 }
 0x2d2   : > { %v1096_v18 = vadd.f32 %v11438_v54, %v14165_v50  ;;  %v1087_v30 = vpop.f32.mrb[3].mxu1  ;;  %v986_v8 = vadd.f32 %v985_v43, %v14148_v15  ;;  %v987_v9 = vpop.f32.mrb[7].mxu0 }
 0x2d3   : > { %v1088_v1 = vadd.f32 %v1087_v30, %v14165_v50  ;;  %v988_v38 = vadd.f32 %v987_v9, %v14152_v17 }
 0x2d4   : > { %v14181_v12 = vpack.c.bf16 %v1096_v18, %v1093_v57  ;;  %v14187_v21 = vpack.c.bf16 %v986_v8, %v982_v7 }
 0x2d5   : > { %v14185_v20 = vpack.c.bf16 %v1088_v1, %v1085_v0  ;;  %v14189_v29 = vpack.c.bf16 %v988_v38, %v984_v22 }
 0x2d7   : > { %v11441_v23 = vpop.f32.mrb[4].mxu1  ;;  %11483 = vmatprep.subr.bf16.mxu1 %v14185_v20  ;;  %1800 = vrot.lane.b32.xlu1 %v14189_v29, %s13546_s18  ;;  %v991_v31 = vpop.f32.mrb[8].mxu0  ;;  %v1296_v10 = vsel %vm1267_vm0, %v14189_v29, 0 }
 0x2d8   : > { %v1100_v62 = vpop.f32.mrb[5].mxu1  ;;  %11484 = vmatpush3.bf16.msra.mxu1 %v14185_v20  ;;  %12060 = vmatprep.subr.msk.bf16.mxu0 %vm1267_vm0, %v14189_v29  ;;  %v993_v36 = vpop.f32.mrb[9].mxu0  ;;  %v1109_v37 = vadd.f32 %v11441_v23, %v14165_v50  ;;  %v992_v45 = vadd.f32 %v991_v31, %v14148_v15 }
 0x2d9   : > { %v11442_v24 = vpop.f32.mrb[6].mxu1  ;;  %11485 = vmatprep.subr.bf16.mxu1 %v14181_v12  ;;  %11454 = vmatpush3.bf16.xpose.msra.mxu0 %v1296_v10  ;;  %v995_v39 = vpop.f32.mrb[10].mxu0  ;;  %v1101_v25 = vadd.f32 %v1100_v62, %v14165_v50  ;;  %v994_v53 = vadd.f32 %v993_v36, %v14152_v17 }
 0x2da   : > { %v1112_v58 = vadd.f32 %v11442_v24, %v14165_v50  ;;  %v1103_v2 = vpop.f32.mrb[7].mxu1  ;;  %v996_v44 = vadd.f32 %v995_v39, %v14148_v15  ;;  %v997_v3 = vpop.f32.mrb[11].mxu0 }
 0x2db   : > { %v1104_v14 = vadd.f32 %v1103_v2, %v14165_v50  ;;  %v998_v16 = vadd.f32 %v997_v3, %v14152_v17 }
 0x2dc   : > { %v14206_v52 = vpack.c.bf16 %v1112_v58, %v1109_v37  ;;  %11486 = vmatpush3.bf16.msra.mxu1 %v14181_v12  ;;  %v14213_v49 = vpack.c.bf16 %v996_v44, %v992_v45 }
 0x2dd   : > { %v14211_v41 = vpack.c.bf16 %v1104_v14, %v1101_v25  ;;  %v14215_v56 = vpack.c.bf16 %v998_v16, %v994_v53 }
 0x2df   : > { %v11445_v61 = vpop.f32.mrb[8].mxu1  ;;  %11487 = vmatprep.subr.bf16.mxu1 %v14211_v41  ;;  %v1001_v60 = vpop.f32.mrb[12].mxu0  ;;  %12061 = vmatprep.subr.msk.bf16.mxu0 %vm1267_vm0, %v14215_v56  ;;  %v1299_v13 = vsel %vm1267_vm0, %v14215_v56, 0 }
 0x2e0   : > { %v1116_v6 = vpop.f32.mrb[9].mxu1  ;;  %11488 = vmatpush3.bf16.msra.mxu1 %v14211_v41  ;;  %v1003_v32 = vpop.f32.mrb[13].mxu0  ;;  %v1125_v55 = vadd.f32 %v11445_v61, %v14165_v50  ;;  %v1002_v27 = vadd.f32 %v1001_v60, %v14148_v15 }
 0x2e1   : > { %v11446_v33 = vpop.f32.mrb[10].mxu1  ;;  %11489 = vmatprep.subr.bf16.mxu1 %v14206_v52  ;;  %11456 = vmatpush3.bf16.xpose.msra.mxu0 %v1299_v13  ;;  %v1005_v59 = vpop.f32.mrb[14].mxu0  ;;  %v1117_v40 = vadd.f32 %v1116_v6, %v14165_v50  ;;  %v1004_v54 = vadd.f32 %v1003_v32, %v14152_v17 }
 0x2e2   : > { %v1128_v34 = vadd.f32 %v11446_v33, %v14165_v50  ;;  %v1119_v28 = vpop.f32.mrb[11].mxu1  ;;  %v1006_v46 = vadd.f32 %v1005_v59, %v14148_v15  ;;  %v1007_v48 = vpop.f32.mrb[15].mxu0 }
 0x2e3   : > { %v1120_v42 = vadd.f32 %v1119_v28, %v14165_v50  ;;  %v1008_v63 = vadd.f32 %v1007_v48, %v14152_v17 }
 0x2e4   : > { %v14230_v51 = vpack.c.bf16 %v1128_v34, %v1125_v55  ;;  %11490 = vmatpush3.bf16.msra.mxu1 %v14206_v52  ;;  %v14237_v18 = vpack.c.bf16 %v1006_v46, %v1002_v27 }
 0x2e5   : > { %v14235_v57 = vpack.c.bf16 %v1120_v42, %v1117_v40  ;;  %v14239_v30 = vpack.c.bf16 %v1008_v63, %v1004_v54 }
 0x2e7   : > { %v11449_v43 = vpop.f32.mrb[12].mxu1  ;;  %11491 = vmatprep.subr.bf16.mxu1 %v14235_v57  ;;  %v1011_v1 = vpop.f32.mrb[16].mxu0  ;;  %12062 = vmatprep.subr.msk.bf16.mxu0 %vm1267_vm0, %v14239_v30  ;;  %v1302_v7 = vsel %vm1267_vm0, %v14239_v30, 0 }
 0x2e8   : > { %v1132_v0 = vpop.f32.mrb[13].mxu1  ;;  %11492 = vmatpush3.bf16.msra.mxu1 %v14235_v57  ;;  %v1013_v9 = vpop.f32.mrb[17].mxu0  ;;  %v1141_v22 = vadd.f32 %v11449_v43, %v14165_v50  ;;  %v1012_v24 = vadd.f32 %v1011_v1, %v14148_v15 }
 0x2e9   : > { %v11450_v8 = vpop.f32.mrb[14].mxu1  ;;  %11493 = vmatprep.subr.bf16.mxu1 %v14230_v51  ;;  %11458 = vmatpush3.bf16.xpose.msra.mxu0 %v1302_v7  ;;  %v1015_v62 = vpop.f32.mrb[18].mxu0  ;;  %v1133_v31 = vadd.f32 %v1132_v0, %v14165_v50  ;;  %v1014_v2 = vadd.f32 %v1013_v9, %v14152_v17 }
 0x2ea   : > { %v1144_v38 = vadd.f32 %v11450_v8, %v14165_v50  ;;  %v1135_v23 = vpop.f32.mrb[15].mxu1  ;;  %v1016_v36 = vadd.f32 %v1015_v62, %v14148_v15  ;;  %v1017_v37 = vpop.f32.mrb[19].mxu0 }
 0x2eb   : > { %v1136_v10 = vadd.f32 %v1135_v23, %v14165_v50  ;;  %v1018_v39 = vadd.f32 %v1017_v37, %v14152_v17 }
 0x2ec   : > { %v14254_v58 = vpack.c.bf16 %v1144_v38, %v1141_v22  ;;  %11494 = vmatpush3.bf16.msra.mxu1 %v14230_v51  ;;  %v14261_v14 = vpack.c.bf16 %v1016_v36, %v1012_v24 }
 0x2ed   : > { %v14259_v25 = vpack.c.bf16 %v1136_v10, %v1133_v31  ;;  %v14263_v45 = vpack.c.bf16 %v1018_v39, %v1014_v2 }
 0x2ef   : > { %11495 = vmatprep.subr.bf16.mxu1 %v14259_v25  ;;  %v1021_v44 = vpop.f32.mrb[20].mxu0  ;;  %12063 = vmatprep.subr.msk.bf16.mxu0 %vm1267_vm0, %v14263_v45  ;;  %v1305_v3 = vsel %vm1267_vm0, %v14263_v45, 0 }
 0x2f0   : > { %11496 = vmatpush3.bf16.msra.mxu1 %v14259_v25  ;;  %v1023_v53 = vpop.f32.mrb[21].mxu0  ;;  %v1022_v61 = vadd.f32 %v1021_v44, %v14148_v15 }
 0x2f1   : > { %11497 = vmatprep.subr.bf16.mxu1 %v14254_v58  ;;  %11460 = vmatpush3.bf16.xpose.msra.mxu0 %v1305_v3  ;;  %v1025_v16 = vpop.f32.mrb[22].mxu0  ;;  %v1024_v13 = vadd.f32 %v1023_v53, %v14152_v17 }
 0x2f2   : > { %v1026_v6 = vadd.f32 %v1025_v16, %v14148_v15  ;;  %v1027_v60 = vpop.f32.mrb[23].mxu0 }
 0x2f3   : > { %v1028_v33 = vadd.f32 %v1027_v60, %v14152_v17 }
 0x2f4   : > { %11498 = vmatpush3.bf16.msra.mxu1 %v14254_v58  ;;  %v14277_v32 = vpack.c.bf16 %v1026_v6, %v1022_v61 }
 0x2f5   : > { %v14279_v55 = vpack.c.bf16 %v1028_v33, %v1024_v13 }
 0x2f7   : > { %v1031_v34 = vpop.f32.mrb[24].mxu0  ;;  %12064 = vmatprep.subr.msk.bf16.mxu0 %vm1267_vm0, %v14279_v55  ;;  %v1308_v28 = vsel %vm1267_vm0, %v14279_v55, 0 }
 0x2f8   : > { %v1033_v59 = vpop.f32.mrb[25].mxu0  ;;  %v1032_v42 = vadd.f32 %v1031_v34, %v14148_v15 }
 0x2f9   : > { %11462 = vmatpush3.bf16.xpose.msra.mxu0 %v1308_v28  ;;  %v1035_v40 = vpop.f32.mrb[26].mxu0  ;;  %v1034_v48 = vadd.f32 %v1033_v59, %v14152_v17 }
 0x2fa   : > { %v1036_v27 = vadd.f32 %v1035_v40, %v14148_v15  ;;  %v1037_v46 = vpop.f32.mrb[27].mxu0 }
 0x2fb   : > { %v1038_v54 = vadd.f32 %v1037_v46, %v14152_v17 }
 0x2fc   : > { %v14289_v63 = vpack.c.bf16 %v1036_v27, %v1032_v42 }
 0x2fd   : > { %v14291_v43 = vpack.c.bf16 %v1038_v54, %v1034_v48 }
 0x2ff   : > { %v1041_v0 = vpop.f32.mrb[28].mxu0  ;;  %12065 = vmatprep.subr.msk.bf16.mxu0 %vm1267_vm0, %v14291_v43  ;;  %v1311_v1 = vsel %vm1267_vm0, %v14291_v43, 0 }
 0x300   : > { %v1043_v7 = vpop.f32.mrb[29].mxu0  ;;  %v1042_v9 = vadd.f32 %v1041_v0, %v14148_v15 }
 0x301   : > { %11464 = vmatpush3.bf16.xpose.msra.mxu0 %v1311_v1  ;;  %v1045_v8 = vpop.f32.mrb[30].mxu0  ;;  %v1044_v23 = vadd.f32 %v1043_v7, %v14152_v17 }
 0x302   : > { %v1046_v22 = vadd.f32 %v1045_v8, %v14148_v15  ;;  %v1047_v38 = vpop.f32.mrb[31].mxu0 }
 0x303   : > { %v1048_v62 = vadd.f32 %v1047_v38, %v14152_v17 }
 0x304   : > { %v14301_v31 = vpack.c.bf16 %v1046_v22, %v1042_v9 }
 0x305   : > { %v14303_v10 = vpack.c.bf16 %v1048_v62, %v1044_v23 }
 0x307   : > { %12066 = vmatprep.subr.msk.bf16.mxu0 %vm1267_vm0, %v14303_v10  ;;  %v1314_v24 = vsel %vm1267_vm0, %v14303_v10, 0 }
 0x309   : > { %11466 = vmatpush3.bf16.xpose.msra.mxu0 %v1314_v24 }
 0x310   : > { %11468 = vmatmul.mubr.msk.bf16.vlgmr.msra.gmra.mrb[32].mxu0 %vm1267_vm0, %v14187_v21 }
 0x311   : > { %11471 = vmatprep.mubr.msk.bf16.mxu0 %vm1267_vm0, %v14213_v49 }
 0x318   : > { %11472 = vmatmul.mubr.msk.bf16.gmra.mrb[36].mxu0 %vm1267_vm0, %v14237_v18 }
 0x319   : > { %11475 = vmatprep.mubr.msk.bf16.mxu0 %vm1267_vm0, %v14261_v14 }
 0x320   : > { %11476 = vmatmul.mubr.msk.bf16.gmra.mrb[40].mxu0 %vm1267_vm0, %v14277_v32 }
 0x321   : > { %11479 = vmatprep.mubr.msk.bf16.mxu0 %vm1267_vm0, %v14289_v63 }
 0x328   : > { %11480 = vmatmul.mubr.msk.bf16.gmra.mrb[44].mxu0 %vm1267_vm0, %v14301_v31 }
 0x341   : > { %v14323_v36 = vpop.permute.xlu0 %1798 }
 0x342   : > { %12067 = vmatprep.subr.msk.bf16.mxu1 %vm1267_vm0, %v14323_v36 }
 0x3e3   : > { %v11469_v37 = vpop.f32.mrb[32].mxu0 }
 0x3e4   : > { %v1350_v2 = vpop.f32.mrb[33].mxu0  ;;  %v1415_v39 = vmul.f32 0.17677669, %v11469_v37 }
 0x3e5   : > { %v11470_v44 = vpop.f32.mrb[34].mxu0  ;;  %v1413_v16 = vmul.f32 0.17677669, %v1350_v2  ;;  %v14364_v2 = vpop.permute.xlu1 %1800 }
 0x3e6   : > { %1433 = vmax.xlane.f32.xlu0 %v1415_v39  ;;  %v1353_v3 = vpop.f32.mrb[35].mxu0  ;;  %v1416_v53 = vmul.f32 0.17677669, %v11470_v44 }
 0x3e7   : > { %v1414_v61 = vmul.f32 0.17677669, %v1353_v3 }
 0x3e8   : > { %1435 = vmax.xlane.f32.xlu1 %v1416_v53 }
 0x3ea   : > { %1429 = vmax.xlane.f32.xlu0 %v1413_v16 }
 0x3eb   : > { %v11473_v6 = vpop.f32.mrb[36].mxu0 }
 0x3ec   : > { %1431 = vmax.xlane.f32.xlu1 %v1414_v61  ;;  %v1366_v60 = vpop.f32.mrb[37].mxu0  ;;  %v14327_v13 = vmul.f32 0.17677669, %v11473_v6 }
 0x3ed   : > { %v11474_v33 = vpop.f32.mrb[38].mxu0  ;;  %v14333_v59 = vmul.f32 0.17677669, %v1366_v60 }
 0x3ee   : > { %1441 = vmax.xlane.f32.xlu0 %v14327_v13  ;;  %v1369_v34 = vpop.f32.mrb[39].mxu0  ;;  %v14330_v28 = vmul.f32 0.17677669, %v11474_v33 }
 0x3ef   : > { %v14336_v40 = vmul.f32 0.17677669, %v1369_v34 }
 0x3f0   : > { %1443 = vmax.xlane.f32.xlu1 %v14330_v28 }
 0x3f2   : > { %1437 = vmax.xlane.f32.xlu0 %v14333_v59 }
 0x3f3   : > { %v11477_v42 = vpop.f32.mrb[40].mxu0 }
 0x3f4   : > { %1439 = vmax.xlane.f32.xlu1 %v14336_v40  ;;  %v1382_v27 = vpop.f32.mrb[41].mxu0  ;;  %v14339_v46 = vmul.f32 0.17677669, %v11477_v42 }
 0x3f5   : > { %v11478_v48 = vpop.f32.mrb[42].mxu0  ;;  %v14345_v1 = vmul.f32 0.17677669, %v1382_v27 }
 0x3f6   : > { %1449 = vmax.xlane.f32.xlu0 %v14339_v46  ;;  %v1385_v54 = vpop.f32.mrb[43].mxu0  ;;  %v14342_v0 = vmul.f32 0.17677669, %v11478_v48 }
 0x3f7   : > { %v14348_v7 = vmul.f32 0.17677669, %v1385_v54 }
 0x3f8   : > { %1451 = vmax.xlane.f32.xlu1 %v14342_v0 }
 0x3fa   : > { %1445 = vmax.xlane.f32.xlu0 %v14345_v1 }
 0x3fb   : > { %v11481_v8 = vpop.f32.mrb[44].mxu0 }
 0x3fc   : > { %1447 = vmax.xlane.f32.xlu1 %v14348_v7  ;;  %v1398_v9 = vpop.f32.mrb[45].mxu0  ;;  %v1427_v22 = vmul.f32 0.17677669, %v11481_v8 }
 0x3fd   : > { %v11482_v38 = vpop.f32.mrb[46].mxu0  ;;  %v14351_v62 = vmul.f32 0.17677669, %v1398_v9 }
 0x3fe   : > { %1457 = vmax.xlane.f32.xlu0 %v1427_v22  ;;  %v1401_v23 = vpop.f32.mrb[47].mxu0  ;;  %v14358_v24 = vmul.f32 0.17677669, %v11482_v38 }
 0x3ff   : > { %v14361_v37 = vmul.f32 0.17677669, %v1401_v23 }
 0x402   : > { %1453 = vmax.xlane.f32.xlu0 %v14351_v62 }
 0x40d   : > { %1804 = vrot.lane.b32.xlu1 %v14239_v30, %s13546_s18 }
 0x418   : > { %1802 = vrot.lane.b32.xlu0 %v14215_v56, %s13546_s18 }
 0x431   : > { %1459 = vmax.xlane.f32.xlu1 %v14358_v24 }
 0x435   : > { %1455 = vmax.xlane.f32.xlu1 %v14361_v37 }
 0x473   : > { %v1434_v44 = vpop.xlane.xlu0 %1433 }
 0x474   : > { %v1463_v3 = vsub.f32 %v1415_v39, %v1434_v44 }
 0x475   : > { %v1436_v6 = vpop.xlane.xlu1 %1435 }
 0x476   : > { %v1481_v60 = vmul.f32 1.442695, %v1463_v3  ;;  %v1464_v33 = vsub.f32 %v1416_v53, %v1436_v6 }
 0x477   : > { %v1430_v34 = vpop.xlane.xlu0 %1429 }
 0x478   : > { %12528 = vpow2.f32 %v1481_v60  ;;  %v1483_v42 = vmul.f32 1.442695, %v1464_v33  ;;  %v1461_v27 = vsub.f32 %v1413_v16, %v1430_v34 }
 0x479   : > { %v1432_v48 = vpop.xlane.xlu1 %1431 }
 0x47a   : > { %12530 = vpow2.f32 %v1483_v42  ;;  %v1477_v54 = vmul.f32 1.442695, %v1461_v27  ;;  %v1462_v8 = vsub.f32 %v1414_v61, %v1432_v48 }
 0x47b   : > { %v1442_v16 = vpop.xlane.xlu0 %1441 }
 0x47c   : > { %12532 = vpow2.f32 %v1477_v54  ;;  %v1479_v9 = vmul.f32 1.442695, %v1462_v8  ;;  %v1467_v33 = vsub.f32 %v14327_v13, %v1442_v16 }
 0x47d   : > { %v1444_v3 = vpop.xlane.xlu1 %1443 }
 0x47e   : > { %12534 = vpow2.f32 %v1479_v9  ;;  %v1489_v27 = vmul.f32 1.442695, %v1467_v33  ;;  %v1468_v8 = vsub.f32 %v14330_v28, %v1444_v3 }
 0x47f   : > { %v1438_v61 = vpop.xlane.xlu0 %1437 }
 0x480   : > { %v1465_v34 = vsub.f32 %v14333_v59, %v1438_v61  ;;  %12536 = vpow2.f32 %v1489_v27  ;;  %v1491_v47 = vmul.f32 1.442695, %v1468_v8 }
 0x481   : > { %v1440_v60 = vpop.xlane.xlu1 %1439 }
 0x482   : > { %v14366_v38 = vpop.eup %12528  ;;  %v1466_v48 = vsub.f32 %v14336_v40, %v1440_v60  ;;  %v1485_v9 = vmul.f32 1.442695, %v1465_v34 }
 0x483   : > { %1513 = vadd.xlane.f32.xlu0 %v14366_v38  ;;  %v1450_v44 = vpop.xlane.xlu0 %1449 }
 0x484   : > { %v14369_v23 = vpop.eup %12530  ;;  %v1487_v26 = vmul.f32 1.442695, %v1466_v48  ;;  %12538 = vpow2.f32 %v1485_v9  ;;  %v1471_v50 = vsub.f32 %v14339_v46, %v1450_v44 }
 0x485   : > { %1515 = vadd.xlane.f32.xlu1 %v14369_v23  ;;  %v1452_v54 = vpop.xlane.xlu1 %1451 }
 0x486   : > { %v14372_v39 = vpop.eup %12532  ;;  %12540 = vpow2.f32 %v1487_v26  ;;  %v1497_v16 = vmul.f32 1.442695, %v1471_v50  ;;  %v1472_v61 = vsub.f32 %v14342_v0, %v1452_v54 }
 0x487   : > { %1509 = vadd.xlane.f32.xlu0 %v14372_v39  ;;  %v1446_v6 = vpop.xlane.xlu0 %1445  ;;  %12542 = vpow2.f32 %v1491_v47 }
 0x488   : > { %v14375_v53 = vpop.eup %12534  ;;  %v1469_v40 = vsub.f32 %v14345_v1, %v1446_v6 }
 0x489   : > { %1511 = vadd.xlane.f32.xlu1 %v14375_v53  ;;  %v1448_v17 = vpop.xlane.xlu1 %1447 }
 0x48a   : > { %v1493_v60 = vmul.f32 1.442695, %v1469_v40  ;;  %v1470_v50 = vsub.f32 %v14348_v7, %v1448_v17 }
 0x48b   : > { %v1458_v42 = vpop.xlane.xlu0 %1457 }
 0x48c   : > { %v1475_v4 = vsub.f32 %v1427_v22, %v1458_v42  ;;  %v14392_v22 = vpop.eup %12536  ;;  %v1495_v6 = vmul.f32 1.442695, %v1470_v50 }
 0x48d   : > { %v14390_v3 = vpop.permute.xlu1 %1804 }
 0x48e   : > { %v1505_v13 = vmul.f32 1.442695, %v1475_v4  ;;  %v14395_v26 = vpop.eup %12538 }
 0x48f   : > { %v1454_v19 = vpop.xlane.xlu0 %1453 }
 0x490   : > { %v1473_v59 = vsub.f32 %v14351_v62, %v1454_v19  ;;  %12544 = vpow2.f32 %v1505_v13  ;;  %v1499_v19 = vmul.f32 1.442695, %v1472_v61  ;;  %v14398_v4 = vpop.eup %12540 }
 0x491   : > { %12546 = vpow2.f32 %v1497_v16  ;;  %v14403_v0 = vpop.eup %12542 }
 0x492   : > { %v1501_v28 = vmul.f32 1.442695, %v1473_v59 }
 0x493   : > { %v1803_v54 = vpop.permute.xlu0 %1802 }
 0x494   : > { %12548 = vpow2.f32 %v1501_v28 }
 0x495   : > { %12550 = vpow2.f32 %v1493_v60 }
 0x496   : > { %12552 = vpow2.f32 %v1499_v19 }
 0x49a   : > { %1808 = vrot.lane.b32.xlu1 %v14279_v55, %s13546_s18  ;;  %v14406_v44 = vpop.eup %12544 }
 0x49b   : > { %v14410_v17 = vpop.eup %12546 }
 0x49d   : > { %1806 = vrot.lane.b32.xlu0 %v14263_v45, %s13546_s18 }
 0x49e   : > { %v14413_v7 = vpop.eup %12548 }
 0x49f   : > { %v14416_v34 = vpop.eup %12550 }
 0x4a0   : > { %v14419_v42 = vpop.eup %12552 }
 0x4bc   : > { %1521 = vadd.xlane.f32.xlu0 %v14392_v22 }
 0x4be   : > { %v1460_v47 = vpop.xlane.xlu1 %1459  ;;  %1517 = vadd.xlane.f32.xlu1 %v14395_v26 }
 0x4bf   : > { %v1476_v46 = vsub.f32 %v14358_v24, %v1460_v47 }
 0x4c0   : > { %1519 = vadd.xlane.f32.xlu0 %v14398_v4 }
 0x4c1   : > { %v1507_v1 = vmul.f32 1.442695, %v1476_v46 }
 0x4c2   : > { %v1456_v62 = vpop.xlane.xlu1 %1455  ;;  %1523 = vadd.xlane.f32.xlu1 %v14403_v0 }
 0x4c3   : > { %12554 = vpow2.f32 %v1507_v1  ;;  %v1474_v33 = vsub.f32 %v14361_v37, %v1456_v62  ;;  %v1839_v62 = vsel %vm1267_vm0, %v14323_v36, 0 }
 0x4c4   : > { %1537 = vadd.xlane.f32.xlu0 %v14406_v44  ;;  %12556 = vpow2.f32 %v1495_v6 }
 0x4c5   : > { %v1503_v24 = vmul.f32 1.442695, %v1474_v33 }
 0x4c6   : > { %1529 = vadd.xlane.f32.xlu1 %v14410_v17 }
 0x4c7   : > { %12558 = vpow2.f32 %v1503_v24 }
 0x4c8   : > { %1533 = vadd.xlane.f32.xlu0 %v14413_v7 }
 0x4ca   : > { %1525 = vadd.xlane.f32.xlu1 %v14416_v34 }
 0x4cd   : > { %v14421_v37 = vpop.eup %12554 }
 0x4ce   : > { %1531 = vadd.xlane.f32.xlu1 %v14419_v42  ;;  %1539 = vadd.xlane.f32.xlu0 %v14421_v37  ;;  %v14425_v27 = vpop.eup %12556 }
 0x4d1   : > { %v14428_v48 = vpop.eup %12558 }
 0x4d2   : > { %1527 = vadd.xlane.f32.xlu1 %v14425_v27 }
 0x4d6   : > { %1535 = vadd.xlane.f32.xlu1 %v14428_v48 }
 0x4e4   : > { %1810 = vrot.lane.b32.xlu0 %v14291_v43, %s13546_s18 }
 0x4e7   : > { %1812 = vrot.lane.b32.xlu1 %v14303_v10, %s13546_s18 }
 0x4e8   : > { %1774 = vrot.lane.b32.xlu0 %v14159_v35, %s13546_s18 }
 0x4eb   : > { %1776 = vrot.lane.b32.xlu1 %v14187_v21, %s13546_s18 }
 0x4ec   : > { %1778 = vrot.lane.b32.xlu0 %v14213_v49, %s13546_s18 }
 0x4ef   : > { %1780 = vrot.lane.b32.xlu1 %v14237_v18, %s13546_s18 }
 0x4f0   : > { %1782 = vrot.lane.b32.xlu0 %v14261_v14, %s13546_s18 }
 0x4f3   : > { %1784 = vrot.lane.b32.xlu1 %v14277_v32, %s13546_s18 }
 0x4f4   : > { %1786 = vrot.lane.b32.xlu0 %v14289_v63, %s13546_s18 }
 0x4f7   : > { %1788 = vrot.lane.b32.xlu1 %v14301_v31, %s13546_s18 }
 0x4f8   : > { %2135 = vrot.lane.b32.xlu0 %v14185_v20, %s13546_s18 }
 0x4fb   : > { %2137 = vrot.lane.b32.xlu1 %v14181_v12, %s13546_s18 }
 0x4fc   : > { %2139 = vrot.lane.b32.xlu0 %v14211_v41, %s13546_s18 }
 0x4ff   : > { %2141 = vrot.lane.b32.xlu1 %v14206_v52, %s13546_s18 }
 0x500   : > { %2143 = vrot.lane.b32.xlu0 %v14235_v57, %s13546_s18 }
 0x503   : > { %2145 = vrot.lane.b32.xlu1 %v14230_v51, %s13546_s18 }
 0x504   : > { %2147 = vrot.lane.b32.xlu0 %v14259_v25, %s13546_s18 }
 0x507   : > { %2149 = vrot.lane.b32.xlu1 %v14254_v58, %s13546_s18 }
 0x508   : > { %2441 = vrot.lane.b32.xlu0 %v14161_v11, %s13547_s22 }
 0x50b   : > { %2443 = vrot.lane.b32.xlu1 %v14189_v29, %s13547_s22 }
 0x510   : > { %v1514_v8 = vpop.xlane.xlu0 %1513 }
 0x512   : > { %v1516_v9 = vpop.xlane.xlu1 %1515 }
 0x513   : > { %12560 = vrcp.f32 %v1516_v9 }
 0x514   : > { %v1510_v13 = vpop.xlane.xlu0 %1509 }
 0x515   : > { %12562 = vrcp.f32 %v1510_v13 }
 0x516   : > { %12564 = vrcp.f32 %v1514_v8  ;;  %v1512_v59 = vpop.xlane.xlu1 %1511 }
 0x517   : > { %12566 = vrcp.f32 %v1512_v59 }
 0x518   : > { %v1807_v36 = vpop.permute.xlu0 %1806 }
 0x519   : > { %v1851_v6 = vsel %vm1267_vm0, %v1807_v36, 0 }
 0x51d   : > { %v12561_v16 = vpop.eup %12560 }
 0x51e   : > { %v1560_v60 = vmul.f32 %v12561_v16, %v14369_v23  ;;  %v1842_v23 = vsel %vm1267_vm0, %v14364_v2, 0 }
 0x51f   : > { %v12563_v40 = vpop.eup %12562 }
 0x520   : > { %v12565_v28 = vpop.eup %12564  ;;  %v1557_v19 = vmul.f32 %v12563_v40, %v14372_v39  ;;  %v1845_v39 = vsel %vm1267_vm0, %v1803_v54, 0 }
 0x521   : > { %v12567_v61 = vpop.eup %12566  ;;  %v1559_v50 = vmul.f32 %v12565_v28, %v14366_v38  ;;  %v1848_v38 = vsel %vm1267_vm0, %v14390_v3, 0 }
 0x522   : > { %v1558_v47 = vmul.f32 %v12567_v61, %v14375_v53  ;;  %v1809_v53 = vpop.permute.xlu1 %1808 }
 0x523   : > { %v1574_v1 = vpack.c.bf16 %v1560_v60, %v1559_v50  ;;  %v1854_v8 = vsel %vm1267_vm0, %v1809_v53, 0 }
 0x524   : > { %v1573_v46 = vpack.c.bf16 %v1558_v47, %v1557_v19 }
 0x526   : > { %11499 = vmatprep.mubr.bf16.mxu1 %v1573_v46 }
 0x527   : > { %11500 = vmatmul.mubr.bf16.vlgmr.msra.gmra.mrb[16].mxu1 %v1574_v1 }
 0x528   : > { %11516 = vmatpush3.bf16.xpose.msra.mxu1 %v1839_v62 }
 0x529   : > { %12068 = vmatprep.subr.msk.bf16.mxu1 %vm1267_vm0, %v14364_v2 }
 0x530   : > { %11518 = vmatpush3.bf16.xpose.msra.mxu1 %v1842_v23 }
 0x531   : > { %12069 = vmatprep.subr.msk.bf16.mxu1 %vm1267_vm0, %v1803_v54 }
 0x538   : > { %11520 = vmatpush3.bf16.xpose.msra.mxu1 %v1845_v39 }
 0x539   : > { %12070 = vmatprep.subr.msk.bf16.mxu1 %vm1267_vm0, %v14390_v3 }
 0x540   : > { %11522 = vmatpush3.bf16.xpose.msra.mxu1 %v1848_v38 }
 0x541   : > { %12071 = vmatprep.subr.msk.bf16.mxu1 %vm1267_vm0, %v1807_v36 }
 0x548   : > { %11524 = vmatpush3.bf16.xpose.msra.mxu1 %v1851_v6 }
 0x549   : > { %12072 = vmatprep.subr.msk.bf16.mxu1 %vm1267_vm0, %v1809_v53  ;;  %v1522_v2 = vpop.xlane.xlu0 %1521 }
 0x54b   : > { %v1518_v33 = vpop.xlane.xlu1 %1517 }
 0x54c   : > { %12568 = vrcp.f32 %v1518_v33 }
 0x54d   : > { %12570 = vrcp.f32 %v1522_v2  ;;  %v1520_v24 = vpop.xlane.xlu0 %1519 }
 0x54e   : > { %12572 = vrcp.f32 %v1520_v24 }
 0x54f   : > { %v1524_v54 = vpop.xlane.xlu1 %1523 }
 0x550   : > { %12574 = vrcp.f32 %v1524_v54  ;;  %11526 = vmatpush3.bf16.xpose.msra.mxu1 %v1854_v8 }
 0x551   : > { %v1538_v3 = vpop.xlane.xlu0 %1537 }
 0x553   : > { %v1530_v9 = vpop.xlane.xlu1 %1529 }
 0x555   : > { %v1534_v16 = vpop.xlane.xlu0 %1533 }
 0x556   : > { %v12569_v13 = vpop.eup %12568 }
 0x557   : > { %v12571_v59 = vpop.eup %12570  ;;  %v1526_v40 = vpop.xlane.xlu1 %1525  ;;  %v1561_v61 = vmul.f32 %v12569_v13, %v14395_v26 }
 0x558   : > { %v12573_v28 = vpop.eup %12572  ;;  %v1563_v1 = vmul.f32 %v12571_v59, %v14392_v22 }
 0x559   : > { %v1562_v60 = vmul.f32 %v12573_v28, %v14398_v4 }
 0x55a   : > { %v12575_v19 = vpop.eup %12574 }
 0x55b   : > { %v1532_v47 = vpop.xlane.xlu1 %1531  ;;  %v1540_v50 = vpop.xlane.xlu0 %1539  ;;  %v1575_v46 = vpack.c.bf16 %v1562_v60, %v1561_v61  ;;  %v1564_v62 = vmul.f32 %v12575_v19, %v14403_v0 }
 0x55c   : > { %12576 = vrcp.f32 %v1532_v47 }
 0x55d   : > { %11503 = vmatprep.mubr.bf16.mxu1 %v1575_v46  ;;  %v1576_v23 = vpack.c.bf16 %v1564_v62, %v1563_v1  ;;  %12578 = vrcp.f32 %v1526_v40 }
 0x55e   : > { %12580 = vrcp.f32 %v1530_v9 }
 0x55f   : > { %v1528_v39 = vpop.xlane.xlu1 %1527  ;;  %11504 = vmatmul.mubr.bf16.gmra.mrb[20].mxu1 %v1576_v23  ;;  %v1811_v38 = vpop.permute.xlu0 %1810 }
 0x560   : > { %12582 = vrcp.f32 %v1528_v39  ;;  %12073 = vmatprep.subr.msk.bf16.mxu1 %vm1267_vm0, %v1811_v38  ;;  %v1857_v26 = vsel %vm1267_vm0, %v1811_v38, 0 }
 0x561   : > { %11528 = vmatpush3.bf16.xpose.msra.mxu1 %v1857_v26  ;;  %12584 = vrcp.f32 %v1534_v16 }
 0x563   : > { %v1536_v4 = vpop.xlane.xlu1 %1535  ;;  %v1775_v36 = vpop.permute.xlu0 %1774 }
 0x564   : > { %12586 = vrcp.f32 %v1536_v4 }
 0x565   : > { %12588 = vrcp.f32 %v1540_v50 }
 0x566   : > { %v12577_v22 = vpop.eup %12576  ;;  %12590 = vrcp.f32 %v1538_v3 }
 0x567   : > { %v1813_v0 = vpop.permute.xlu1 %1812  ;;  %v1779_v53 = vpop.permute.xlu0 %1778  ;;  %v1568_v54 = vmul.f32 %v12577_v22, %v14419_v42 }
 0x568   : > { %v12579_v6 = vpop.eup %12578  ;;  %12074 = vmatprep.subr.msk.bf16.mxu1 %vm1267_vm0, %v1813_v0  ;;  %v1860_v2 = vsel %vm1267_vm0, %v1813_v0, 0 }
 0x569   : > { %v12581_v33 = vpop.eup %12580  ;;  %11530 = vmatpush3.bf16.xpose.msra.mxu1 %v1860_v2  ;;  %v1565_v13 = vmul.f32 %v12579_v6, %v14416_v34 }
 0x56a   : > { %v12583_v24 = vpop.eup %12582  ;;  %v1567_v3 = vmul.f32 %v12581_v33, %v14410_v17 }
 0x56b   : > { %v1777_v8 = vpop.permute.xlu1 %1776  ;;  %v1783_v9 = vpop.permute.xlu0 %1782  ;;  %v1566_v59 = vmul.f32 %v12583_v24, %v14425_v27 }
 0x56c   : > { %v12585_v16 = vpop.eup %12584  ;;  %v1578_v61 = vpack.c.bf16 %v1568_v54, %v1567_v3 }
 0x56d   : > { %v1577_v40 = vpack.c.bf16 %v1566_v59, %v1565_v13  ;;  %v1569_v50 = vmul.f32 %v12585_v16, %v14413_v7 }
 0x56e   : > { %v12587_v28 = vpop.eup %12586 }
 0x56f   : > { %v12589_v60 = vpop.eup %12588  ;;  %v1781_v19 = vpop.permute.xlu1 %1780  ;;  %11507 = vmatprep.mubr.bf16.mxu1 %v1577_v40  ;;  %v1570_v42 = vmul.f32 %v12587_v28, %v14428_v48 }
 0x570   : > { %v1787_v47 = vpop.permute.xlu0 %1786  ;;  %11508 = vmatmul.mubr.bf16.gmra.mrb[24].mxu1 %v1578_v61  ;;  %v12591_v46 = vpop.eup %12590  ;;  %v1572_v34 = vmul.f32 %v12589_v60, %v14421_v37 }
 0x571   : > { %v1579_v1 = vpack.c.bf16 %v1570_v42, %v1569_v50  ;;  %v1571_v17 = vmul.f32 %v12591_v46, %v14406_v44 }
 0x573   : > { %v1785_v27 = vpop.permute.xlu1 %1784  ;;  %11511 = vmatprep.mubr.bf16.mxu1 %v1579_v1  ;;  %v1580_v23 = vpack.c.bf16 %v1572_v34, %v1571_v17 }
 0x574   : > { %v2136_v62 = vpop.permute.xlu0 %2135 }
 0x575   : > { %11547 = vmatprep.subr.bf16.mxu0 %v2136_v62 }
 0x576   : > { %11548 = vmatpush3.bf16.msra.mxu0 %v2136_v62 }
 0x577   : > { %v1789_v39 = vpop.permute.xlu1 %1788 }
 0x578   : > { %11512 = vmatmul.mubr.bf16.gmra.mrb[28].mxu1 %v1580_v23  ;;  %v2140_v48 = vpop.permute.xlu0 %2139 }
 0x579   : > { %11531 = vmatprep.mubr.msk.bf16.mxu1 %vm1267_vm0, %v1775_v36 }
 0x57b   : > { %v2138_v7 = vpop.permute.xlu1 %2137 }
 0x57c   : > { %11549 = vmatprep.subr.bf16.mxu0 %v2138_v7  ;;  %v2144_v38 = vpop.permute.xlu0 %2143 }
 0x57d   : > { %11550 = vmatpush3.bf16.msra.mxu0 %v2138_v7 }
 0x57e   : > { %11551 = vmatprep.subr.bf16.mxu0 %v2140_v48 }
 0x57f   : > { %v2142_v37 = vpop.permute.xlu1 %2141 }
 0x580   : > { %11532 = vmatmul.mubr.msk.bf16.vlgmr.msra.gmra.mrb[32].mxu1 %vm1267_vm0, %v1777_v8  ;;  %v2148_v26 = vpop.permute.xlu0 %2147 }
 0x581   : > { %11535 = vmatprep.mubr.msk.bf16.mxu1 %vm1267_vm0, %v1779_v53  ;;  %11552 = vmatpush3.bf16.msra.mxu0 %v2140_v48 }
 0x582   : > { %11553 = vmatprep.subr.bf16.mxu0 %v2142_v37 }
 0x583   : > { %v2146_v44 = vpop.permute.xlu1 %2145 }
 0x584   : > { %v14514_v36 = vpop.permute.xlu0 %2441 }
 0x585   : > { %11554 = vmatpush3.bf16.msra.mxu0 %v2142_v37 }
 0x586   : > { %11555 = vmatprep.subr.bf16.mxu0 %v2144_v38 }
 0x587   : > { %v2150_v4 = vpop.permute.xlu1 %2149 }
 0x588   : > { %11536 = vmatmul.mubr.msk.bf16.gmra.mrb[36].mxu1 %vm1267_vm0, %v1781_v19 }
 0x589   : > { %11539 = vmatprep.mubr.msk.bf16.mxu1 %vm1267_vm0, %v1783_v9  ;;  %11556 = vmatpush3.bf16.msra.mxu0 %v2144_v38 }
 0x58a   : > { %11557 = vmatprep.subr.bf16.mxu0 %v2146_v44 }
 0x58d   : > { %11558 = vmatpush3.bf16.msra.mxu0 %v2146_v44 }
 0x58e   : > { %11559 = vmatprep.subr.bf16.mxu0 %v2148_v26 }
 0x590   : > { %11540 = vmatmul.mubr.msk.bf16.gmra.mrb[40].mxu1 %vm1267_vm0, %v1785_v27 }
 0x591   : > { %11543 = vmatprep.mubr.msk.bf16.mxu1 %vm1267_vm0, %v1787_v47  ;;  %11560 = vmatpush3.bf16.msra.mxu0 %v2148_v26 }
 0x592   : > { %11561 = vmatprep.subr.bf16.mxu0 %v2150_v4 }
 0x595   : > { %11562 = vmatpush3.bf16.msra.mxu0 %v2150_v4 }
 0x596   : > { %12075 = vmatprep.subr.msk.bf16.mxu0 %vm1267_vm0, %v14514_v36 }
 0x598   : > { %11544 = vmatmul.mubr.msk.bf16.gmra.mrb[44].mxu1 %vm1267_vm0, %v1789_v39 }
 0x5fa   : > { %v11501_v22 = vpop.f32.mrb[16].mxu1 }
 0x5fb   : > { %1680 = vst.msk [vmem:[#allocation4 + $0x10] sm:$0xff] %vm1267_vm0, %v11501_v22  ;;  %v1615_v0 = vpop.f32.mrb[17].mxu1 }
 0x5fc   : > { %1678 = vst.msk [vmem:[#allocation4] sm:$0xff] %vm1267_vm0, %v1615_v0  ;;  %v11502_v53 = vpop.f32.mrb[18].mxu1 }
 0x5fd   : > { %1681 = vst.msk [vmem:[#allocation4 + $0x18] sm:$0xff] %vm1267_vm0, %v11502_v53  ;;  %v1618_v6 = vpop.f32.mrb[19].mxu1 }
 0x5fe   : > { %1679 = vst.msk [vmem:[#allocation4 + $0x8] sm:$0xff] %vm1267_vm0, %v1618_v6 }
 0x632   : > { %v11505_v2 = vpop.f32.mrb[20].mxu1 }
 0x633   : > { %1684 = vst.msk [vmem:[#allocation4 + $0x30] sm:$0xff] %vm1267_vm0, %v11505_v2  ;;  %v1631_v33 = vpop.f32.mrb[21].mxu1 }
 0x634   : > { %1682 = vst.msk [vmem:[#allocation4 + $0x20] sm:$0xff] %vm1267_vm0, %v1631_v33  ;;  %v11506_v24 = vpop.f32.mrb[22].mxu1 }
 0x635   : > { %1685 = vst.msk [vmem:[#allocation4 + $0x38] sm:$0xff] %vm1267_vm0, %v11506_v24  ;;  %v1634_v54 = vpop.f32.mrb[23].mxu1 }
 0x636   : > { %1683 = vst.msk [vmem:[#allocation4 + $0x28] sm:$0xff] %vm1267_vm0, %v1634_v54 }
 0x643   : > { %v11509_v8 = vpop.f32.mrb[24].mxu1 }
 0x644   : > { %1688 = vst.msk [vmem:[#allocation4 + $0x50] sm:$0xff] %vm1267_vm0, %v11509_v8  ;;  %v1647_v9 = vpop.f32.mrb[25].mxu1 }
 0x645   : > { %1686 = vst.msk [vmem:[#allocation4 + $0x40] sm:$0xff] %vm1267_vm0, %v1647_v9  ;;  %v11510_v13 = vpop.f32.mrb[26].mxu1 }
 0x646   : > { %1689 = vst.msk [vmem:[#allocation4 + $0x58] sm:$0xff] %vm1267_vm0, %v11510_v13  ;;  %v1650_v59 = vpop.f32.mrb[27].mxu1 }
 0x647   : > { %1687 = vst.msk [vmem:[#allocation4 + $0x48] sm:$0xff] %vm1267_vm0, %v1650_v59  ;;  %v14575_v59 = vpop.permute.xlu1 %2443 }
 0x64b   : > { %v11513_v16 = vpop.f32.mrb[28].mxu1 }
 0x64c   : > { %1692 = vst.msk [vmem:[#allocation4 + $0x70] sm:$0xff] %vm1267_vm0, %v11513_v16  ;;  %v1663_v3 = vpop.f32.mrb[29].mxu1 }
 0x64d   : > { %1690 = vst.msk [vmem:[#allocation4 + $0x60] sm:$0xff] %vm1267_vm0, %v1663_v3  ;;  %v11514_v40 = vpop.f32.mrb[30].mxu1 }
 0x64e   : > { %1693 = vst.msk [vmem:[#allocation4 + $0x78] sm:$0xff] %vm1267_vm0, %v11514_v40  ;;  %v1666_v28 = vpop.f32.mrb[31].mxu1 }
 0x64f   : > { %1691 = vst.msk [vmem:[#allocation4 + $0x68] sm:$0xff] %vm1267_vm0, %v1666_v28 }
 0x653   : > { %v11533_v61 = vpop.f32.mrb[32].mxu1 }
 0x654   : > { %v1896_v60 = vpop.f32.mrb[33].mxu1  ;;  %v1961_v19 = vmul.f32 0.17677669, %v11533_v61 }
 0x655   : > { %v11534_v47 = vpop.f32.mrb[34].mxu1  ;;  %v1959_v46 = vmul.f32 0.17677669, %v1896_v60 }
 0x656   : > { %1979 = vmax.xlane.f32.xlu0 %v1961_v19  ;;  %v1899_v50 = vpop.f32.mrb[35].mxu1  ;;  %v1962_v27 = vmul.f32 0.17677669, %v11534_v47 }
 0x657   : > { %v1960_v42 = vmul.f32 0.17677669, %v1899_v50 }
 0x659   : > { %1977 = vmax.xlane.f32.xlu1 %v1960_v42 }
 0x65a   : > { %1975 = vmax.xlane.f32.xlu0 %v1959_v46 }
 0x65b   : > { %v11537_v1 = vpop.f32.mrb[36].mxu1 }
 0x65c   : > { %v1912_v34 = vpop.f32.mrb[37].mxu1  ;;  %v14538_v39 = vmul.f32 0.17677669, %v11537_v1 }
 0x65d   : > { %v11538_v62 = vpop.f32.mrb[38].mxu1  ;;  %v14544_v38 = vmul.f32 0.17677669, %v1912_v34 }
 0x65e   : > { %1981 = vmax.xlane.f32.xlu0 %v1962_v27  ;;  %v1915_v17 = vpop.f32.mrb[39].mxu1  ;;  %v14535_v23 = vmul.f32 0.17677669, %v11538_v62 }
 0x65f   : > { %v14541_v7 = vmul.f32 0.17677669, %v1915_v17 }
 0x660   : > { %1989 = vmax.xlane.f32.xlu1 %v14535_v23 }
 0x662   : > { %1987 = vmax.xlane.f32.xlu0 %v14538_v39 }
 0x663   : > { %v11541_v48 = vpop.f32.mrb[40].mxu1 }
 0x664   : > { %1985 = vmax.xlane.f32.xlu1 %v14541_v7  ;;  %v1928_v37 = vpop.f32.mrb[41].mxu1  ;;  %v14549_v22 = vmul.f32 0.17677669, %v11541_v48 }
 0x665   : > { %v11542_v44 = vpop.f32.mrb[42].mxu1  ;;  %v14555_v6 = vmul.f32 0.17677669, %v1928_v37 }
 0x666   : > { %v14546_v26 = vmul.f32 0.17677669, %v11542_v44  ;;  %1983 = vmax.xlane.f32.xlu0 %v14544_v38  ;;  %v1931_v4 = vpop.f32.mrb[43].mxu1 }
 0x667   : > { %v14552_v0 = vmul.f32 0.17677669, %v1931_v4 }
 0x668   : > { %1997 = vmax.xlane.f32.xlu1 %v14546_v26 }
 0x66a   : > { %1995 = vmax.xlane.f32.xlu0 %v14549_v22 }
 0x66b   : > { %v11545_v53 = vpop.f32.mrb[44].mxu1 }
 0x66c   : > { %1993 = vmax.xlane.f32.xlu1 %v14552_v0  ;;  %v1944_v2 = vpop.f32.mrb[45].mxu1  ;;  %v14559_v54 = vmul.f32 0.17677669, %v11545_v53 }
 0x66d   : > { %v11546_v33 = vpop.f32.mrb[46].mxu1  ;;  %v14562_v8 = vmul.f32 0.17677669, %v1944_v2 }
 0x66e   : > { %1991 = vmax.xlane.f32.xlu0 %v14555_v6  ;;  %v1947_v24 = vpop.f32.mrb[47].mxu1  ;;  %v14569_v9 = vmul.f32 0.17677669, %v11546_v33 }
 0x66f   : > { %v14572_v13 = vmul.f32 0.17677669, %v1947_v24 }
 0x672   : > { %2003 = vmax.xlane.f32.xlu0 %v14559_v54 }
 0x676   : > { %1999 = vmax.xlane.f32.xlu0 %v14562_v8 }
 0x67d   : > { %2447 = vrot.lane.b32.xlu1 %v14239_v30, %s13547_s22 }
 0x68c   : > { %2445 = vrot.lane.b32.xlu0 %v14215_v56, %s13547_s22 }
 0x6a1   : > { %2005 = vmax.xlane.f32.xlu1 %v14569_v9 }
 0x6a5   : > { %2001 = vmax.xlane.f32.xlu1 %v14572_v13 }
 0x6e3   : > { %v1980_v16 = vpop.xlane.xlu0 %1979 }
 0x6e4   : > { %v2009_v3 = vsub.f32 %v1961_v19, %v1980_v16 }
 0x6e6   : > { %v2027_v40 = vmul.f32 1.442695, %v2009_v3  ;;  %v1978_v28 = vpop.xlane.xlu1 %1977 }
 0x6e7   : > { %v2008_v61 = vsub.f32 %v1960_v42, %v1978_v28  ;;  %v1976_v60 = vpop.xlane.xlu0 %1975 }
 0x6e8   : > { %12592 = vpow2.f32 %v2027_v40  ;;  %v2007_v47 = vsub.f32 %v1959_v46, %v1976_v60 }
 0x6e9   : > { %v2025_v50 = vmul.f32 1.442695, %v2008_v61 }
 0x6ea   : > { %v2023_v1 = vmul.f32 1.442695, %v2007_v47 }
 0x6eb   : > { %12594 = vpow2.f32 %v2025_v50  ;;  %v1982_v34 = vpop.xlane.xlu0 %1981 }
 0x6ec   : > { %12596 = vpow2.f32 %v2023_v1  ;;  %v2010_v62 = vsub.f32 %v1962_v27, %v1982_v34 }
 0x6ed   : > { %v1990_v44 = vpop.xlane.xlu1 %1989 }
 0x6ee   : > { %v2029_v17 = vmul.f32 1.442695, %v2010_v62  ;;  %v2014_v61 = vsub.f32 %v14535_v23, %v1990_v44 }
 0x6ef   : > { %v1988_v46 = vpop.xlane.xlu0 %1987 }
 0x6f0   : > { %12598 = vpow2.f32 %v2029_v17  ;;  %v2013_v53 = vsub.f32 %v14538_v39, %v1988_v46  ;;  %v2037_v1 = vmul.f32 1.442695, %v2014_v61 }
 0x6f1   : > { %v1986_v2 = vpop.xlane.xlu1 %1985 }
 0x6f2   : > { %v14577_v48 = vpop.eup %12592  ;;  %v2035_v24 = vmul.f32 1.442695, %v2013_v53  ;;  %v2012_v3 = vsub.f32 %v14541_v7, %v1986_v2 }
 0x6f3   : > { %2059 = vadd.xlane.f32.xlu1 %v14577_v48  ;;  %v1984_v27 = vpop.xlane.xlu0 %1983 }
 0x6f4   : > { %v2011_v16 = vsub.f32 %v14544_v38, %v1984_v27  ;;  %12600 = vpow2.f32 %v2035_v24  ;;  %v2033_v47 = vmul.f32 1.442695, %v2012_v3 }
 0x6f5   : > { %v14580_v37 = vpop.eup %12594  ;;  %v1998_v40 = vpop.xlane.xlu1 %1997 }
 0x6f6   : > { %v14582_v19 = vpop.eup %12596  ;;  %2057 = vadd.xlane.f32.xlu0 %v14580_v37  ;;  %v2031_v60 = vmul.f32 1.442695, %v2011_v16  ;;  %v2018_v23 = vsub.f32 %v14546_v26, %v1998_v40 }
 0x6f7   : > { %2055 = vadd.xlane.f32.xlu1 %v14582_v19  ;;  %v1996_v4 = vpop.xlane.xlu0 %1995 }
 0x6f8   : > { %v2017_v50 = vsub.f32 %v14549_v22, %v1996_v4  ;;  %12602 = vpow2.f32 %v2031_v60  ;;  %v2045_v4 = vmul.f32 1.442695, %v2018_v23 }
 0x6f9   : > { %v1994_v34 = vpop.xlane.xlu1 %1993  ;;  %12604 = vpow2.f32 %v2033_v47 }
 0x6fa   : > { %v14586_v42 = vpop.eup %12598  ;;  %v2043_v62 = vmul.f32 1.442695, %v2017_v50  ;;  %12606 = vpow2.f32 %v2037_v1 }
 0x6fb   : > { %2061 = vadd.xlane.f32.xlu1 %v14586_v42  ;;  %v1992_v33 = vpop.xlane.xlu0 %1991 }
 0x6fc   : > { %v2015_v38 = vsub.f32 %v14555_v6, %v1992_v33  ;;  %12608 = vpow2.f32 %v2043_v62  ;;  %v2016_v6 = vsub.f32 %v14552_v0, %v1994_v34 }
 0x6fd   : > { %v14604_v22 = vpop.permute.xlu1 %2447 }
 0x6fe   : > { %v2039_v27 = vmul.f32 1.442695, %v2015_v38  ;;  %v14602_v44 = vpop.eup %12600  ;;  %v2041_v33 = vmul.f32 1.442695, %v2016_v6 }
 0x6ff   : > { %v2004_v28 = vpop.xlane.xlu0 %2003 }
 0x700   : > { %v2021_v39 = vsub.f32 %v14559_v54, %v2004_v28 }
 0x702   : > { %v2051_v7 = vmul.f32 1.442695, %v2021_v39  ;;  %v14608_v53 = vpop.eup %12602 }
 0x703   : > { %v2000_v17 = vpop.xlane.xlu0 %1999 }
 0x704   : > { %v2019_v46 = vsub.f32 %v14562_v8, %v2000_v17  ;;  %12610 = vpow2.f32 %v2051_v7  ;;  %v14610_v8 = vpop.eup %12604 }
 0x705   : > { %12612 = vpow2.f32 %v2039_v27  ;;  %v14615_v16 = vpop.eup %12606 }
 0x706   : > { %v2047_v54 = vmul.f32 1.442695, %v2019_v46  ;;  %v14617_v0 = vpop.eup %12608 }
 0x707   : > { %v2446_v34 = vpop.permute.xlu0 %2445 }
 0x708   : > { %12614 = vpow2.f32 %v2047_v54 }
 0x709   : > { %12616 = vpow2.f32 %v2045_v4 }
 0x70c   : > { %2449 = vrot.lane.b32.xlu0 %v14263_v45, %s13547_s22  ;;  %2451 = vrot.lane.b32.xlu1 %v14279_v55, %s13547_s22 }
 0x70e   : > { %v14622_v28 = vpop.eup %12610 }
 0x70f   : > { %v14624_v61 = vpop.eup %12612 }
 0x712   : > { %v14628_v60 = vpop.eup %12614 }
 0x713   : > { %v14630_v47 = vpop.eup %12616 }
 0x72b   : > { %2067 = vadd.xlane.f32.xlu0 %v14602_v44 }
 0x72e   : > { %v2006_v2 = vpop.xlane.xlu1 %2005 }
 0x72f   : > { %v2022_v26 = vsub.f32 %v14569_v9, %v2006_v2  ;;  %2063 = vadd.xlane.f32.xlu0 %v14608_v53 }
 0x730   : > { %2065 = vadd.xlane.f32.xlu1 %v14610_v8 }
 0x731   : > { %v2053_v24 = vmul.f32 1.442695, %v2022_v26  ;;  %v2482_v26 = vsel %vm1267_vm0, %v14514_v36, 0 }
 0x732   : > { %v2002_v3 = vpop.xlane.xlu1 %2001 }
 0x733   : > { %12618 = vpow2.f32 %v2053_v24  ;;  %v2020_v40 = vsub.f32 %v14572_v13, %v2002_v3  ;;  %2069 = vadd.xlane.f32.xlu0 %v14615_v16 }
 0x734   : > { %2075 = vadd.xlane.f32.xlu1 %v14617_v0  ;;  %12620 = vpow2.f32 %v2041_v33 }
 0x735   : > { %v2049_v9 = vmul.f32 1.442695, %v2020_v40 }
 0x737   : > { %2083 = vadd.xlane.f32.xlu0 %v14622_v28  ;;  %12622 = vpow2.f32 %v2049_v9 }
 0x738   : > { %2071 = vadd.xlane.f32.xlu1 %v14624_v61 }
 0x73b   : > { %2079 = vadd.xlane.f32.xlu0 %v14628_v60 }
 0x73c   : > { %2077 = vadd.xlane.f32.xlu1 %v14630_v47 }
 0x73d   : > { %v14634_v13 = vpop.eup %12618 }
 0x73e   : > { %v14636_v50 = vpop.eup %12620 }
 0x73f   : > { %2085 = vadd.xlane.f32.xlu0 %v14634_v13 }
 0x740   : > { %2073 = vadd.xlane.f32.xlu1 %v14636_v50 }
 0x741   : > { %v14640_v1 = vpop.eup %12622 }
 0x744   : > { %2081 = vadd.xlane.f32.xlu1 %v14640_v1 }
 0x755   : > { %2455 = vrot.lane.b32.xlu1 %v14303_v10, %s13547_s22  ;;  %2453 = vrot.lane.b32.xlu0 %v14291_v43, %s13547_s22 }
 0x759   : > { %2419 = vrot.lane.b32.xlu1 %v14187_v21, %s13547_s22  ;;  %2417 = vrot.lane.b32.xlu0 %v14159_v35, %s13547_s22 }
 0x75d   : > { %2423 = vrot.lane.b32.xlu1 %v14237_v18, %s13547_s22  ;;  %2421 = vrot.lane.b32.xlu0 %v14213_v49, %s13547_s22 }
 0x761   : > { %2427 = vrot.lane.b32.xlu1 %v14277_v32, %s13547_s22  ;;  %2425 = vrot.lane.b32.xlu0 %v14261_v14, %s13547_s22 }
 0x765   : > { %2431 = vrot.lane.b32.xlu1 %v14301_v31, %s13547_s22  ;;  %2429 = vrot.lane.b32.xlu0 %v14289_v63, %s13547_s22 }
 0x769   : > { %2780 = vrot.lane.b32.xlu1 %v14181_v12, %s13547_s22  ;;  %2778 = vrot.lane.b32.xlu0 %v14185_v20, %s13547_s22 }
 0x76d   : > { %2784 = vrot.lane.b32.xlu1 %v14206_v52, %s13547_s22  ;;  %2782 = vrot.lane.b32.xlu0 %v14211_v41, %s13547_s22 }
 0x771   : > { %2788 = vrot.lane.b32.xlu1 %v14230_v51, %s13547_s22  ;;  %2786 = vrot.lane.b32.xlu0 %v14235_v57, %s13547_s22 }
 0x775   : > { %2792 = vrot.lane.b32.xlu1 %v14254_v58, %s13547_s22  ;;  %2790 = vrot.lane.b32.xlu0 %v14259_v25, %s13547_s22 }
 0x779   : > { %3086 = vrot.lane.b32.xlu1 %v14189_v29, %s13548_s25  ;;  %3084 = vrot.lane.b32.xlu0 %v14161_v11, %s13548_s25 }
 0x780   : > { %v2060_v39 = vpop.xlane.xlu1 %2059 }
 0x783   : > { %v2058_v62 = vpop.xlane.xlu0 %2057 }
 0x784   : > { %12624 = vrcp.f32 %v2058_v62  ;;  %v2056_v38 = vpop.xlane.xlu1 %2055 }
 0x785   : > { %12626 = vrcp.f32 %v2056_v38 }
 0x786   : > { %12628 = vrcp.f32 %v2060_v39 }
 0x787   : > { %v2450_v36 = vpop.permute.xlu0 %2449 }
 0x788   : > { %v2062_v17 = vpop.xlane.xlu1 %2061 }
 0x789   : > { %12630 = vrcp.f32 %v2062_v17 }
 0x78e   : > { %v12625_v7 = vpop.eup %12624 }
 0x78f   : > { %v12627_v46 = vpop.eup %12626  ;;  %v2104_v23 = vmul.f32 %v12625_v7, %v14580_v37  ;;  %v2485_v37 = vsel %vm1267_vm0, %v14575_v59, 0 }
 0x790   : > { %v2103_v27 = vmul.f32 %v12627_v46, %v14582_v19  ;;  %v12629_v54 = vpop.eup %12628  ;;  %v2491_v19 = vsel %vm1267_vm0, %v14604_v22, 0 }
 0x791   : > { %v2105_v11 = vmul.f32 %v12629_v54, %v14577_v48  ;;  %v2488_v48 = vsel %vm1267_vm0, %v2446_v34, 0 }
 0x792   : > { %v2119_v29 = vpack.c.bf16 %v2104_v23, %v2103_v27 }
 0x793   : > { %v12631_v4 = vpop.eup %12630 }
 0x794   : > { %v2106_v6 = vmul.f32 %v12631_v4, %v14586_v42  ;;  %11563 = vmatprep.mubr.bf16.mxu0 %v2119_v29  ;;  %v2494_v42 = vsel %vm1267_vm0, %v2450_v36, 0 }
 0x796   : > { %v2120_v2 = vpack.c.bf16 %v2106_v6, %v2105_v11 }
 0x798   : > { %11564 = vmatmul.mubr.bf16.vlgmr.msra.gmra.mrb[48].mxu0 %v2120_v2 }
 0x799   : > { %11580 = vmatpush3.bf16.xpose.msra.mxu0 %v2482_v26 }
 0x79a   : > { %12076 = vmatprep.subr.msk.bf16.mxu0 %vm1267_vm0, %v14575_v59  ;;  %v2452_v59 = vpop.permute.xlu1 %2451 }
 0x79b   : > { %v2497_v40 = vsel %vm1267_vm0, %v2452_v59, 0 }
 0x7a1   : > { %11582 = vmatpush3.bf16.xpose.msra.mxu0 %v2485_v37 }
 0x7a2   : > { %12077 = vmatprep.subr.msk.bf16.mxu0 %vm1267_vm0, %v2446_v34 }
 0x7a9   : > { %11584 = vmatpush3.bf16.xpose.msra.mxu0 %v2488_v48 }
 0x7aa   : > { %12078 = vmatprep.subr.msk.bf16.mxu0 %vm1267_vm0, %v14604_v22 }
 0x7b1   : > { %11586 = vmatpush3.bf16.xpose.msra.mxu0 %v2491_v19 }
 0x7b2   : > { %12079 = vmatprep.subr.msk.bf16.mxu0 %vm1267_vm0, %v2450_v36 }
 0x7b8   : > { %v2068_v33 = vpop.xlane.xlu0 %2067 }
 0x7b9   : > { %11588 = vmatpush3.bf16.xpose.msra.mxu0 %v2494_v42 }
 0x7ba   : > { %12080 = vmatprep.subr.msk.bf16.mxu0 %vm1267_vm0, %v2452_v59 }
 0x7bc   : > { %v2064_v24 = vpop.xlane.xlu0 %2063 }
 0x7bd   : > { %12632 = vrcp.f32 %v2064_v24  ;;  %v2066_v3 = vpop.xlane.xlu1 %2065 }
 0x7be   : > { %12634 = vrcp.f32 %v2066_v3 }
 0x7bf   : > { %12636 = vrcp.f32 %v2068_v33 }
 0x7c0   : > { %v2070_v9 = vpop.xlane.xlu0 %2069 }
 0x7c1   : > { %11590 = vmatpush3.bf16.xpose.msra.mxu0 %v2497_v40  ;;  %12638 = vrcp.f32 %v2070_v9  ;;  %v2076_v22 = vpop.xlane.xlu1 %2075 }
 0x7c4   : > { %v2084_v34 = vpop.xlane.xlu0 %2083 }
 0x7c5   : > { %v2072_v39 = vpop.xlane.xlu1 %2071 }
 0x7c7   : > { %v12633_v62 = vpop.eup %12632 }
 0x7c8   : > { %v12635_v38 = vpop.eup %12634  ;;  %v2080_v17 = vpop.xlane.xlu0 %2079  ;;  %v2107_v7 = vmul.f32 %v12633_v62, %v14608_v53 }
 0x7c9   : > { %v12637_v46 = vpop.eup %12636  ;;  %v2078_v23 = vpop.xlane.xlu1 %2077  ;;  %v2108_v27 = vmul.f32 %v12635_v38, %v14610_v8 }
 0x7ca   : > { %12640 = vrcp.f32 %v2078_v23  ;;  %v2109_v11 = vmul.f32 %v12637_v46, %v14602_v44 }
 0x7cb   : > { %v12639_v54 = vpop.eup %12638  ;;  %v2121_v29 = vpack.c.bf16 %v2108_v27, %v2107_v7  ;;  %12642 = vrcp.f32 %v2072_v39 }
 0x7cc   : > { %v2086_v4 = vpop.xlane.xlu0 %2085  ;;  %v2110_v6 = vmul.f32 %v12639_v54, %v14615_v16  ;;  %12644 = vrcp.f32 %v2076_v22 }
 0x7cd   : > { %v2074_v2 = vpop.xlane.xlu1 %2073  ;;  %11567 = vmatprep.mubr.bf16.mxu0 %v2121_v29 }
 0x7ce   : > { %12646 = vrcp.f32 %v2074_v2  ;;  %v2122_v26 = vpack.c.bf16 %v2110_v6, %v2109_v11 }
 0x7cf   : > { %12648 = vrcp.f32 %v2080_v17 }
 0x7d0   : > { %11568 = vmatmul.mubr.bf16.gmra.mrb[52].mxu0 %v2122_v26  ;;  %v2454_v53 = vpop.permute.xlu0 %2453 }
 0x7d1   : > { %v2082_v37 = vpop.xlane.xlu1 %2081  ;;  %12081 = vmatprep.subr.msk.bf16.mxu0 %vm1267_vm0, %v2454_v53  ;;  %v2500_v8 = vsel %vm1267_vm0, %v2454_v53, 0 }
 0x7d2   : > { %12650 = vrcp.f32 %v2082_v37  ;;  %11592 = vmatpush3.bf16.xpose.msra.mxu0 %v2500_v8 }
 0x7d3   : > { %12652 = vrcp.f32 %v2086_v4 }
 0x7d4   : > { %v2418_v48 = vpop.permute.xlu0 %2417  ;;  %v12641_v44 = vpop.eup %12640  ;;  %12654 = vrcp.f32 %v2084_v34 }
 0x7d5   : > { %v2456_v16 = vpop.permute.xlu1 %2455  ;;  %v12643_v19 = vpop.eup %12642  ;;  %v2114_v59 = vmul.f32 %v12641_v44, %v14630_v47 }
 0x7d6   : > { %12082 = vmatprep.subr.msk.bf16.mxu0 %vm1267_vm0, %v2456_v16  ;;  %v12645_v36 = vpop.eup %12644  ;;  %v2503_v3 = vsel %vm1267_vm0, %v2456_v16, 0  ;;  %v2111_v40 = vmul.f32 %v12643_v19, %v14624_v61 }
 0x7d7   : > { %v2113_v34 = vmul.f32 %v12645_v36, %v14617_v0 }
 0x7d8   : > { %v12647_v42 = vpop.eup %12646  ;;  %v2422_v33 = vpop.permute.xlu0 %2421 }
 0x7d9   : > { %v2420_v24 = vpop.permute.xlu1 %2419  ;;  %v2112_v9 = vmul.f32 %v12647_v42, %v14636_v50  ;;  %v12649_v22 = vpop.eup %12648  ;;  %v2124_v17 = vpack.c.bf16 %v2114_v59, %v2113_v34 }
 0x7da   : > { %11594 = vmatpush3.bf16.xpose.msra.mxu0 %v2503_v3  ;;  %v2115_v47 = vmul.f32 %v12649_v22, %v14628_v60 }
 0x7db   : > { %v2123_v39 = vpack.c.bf16 %v2112_v9, %v2111_v40 }
 0x7dc   : > { %v12651_v62 = vpop.eup %12650  ;;  %v2426_v38 = vpop.permute.xlu0 %2425 }
 0x7dd   : > { %v12653_v7 = vpop.eup %12652  ;;  %v2424_v46 = vpop.permute.xlu1 %2423  ;;  %11571 = vmatprep.mubr.bf16.mxu0 %v2123_v39  ;;  %v2116_v23 = vmul.f32 %v12651_v62, %v14640_v1 }
 0x7de   : > { %11572 = vmatmul.mubr.bf16.gmra.mrb[56].mxu0 %v2124_v17  ;;  %v12655_v27 = vpop.eup %12654  ;;  %v2118_v50 = vmul.f32 %v12653_v7, %v14634_v13 }
 0x7df   : > { %v2125_v61 = vpack.c.bf16 %v2116_v23, %v2115_v47  ;;  %v2117_v0 = vmul.f32 %v12655_v27, %v14622_v28 }
 0x7e0   : > { %v2430_v54 = vpop.permute.xlu0 %2429 }
 0x7e1   : > { %v2428_v29 = vpop.permute.xlu1 %2427  ;;  %11575 = vmatprep.mubr.bf16.mxu0 %v2125_v61  ;;  %v2126_v11 = vpack.c.bf16 %v2118_v50, %v2117_v0 }
 0x7e4   : > { %v2779_v4 = vpop.permute.xlu0 %2778 }
 0x7e5   : > { %v2432_v6 = vpop.permute.xlu1 %2431  ;;  %11611 = vmatprep.subr.bf16.mxu1 %v2779_v4 }
 0x7e6   : > { %11576 = vmatmul.mubr.bf16.gmra.mrb[60].mxu0 %v2126_v11  ;;  %11612 = vmatpush3.bf16.msra.mxu1 %v2779_v4 }
 0x7e7   : > { %11595 = vmatprep.mubr.msk.bf16.mxu0 %vm1267_vm0, %v2418_v48 }
 0x7e8   : > { %v2783_v1 = vpop.permute.xlu0 %2782 }
 0x7e9   : > { %v2781_v60 = vpop.permute.xlu1 %2780 }
 0x7ea   : > { %11613 = vmatprep.subr.bf16.mxu1 %v2781_v60 }
 0x7eb   : > { %11614 = vmatpush3.bf16.msra.mxu1 %v2781_v60 }
 0x7ec   : > { %11615 = vmatprep.subr.bf16.mxu1 %v2783_v1  ;;  %v2787_v28 = vpop.permute.xlu0 %2786 }
 0x7ed   : > { %v2785_v13 = vpop.permute.xlu1 %2784 }
 0x7ee   : > { %11596 = vmatmul.mubr.msk.bf16.vlgmr.msra.gmra.mrb[64].mxu0 %vm1267_vm0, %v2420_v24 }
 0x7ef   : > { %11599 = vmatprep.mubr.msk.bf16.mxu0 %vm1267_vm0, %v2422_v33  ;;  %11616 = vmatpush3.bf16.msra.mxu1 %v2783_v1 }
 0x7f0   : > { %11617 = vmatprep.subr.bf16.mxu1 %v2785_v13  ;;  %v2791_v26 = vpop.permute.xlu0 %2790 }
 0x7f1   : > { %v2789_v2 = vpop.permute.xlu1 %2788 }
 0x7f3   : > { %11618 = vmatpush3.bf16.msra.mxu1 %v2785_v13 }
 0x7f4   : > { %11619 = vmatprep.subr.bf16.mxu1 %v2787_v28  ;;  %v14726_v37 = vpop.permute.xlu0 %3084 }
 0x7f5   : > { %v2793_v53 = vpop.permute.xlu1 %2792 }
 0x7f6   : > { %11600 = vmatmul.mubr.msk.bf16.gmra.mrb[68].mxu0 %vm1267_vm0, %v2424_v46 }
 0x7f7   : > { %11603 = vmatprep.mubr.msk.bf16.mxu0 %vm1267_vm0, %v2426_v38  ;;  %11620 = vmatpush3.bf16.msra.mxu1 %v2787_v28 }
 0x7f8   : > { %11621 = vmatprep.subr.bf16.mxu1 %v2789_v2 }
 0x7fb   : > { %11622 = vmatpush3.bf16.msra.mxu1 %v2789_v2 }
 0x7fc   : > { %11623 = vmatprep.subr.bf16.mxu1 %v2791_v26 }
 0x7fe   : > { %11604 = vmatmul.mubr.msk.bf16.gmra.mrb[72].mxu0 %vm1267_vm0, %v2428_v29 }
 0x7ff   : > { %11607 = vmatprep.mubr.msk.bf16.mxu0 %vm1267_vm0, %v2430_v54  ;;  %11624 = vmatpush3.bf16.msra.mxu1 %v2791_v26 }
 0x800   : > { %11625 = vmatprep.subr.bf16.mxu1 %v2793_v53 }
 0x803   : > { %11626 = vmatpush3.bf16.msra.mxu1 %v2793_v53 }
 0x804   : > { %12083 = vmatprep.subr.msk.bf16.mxu1 %vm1267_vm0, %v14726_v37 }
 0x806   : > { %11608 = vmatmul.mubr.msk.bf16.gmra.mrb[76].mxu0 %vm1267_vm0, %v2432_v6 }
 0x86b   : > { %v14731_v8 = vpop.f32.mrb[48].mxu0 }
 0x86c   : > { %v14733_v48 = vpop.f32.mrb[49].mxu0 }
 0x86d   : > { %v14735_v44 = vpop.f32.mrb[50].mxu0 }
 0x86e   : > { %v14737_v16 = vpop.f32.mrb[51].mxu0 }
 0x8a3   : > { %v14739_v19 = vpop.f32.mrb[52].mxu0 }
 0x8a4   : > { %v14741_v36 = vpop.f32.mrb[53].mxu0 }
 0x8a5   : > { %v14743_v42 = vpop.f32.mrb[54].mxu0 }
 0x8a6   : > { %v14745_v33 = vpop.f32.mrb[55].mxu0 }
 0x8b1   : > { %v14747_v59 = vpop.f32.mrb[56].mxu0 }
 0x8b2   : > { %17327 = vst [vmem:[#allocation26_spill] sm:$0xff] %v14747_v59  ;;  %v14749_v24 = vpop.f32.mrb[57].mxu0 }
 0x8b3   : > { %v14751_v3 = vpop.f32.mrb[58].mxu0 }
 0x8b4   : > { %17328 = vst [vmem:[#allocation27_spill] sm:$0xff] %v14751_v3  ;;  %v14753_v40 = vpop.f32.mrb[59].mxu0 }
 0x8b9   : > { %v14755_v9 = vpop.f32.mrb[60].mxu0 }
 0x8ba   : > { %17329 = vst [vmem:[#allocation28_spill] sm:$0xff] %v14755_v9  ;;  %v14757_v22 = vpop.f32.mrb[61].mxu0 }
 0x8bb   : > { %17330 = vst [vmem:[#allocation29_spill] sm:$0xff] %v14757_v22  ;;  %v14759_v34 = vpop.f32.mrb[62].mxu0 }
 0x8bc   : > { %17331 = vst [vmem:[#allocation30_spill] sm:$0xff] %v14759_v34  ;;  %v14761_v39 = vpop.f32.mrb[63].mxu0 }
 0x8bd   : > { %17332 = vst [vmem:[#allocation31_spill] sm:$0xff] %v14761_v39 }
 0x8c1   : > { %v11597_v62 = vpop.f32.mrb[64].mxu0 }
 0x8c2   : > { %v2604_v38 = vmul.f32 0.17677669, %v11597_v62  ;;  %v2539_v17 = vpop.f32.mrb[65].mxu0 }
 0x8c3   : > { %v11598_v7 = vpop.f32.mrb[66].mxu0  ;;  %v2602_v23 = vmul.f32 0.17677669, %v2539_v17 }
 0x8c4   : > { %2622 = vmax.xlane.f32.xlu0 %v2604_v38  ;;  %v2542_v46 = vpop.f32.mrb[67].mxu0  ;;  %v2605_v61 = vmul.f32 0.17677669, %v11598_v7 }
 0x8c5   : > { %v2603_v47 = vmul.f32 0.17677669, %v2542_v46 }
 0x8c7   : > { %2620 = vmax.xlane.f32.xlu1 %v2603_v47 }
 0x8c8   : > { %2618 = vmax.xlane.f32.xlu0 %v2602_v23 }
 0x8c9   : > { %v11601_v27 = vpop.f32.mrb[68].mxu0 }
 0x8ca   : > { %v2555_v54 = vpop.f32.mrb[69].mxu0  ;;  %v14765_v4 = vmul.f32 0.17677669, %v11601_v27 }
 0x8cb   : > { %v11602_v50 = vpop.f32.mrb[70].mxu0  ;;  %v14771_v60 = vmul.f32 0.17677669, %v2555_v54 }
 0x8cc   : > { %v14763_v29 = vmul.f32 0.17677669, %v11602_v50  ;;  %2624 = vmax.xlane.f32.xlu0 %v2605_v61  ;;  %v2558_v0 = vpop.f32.mrb[71].mxu0 }
 0x8cd   : > { %v14768_v11 = vmul.f32 0.17677669, %v2558_v0 }
 0x8ce   : > { %2632 = vmax.xlane.f32.xlu1 %v14763_v29 }
 0x8d0   : > { %2630 = vmax.xlane.f32.xlu0 %v14765_v4 }
 0x8d1   : > { %v11605_v6 = vpop.f32.mrb[72].mxu0 }
 0x8d2   : > { %2628 = vmax.xlane.f32.xlu1 %v14768_v11  ;;  %v2571_v1 = vpop.f32.mrb[73].mxu0  ;;  %v14777_v26 = vmul.f32 0.17677669, %v11605_v6 }
 0x8d3   : > { %v11606_v13 = vpop.f32.mrb[74].mxu0  ;;  %v14783_v17 = vmul.f32 0.17677669, %v2571_v1  ;;  %v14803_v1 = vpop.permute.xlu1 %3086 }
 0x8d4   : > { %v14774_v28 = vmul.f32 0.17677669, %v11606_v13  ;;  %2626 = vmax.xlane.f32.xlu0 %v14771_v60  ;;  %v2574_v2 = vpop.f32.mrb[75].mxu0 }
 0x8d5   : > { %v14780_v53 = vmul.f32 0.17677669, %v2574_v2 }
 0x8d6   : > { %2640 = vmax.xlane.f32.xlu1 %v14774_v28 }
 0x8d8   : > { %2638 = vmax.xlane.f32.xlu0 %v14777_v26 }
 0x8d9   : > { %v11609_v62 = vpop.f32.mrb[76].mxu0 }
 0x8da   : > { %2636 = vmax.xlane.f32.xlu1 %v14780_v53  ;;  %v2587_v7 = vpop.f32.mrb[77].mxu0  ;;  %v14787_v54 = vmul.f32 0.17677669, %v11609_v62 }
 0x8db   : > { %v11610_v46 = vpop.f32.mrb[78].mxu0  ;;  %v14790_v50 = vmul.f32 0.17677669, %v2587_v7 }
 0x8dc   : > { %2634 = vmax.xlane.f32.xlu0 %v14783_v17  ;;  %v2590_v27 = vpop.f32.mrb[79].mxu0  ;;  %v14797_v0 = vmul.f32 0.17677669, %v11610_v46 }
 0x8dd   : > { %v14800_v6 = vmul.f32 0.17677669, %v2590_v27 }
 0x8e0   : > { %2646 = vmax.xlane.f32.xlu0 %v14787_v54 }
 0x8e4   : > { %2642 = vmax.xlane.f32.xlu0 %v14790_v50 }
 0x8eb   : > { %3090 = vrot.lane.b32.xlu1 %v14239_v30, %s13548_s25 }
 0x8fa   : > { %3088 = vrot.lane.b32.xlu0 %v14215_v56, %s13548_s25 }
 0x90f   : > { %2648 = vmax.xlane.f32.xlu1 %v14797_v0 }
 0x913   : > { %2644 = vmax.xlane.f32.xlu1 %v14800_v6 }
 0x951   : > { %v2623_v13 = vpop.xlane.xlu0 %2622 }
 0x952   : > { %v2652_v2 = vsub.f32 %v2604_v38, %v2623_v13 }
 0x954   : > { %v2670_v62 = vmul.f32 1.442695, %v2652_v2  ;;  %v2621_v7 = vpop.xlane.xlu1 %2620 }
 0x955   : > { %v2651_v15 = vsub.f32 %v2603_v47, %v2621_v7  ;;  %v2619_v5 = vpop.xlane.xlu0 %2618 }
 0x956   : > { %12656 = vpow2.f32 %v2670_v62  ;;  %v2650_v30 = vsub.f32 %v2602_v23, %v2619_v5 }
 0x957   : > { %v2668_v34 = vmul.f32 1.442695, %v2651_v15 }
 0x958   : > { %v2666_v56 = vmul.f32 1.442695, %v2650_v30 }
 0x959   : > { %12658 = vpow2.f32 %v2668_v34  ;;  %v2625_v46 = vpop.xlane.xlu0 %2624 }
 0x95a   : > { %12660 = vpow2.f32 %v2666_v56  ;;  %v2653_v9 = vsub.f32 %v2605_v61, %v2625_v46 }
 0x95b   : > { %v2633_v34 = vpop.xlane.xlu1 %2632 }
 0x95c   : > { %v2672_v27 = vmul.f32 1.442695, %v2653_v9  ;;  %v2657_v46 = vsub.f32 %v14763_v29, %v2633_v34 }
 0x95d   : > { %v2631_v15 = vpop.xlane.xlu0 %2630 }
 0x95e   : > { %12662 = vpow2.f32 %v2672_v27  ;;  %v2656_v23 = vsub.f32 %v14765_v4, %v2631_v15  ;;  %v2680_v3 = vmul.f32 1.442695, %v2657_v46 }
 0x95f   : > { %v2629_v61 = vpop.xlane.xlu1 %2628 }
 0x960   : > { %v14805_v39 = vpop.eup %12656  ;;  %v2678_v2 = vmul.f32 1.442695, %v2656_v23  ;;  %v2655_v7 = vsub.f32 %v14768_v11, %v2629_v61 }
 0x961   : > { %2702 = vadd.xlane.f32.xlu1 %v14805_v39  ;;  %v2627_v9 = vpop.xlane.xlu0 %2626 }
 0x962   : > { %v2654_v62 = vsub.f32 %v14771_v60, %v2627_v9  ;;  %12664 = vpow2.f32 %v2678_v2  ;;  %v2676_v27 = vmul.f32 1.442695, %v2655_v7 }
 0x963   : > { %v14808_v22 = vpop.eup %12658  ;;  %v2641_v30 = vpop.xlane.xlu1 %2640 }
 0x964   : > { %v14810_v38 = vpop.eup %12660  ;;  %2700 = vadd.xlane.f32.xlu0 %v14808_v22  ;;  %v2661_v29 = vsub.f32 %v14774_v28, %v2641_v30 }
 0x965   : > { %2698 = vadd.xlane.f32.xlu1 %v14810_v38  ;;  %v2639_v47 = vpop.xlane.xlu0 %2638 }
 0x967   : > { %v2637_v59 = vpop.xlane.xlu1 %2636 }
 0x968   : > { %v14814_v5 = vpop.eup %12662 }
 0x969   : > { %2704 = vadd.xlane.f32.xlu1 %v14814_v5  ;;  %v2635_v13 = vpop.xlane.xlu0 %2634 }
 0x96a   : > { %v2658_v60 = vsub.f32 %v14783_v17, %v2635_v13  ;;  %v2659_v17 = vsub.f32 %v14780_v53, %v2637_v59 }
 0x96c   : > { %v2682_v34 = vmul.f32 1.442695, %v2658_v60  ;;  %v14830_v61 = vpop.eup %12664  ;;  %v2684_v2 = vmul.f32 1.442695, %v2659_v17  ;;  %v3125_v60 = vsel %vm1267_vm0, %v14726_v37, 0 }
 0x96d   : > { %v2647_v56 = vpop.xlane.xlu0 %2646 }
 0x96e   : > { %v2664_v4 = vsub.f32 %v14787_v54, %v2647_v56 }
 0x970   : > { %v2694_v11 = vmul.f32 1.442695, %v2664_v4 }
 0x971   : > { %v2643_v9 = vpop.xlane.xlu0 %2642 }
 0x972   : > { %v2662_v23 = vsub.f32 %v14790_v50, %v2643_v9 }
 0x974   : > { %v2690_v54 = vmul.f32 1.442695, %v2662_v23 }
 0x97a   : > { %3092 = vrot.lane.b32.xlu0 %v14263_v45, %s13548_s25  ;;  %3094 = vrot.lane.b32.xlu1 %v14279_v55, %s13548_s25  ;;  %v2674_v45 = vmul.f32 1.442695, %v2654_v62  ;;  %v2660_v55 = vsub.f32 %v14777_v26, %v2639_v47  ;;  %v14832_v26 = vpop.permute.xlu1 %3090  ;;  %v2688_v47 = vmul.f32 1.442695, %v2661_v29 }
 0x97c   : > { %12666 = vpow2.f32 %v2674_v45  ;;  %v2686_v15 = vmul.f32 1.442695, %v2660_v55 }
 0x97d   : > { %12668 = vpow2.f32 %v2676_v27 }
 0x97e   : > { %12670 = vpow2.f32 %v2680_v3 }
 0x97f   : > { %12672 = vpow2.f32 %v2686_v15 }
 0x980   : > { %12674 = vpow2.f32 %v2694_v11 }
 0x981   : > { %12676 = vpow2.f32 %v2682_v34 }
 0x982   : > { %12678 = vpow2.f32 %v2690_v54 }
 0x983   : > { %12680 = vpow2.f32 %v2688_v47 }
 0x986   : > { %v14836_v3 = vpop.eup %12666 }
 0x987   : > { %v14838_v50 = vpop.eup %12668 }
 0x988   : > { %v14843_v7 = vpop.eup %12670 }
 0x989   : > { %v14845_v59 = vpop.eup %12672 }
 0x98a   : > { %v14850_v56 = vpop.eup %12674 }
 0x98b   : > { %v14852_v46 = vpop.eup %12676 }
 0x98c   : > { %v14856_v45 = vpop.eup %12678 }
 0x98d   : > { %v14858_v27 = vpop.eup %12680 }
 0x999   : > { %2710 = vadd.xlane.f32.xlu0 %v14830_v61 }
 0x99c   : > { %v2649_v13 = vpop.xlane.xlu1 %2648 }
 0x99d   : > { %v2665_v28 = vsub.f32 %v14797_v0, %v2649_v13  ;;  %2706 = vadd.xlane.f32.xlu0 %v14836_v3 }
 0x99e   : > { %2708 = vadd.xlane.f32.xlu1 %v14838_v50 }
 0x99f   : > { %v2696_v62 = vmul.f32 1.442695, %v2665_v28 }
 0x9a0   : > { %v2645_v30 = vpop.xlane.xlu1 %2644 }
 0x9a1   : > { %12682 = vpow2.f32 %v2696_v62  ;;  %v2663_v53 = vsub.f32 %v14800_v6, %v2645_v30  ;;  %2712 = vadd.xlane.f32.xlu0 %v14843_v7 }
 0x9a2   : > { %2718 = vadd.xlane.f32.xlu1 %v14845_v59  ;;  %12684 = vpow2.f32 %v2684_v2 }
 0x9a3   : > { %v2692_v0 = vmul.f32 1.442695, %v2663_v53 }
 0x9a5   : > { %2726 = vadd.xlane.f32.xlu0 %v14850_v56  ;;  %12686 = vpow2.f32 %v2692_v0 }
 0x9a6   : > { %2714 = vadd.xlane.f32.xlu1 %v14852_v46 }
 0x9a9   : > { %2722 = vadd.xlane.f32.xlu0 %v14856_v45 }
 0x9aa   : > { %2720 = vadd.xlane.f32.xlu1 %v14858_v27 }
 0x9ab   : > { %v14862_v6 = vpop.eup %12682 }
 0x9ac   : > { %v14864_v55 = vpop.eup %12684 }
 0x9ad   : > { %2728 = vadd.xlane.f32.xlu0 %v14862_v6 }
 0x9ae   : > { %2716 = vadd.xlane.f32.xlu1 %v14864_v55 }
 0x9af   : > { %v14868_v4 = vpop.eup %12686 }
 0x9b2   : > { %2724 = vadd.xlane.f32.xlu1 %v14868_v4 }
 0x9c3   : > { %3098 = vrot.lane.b32.xlu1 %v14303_v10, %s13548_s25  ;;  %3096 = vrot.lane.b32.xlu0 %v14291_v43, %s13548_s25 }
 0x9c7   : > { %3062 = vrot.lane.b32.xlu1 %v14187_v21, %s13548_s25  ;;  %3060 = vrot.lane.b32.xlu0 %v14159_v35, %s13548_s25  ;;  %v3089_v35 = vpop.permute.xlu0 %3088 }
 0x9cb   : > { %3066 = vrot.lane.b32.xlu1 %v14237_v18, %s13548_s25  ;;  %3064 = vrot.lane.b32.xlu0 %v14213_v49, %s13548_s25 }
 0x9cf   : > { %3070 = vrot.lane.b32.xlu1 %v14277_v32, %s13548_s25  ;;  %3068 = vrot.lane.b32.xlu0 %v14261_v14, %s13548_s25 }
 0x9d3   : > { %3074 = vrot.lane.b32.xlu1 %v14301_v31, %s13548_s25  ;;  %3072 = vrot.lane.b32.xlu0 %v14289_v63, %s13548_s25 }
 0x9d7   : > { %3423 = vrot.lane.b32.xlu1 %v14181_v12, %s13548_s25  ;;  %3421 = vrot.lane.b32.xlu0 %v14185_v20, %s13548_s25 }
 0x9db   : > { %3425 = vrot.lane.b32.xlu0 %v14211_v41, %s13548_s25 }
 0x9df   : > { %3427 = vrot.lane.b32.xlu0 %v14206_v52, %s13548_s25 }
 0x9ee   : > { %v2703_v21 = vpop.xlane.xlu1 %2702 }
 0x9f1   : > { %v2701_v49 = vpop.xlane.xlu0 %2700 }
 0x9f2   : > { %12688 = vrcp.f32 %v2701_v49  ;;  %v2699_v18 = vpop.xlane.xlu1 %2698 }
 0x9f3   : > { %12690 = vrcp.f32 %v2699_v18 }
 0x9f4   : > { %12692 = vrcp.f32 %v2703_v21 }
 0x9f5   : > { %v3093_v37 = vpop.permute.xlu0 %3092 }
 0x9f6   : > { %v2705_v14 = vpop.xlane.xlu1 %2704 }
 0x9f7   : > { %12694 = vrcp.f32 %v2705_v14 }
 0x9fc   : > { %v12689_v32 = vpop.eup %12688 }
 0x9fd   : > { %v12691_v12 = vpop.eup %12690  ;;  %v2747_v63 = vmul.f32 %v12689_v32, %v14808_v22  ;;  %v3128_v22 = vsel %vm1267_vm0, %v14803_v1, 0 }
 0x9fe   : > { %v2746_v20 = vmul.f32 %v12691_v12, %v14810_v38  ;;  %v12693_v43 = vpop.eup %12692  ;;  %v3134_v38 = vsel %vm1267_vm0, %v14832_v26, 0 }
 0x9ff   : > { %v2748_v52 = vmul.f32 %v12693_v43, %v14805_v39  ;;  %v3131_v39 = vsel %vm1267_vm0, %v3089_v35, 0 }
 0xa00   : > { %v2762_v41 = vpack.c.bf16 %v2747_v63, %v2746_v20 }
 0xa01   : > { %v12695_v31 = vpop.eup %12694 }
 0xa02   : > { %v2749_v10 = vmul.f32 %v12695_v31, %v14814_v5  ;;  %11627 = vmatprep.mubr.bf16.mxu1 %v2762_v41  ;;  %v3137_v5 = vsel %vm1267_vm0, %v3093_v37, 0 }
 0xa04   : > { %v2763_v15 = vpack.c.bf16 %v2749_v10, %v2748_v52 }
 0xa06   : > { %11628 = vmatmul.mubr.bf16.vlgmr.msra.gmra.mrb[48].mxu1 %v2763_v15 }
 0xa07   : > { %11644 = vmatpush3.bf16.xpose.msra.mxu1 %v3125_v60 }
 0xa08   : > { %12084 = vmatprep.subr.msk.bf16.mxu1 %vm1267_vm0, %v14803_v1  ;;  %v3095_v1 = vpop.permute.xlu1 %3094 }
 0xa09   : > { %v3140_v29 = vsel %vm1267_vm0, %v3095_v1, 0 }
 0xa0f   : > { %11646 = vmatpush3.bf16.xpose.msra.mxu1 %v3128_v22 }
 0xa10   : > { %12085 = vmatprep.subr.msk.bf16.mxu1 %vm1267_vm0, %v3089_v35 }
 0xa17   : > { %11648 = vmatpush3.bf16.xpose.msra.mxu1 %v3131_v39 }
 0xa18   : > { %12086 = vmatprep.subr.msk.bf16.mxu1 %vm1267_vm0, %v14832_v26 }
 0xa1f   : > { %11650 = vmatpush3.bf16.xpose.msra.mxu1 %v3134_v38 }
 0xa20   : > { %12087 = vmatprep.subr.msk.bf16.mxu1 %vm1267_vm0, %v3093_v37 }
 0xa26   : > { %v2711_v9 = vpop.xlane.xlu0 %2710 }
 0xa27   : > { %11652 = vmatpush3.bf16.xpose.msra.mxu1 %v3137_v5 }
 0xa28   : > { %12088 = vmatprep.subr.msk.bf16.mxu1 %vm1267_vm0, %v3095_v1 }
 0xa2a   : > { %v2707_v11 = vpop.xlane.xlu0 %2706 }
 0xa2b   : > { %12696 = vrcp.f32 %v2707_v11  ;;  %v2709_v23 = vpop.xlane.xlu1 %2708 }
 0xa2c   : > { %12698 = vrcp.f32 %v2709_v23 }
 0xa2d   : > { %12700 = vrcp.f32 %v2711_v9 }
 0xa2e   : > { %v2713_v34 = vpop.xlane.xlu0 %2712 }
 0xa2f   : > { %11654 = vmatpush3.bf16.xpose.msra.mxu1 %v3140_v29  ;;  %12702 = vrcp.f32 %v2713_v34  ;;  %v2719_v26 = vpop.xlane.xlu1 %2718 }
 0xa32   : > { %v2727_v54 = vpop.xlane.xlu0 %2726 }
 0xa33   : > { %v2715_v47 = vpop.xlane.xlu1 %2714 }
 0xa35   : > { %v12697_v17 = vpop.eup %12696 }
 0xa36   : > { %v12699_v13 = vpop.eup %12698  ;;  %v2723_v28 = vpop.xlane.xlu0 %2722  ;;  %v2750_v2 = vmul.f32 %v12697_v17, %v14836_v3 }
 0xa37   : > { %v12701_v62 = vpop.eup %12700  ;;  %v2721_v30 = vpop.xlane.xlu1 %2720  ;;  %v2751_v53 = vmul.f32 %v12699_v13, %v14838_v50 }
 0xa38   : > { %12704 = vrcp.f32 %v2721_v30  ;;  %v2752_v49 = vmul.f32 %v12701_v62, %v14830_v61 }
 0xa39   : > { %v12703_v0 = vpop.eup %12702  ;;  %v2764_v35 = vpack.c.bf16 %v2751_v53, %v2750_v2  ;;  %12706 = vrcp.f32 %v2715_v47 }
 0xa3a   : > { %v2729_v21 = vpop.xlane.xlu0 %2728  ;;  %v2753_v18 = vmul.f32 %v12703_v0, %v14843_v7  ;;  %12708 = vrcp.f32 %v2719_v26 }
 0xa3b   : > { %v2717_v14 = vpop.xlane.xlu1 %2716  ;;  %11631 = vmatprep.mubr.bf16.mxu1 %v2764_v35 }
 0xa3c   : > { %12710 = vrcp.f32 %v2717_v14  ;;  %v2765_v32 = vpack.c.bf16 %v2753_v18, %v2752_v49 }
 0xa3d   : > { %12712 = vrcp.f32 %v2723_v28 }
 0xa3e   : > { %11632 = vmatmul.mubr.bf16.gmra.mrb[52].mxu1 %v2765_v32  ;;  %v3097_v3 = vpop.permute.xlu0 %3096 }
 0xa3f   : > { %v2725_v12 = vpop.xlane.xlu1 %2724  ;;  %12089 = vmatprep.subr.msk.bf16.mxu1 %vm1267_vm0, %v3097_v3  ;;  %v3143_v50 = vsel %vm1267_vm0, %v3097_v3, 0 }
 0xa40   : > { %12714 = vrcp.f32 %v2725_v12  ;;  %11656 = vmatpush3.bf16.xpose.msra.mxu1 %v3143_v50 }
 0xa41   : > { %12716 = vrcp.f32 %v2729_v21 }
 0xa42   : > { %v3061_v63 = vpop.permute.xlu0 %3060  ;;  %v12705_v61 = vpop.eup %12704  ;;  %12718 = vrcp.f32 %v2727_v54 }
 0xa43   : > { %v3099_v7 = vpop.permute.xlu1 %3098  ;;  %v12707_v20 = vpop.eup %12706  ;;  %v2757_v52 = vmul.f32 %v12705_v61, %v14858_v27 }
 0xa44   : > { %12090 = vmatprep.subr.msk.bf16.mxu1 %vm1267_vm0, %v3099_v7  ;;  %v12709_v43 = vpop.eup %12708  ;;  %v3146_v15 = vsel %vm1267_vm0, %v3099_v7, 0  ;;  %v2754_v60 = vmul.f32 %v12707_v20, %v14852_v46 }
 0xa45   : > { %v2756_v38 = vmul.f32 %v12709_v43, %v14845_v59 }
 0xa46   : > { %v12711_v41 = vpop.eup %12710  ;;  %v3065_v31 = vpop.permute.xlu0 %3064 }
 0xa47   : > { %v3063_v10 = vpop.permute.xlu1 %3062  ;;  %v2755_v22 = vmul.f32 %v12711_v41, %v14864_v55  ;;  %v12713_v39 = vpop.eup %12712  ;;  %v2767_v1 = vpack.c.bf16 %v2757_v52, %v2756_v38 }
 0xa48   : > { %11658 = vmatpush3.bf16.xpose.msra.mxu1 %v3146_v15  ;;  %v2758_v27 = vmul.f32 %v12713_v39, %v14856_v45 }
 0xa49   : > { %v2766_v37 = vpack.c.bf16 %v2755_v22, %v2754_v60 }
 0xa4a   : > { %v12715_v5 = vpop.eup %12714  ;;  %v3069_v9 = vpop.permute.xlu0 %3068 }
 0xa4b   : > { %v12717_v11 = vpop.eup %12716  ;;  %v3067_v23 = vpop.permute.xlu1 %3066  ;;  %11635 = vmatprep.mubr.bf16.mxu1 %v2766_v37  ;;  %v2759_v29 = vmul.f32 %v12715_v5, %v14868_v4 }
 0xa4c   : > { %11636 = vmatmul.mubr.bf16.gmra.mrb[56].mxu1 %v2767_v1  ;;  %v12719_v34 = vpop.eup %12718  ;;  %v2761_v55 = vmul.f32 %v12717_v11, %v14862_v6 }
 0xa4d   : > { %v2768_v46 = vpack.c.bf16 %v2759_v29, %v2758_v27  ;;  %v2760_v59 = vmul.f32 %v12719_v34, %v14850_v56  ;;  %v17333_v56 = vmov 0  }
 0xa4e   : > { %v3073_v26 = vpop.permute.xlu0 %3072 }
 0xa4f   : > { %v3071_v54 = vpop.permute.xlu1 %3070  ;;  %11639 = vmatprep.mubr.bf16.mxu1 %v2768_v46  ;;  %v2769_v17 = vpack.c.bf16 %v2761_v55, %v2760_v59 }
 0xa52   : > { %v3422_v47 = vpop.permute.xlu0 %3421 }
 0xa53   : > { %v3075_v13 = vpop.permute.xlu1 %3074  ;;  %11675 = vmatprep.subr.bf16.mxu0 %v3422_v47 }
 0xa54   : > { %11640 = vmatmul.mubr.bf16.gmra.mrb[60].mxu1 %v2769_v17  ;;  %11676 = vmatpush3.bf16.msra.mxu0 %v3422_v47 }
 0xa55   : > { %11659 = vmatprep.mubr.msk.bf16.mxu1 %vm1267_vm0, %v3061_v63 }
 0xa56   : > { %v3426_v45 = vpop.permute.xlu0 %3425 }
 0xa57   : > { %v3424_v4 = vpop.permute.xlu1 %3423 }
 0xa58   : > { %11677 = vmatprep.subr.bf16.mxu0 %v3424_v4 }
 0xa59   : > { %11678 = vmatpush3.bf16.msra.mxu0 %v3424_v4 }
 0xa5a   : > { %11679 = vmatprep.subr.bf16.mxu0 %v3426_v45  ;;  %v3428_v6 = vpop.permute.xlu0 %3427 }
 0xa5c   : > { %11660 = vmatmul.mubr.msk.bf16.vlgmr.msra.gmra.mrb[64].mxu1 %vm1267_vm0, %v3063_v10 }
 0xa5d   : > { %11663 = vmatprep.mubr.msk.bf16.mxu1 %vm1267_vm0, %v3065_v31  ;;  %11680 = vmatpush3.bf16.msra.mxu0 %v3426_v45 }
 0xa5e   : > { %11681 = vmatprep.subr.bf16.mxu0 %v3428_v6 }
 0xa61   : > { %11682 = vmatpush3.bf16.msra.mxu0 %v3428_v6 }
 0xa64   : > { %11664 = vmatmul.mubr.msk.bf16.gmra.mrb[68].mxu1 %vm1267_vm0, %v3067_v23 }
 0xa65   : > { %11667 = vmatprep.mubr.msk.bf16.mxu1 %vm1267_vm0, %v3069_v9 }
 0xa6c   : > { %11668 = vmatmul.mubr.msk.bf16.gmra.mrb[72].mxu1 %vm1267_vm0, %v3071_v54 }
 0xa6d   : > { %11671 = vmatprep.mubr.msk.bf16.mxu1 %vm1267_vm0, %v3073_v26 }
 0xa74   : > { %11672 = vmatmul.mubr.msk.bf16.gmra.mrb[76].mxu1 %vm1267_vm0, %v3075_v13 }
 0xa75   : > { %4403 = vmatprep.mubr.bf16.mxu1 %v17333_v56 }
 0xad9   : > { %v14944_v28 = vpop.f32.mrb[48].mxu1 }
 0xada   : > { %v14946_v2 = vpop.f32.mrb[49].mxu1 }
 0xadb   : > { %v14948_v62 = vpop.f32.mrb[50].mxu1 }
 0xadc   : > { %v14950_v30 = vpop.f32.mrb[51].mxu1 }
 0xb11   : > { %v14952_v53 = vpop.f32.mrb[52].mxu1 }
 0xb12   : > { %v14954_v0 = vpop.f32.mrb[53].mxu1 }
 0xb13   : > { %v14956_v35 = vpop.f32.mrb[54].mxu1 }
 0xb14   : > { %v14958_v21 = vpop.f32.mrb[55].mxu1 }
 0xb1f   : > { %v14960_v49 = vpop.f32.mrb[56].mxu1 }
 0xb20   : > { %v14962_v18 = vpop.f32.mrb[57].mxu1 }
 0xb21   : > { %v14964_v14 = vpop.f32.mrb[58].mxu1 }
 0xb22   : > { %v14966_v32 = vpop.f32.mrb[59].mxu1 }
 0xb27   : > { %v14968_v3 = vpop.f32.mrb[60].mxu1 }
 0xb28   : > { %v14970_v12 = vpop.f32.mrb[61].mxu1 }
 0xb29   : > { %v14972_v50 = vpop.f32.mrb[62].mxu1 }
 0xb2a   : > { %v14974_v63 = vpop.f32.mrb[63].mxu1 }
 0xb2f   : > { %v11661_v61 = vpop.f32.mrb[64].mxu1 }
 0xb30   : > { %v3247_v7 = vmul.f32 0.17677669, %v11661_v61  ;;  %v3182_v20 = vpop.f32.mrb[65].mxu1 }
 0xb31   : > { %v11662_v43 = vpop.f32.mrb[66].mxu1  ;;  %v3245_v52 = vmul.f32 0.17677669, %v3182_v20 }
 0xb32   : > { %3265 = vmax.xlane.f32.xlu0 %v3247_v7  ;;  %v3185_v41 = vpop.f32.mrb[67].mxu1  ;;  %v3248_v15 = vmul.f32 0.17677669, %v11662_v43 }
 0xb33   : > { %v3246_v31 = vmul.f32 0.17677669, %v3185_v41 }
 0xb35   : > { %3263 = vmax.xlane.f32.xlu1 %v3246_v31 }
 0xb36   : > { %3261 = vmax.xlane.f32.xlu0 %v3245_v52 }
 0xb37   : > { %v11665_v10 = vpop.f32.mrb[68].mxu1 }
 0xb38   : > { %v3198_v60 = vpop.f32.mrb[69].mxu1  ;;  %v3251_v37 = vmul.f32 0.17677669, %v11665_v10 }
 0xb39   : > { %v11666_v22 = vpop.f32.mrb[70].mxu1  ;;  %v3249_v1 = vmul.f32 0.17677669, %v3198_v60 }
 0xb3a   : > { %v3252_v39 = vmul.f32 0.17677669, %v11666_v22  ;;  %3267 = vmax.xlane.f32.xlu0 %v3248_v15  ;;  %v3201_v38 = vpop.f32.mrb[71].mxu1 }
 0xb3b   : > { %v14976_v5 = vmul.f32 0.17677669, %v3201_v38 }
 0xb3c   : > { %3275 = vmax.xlane.f32.xlu1 %v3252_v39 }
 0xb3e   : > { %3273 = vmax.xlane.f32.xlu0 %v3251_v37 }
 0xb3f   : > { %v11669_v9 = vpop.f32.mrb[72].mxu1 }
 0xb40   : > { %3271 = vmax.xlane.f32.xlu1 %v14976_v5  ;;  %v3214_v11 = vpop.f32.mrb[73].mxu1  ;;  %v14981_v34 = vmul.f32 0.17677669, %v11669_v9 }
 0xb41   : > { %v11670_v23 = vpop.f32.mrb[74].mxu1  ;;  %v14987_v55 = vmul.f32 0.17677669, %v3214_v11 }
 0xb42   : > { %v14979_v27 = vmul.f32 0.17677669, %v11670_v23  ;;  %3269 = vmax.xlane.f32.xlu0 %v3249_v1  ;;  %v3217_v29 = vpop.f32.mrb[75].mxu1 }
 0xb43   : > { %v14984_v46 = vmul.f32 0.17677669, %v3217_v29 }
 0xb44   : > { %3283 = vmax.xlane.f32.xlu1 %v14979_v27 }
 0xb46   : > { %3281 = vmax.xlane.f32.xlu0 %v14981_v34 }
 0xb47   : > { %v11673_v26 = vpop.f32.mrb[76].mxu1 }
 0xb48   : > { %3279 = vmax.xlane.f32.xlu1 %v14984_v46  ;;  %v3230_v54 = vpop.f32.mrb[77].mxu1  ;;  %v14991_v17 = vmul.f32 0.17677669, %v11673_v26 }
 0xb49   : > { %v11674_v59 = vpop.f32.mrb[78].mxu1  ;;  %v14994_v13 = vmul.f32 0.17677669, %v3230_v54 }
 0xb4a   : > { %3277 = vmax.xlane.f32.xlu0 %v14987_v55  ;;  %v3233_v47 = vpop.f32.mrb[79].mxu1  ;;  %v15001_v45 = vmul.f32 0.17677669, %v11674_v59 }
 0xb4b   : > { %v15004_v4 = vmul.f32 0.17677669, %v3233_v47 }
 0xb4e   : > { %3289 = vmax.xlane.f32.xlu0 %v14991_v17 }
 0xb52   : > { %3285 = vmax.xlane.f32.xlu0 %v14994_v13 }
 0xb59   : > { %3431 = vrot.lane.b32.xlu1 %v14230_v51, %s13548_s25 }
 0xb68   : > { %3429 = vrot.lane.b32.xlu0 %v14235_v57, %s13548_s25 }
 0xb7d   : > { %3291 = vmax.xlane.f32.xlu1 %v15001_v45 }
 0xb81   : > { %3287 = vmax.xlane.f32.xlu1 %v15004_v4 }
 0xbbf   : > { %v3266_v6 = vpop.xlane.xlu0 %3265 }
 0xbc0   : > { %v3295_v61 = vsub.f32 %v3247_v7, %v3266_v6 }
 0xbc2   : > { %v3313_v20 = vmul.f32 1.442695, %v3295_v61  ;;  %v3264_v41 = vpop.xlane.xlu1 %3263 }
 0xbc3   : > { %v3262_v43 = vpop.xlane.xlu0 %3261  ;;  %v3294_v51 = vsub.f32 %v3246_v31, %v3264_v41 }
 0xbc4   : > { %12720 = vpow2.f32 %v3313_v20  ;;  %v3293_v10 = vsub.f32 %v3245_v52, %v3262_v43 }
 0xbc5   : > { %v3311_v11 = vmul.f32 1.442695, %v3294_v51 }
 0xbc6   : > { %v3309_v60 = vmul.f32 1.442695, %v3293_v10 }
 0xbc7   : > { %v3268_v22 = vpop.xlane.xlu0 %3267 }
 0xbc8   : > { %12722 = vpow2.f32 %v3309_v60  ;;  %v3296_v57 = vsub.f32 %v3248_v15, %v3268_v22 }
 0xbc9   : > { %v3276_v38 = vpop.xlane.xlu1 %3275 }
 0xbca   : > { %v3315_v9 = vmul.f32 1.442695, %v3296_v57  ;;  %v3300_v23 = vsub.f32 %v3252_v39, %v3276_v38 }
 0xbcb   : > { %v3274_v29 = vpop.xlane.xlu0 %3273 }
 0xbcc   : > { %12724 = vpow2.f32 %v3315_v9  ;;  %v3299_v26 = vsub.f32 %v3251_v37, %v3274_v29  ;;  %v3323_v47 = vmul.f32 1.442695, %v3300_v23 }
 0xbcd   : > { %v3272_v54 = vpop.xlane.xlu1 %3271  ;;  %12726 = vpow2.f32 %v3311_v11 }
 0xbce   : > { %v15007_v59 = vpop.eup %12720  ;;  %v3321_v7 = vmul.f32 1.442695, %v3299_v26  ;;  %v3298_v31 = vsub.f32 %v14976_v5, %v3272_v54 }
 0xbcf   : > { %3345 = vadd.xlane.f32.xlu1 %v15007_v59  ;;  %v3270_v52 = vpop.xlane.xlu0 %3269 }
 0xbd0   : > { %12728 = vpow2.f32 %v3321_v7  ;;  %v3297_v15 = vsub.f32 %v3249_v1, %v3270_v52  ;;  %v3319_v37 = vmul.f32 1.442695, %v3298_v31 }
 0xbd1   : > { %12730 = vpow2.f32 %v3323_v47  ;;  %v3284_v10 = vpop.xlane.xlu1 %3283 }
 0xbd2   : > { %v15011_v6 = vpop.eup %12722  ;;  %v3317_v61 = vmul.f32 1.442695, %v3297_v15  ;;  %v3304_v29 = vsub.f32 %v14979_v27, %v3284_v10 }
 0xbd3   : > { %3341 = vadd.xlane.f32.xlu1 %v15011_v6  ;;  %v3282_v39 = vpop.xlane.xlu0 %3281 }
 0xbd4   : > { %12732 = vpow2.f32 %v3317_v61  ;;  %v3331_v7 = vmul.f32 1.442695, %v3304_v29  ;;  %v3303_v47 = vsub.f32 %v14981_v34, %v3282_v39 }
 0xbd5   : > { %12734 = vpow2.f32 %v3319_v37  ;;  %v3280_v22 = vpop.xlane.xlu1 %3279 }
 0xbd6   : > { %v15014_v20 = vpop.eup %12724  ;;  %v3302_v26 = vsub.f32 %v14984_v46, %v3280_v22  ;;  %v3329_v15 = vmul.f32 1.442695, %v3303_v47 }
 0xbd7   : > { %3347 = vadd.xlane.f32.xlu1 %v15014_v20  ;;  %v3278_v43 = vpop.xlane.xlu0 %3277  ;;  %v15017_v41 = vpop.eup %12726 }
 0xbd8   : > { %v3301_v23 = vsub.f32 %v14987_v55, %v3278_v43  ;;  %v3327_v52 = vmul.f32 1.442695, %v3302_v26 }
 0xbd9   : > { %v3432_v11 = vpop.permute.xlu1 %3431 }
 0xbda   : > { %v15019_v5 = vpop.eup %12728  ;;  %v3325_v54 = vmul.f32 1.442695, %v3301_v23 }
 0xbdb   : > { %3343 = vadd.xlane.f32.xlu1 %v15017_v41  ;;  %3353 = vadd.xlane.f32.xlu0 %v15019_v5  ;;  %v3290_v1 = vpop.xlane.xlu0 %3289  ;;  %v15023_v60 = vpop.eup %12730 }
 0xbdc   : > { %12736 = vpow2.f32 %v3325_v54  ;;  %v3307_v27 = vsub.f32 %v14991_v17, %v3290_v1 }
 0xbdd   : > { %12738 = vpow2.f32 %v3331_v7 }
 0xbde   : > { %v15025_v51 = vpop.eup %12732  ;;  %12740 = vpow2.f32 %v3327_v52  ;;  %v3337_v39 = vmul.f32 1.442695, %v3307_v27 }
 0xbdf   : > { %3355 = vadd.xlane.f32.xlu0 %v15023_v60  ;;  %3349 = vadd.xlane.f32.xlu1 %v15025_v51  ;;  %v3286_v57 = vpop.xlane.xlu0 %3285  ;;  %v15029_v38 = vpop.eup %12734  ;;  %12742 = vpow2.f32 %v3329_v15 }
 0xbe3   : > { %3351 = vadd.xlane.f32.xlu0 %v15029_v38  ;;  %v3430_v9 = vpop.permute.xlu0 %3429 }
 0xbe4   : > { %11683 = vmatprep.subr.bf16.mxu0 %v3430_v9 }
 0xbe5   : > { %11684 = vmatpush3.bf16.msra.mxu0 %v3430_v9 }
 0xbe6   : > { %11685 = vmatprep.subr.bf16.mxu0 %v3432_v11  ;;  %v15044_v43 = vpop.eup %12736 }
 0xbe7   : > { %v15047_v10 = vpop.eup %12738 }
 0xbe9   : > { %11686 = vmatpush3.bf16.msra.mxu0 %v3432_v11 }
 0xbf0   : > { %3435 = vrot.lane.b32.xlu1 %v14254_v58, %s13548_s25  ;;  %v3305_v58 = vsub.f32 %v14994_v13, %v3286_v57  ;;  %v15049_v13 = vpop.eup %12740 }
 0xbf1   : > { %v15053_v17 = vpop.eup %12742 }
 0xbf2   : > { %v3333_v46 = vmul.f32 1.442695, %v3305_v58 }
 0xbf9   : > { %3433 = vrot.lane.b32.xlu0 %v14259_v25, %s13548_s25 }
 0xc0a   : > { %v3292_v31 = vpop.xlane.xlu1 %3291 }
 0xc0b   : > { %v3308_v25 = vsub.f32 %v15001_v45, %v3292_v31 }
 0xc0d   : > { %v3339_v34 = vmul.f32 1.442695, %v3308_v25 }
 0xc0e   : > { %v3288_v61 = vpop.xlane.xlu1 %3287 }
 0xc0f   : > { %v3306_v55 = vsub.f32 %v15004_v4, %v3288_v61 }
 0xc11   : > { %v3335_v37 = vmul.f32 1.442695, %v3306_v55 }
 0xc13   : > { %12744 = vpow2.f32 %v3335_v37 }
 0xc14   : > { %3357 = vadd.xlane.f32.xlu1 %v15044_v43  ;;  %12746 = vpow2.f32 %v3333_v46 }
 0xc15   : > { %12748 = vpow2.f32 %v3339_v34 }
 0xc16   : > { %12750 = vpow2.f32 %v3337_v39 }
 0xc18   : > { %3359 = vadd.xlane.f32.xlu0 %v15049_v13  ;;  %3363 = vadd.xlane.f32.xlu1 %v15047_v10 }
 0xc1c   : > { %3361 = vadd.xlane.f32.xlu0 %v15053_v17 }
 0xc1d   : > { %v15056_v45 = vpop.eup %12744 }
 0xc1e   : > { %3367 = vadd.xlane.f32.xlu1 %v15056_v45  ;;  %v15059_v4 = vpop.eup %12746 }
 0xc1f   : > { %v15062_v1 = vpop.eup %12748 }
 0xc20   : > { %3365 = vadd.xlane.f32.xlu0 %v15059_v4  ;;  %v15065_v22 = vpop.eup %12750 }
 0xc22   : > { %3371 = vadd.xlane.f32.xlu1 %v15062_v1 }
 0xc24   : > { %3369 = vadd.xlane.f32.xlu0 %v15065_v22 }
 0xc33   : > { %2274 = vrot.lane.b32.xlu1 %v14737_v16, %s13548_s25 }
 0xc37   : > { %2276 = vrot.lane.b32.xlu1 %v14731_v8, %s13548_s25 }
 0xc3a   : > { %2272 = vrot.lane.b32.xlu0 %v14733_v48, %s13548_s25 }
 0xc3b   : > { %2278 = vrot.lane.b32.xlu1 %v14735_v44, %s13548_s25 }
 0xc3e   : > { %2915 = vrot.lane.b32.xlu0 %v14946_v2, %s13547_s22 }
 0xc3f   : > { %2917 = vrot.lane.b32.xlu1 %v14950_v30, %s13547_s22 }
 0xc42   : > { %2919 = vrot.lane.b32.xlu0 %v14944_v28, %s13547_s22 }
 0xc43   : > { %2921 = vrot.lane.b32.xlu1 %v14948_v62, %s13547_s22 }
 0xc46   : > { %2280 = vrot.lane.b32.xlu0 %v14741_v36, %s13548_s25 }
 0xc47   : > { %2282 = vrot.lane.b32.xlu1 %v14745_v33, %s13548_s25 }
 0xc4a   : > { %2284 = vrot.lane.b32.xlu0 %v14739_v19, %s13548_s25 }
 0xc4b   : > { %2286 = vrot.lane.b32.xlu1 %v14743_v42, %s13548_s25 }
 0xc4e   : > { %2923 = vrot.lane.b32.xlu0 %v14954_v0, %s13547_s22 }
 0xc4f   : > { %2925 = vrot.lane.b32.xlu1 %v14958_v21, %s13547_s22 }
 0xc52   : > { %2927 = vrot.lane.b32.xlu0 %v14952_v53, %s13547_s22 }
 0xc53   : > { %2929 = vrot.lane.b32.xlu1 %v14956_v35, %s13547_s22 }
 0xc56   : > { %2288 = vrot.lane.b32.xlu0 %v14749_v24, %s13548_s25 }
 0xc57   : > { %2290 = vrot.lane.b32.xlu1 %v14753_v40, %s13548_s25 }
 0xc5c   : > { %v3346_v8 = vpop.xlane.xlu1 %3345 }
 0xc60   : > { %v3342_v48 = vpop.xlane.xlu1 %3341 }
 0xc61   : > { %12752 = vrcp.f32 %v3342_v48 }
 0xc64   : > { %v3348_v44 = vpop.xlane.xlu1 %3347 }
 0xc68   : > { %v3344_v16 = vpop.xlane.xlu1 %3343  ;;  %v3354_v19 = vpop.xlane.xlu0 %3353 }
 0xc69   : > { %12754 = vrcp.f32 %v3344_v16 }
 0xc6a   : > { %12756 = vrcp.f32 %v3348_v44 }
 0xc6b   : > { %12758 = vrcp.f32 %v3346_v8  ;;  %v12753_v28 = vpop.eup %12752 }
 0xc6c   : > { %v3350_v36 = vpop.xlane.xlu1 %3349  ;;  %v3356_v42 = vpop.xlane.xlu0 %3355  ;;  %v3389_v62 = vmul.f32 %v12753_v28, %v15011_v6 }
 0xc6d   : > { %12760 = vrcp.f32 %v3350_v36 }
 0xc70   : > { %v3352_v33 = vpop.xlane.xlu0 %3351  ;;  %v3436_v0 = vpop.permute.xlu1 %3435 }
 0xc71   : > { %12762 = vrcp.f32 %v3352_v33 }
 0xc72   : > { %12764 = vrcp.f32 %v3356_v42 }
 0xc73   : > { %v12755_v24 = vpop.eup %12754  ;;  %12766 = vrcp.f32 %v3354_v19 }
 0xc74   : > { %v12757_v2 = vpop.eup %12756  ;;  %v3434_v40 = vpop.permute.xlu0 %3433  ;;  %v3390_v30 = vmul.f32 %v12755_v24, %v15017_v41 }
 0xc75   : > { %11687 = vmatprep.subr.bf16.mxu0 %v3434_v40  ;;  %v12759_v53 = vpop.eup %12758  ;;  %v3392_v21 = vmul.f32 %v12757_v2, %v15014_v20 }
 0xc76   : > { %11688 = vmatpush3.bf16.msra.mxu0 %v3434_v40  ;;  %v3405_v35 = vpack.c.bf16 %v3390_v30, %v3389_v62  ;;  %v3391_v9 = vmul.f32 %v12759_v53, %v15007_v59 }
 0xc77   : > { %11689 = vmatprep.subr.bf16.mxu0 %v3436_v0  ;;  %v12761_v57 = vpop.eup %12760 }
 0xc78   : > { %11691 = vmatprep.mubr.bf16.mxu0 %v3405_v35  ;;  %v3406_v23 = vpack.c.bf16 %v3392_v21, %v3391_v9  ;;  %v3393_v6 = vmul.f32 %v12761_v57, %v15025_v51 }
 0xc7a   : > { %11690 = vmatpush3.bf16.msra.mxu0 %v3436_v0 }
 0xc7b   : > { %v12763_v11 = vpop.eup %12762 }
 0xc7c   : > { %v12765_v29 = vpop.eup %12764  ;;  %v3394_v41 = vmul.f32 %v12763_v11, %v15029_v38 }
 0xc7d   : > { %11692 = vmatmul.mubr.bf16.vlgmr.msra.gmra.mrb[80].mxu0 %v3406_v23  ;;  %v12767_v26 = vpop.eup %12766  ;;  %v3396_v7 = vmul.f32 %v12765_v29, %v15023_v60  ;;  %v12256_v23 = vld [vmem:[#allocation11] sm:$0xff]   ;;  %v12257_v29 = vld [vmem:[#allocation11 + $0x8] sm:$0xff]  }
 0xc7e   : > { %v3407_v54 = vpack.c.bf16 %v3394_v41, %v3393_v6  ;;  %v3395_v20 = vmul.f32 %v12767_v26, %v15019_v5  ;;  %11707 = vmatprep.subr.bf16.mxu0 %v12256_v23  ;;  %v12258_v6 = vld [vmem:[#allocation11 + $0x10] sm:$0xff]   ;;  %v12259_v41 = vld [vmem:[#allocation11 + $0x18] sm:$0xff]   ;;  %v12260_v26 = vld [vmem:[#allocation11 + $0x20] sm:$0xff]  }
 0xc7f   : > { %11708 = vmatpush3.bf16.msra.mxu0 %v12256_v23 }
 0xc80   : > { %11695 = vmatprep.mubr.bf16.mxu0 %v3407_v54  ;;  %v3408_v47 = vpack.c.bf16 %v3396_v7, %v3395_v20  ;;  %11709 = vmatprep.subr.bf16.mxu0 %v12257_v29  ;;  %v12261_v54 = vld [vmem:[#allocation11 + $0x28] sm:$0xff]   ;;  %v12262_v7 = vld [vmem:[#allocation11 + $0x30] sm:$0xff]  }
 0xc83   : > { %11710 = vmatpush3.bf16.msra.mxu0 %v12257_v29 }
 0xc84   : > { %11711 = vmatprep.subr.bf16.mxu0 %v12258_v6 }
 0xc85   : > { %11696 = vmatmul.mubr.bf16.gmra.mrb[84].mxu0 %v3408_v47  ;;  %v12263_v47 = vld [vmem:[#allocation11 + $0x38] sm:$0xff]  }
 0xc87   : > { %11712 = vmatpush3.bf16.msra.mxu0 %v12258_v6 }
 0xc88   : > { %11713 = vmatprep.subr.bf16.mxu0 %v12259_v41 }
 0xc8b   : > { %11714 = vmatpush3.bf16.msra.mxu0 %v12259_v41 }
 0xc8c   : > { %11715 = vmatprep.subr.bf16.mxu0 %v12260_v26 }
 0xc8f   : > { %11716 = vmatpush3.bf16.msra.mxu0 %v12260_v26 }
 0xc90   : > { %11717 = vmatprep.subr.bf16.mxu0 %v12261_v54 }
 0xc93   : > { %11718 = vmatpush3.bf16.msra.mxu0 %v12261_v54 }
 0xc94   : > { %11719 = vmatprep.subr.bf16.mxu0 %v12262_v7 }
 0xc97   : > { %11720 = vmatpush3.bf16.msra.mxu0 %v12262_v7 }
 0xc98   : > { %11721 = vmatprep.subr.bf16.mxu0 %v12263_v47 }
 0xc9b   : > { %11722 = vmatpush3.bf16.msra.mxu0 %v12263_v47 }
 0xca1   : > { %v3358_v52 = vpop.xlane.xlu1 %3357 }
 0xca2   : > { %12768 = vrcp.f32 %v3358_v52 }
 0xca5   : > { %v3364_v59 = vpop.xlane.xlu1 %3363  ;;  %v3360_v31 = vpop.xlane.xlu0 %3359 }
 0xca6   : > { %12770 = vrcp.f32 %v3360_v31 }
 0xca7   : > { %12772 = vrcp.f32 %v3364_v59 }
 0xca9   : > { %v3362_v15 = vpop.xlane.xlu0 %3361 }
 0xcaa   : > { %12774 = vrcp.f32 %v3362_v15 }
 0xcab   : > { %v3368_v51 = vpop.xlane.xlu1 %3367 }
 0xcac   : > { %12776 = vrcp.f32 %v3368_v51  ;;  %v12769_v58 = vpop.eup %12768  ;;  %v17334_v51 = vld [vmem:[#allocation26_spill] sm:$0xff] }
 0xcad   : > { %v3366_v38 = vpop.xlane.xlu0 %3365  ;;  %v3397_v55 = vmul.f32 %v12769_v58, %v15044_v43 }
 0xcae   : > { %12778 = vrcp.f32 %v3366_v38 }
 0xcaf   : > { %v3372_v61 = vpop.xlane.xlu1 %3371 }
 0xcb0   : > { %12780 = vrcp.f32 %v3372_v61  ;;  %v12771_v60 = vpop.eup %12770  ;;  %v17335_v61 = vld [vmem:[#allocation27_spill] sm:$0xff] }
 0xcb1   : > { %v3370_v25 = vpop.xlane.xlu0 %3369  ;;  %v12773_v5 = vpop.eup %12772  ;;  %v3398_v27 = vmul.f32 %v12771_v60, %v15049_v13 }
 0xcb2   : > { %12782 = vrcp.f32 %v3370_v25  ;;  %v3400_v48 = vmul.f32 %v12773_v5, %v15047_v10  ;;  %v17336_v25 = vld [vmem:[#allocation29_spill] sm:$0xff] }
 0xcb3   : > { %v2275_v46 = vpop.permute.xlu1 %2274  ;;  %v3409_v34 = vpack.c.bf16 %v3398_v27, %v3397_v55 }
 0xcb4   : > { %v12775_v37 = vpop.eup %12774  ;;  %2322 = vst.msk [vmem:[#allocation4 + $0x8] sm:$0xff] %vm2320_vm1, %v2275_v46 }
 0xcb5   : > { %v2273_v39 = vpop.permute.xlu0 %2272  ;;  %v3399_v8 = vmul.f32 %v12775_v37, %v15053_v17  ;;  %11699 = vmatprep.mubr.bf16.mxu0 %v3409_v34  ;;  %v17339_v34 = vld [vmem:[#allocation30_spill] sm:$0xff] }
 0xcb6   : > { %v12777_v44 = vpop.eup %12776  ;;  %2321 = vst.msk [vmem:[#allocation4] sm:$0xff] %vm2320_vm1, %v2273_v39 }
 0xcb7   : > { %v2277_v16 = vpop.permute.xlu1 %2276  ;;  %v3410_v19 = vpack.c.bf16 %v3400_v48, %v3399_v8  ;;  %v3402_v42 = vmul.f32 %v12777_v44, %v15056_v45 }
 0xcb8   : > { %v12779_v43 = vpop.eup %12778  ;;  %2323 = vst.msk [vmem:[#allocation4 + $0x10] sm:$0xff] %vm2320_vm1, %v2277_v16 }
 0xcb9   : > { %11700 = vmatmul.mubr.bf16.gmra.mrb[88].mxu0 %v3410_v19  ;;  %v2916_v13 = vpop.permute.xlu0 %2915  ;;  %v3401_v36 = vmul.f32 %v12779_v43, %v15059_v4 }
 0xcba   : > { %v12781_v33 = vpop.eup %12780  ;;  %2964 = vst.msk [vmem:[#allocation4] sm:$0xff] %vm2963_vm2, %v2916_v13 }
 0xcbb   : > { %v2279_v10 = vpop.permute.xlu1 %2278  ;;  %v3411_v17 = vpack.c.bf16 %v3402_v42, %v3401_v36  ;;  %v3404_v40 = vmul.f32 %v12781_v33, %v15062_v1 }
 0xcbc   : > { %v12783_v28 = vpop.eup %12782  ;;  %2324 = vst.msk [vmem:[#allocation4 + $0x18] sm:$0xff] %vm2320_vm1, %v2279_v10 }
 0xcbd   : > { %11703 = vmatprep.mubr.bf16.mxu0 %v3411_v17  ;;  %v2920_v24 = vpop.permute.xlu0 %2919  ;;  %v3403_v2 = vmul.f32 %v12783_v28, %v15065_v22 }
 0xcbe   : > { %2966 = vst.msk [vmem:[#allocation4 + $0x10] sm:$0xff] %vm2963_vm2, %v2920_v24 }
 0xcbf   : > { %v2918_v62 = vpop.permute.xlu1 %2917  ;;  %v3412_v4 = vpack.c.bf16 %v3404_v40, %v3403_v2 }
 0xcc0   : > { %2965 = vst.msk [vmem:[#allocation4 + $0x8] sm:$0xff] %vm2963_vm2, %v2918_v62 }
 0xcc1   : > { %11704 = vmatmul.mubr.bf16.gmra.mrb[92].mxu0 %v3412_v4  ;;  %v2281_v45 = vpop.permute.xlu0 %2280 }
 0xcc2   : > { %2325 = vst.msk [vmem:[#allocation4 + $0x20] sm:$0xff] %vm2320_vm1, %v2281_v45 }
 0xcc3   : > { %v2922_v30 = vpop.permute.xlu1 %2921 }
 0xcc4   : > { %2967 = vst.msk [vmem:[#allocation4 + $0x18] sm:$0xff] %vm2963_vm2, %v2922_v30 }
 0xcc5   : > { %v2285_v53 = vpop.permute.xlu0 %2284 }
 0xcc6   : > { %2327 = vst.msk [vmem:[#allocation4 + $0x30] sm:$0xff] %vm2320_vm1, %v2285_v53 }
 0xcc7   : > { %v2283_v0 = vpop.permute.xlu1 %2282 }
 0xcc8   : > { %2326 = vst.msk [vmem:[#allocation4 + $0x28] sm:$0xff] %vm2320_vm1, %v2283_v0 }
 0xcc9   : > { %v2924_v1 = vpop.permute.xlu0 %2923 }
 0xcca   : > { %2968 = vst.msk [vmem:[#allocation4 + $0x20] sm:$0xff] %vm2963_vm2, %v2924_v1 }
 0xccb   : > { %v2287_v22 = vpop.permute.xlu1 %2286 }
 0xccc   : > { %2328 = vst.msk [vmem:[#allocation4 + $0x38] sm:$0xff] %vm2320_vm1, %v2287_v22 }
 0xccd   : > { %v2928_v35 = vpop.permute.xlu0 %2927 }
 0xcce   : > { %2970 = vst.msk [vmem:[#allocation4 + $0x30] sm:$0xff] %vm2963_vm2, %v2928_v35 }
 0xccf   : > { %v2926_v21 = vpop.permute.xlu1 %2925 }
 0xcd0   : > { %2969 = vst.msk [vmem:[#allocation4 + $0x28] sm:$0xff] %vm2963_vm2, %v2926_v21 }
 0xcd1   : > { %v2289_v57 = vpop.permute.xlu0 %2288 }
 0xcd2   : > { %2329 = vst.msk [vmem:[#allocation4 + $0x40] sm:$0xff] %vm2320_vm1, %v2289_v57 }
 0xcd3   : > { %v2930_v9 = vpop.permute.xlu1 %2929 }
 0xcd4   : > { %2971 = vst.msk [vmem:[#allocation4 + $0x38] sm:$0xff] %vm2963_vm2, %v2930_v9 }
 0xcd7   : > { %v2291_v11 = vpop.permute.xlu1 %2290 }
 0xcd8   : > { %2330 = vst.msk [vmem:[#allocation4 + $0x48] sm:$0xff] %vm2320_vm1, %v2291_v11 }
 0xd50   : > { %v11693_v20 = vpop.f32.mrb[80].mxu0 }
 0xd51   : > { %3562 = vrot.lane.b32.xlu0 %v11693_v20, %s13546_s18  ;;  %v3479_v52 = vpop.f32.mrb[81].mxu0 }
 0xd52   : > { %v11694_v59 = vpop.f32.mrb[82].mxu0 }
 0xd53   : > { %3564 = vrot.lane.b32.xlu1 %v11694_v59, %s13546_s18  ;;  %v3482_v31 = vpop.f32.mrb[83].mxu0 }
 0xd55   : > { %3558 = vrot.lane.b32.xlu0 %v3479_v52, %s13546_s18 }
 0xd57   : > { %3560 = vrot.lane.b32.xlu1 %v3482_v31, %s13546_s18 }
 0xd58   : > { %v11697_v15 = vpop.f32.mrb[84].mxu0 }
 0xd59   : > { %2292 = vrot.lane.b32.xlu0 %v17334_v51, %s13548_s25  ;;  %v3495_v38 = vpop.f32.mrb[85].mxu0 }
 0xd5a   : > { %v11698_v58 = vpop.f32.mrb[86].mxu0 }
 0xd5b   : > { %2294 = vrot.lane.b32.xlu1 %v17335_v61, %s13548_s25  ;;  %v3498_v60 = vpop.f32.mrb[87].mxu0 }
 0xd5d   : > { %2931 = vrot.lane.b32.xlu0 %v14962_v18, %s13547_s22  ;;  %v17337_v18 = vld [vmem:[#allocation31_spill] sm:$0xff] }
 0xd5f   : > { %2933 = vrot.lane.b32.xlu1 %v14966_v32, %s13547_s22 }
 0xd61   : > { %3570 = vrot.lane.b32.xlu0 %v11697_v15, %s13546_s18 }
 0xd63   : > { %3572 = vrot.lane.b32.xlu1 %v11698_v58, %s13546_s18 }
 0xd65   : > { %3566 = vrot.lane.b32.xlu0 %v3495_v38, %s13546_s18 }
 0xd67   : > { %3568 = vrot.lane.b32.xlu1 %v3498_v60, %s13546_s18 }
 0xd69   : > { %2935 = vrot.lane.b32.xlu0 %v14960_v49, %s13547_s22 }
 0xd6b   : > { %2937 = vrot.lane.b32.xlu1 %v14964_v14, %s13547_s22  ;;  %v17338_v14 = vld [vmem:[#allocation28_spill] sm:$0xff] }
 0xd6d   : > { %2296 = vrot.lane.b32.xlu0 %v17336_v25, %s13548_s25 }
 0xd6f   : > { %2298 = vrot.lane.b32.xlu1 %v17337_v18, %s13548_s25 }
 0xd8c   : > { %v11701_v32 = vpop.f32.mrb[88].mxu0 }
 0xd8d   : > { %3578 = vrot.lane.b32.xlu0 %v11701_v32, %s13546_s18  ;;  %v3511_v5 = vpop.f32.mrb[89].mxu0 }
 0xd8e   : > { %v11702_v55 = vpop.f32.mrb[90].mxu0 }
 0xd8f   : > { %3580 = vrot.lane.b32.xlu1 %v11702_v55, %s13546_s18  ;;  %v3514_v27 = vpop.f32.mrb[91].mxu0 }
 0xd91   : > { %3574 = vrot.lane.b32.xlu0 %v3511_v5, %s13546_s18  ;;  %v15216_v5 = vld [vmem:[%s17256_s4] ss:$0 sm:$0xff] }
 0xd93   : > { %3576 = vrot.lane.b32.xlu1 %v3514_v27, %s13546_s18 }
 0xd94   : > { %v11705_v49 = vpop.f32.mrb[92].mxu0 }
 0xd95   : > { %2300 = vrot.lane.b32.xlu0 %v17338_v14, %s13548_s25  ;;  %v3527_v46 = vpop.f32.mrb[93].mxu0 }
 0xd96   : > { %v11706_v37 = vpop.f32.mrb[94].mxu0 }
 0xd97   : > { %2302 = vrot.lane.b32.xlu1 %v17339_v34, %s13548_s25  ;;  %v3530_v39 = vpop.f32.mrb[95].mxu0  ;;  %v13296_v34 = vld [vmem:[%s13816_s29] sm:$0xff] }
 0xd99   : > { %2939 = vrot.lane.b32.xlu0 %v14970_v12, %s13547_s22 }
 0xd9b   : > { %2941 = vrot.lane.b32.xlu1 %v14974_v63, %s13547_s22 }
 0xd9d   : > { %2943 = vrot.lane.b32.xlu0 %v14968_v3, %s13547_s22 }
 0xd9f   : > { %2945 = vrot.lane.b32.xlu1 %v14972_v50, %s13547_s22 }
 0xda1   : > { %3582 = vrot.lane.b32.xlu0 %v3527_v46, %s13546_s18 }
 0xda3   : > { %3584 = vrot.lane.b32.xlu1 %v3530_v39, %s13546_s18 }
 0xda5   : > { %3586 = vrot.lane.b32.xlu0 %v11705_v49, %s13546_s18 }
 0xda7   : > { %3588 = vrot.lane.b32.xlu1 %v11706_v37, %s13546_s18 }
 0xdc3   : > { %v3563_v8 = vpop.permute.xlu0 %3562 }
 0xdc4   : > { %3609 = vst.msk [vmem:[#allocation4 + $0x10] sm:$0xff] %vm3606_vm3, %v3563_v8 }
 0xdc5   : > { %v3565_v12 = vpop.permute.xlu1 %3564 }
 0xdc6   : > { %3610 = vst.msk [vmem:[#allocation4 + $0x18] sm:$0xff] %vm3606_vm3, %v3565_v12  ;;  %v13297_v12 = vld [vmem:[%s13816_s29 + $0x8] sm:$0xff] }
 0xdc7   : > { %v3559_v63 = vpop.permute.xlu0 %3558 }
 0xdc8   : > { %3607 = vst.msk [vmem:[#allocation4] sm:$0xff] %vm3606_vm3, %v3559_v63 }
 0xdc9   : > { %v3561_v3 = vpop.permute.xlu1 %3560 }
 0xdca   : > { %3608 = vst.msk [vmem:[#allocation4 + $0x8] sm:$0xff] %vm3606_vm3, %v3561_v3  ;;  %v13298_v3 = vld [vmem:[%s13816_s29 + $0x10] sm:$0xff] }
 0xdcb   : > { %v2293_v50 = vpop.permute.xlu0 %2292  ;;  %v3625_v42 = vld [vmem:[#allocation4 + $0x10] sm:$0xff] }
 0xdcc   : > { %2331 = vst.msk [vmem:[#allocation4 + $0x50] sm:$0xff] %vm2320_vm1, %v2293_v50 }
 0xdcd   : > { %v2295_v48 = vpop.permute.xlu1 %2294  ;;  %v3626_v16 = vld [vmem:[#allocation4 + $0x18] sm:$0xff] }
 0xdce   : > { %2332 = vst.msk [vmem:[#allocation4 + $0x58] sm:$0xff] %vm2320_vm1, %v2295_v48  ;;  %v3640_v10 = vpack.c.bf16 %v3626_v16, %v3625_v42 }
 0xdcf   : > { %v2932_v44 = vpop.permute.xlu0 %2931  ;;  %v3623_v43 = vld [vmem:[#allocation4] sm:$0xff] }
 0xdd0   : > { %2972 = vst.msk [vmem:[#allocation4 + $0x40] sm:$0xff] %vm2963_vm2, %v2932_v44  ;;  %v13299_v44 = vld [vmem:[%s13816_s29 + $0x18] sm:$0xff] }
 0xdd1   : > { %v2934_v19 = vpop.permute.xlu1 %2933  ;;  %v3624_v13 = vld [vmem:[#allocation4 + $0x8] sm:$0xff] }
 0xdd2   : > { %2973 = vst.msk [vmem:[#allocation4 + $0x48] sm:$0xff] %vm2963_vm2, %v2934_v19  ;;  %v3639_v36 = vpack.c.bf16 %v3624_v13, %v3623_v43 }
 0xdd3   : > { %v3571_v33 = vpop.permute.xlu0 %3570 }
 0xdd4   : > { %3613 = vst.msk [vmem:[#allocation4 + $0x30] sm:$0xff] %vm3606_vm3, %v3571_v33  ;;  %11723 = vmatprep.mubr.bf16.mxu0 %v3639_v36 }
 0xdd5   : > { %v3573_v17 = vpop.permute.xlu1 %3572  ;;  %11724 = vmatmul.mubr.bf16.vlgmr.msra.gmra.mrb[96].mxu0 %v3640_v10  ;;  %v13300_v10 = vld [vmem:[%s13816_s29 + $0x20] sm:$0xff] }
 0xdd6   : > { %3614 = vst.msk [vmem:[#allocation4 + $0x38] sm:$0xff] %vm3606_vm3, %v3573_v17 }
 0xdd7   : > { %v3567_v28 = vpop.permute.xlu0 %3566 }
 0xdd8   : > { %3611 = vst.msk [vmem:[#allocation4 + $0x20] sm:$0xff] %vm3606_vm3, %v3567_v28 }
 0xdd9   : > { %v3569_v24 = vpop.permute.xlu1 %3568 }
 0xdda   : > { %3612 = vst.msk [vmem:[#allocation4 + $0x28] sm:$0xff] %vm3606_vm3, %v3569_v24 }
 0xddb   : > { %v2936_v2 = vpop.permute.xlu0 %2935  ;;  %v3629_v1 = vld [vmem:[#allocation4 + $0x30] sm:$0xff] }
 0xddc   : > { %2974 = vst.msk [vmem:[#allocation4 + $0x50] sm:$0xff] %vm2963_vm2, %v2936_v2  ;;  %v13301_v2 = vld [vmem:[%s13816_s29 + $0x28] sm:$0xff] }
 0xddd   : > { %v2938_v40 = vpop.permute.xlu1 %2937  ;;  %v3630_v4 = vld [vmem:[#allocation4 + $0x38] sm:$0xff] }
 0xdde   : > { %2975 = vst.msk [vmem:[#allocation4 + $0x58] sm:$0xff] %vm2963_vm2, %v2938_v40  ;;  %v3642_v22 = vpack.c.bf16 %v3630_v4, %v3629_v1 }
 0xddf   : > { %v2297_v62 = vpop.permute.xlu0 %2296  ;;  %v3627_v30 = vld [vmem:[#allocation4 + $0x20] sm:$0xff] }
 0xde0   : > { %2333 = vst.msk [vmem:[#allocation4 + $0x60] sm:$0xff] %vm2320_vm1, %v2297_v62  ;;  %v13302_v62 = vld [vmem:[%s13816_s29 + $0x30] sm:$0xff] }
 0xde1   : > { %v2299_v45 = vpop.permute.xlu1 %2298  ;;  %v3628_v53 = vld [vmem:[#allocation4 + $0x28] sm:$0xff] }
 0xde2   : > { %2334 = vst.msk [vmem:[#allocation4 + $0x68] sm:$0xff] %vm2320_vm1, %v2299_v45  ;;  %v3641_v0 = vpack.c.bf16 %v3628_v53, %v3627_v30  ;;  %v13303_v45 = vld [vmem:[%s13816_s29 + $0x38] sm:$0xff] }
 0xde4   : > { %11727 = vmatprep.mubr.bf16.mxu0 %v3641_v0 }
 0xde5   : > { %11728 = vmatmul.mubr.bf16.gmra.mrb[100].mxu0 %v3642_v22 }
 0xdff   : > { %v3579_v35 = vpop.permute.xlu0 %3578 }
 0xe00   : > { %3617 = vst.msk [vmem:[#allocation4 + $0x50] sm:$0xff] %vm3606_vm3, %v3579_v35 }
 0xe01   : > { %v3581_v21 = vpop.permute.xlu1 %3580 }
 0xe02   : > { %3618 = vst.msk [vmem:[#allocation4 + $0x58] sm:$0xff] %vm3606_vm3, %v3581_v21 }
 0xe03   : > { %v3575_v57 = vpop.permute.xlu0 %3574 }
 0xe04   : > { %3615 = vst.msk [vmem:[#allocation4 + $0x40] sm:$0xff] %vm3606_vm3, %v3575_v57  ;;  %v13304_v57 = vld [vmem:[%s13816_s29 + $0x40] sm:$0xff] }
 0xe05   : > { %v3577_v9 = vpop.permute.xlu1 %3576 }
 0xe06   : > { %3616 = vst.msk [vmem:[#allocation4 + $0x48] sm:$0xff] %vm3606_vm3, %v3577_v9 }
 0xe07   : > { %v2301_v11 = vpop.permute.xlu0 %2300  ;;  %v3633_v20 = vld [vmem:[#allocation4 + $0x50] sm:$0xff] }
 0xe08   : > { %2335 = vst.msk [vmem:[#allocation4 + $0x70] sm:$0xff] %vm2320_vm1, %v2301_v11 }
 0xe09   : > { %v2303_v23 = vpop.permute.xlu1 %2302  ;;  %v3634_v6 = vld [vmem:[#allocation4 + $0x58] sm:$0xff] }
 0xe0a   : > { %2336 = vst.msk [vmem:[#allocation4 + $0x78] sm:$0xff] %vm2320_vm1, %v2303_v23  ;;  %v3644_v52 = vpack.c.bf16 %v3634_v6, %v3633_v20 }
 0xe0b   : > { %v2940_v29 = vpop.permute.xlu0 %2939  ;;  %v3631_v26 = vld [vmem:[#allocation4 + $0x40] sm:$0xff] }
 0xe0c   : > { %2976 = vst.msk [vmem:[#allocation4 + $0x60] sm:$0xff] %vm2963_vm2, %v2940_v29  ;;  %v13305_v29 = vld [vmem:[%s13816_s29 + $0x48] sm:$0xff] }
 0xe0d   : > { %v2942_v41 = vpop.permute.xlu1 %2941  ;;  %v3632_v54 = vld [vmem:[#allocation4 + $0x48] sm:$0xff] }
 0xe0e   : > { %2977 = vst.msk [vmem:[#allocation4 + $0x68] sm:$0xff] %vm2963_vm2, %v2942_v41  ;;  %v3643_v7 = vpack.c.bf16 %v3632_v54, %v3631_v26  ;;  %v13306_v41 = vld [vmem:[%s13816_s29 + $0x50] sm:$0xff]  ;;  %v13307_v54 = vld [vmem:[%s13816_s29 + $0x58] sm:$0xff] }
 0xe0f   : > { %v2944_v47 = vpop.permute.xlu0 %2943 }
 0xe10   : > { %2978 = vst.msk [vmem:[#allocation4 + $0x70] sm:$0xff] %vm2963_vm2, %v2944_v47  ;;  %11731 = vmatprep.mubr.bf16.mxu0 %v3643_v7 }
 0xe11   : > { %v2946_v59 = vpop.permute.xlu1 %2945  ;;  %11732 = vmatmul.mubr.bf16.gmra.mrb[104].mxu0 %v3644_v52 }
 0xe12   : > { %2979 = vst.msk [vmem:[#allocation4 + $0x78] sm:$0xff] %vm2963_vm2, %v2946_v59 }
 0xe13   : > { %v3583_v31 = vpop.permute.xlu0 %3582 }
 0xe14   : > { %3619 = vst.msk [vmem:[#allocation4 + $0x60] sm:$0xff] %vm3606_vm3, %v3583_v31 }
 0xe15   : > { %v3585_v15 = vpop.permute.xlu1 %3584 }
 0xe16   : > { %3620 = vst.msk [vmem:[#allocation4 + $0x68] sm:$0xff] %vm3606_vm3, %v3585_v15 }
 0xe17   : > { %v3587_v51 = vpop.permute.xlu0 %3586 }
 0xe18   : > { %3621 = vst.msk [vmem:[#allocation4 + $0x70] sm:$0xff] %vm3606_vm3, %v3587_v51  ;;  %v13308_v51 = vld [vmem:[%s13816_s29 + $0x60] sm:$0xff] }
 0xe19   : > { %v3589_v38 = vpop.permute.xlu1 %3588 }
 0xe1a   : > { %3622 = vst.msk [vmem:[#allocation4 + $0x78] sm:$0xff] %vm3606_vm3, %v3589_v38 }
 0xe1b   : > { %v3635_v58 = vld [vmem:[#allocation4 + $0x60] sm:$0xff] }
 0xe1d   : > { %v3636_v61 = vld [vmem:[#allocation4 + $0x68] sm:$0xff] }
 0xe1e   : > { %v3645_v60 = vpack.c.bf16 %v3636_v61, %v3635_v58 }
 0xe1f   : > { %v3637_v25 = vld [vmem:[#allocation4 + $0x70] sm:$0xff] }
 0xe20   : > { %11735 = vmatprep.mubr.bf16.mxu0 %v3645_v60  ;;  %v13309_v60 = vld [vmem:[%s13816_s29 + $0x68] sm:$0xff] }
 0xe21   : > { %v3638_v18 = vld [vmem:[#allocation4 + $0x78] sm:$0xff] }
 0xe22   : > { %v3646_v32 = vpack.c.bf16 %v3638_v18, %v3637_v25  ;;  %v13310_v18 = vld [vmem:[%s13816_s29 + $0x70] sm:$0xff] }
 0xe24   : > { %11736 = vmatmul.mubr.bf16.gmra.mrb[108].mxu0 %v3646_v32 }
 0xe25   : > { %4516 = vmatprep.mubr.bf16.mxu0 %v17333_v56 }
 0xea8   : > { %v11725_v55 = vpop.f32.mrb[96].mxu0 }
 0xea9   : > { %v3751_v27 = vpop.f32.mrb[97].mxu0  ;;  %v3760_v37 = vadd.f32 %v11725_v55, %v15216_v5  ;;  %v13311_v55 = vld [vmem:[%s13816_s29 + $0x78] sm:$0xff] }
 0xeaa   : > { %v3752_v49 = vadd.f32 %v15216_v5, %v3751_v27  ;;  %v11726_v14 = vpop.f32.mrb[98].mxu0 }
 0xeab   : > { %v3754_v46 = vpop.f32.mrb[99].mxu0  ;;  %v15229_v50 = vadd.f32 %v13298_v3, %v3760_v37  ;;  %v3763_v48 = vadd.f32 %v11726_v14, %v15216_v5 }
 0xeac   : > { %v15221_v39 = vadd.f32 %v13296_v34, %v3752_v49  ;;  %v3755_v8 = vadd.f32 %v15216_v5, %v3754_v46 }
 0xead   : > { %v15235_v16 = vadd.f32 %v13299_v44, %v3763_v48 }
 0xeae   : > { %v15225_v63 = vadd.f32 %v13297_v12, %v3755_v8  ;;  %3862 = vadd.xlane.f32.xlu0 %v15221_v39 }
 0xeb0   : > { %3864 = vadd.xlane.f32.xlu1 %v15225_v63 }
 0xeb2   : > { %3866 = vadd.xlane.f32.xlu0 %v15229_v50 }
 0xeb6   : > { %3868 = vadd.xlane.f32.xlu0 %v15235_v16 }
 0xeb8   : > { %v11729_v19 = vpop.f32.mrb[100].mxu0 }
 0xeb9   : > { %v3767_v43 = vpop.f32.mrb[101].mxu0  ;;  %v3776_v33 = vadd.f32 %v11729_v19, %v15216_v5 }
 0xeba   : > { %v3768_v13 = vadd.f32 %v15216_v5, %v3767_v43  ;;  %v11730_v36 = vpop.f32.mrb[102].mxu0 }
 0xebb   : > { %v3770_v42 = vpop.f32.mrb[103].mxu0  ;;  %v3779_v24 = vadd.f32 %v11730_v36, %v15216_v5  ;;  %v15250_v4 = vadd.f32 %v13302_v62, %v3776_v33 }
 0xebc   : > { %v15241_v17 = vadd.f32 %v13300_v10, %v3768_v13  ;;  %v3771_v28 = vadd.f32 %v15216_v5, %v3770_v42 }
 0xebd   : > { %v15254_v30 = vadd.f32 %v13303_v45, %v3779_v24 }
 0xebe   : > { %v15246_v40 = vadd.f32 %v13301_v2, %v3771_v28  ;;  %3870 = vadd.xlane.f32.xlu0 %v15241_v17 }
 0xec0   : > { %3872 = vadd.xlane.f32.xlu1 %v15246_v40 }
 0xec2   : > { %3874 = vadd.xlane.f32.xlu0 %v15250_v4 }
 0xec4   : > { %3876 = vadd.xlane.f32.xlu1 %v15254_v30 }
 0xee4   : > { %v11733_v53 = vpop.f32.mrb[104].mxu0 }
 0xee5   : > { %v3783_v0 = vpop.f32.mrb[105].mxu0  ;;  %v3792_v21 = vadd.f32 %v11733_v53, %v15216_v5 }
 0xee6   : > { %v3784_v1 = vadd.f32 %v15216_v5, %v3783_v0  ;;  %v11734_v22 = vpop.f32.mrb[106].mxu0 }
 0xee7   : > { %v3786_v35 = vpop.f32.mrb[107].mxu0  ;;  %v3795_v23 = vadd.f32 %v11734_v22, %v15216_v5  ;;  %v15270_v26 = vadd.f32 %v13306_v41, %v3792_v21  ;;  %v12269_v41 = vld [vmem:[#allocation12 + $0xc] ss:$16 sps:$4 sm:$0xff]  }
 0xee8   : > { %v15261_v9 = vadd.f32 %v13304_v57, %v3784_v1  ;;  %v3787_v11 = vadd.f32 %v15216_v5, %v3786_v35  ;;  %4484 = vmatprep.subr.bf16.mxu0 %v12269_v41 }
 0xee9   : > { %v15274_v7 = vadd.f32 %v13307_v54, %v3795_v23  ;;  %v12264_v54 = vld [vmem:[#allocation12] ss:$16 sps:$4 sm:$0xff]  }
 0xeea   : > { %v15266_v6 = vadd.f32 %v13305_v29, %v3787_v11  ;;  %3878 = vadd.xlane.f32.xlu0 %v15261_v9  ;;  %v12266_v29 = vld [vmem:[#allocation12 + $0x4] ss:$16 sps:$4 sm:$0xff]  }
 0xeeb   : > { %4371 = vmatprep.subr.bf16.mxu1 %v12266_v29 }
 0xeec   : > { %3880 = vadd.xlane.f32.xlu1 %v15266_v6  ;;  %4372 = vmatpush1.bf16.msra.mxu1 %v12264_v54 }
 0xeee   : > { %3882 = vadd.xlane.f32.xlu0 %v15270_v26 }
 0xef0   : > { %3884 = vadd.xlane.f32.xlu1 %v15274_v7 }
 0xef7   : > { %v11737_v20 = vpop.f32.mrb[108].mxu0 }
 0xef8   : > { %v3799_v47 = vpop.f32.mrb[109].mxu0  ;;  %v3808_v15 = vadd.f32 %v11737_v20, %v15216_v5  ;;  %v12267_v20 = vld [vmem:[#allocation12 + $0x8] ss:$16 sps:$4 sm:$0xff]  }
 0xef9   : > { %v3800_v52 = vadd.f32 %v15216_v5, %v3799_v47  ;;  %v11738_v59 = vpop.f32.mrb[110].mxu0  ;;  %4485 = vmatpush1.bf16.msra.mxu0 %v12267_v20  ;;  %v12272_v47 = vld [vmem:[#allocation12 + $0x24] ss:$16 sps:$4 sm:$0xff]  }
 0xefa   : > { %v3802_v31 = vpop.f32.mrb[111].mxu0  ;;  %v3811_v61 = vadd.f32 %v11738_v59, %v15216_v5  ;;  %v15290_v32 = vadd.f32 %v13310_v18, %v3808_v15  ;;  %v12270_v59 = vld [vmem:[#allocation12 + $0x20] ss:$16 sps:$4 sm:$0xff]   ;;  %4373 = vmatprep.subr.bf16.mxu1 %v12272_v47  ;;  %v12278_v15 = vld [vmem:[#allocation12 + $0x44] ss:$16 sps:$4 sm:$0xff]  }
 0xefb   : > { %v15281_v38 = vadd.f32 %v13308_v51, %v3800_v52  ;;  %v3803_v58 = vadd.f32 %v15216_v5, %v3802_v31  ;;  %v12275_v52 = vld [vmem:[#allocation12 + $0x2c] ss:$16 sps:$4 sm:$0xff]   ;;  %v12273_v31 = vld [vmem:[#allocation12 + $0x28] ss:$16 sps:$4 sm:$0xff]   ;;  %4374 = vmatpush1.bf16.msra.mxu1 %v12270_v59 }
 0xefc   : > { %v15294_v27 = vadd.f32 %v13311_v55, %v3811_v61  ;;  %4486 = vmatprep.subr.bf16.mxu0 %v12275_v52  ;;  %v12281_v51 = vld [vmem:[#allocation12 + $0x4c] ss:$16 sps:$4 sm:$0xff]   ;;  %v12279_v61 = vld [vmem:[#allocation12 + $0x48] ss:$16 sps:$4 sm:$0xff]   ;;  %4375 = vmatprep.subr.bf16.mxu1 %v12278_v15  ;;  %v12282_v55 = vld [vmem:[#allocation12 + $0x60] ss:$16 sps:$4 sm:$0xff]  }
 0xefd   : > { %v15286_v25 = vadd.f32 %v13309_v60, %v3803_v58  ;;  %3886 = vadd.xlane.f32.xlu0 %v15281_v38  ;;  %4487 = vmatpush1.bf16.msra.mxu0 %v12273_v31  ;;  %v12276_v58 = vld [vmem:[#allocation12 + $0x40] ss:$16 sps:$4 sm:$0xff]   ;;  %v12284_v60 = vld [vmem:[#allocation12 + $0x64] ss:$16 sps:$4 sm:$0xff]   ;;  %v12287_v18 = vld [vmem:[#allocation12 + $0x6c] ss:$16 sps:$4 sm:$0xff]  }
 0xefe   : > { %4488 = vmatprep.subr.bf16.mxu0 %v12281_v51 }
 0xeff   : > { %3888 = vadd.xlane.f32.xlu1 %v15286_v25  ;;  %4376 = vmatpush1.bf16.msra.mxu1 %v12276_v58 }
 0xf00   : > { %4377 = vmatprep.subr.bf16.mxu1 %v12284_v60 }
 0xf01   : > { %3890 = vadd.xlane.f32.xlu0 %v15290_v32  ;;  %4489 = vmatpush1.bf16.msra.mxu0 %v12279_v61 }
 0xf02   : > { %4490 = vmatprep.subr.bf16.mxu0 %v12287_v18 }
 0xf03   : > { %3892 = vadd.xlane.f32.xlu1 %v15294_v27  ;;  %4378 = vmatpush1.bf16.msra.mxu1 %v12282_v55 }
 0xf3b   : > { %v3863_v49 = vpop.xlane.xlu0 %3862 }
 0xf3c   : > { %v3894_v14 = vmul.f32 0.0078125, %v3863_v49  ;;  %v12285_v49 = vld [vmem:[#allocation12 + $0x68] ss:$16 sps:$4 sm:$0xff]  }
 0xf3d   : > { %v3865_v5 = vpop.xlane.xlu1 %3864  ;;  %4491 = vmatpush1.bf16.msra.mxu0 %v12285_v49 }
 0xf3e   : > { %v15299_v46 = vsub.f32 %v15221_v39, %v3894_v14  ;;  %v3895_v37 = vmul.f32 0.0078125, %v3865_v5  ;;  %v12290_v14 = vld [vmem:[#allocation12 + $0x84] ss:$16 sps:$4 sm:$0xff]   ;;  %v12293_v5 = vld [vmem:[#allocation12 + $0x8c] ss:$16 sps:$4 sm:$0xff]  }
 0xf3f   : > { %v3867_v34 = vpop.xlane.xlu0 %3866  ;;  %4379 = vmatprep.subr.bf16.mxu1 %v12290_v14  ;;  %4492 = vmatprep.subr.bf16.mxu0 %v12293_v5 }
 0xf40   : > { %v15302_v8 = vsub.f32 %v15225_v63, %v3895_v37  ;;  %v3896_v12 = vmul.f32 0.0078125, %v3867_v34  ;;  %v3926_v3 = vmul.f32 %v15299_v46, %v15299_v46  ;;  %v12288_v37 = vld [vmem:[#allocation12 + $0x80] ss:$16 sps:$4 sm:$0xff]   ;;  %v12291_v34 = vld [vmem:[#allocation12 + $0x88] ss:$16 sps:$4 sm:$0xff]  }
 0xf41   : > { %4380 = vmatpush1.bf16.msra.mxu1 %v12288_v37  ;;  %4493 = vmatpush1.bf16.msra.mxu0 %v12291_v34 }
 0xf42   : > { %v15307_v48 = vsub.f32 %v15229_v50, %v3896_v12  ;;  %3942 = vadd.xlane.f32.xlu0 %v3926_v3  ;;  %v3927_v44 = vmul.f32 %v15302_v8, %v15302_v8  ;;  %v12296_v12 = vld [vmem:[#allocation12 + $0xa4] ss:$16 sps:$4 sm:$0xff]   ;;  %v12299_v3 = vld [vmem:[#allocation12 + $0xac] ss:$16 sps:$4 sm:$0xff]  }
 0xf43   : > { %v3869_v19 = vpop.xlane.xlu0 %3868  ;;  %4381 = vmatprep.subr.bf16.mxu1 %v12296_v12  ;;  %4494 = vmatprep.subr.bf16.mxu0 %v12299_v3 }
 0xf44   : > { %v3897_v43 = vmul.f32 0.0078125, %v3869_v19  ;;  %3944 = vadd.xlane.f32.xlu1 %v3927_v44  ;;  %v3928_v13 = vmul.f32 %v15307_v48, %v15307_v48  ;;  %v12294_v44 = vld [vmem:[#allocation12 + $0xa0] ss:$16 sps:$4 sm:$0xff]   ;;  %v12297_v19 = vld [vmem:[#allocation12 + $0xa8] ss:$16 sps:$4 sm:$0xff]  }
 0xf45   : > { %4382 = vmatpush1.bf16.msra.mxu1 %v12294_v44  ;;  %4495 = vmatpush1.bf16.msra.mxu0 %v12297_v19 }
 0xf46   : > { %v15314_v36 = vsub.f32 %v15235_v16, %v3897_v43  ;;  %3946 = vadd.xlane.f32.xlu0 %v3928_v13  ;;  %v12302_v43 = vld [vmem:[#allocation12 + $0xc4] ss:$16 sps:$4 sm:$0xff]   ;;  %v12305_v13 = vld [vmem:[#allocation12 + $0xcc] ss:$16 sps:$4 sm:$0xff]  }
 0xf47   : > { %4383 = vmatprep.subr.bf16.mxu1 %v12302_v43  ;;  %4496 = vmatprep.subr.bf16.mxu0 %v12305_v13  ;;  %v12312_v13 = vld [vmem:[#allocation14 + $0x40] sm:$0xff]  }
 0xf48   : > { %v3929_v42 = vmul.f32 %v15314_v36, %v15314_v36 }
 0xf4a   : > { %3948 = vadd.xlane.f32.xlu1 %v3929_v42  ;;  %v12300_v42 = vld [vmem:[#allocation12 + $0xc0] ss:$16 sps:$4 sm:$0xff]  }
 0xf4b   : > { %v3871_v33 = vpop.xlane.xlu0 %3870  ;;  %4384 = vmatpush1.bf16.msra.mxu1 %v12300_v42  ;;  %v12314_v42 = vld [vmem:[#allocation14 + $0xc0] sm:$0xff]  }
 0xf4c   : > { %v3898_v10 = vmul.f32 0.0078125, %v3871_v33  ;;  %v12303_v33 = vld [vmem:[#allocation12 + $0xc8] ss:$16 sps:$4 sm:$0xff]  }
 0xf4d   : > { %v3873_v28 = vpop.xlane.xlu1 %3872  ;;  %4497 = vmatpush1.bf16.msra.mxu0 %v12303_v33 }
 0xf4e   : > { %v15319_v24 = vsub.f32 %v15241_v17, %v3898_v10  ;;  %v3899_v2 = vmul.f32 0.0078125, %v3873_v28  ;;  %v12308_v10 = vld [vmem:[#allocation12 + $0xe4] ss:$16 sps:$4 sm:$0xff]   ;;  %v12311_v28 = vld [vmem:[#allocation12 + $0xec] ss:$16 sps:$4 sm:$0xff]  }
 0xf4f   : > { %v3875_v62 = vpop.xlane.xlu0 %3874  ;;  %4385 = vmatprep.subr.bf16.mxu1 %v12308_v10  ;;  %4498 = vmatprep.subr.bf16.mxu0 %v12311_v28 }
 0xf50   : > { %v15322_v45 = vsub.f32 %v15246_v40, %v3899_v2  ;;  %v3900_v53 = vmul.f32 0.0078125, %v3875_v62  ;;  %v3930_v0 = vmul.f32 %v15319_v24, %v15319_v24  ;;  %v12306_v2 = vld [vmem:[#allocation12 + $0xe0] ss:$16 sps:$4 sm:$0xff]   ;;  %v12309_v62 = vld [vmem:[#allocation12 + $0xe8] ss:$16 sps:$4 sm:$0xff]  }
 0xf51   : > { %v3877_v1 = vpop.xlane.xlu1 %3876  ;;  %4386 = vmatpush1.bf16.msra.mxu1 %v12306_v2  ;;  %4499 = vmatpush1.bf16.msra.mxu0 %v12309_v62 }
 0xf52   : > { %v15327_v22 = vsub.f32 %v15250_v4, %v3900_v53  ;;  %v3901_v35 = vmul.f32 0.0078125, %v3877_v1  ;;  %3950 = vadd.xlane.f32.xlu0 %v3930_v0  ;;  %v3931_v21 = vmul.f32 %v15322_v45, %v15322_v45  ;;  %11003 = vmatprep.subr.bf16.mxu1 %v12312_v13 }
 0xf53   : > { %11067 = vmatprep.subr.bf16.mxu0 %v12314_v42 }
 0xf54   : > { %v15332_v57 = vsub.f32 %v15254_v30, %v3901_v35  ;;  %3952 = vadd.xlane.f32.xlu1 %v3931_v21  ;;  %v3932_v11 = vmul.f32 %v15327_v22, %v15327_v22 }
 0xf56   : > { %3954 = vadd.xlane.f32.xlu0 %v3932_v11  ;;  %v3933_v23 = vmul.f32 %v15332_v57, %v15332_v57 }
 0xf58   : > { %3956 = vadd.xlane.f32.xlu1 %v3933_v23 }
 0xf77   : > { %v3879_v53 = vpop.xlane.xlu0 %3878 }
 0xf78   : > { %v3902_v0 = vmul.f32 0.0078125, %v3879_v53 }
 0xf79   : > { %v3881_v1 = vpop.xlane.xlu1 %3880 }
 0xf7a   : > { %v15339_v35 = vsub.f32 %v15261_v9, %v3902_v0  ;;  %v3903_v21 = vmul.f32 0.0078125, %v3881_v1 }
 0xf7b   : > { %v3883_v11 = vpop.xlane.xlu0 %3882 }
 0xf7c   : > { %v15342_v23 = vsub.f32 %v15266_v6, %v3903_v21  ;;  %v3904_v29 = vmul.f32 0.0078125, %v3883_v11  ;;  %v3934_v41 = vmul.f32 %v15339_v35, %v15339_v35 }
 0xf7d   : > { %v3885_v54 = vpop.xlane.xlu1 %3884 }
 0xf7e   : > { %v15347_v20 = vsub.f32 %v15270_v26, %v3904_v29  ;;  %v3905_v47 = vmul.f32 0.0078125, %v3885_v54  ;;  %3958 = vadd.xlane.f32.xlu0 %v3934_v41  ;;  %v3935_v52 = vmul.f32 %v15342_v23, %v15342_v23 }
 0xf80   : > { %v15352_v59 = vsub.f32 %v15274_v7, %v3905_v47  ;;  %3960 = vadd.xlane.f32.xlu1 %v3935_v52  ;;  %v3936_v31 = vmul.f32 %v15347_v20, %v15347_v20 }
 0xf82   : > { %3962 = vadd.xlane.f32.xlu0 %v3936_v31  ;;  %v3937_v15 = vmul.f32 %v15352_v59, %v15352_v59 }
 0xf84   : > { %3964 = vadd.xlane.f32.xlu1 %v3937_v15 }
 0xf8a   : > { %v3887_v51 = vpop.xlane.xlu0 %3886 }
 0xf8b   : > { %v3906_v58 = vmul.f32 0.0078125, %v3887_v51 }
 0xf8c   : > { %v3889_v61 = vpop.xlane.xlu1 %3888 }
 0xf8d   : > { %v15359_v60 = vsub.f32 %v15281_v38, %v3906_v58  ;;  %v3907_v18 = vmul.f32 0.0078125, %v3889_v61 }
 0xf8e   : > { %v3891_v55 = vpop.xlane.xlu0 %3890 }
 0xf8f   : > { %v15362_v49 = vsub.f32 %v15286_v25, %v3907_v18  ;;  %v3908_v14 = vmul.f32 0.0078125, %v3891_v55  ;;  %v3938_v5 = vmul.f32 %v15359_v60, %v15359_v60 }
 0xf90   : > { %v3893_v37 = vpop.xlane.xlu1 %3892 }
 0xf91   : > { %v15367_v34 = vsub.f32 %v15290_v32, %v3908_v14  ;;  %v3909_v12 = vmul.f32 0.0078125, %v3893_v37  ;;  %3966 = vadd.xlane.f32.xlu0 %v3938_v5  ;;  %v3939_v3 = vmul.f32 %v15362_v49, %v15362_v49 }
 0xf93   : > { %v15372_v44 = vsub.f32 %v15294_v27, %v3909_v12  ;;  %3968 = vadd.xlane.f32.xlu1 %v3939_v3  ;;  %v3940_v19 = vmul.f32 %v15367_v34, %v15367_v34 }
 0xf95   : > { %3970 = vadd.xlane.f32.xlu0 %v3940_v19  ;;  %v3941_v43 = vmul.f32 %v15372_v44, %v15372_v44 }
 0xf97   : > { %3972 = vadd.xlane.f32.xlu1 %v3941_v43 }
 0xfcf   : > { %v3943_v33 = vpop.xlane.xlu0 %3942 }
 0xfd0   : > { %v3974_v10 = vmul.f32 0.007874016, %v3943_v33 }
 0xfd1   : > { %v3945_v28 = vpop.xlane.xlu1 %3944 }
 0xfd2   : > { %12784 = vrsqrt.f32 %v3974_v10  ;;  %v3975_v2 = vmul.f32 0.007874016, %v3945_v28  ;;  %vm3992_vm4 = vcmp.eq.f32.partialorder %v3974_v10, inf  ;;  %v3995_v29 = vand.u32 2147483648, %v3974_v10 }
 0xfd3   : > { %v3947_v62 = vpop.xlane.xlu0 %3946  ;;  %vm3994_vm6 = vcmp.eq.f32.partialorder %v3974_v10, 0.0 }
 0xfd4   : > { %v3976_v53 = vmul.f32 0.007874016, %v3947_v62  ;;  %12786 = vrsqrt.f32 %v3975_v2  ;;  %vm3999_vm7 = vcmp.eq.f32.partialorder %v3975_v2, inf  ;;  %v4002_v61 = vand.u32 2147483648, %v3975_v2 }
 0xfd5   : > { %vm4001_vm5 = vcmp.eq.f32.partialorder %v3975_v2, 0.0 }
 0xfd6   : > { %12788 = vrsqrt.f32 %v3976_v53  ;;  %vm4006_vm9 = vcmp.eq.f32.partialorder %v3976_v53, inf  ;;  %vm4008_vm8 = vcmp.eq.f32.partialorder %v3976_v53, 0.0  ;;  %v4009_v12 = vand.u32 2147483648, %v3976_v53 }
 0xfd7   : > { %v3949_v0 = vpop.xlane.xlu1 %3948 }
 0xfd8   : > { %v3977_v1 = vmul.f32 0.007874016, %v3949_v0 }
 0xfda   : > { %12790 = vrsqrt.f32 %v3977_v1  ;;  %vm4013_vm10 = vcmp.eq.f32.partialorder %v3977_v1, inf  ;;  %v4016_v62 = vand.u32 2147483648, %v3977_v1  ;;  %vm4015_vm11 = vcmp.eq.f32.partialorder %v3977_v1, 0.0 }
 0xfdc   : > { %v12785_v21 = vpop.eup %12784 }
 0xfdd   : > { %v3991_v11 = vmul.f32 %v12785_v21, %v3974_v10 }
 0xfde   : > { %v12787_v41 = vpop.eup %12786 }
 0xfdf   : > { %v3993_v54 = vsel %vm3992_vm4, %v3974_v10, %v3991_v11  ;;  %v3951_v47 = vpop.xlane.xlu0 %3950  ;;  %v3998_v15 = vmul.f32 %v12787_v41, %v3975_v2 }
 0xfe0   : > { %v12789_v52 = vpop.eup %12788  ;;  %v3996_v31 = vsel %vm3994_vm6, %v3995_v29, %v3993_v54  ;;  %v3978_v51 = vmul.f32 0.007874016, %v3951_v47 }
 0xfe1   : > { %v4102_v58 = vadd.f32 1e-06, %v3996_v31  ;;  %v4005_v18 = vmul.f32 %v12789_v52, %v3976_v53  ;;  %v3953_v55 = vpop.xlane.xlu1 %3952  ;;  %v4000_v14 = vsel %vm3999_vm7, %v3975_v2, %v3998_v15 }
 0xfe2   : > { %12792 = vrsqrt.f32 %v3978_v51  ;;  %v4003_v5 = vsel %vm4001_vm5, %v4002_v61, %v4000_v14  ;;  %v3979_v13 = vmul.f32 0.007874016, %v3953_v55  ;;  %vm4020_vm12 = vcmp.eq.f32.partialorder %v3978_v51, inf }
 0xfe3   : > { %v4007_v37 = vsel %vm4006_vm9, %v3976_v53, %v4005_v18  ;;  %v3955_v3 = vpop.xlane.xlu0 %3954  ;;  %12794 = vrcp.f32 %v4102_v58  ;;  %v4103_v43 = vadd.f32 1e-06, %v4003_v5  ;;  %v4023_v47 = vand.u32 2147483648, %v3978_v51 }
 0xfe4   : > { %v12791_v19 = vpop.eup %12790  ;;  %v15378_v42 = vmul.f32 0.007874016, %v3955_v3  ;;  %v4010_v28 = vsel %vm4008_vm8, %v4009_v12, %v4007_v37  ;;  %vm4022_vm13 = vcmp.eq.f32.partialorder %v3978_v51, 0.0  ;;  %vm4027_vm14 = vcmp.eq.f32.partialorder %v3979_v13, inf  ;;  %v12313_v3 = vld [vmem:[#allocation14] sm:$0xff]  }
 0xfe5   : > { %v4012_v33 = vmul.f32 %v12791_v19, %v3977_v1  ;;  %v3957_v10 = vpop.xlane.xlu1 %3956  ;;  %12796 = vrcp.f32 %v4103_v43  ;;  %v4104_v21 = vadd.f32 1e-06, %v4010_v28  ;;  %v4030_v5 = vand.u32 2147483648, %v3979_v13  ;;  %v12315_v19 = vld [vmem:[#allocation14 + $0x80] sm:$0xff]  }
 0xfe6   : > { %12798 = vrsqrt.f32 %v3979_v13  ;;  %v3981_v0 = vmul.f32 0.007874016, %v3957_v10  ;;  %vm4029_vm15 = vcmp.eq.f32.partialorder %v3979_v13, 0.0  ;;  %vm4034_vm4 = vcmp.eq.f32.partialorder %v15378_v42, inf }
 0xfe7   : > { %v4014_v2 = vsel %vm4013_vm10, %v3977_v1, %v4012_v33  ;;  %12800 = vrsqrt.f32 %v15378_v42  ;;  %vm4036_vm6 = vcmp.eq.f32.partialorder %v15378_v42, 0.0  ;;  %v4037_v28 = vand.u32 2147483648, %v15378_v42 }
 0xfe8   : > { %v4017_v53 = vsel %vm4015_vm11, %v4016_v62, %v4014_v2  ;;  %12802 = vrsqrt.f32 %v3981_v0  ;;  %vm4041_vm7 = vcmp.eq.f32.partialorder %v3981_v0, inf  ;;  %vm4043_vm5 = vcmp.eq.f32.partialorder %v3981_v0, 0.0 }
 0xfe9   : > { %v4105_v11 = vadd.f32 1e-06, %v4017_v53 }
 0xfeb   : > { %12804 = vrcp.f32 %v4105_v11 }
 0xfec   : > { %v12793_v29 = vpop.eup %12792  ;;  %12806 = vrcp.f32 %v4104_v21  ;;  %v4044_v21 = vand.u32 2147483648, %v3981_v0 }
 0xfed   : > { %v4019_v41 = vmul.f32 %v12793_v29, %v3978_v51  ;;  %v12795_v54 = vpop.eup %12794 }
 0xfee   : > { %v4134_v58 = vmul.f32 %v12795_v54, %v15299_v46  ;;  %v12316_v46 = vld [vmem:[#allocation14 + $0x48] sm:$0xff]  }
 0xfef   : > { %v4021_v52 = vsel %vm4020_vm12, %v3978_v51, %v4019_v41  ;;  %v12797_v31 = vpop.eup %12796  ;;  %v12317_v51 = vld [vmem:[#allocation14 + $0xc8] sm:$0xff]  }
 0xff0   : > { %v4024_v15 = vsel %vm4022_vm13, %v4023_v47, %v4021_v52  ;;  %v12799_v1 = vpop.eup %12798  ;;  %v4135_v61 = vmul.f32 %v12797_v31, %v15302_v8  ;;  %v12318_v54 = vld [vmem:[#allocation14 + $0x8] sm:$0xff]   ;;  %v12320_v31 = vld [vmem:[#allocation14 + $0x50] sm:$0xff]  }
 0xff1   : > { %v12801_v18 = vpop.eup %12800  ;;  %v4026_v55 = vmul.f32 %v12799_v1, %v3979_v13  ;;  %v4106_v14 = vadd.f32 1e-06, %v4024_v15  ;;  %v12319_v47 = vld [vmem:[#allocation14 + $0x88] sm:$0xff]   ;;  %v12321_v15 = vld [vmem:[#allocation14 + $0xd0] sm:$0xff]  }
 0xff2   : > { %v4033_v37 = vmul.f32 %v12801_v18, %v15378_v42  ;;  %v4150_v12 = vpack.c.bf16 %v4135_v61, %v4134_v58  ;;  %v12803_v43 = vpop.eup %12802  ;;  %v12324_v18 = vld [vmem:[#allocation14 + $0x58] sm:$0xff]  }
 0xff3   : > { %v4028_v33 = vsel %vm4027_vm14, %v3979_v13, %v4026_v55  ;;  %v4040_v62 = vmul.f32 %v12803_v43, %v3981_v0  ;;  %12808 = vrcp.f32 %v4106_v14  ;;  %v12325_v55 = vld [vmem:[#allocation14 + $0xd8] sm:$0xff]  }
 0xff4   : > { %v4035_v10 = vsel %vm4034_vm4, %v15378_v42, %v4033_v37  ;;  %4404 = vmatmul.mubr.bf16.vlgmr.msra.gmra.mrb[80].mxu1 %v4150_v12  ;;  %4517 = vmatmul.mubr.bf16.vlgmr.msra.gmra.mrb[112].mxu0 %v4150_v12  ;;  %v4031_v2 = vsel %vm4029_vm15, %v4030_v5, %v4028_v33  ;;  %v12323_v42 = vld [vmem:[#allocation14 + $0x90] sm:$0xff]   ;;  %v12327_v14 = vld [vmem:[#allocation14 + $0x98] sm:$0xff]   ;;  %v12328_v37 = vld [vmem:[#allocation14 + $0x60] sm:$0xff]  }
 0xff5   : > { %v12805_v8 = vpop.eup %12804  ;;  %4413 = vmatprep.mubr.bf16.mxu1 %v17333_v56  ;;  %4526 = vmatprep.mubr.bf16.mxu0 %v17333_v56  ;;  %v4107_v13 = vadd.f32 1e-06, %v4031_v2  ;;  %v4042_v11 = vsel %vm4041_vm7, %v3981_v0, %v4040_v62  ;;  %v4038_v41 = vsel %vm4036_vm6, %v4037_v28, %v4035_v10  ;;  %v12329_v12 = vld [vmem:[#allocation14 + $0xe0] sm:$0xff]   ;;  %v12332_v10 = vld [vmem:[#allocation14 + $0x68] sm:$0xff]  }
 0xff6   : > { %v12807_v53 = vpop.eup %12806  ;;  %v4137_v29 = vmul.f32 %v12805_v8, %v15314_v36  ;;  %11004 = vmatpush3.bf16.msra.mxu1 %v12313_v3  ;;  %11068 = vmatpush3.bf16.msra.mxu0 %v12315_v19  ;;  %v4045_v52 = vsel %vm4043_vm5, %v4044_v21, %v4042_v11  ;;  %v4108_v61 = vadd.f32 1e-06, %v4038_v41  ;;  %v12322_v36 = vld [vmem:[#allocation14 + $0x10] sm:$0xff]   ;;  %v12333_v28 = vld [vmem:[#allocation14 + $0xe8] sm:$0xff]  }
 0xff7   : > { %12810 = vrcp.f32 %v4107_v13  ;;  %11005 = vmatprep.subr.bf16.mxu1 %v12316_v46  ;;  %11069 = vmatprep.subr.bf16.mxu0 %v12317_v51  ;;  %v4136_v1 = vmul.f32 %v12807_v53, %v15307_v48  ;;  %v4109_v58 = vadd.f32 1e-06, %v4045_v52  ;;  %v12326_v48 = vld [vmem:[#allocation14 + $0x18] sm:$0xff]   ;;  %v12330_v46 = vld [vmem:[#allocation14 + $0x20] sm:$0xff]  }
 0xff8   : > { %v12331_v51 = vld [vmem:[#allocation14 + $0xa0] sm:$0xff]  }
 0xff9   : > { %v4151_v0 = vpack.c.bf16 %v4137_v29, %v4136_v1  ;;  %12812 = vrcp.f32 %v4109_v58 }
 0xffa   : > { %11006 = vmatpush3.bf16.msra.mxu1 %v12318_v54  ;;  %11070 = vmatpush3.bf16.msra.mxu0 %v12319_v47  ;;  %12814 = vrcp.f32 %v4108_v61 }
 0xffb   : > { %11007 = vmatprep.subr.bf16.mxu1 %v12320_v31  ;;  %11071 = vmatprep.subr.bf16.mxu0 %v12321_v15 }
 0xffc   : > { %4414 = vmatmul.mubr.bf16.gmra.mrb[84].mxu1 %v4151_v0  ;;  %4527 = vmatmul.mubr.bf16.gmra.mrb[116].mxu0 %v4151_v0 }
 0xffd   : > { %4423 = vmatprep.mubr.bf16.mxu1 %v17333_v56  ;;  %4536 = vmatprep.mubr.bf16.mxu0 %v17333_v56  ;;  %v12809_v5 = vpop.eup %12808 }
 0xffe   : > { %11008 = vmatpush3.bf16.msra.mxu1 %v12322_v36  ;;  %11072 = vmatpush3.bf16.msra.mxu0 %v12323_v42  ;;  %v4138_v19 = vmul.f32 %v12809_v5, %v15319_v24 }
 0xfff   : > { %11009 = vmatprep.subr.bf16.mxu1 %v12324_v18  ;;  %11073 = vmatprep.subr.bf16.mxu0 %v12325_v55 }
0x1001   : > { %v12811_v3 = vpop.eup %12810 }
0x1002   : > { %v4139_v43 = vmul.f32 %v12811_v3, %v15322_v45  ;;  %11010 = vmatpush3.bf16.msra.mxu1 %v12326_v48  ;;  %11074 = vmatpush3.bf16.msra.mxu0 %v12327_v14 }
0x1003   : > { %11011 = vmatprep.subr.bf16.mxu1 %v12328_v37  ;;  %11075 = vmatprep.subr.bf16.mxu0 %v12329_v12  ;;  %v12813_v8 = vpop.eup %12812 }
0x1004   : > { %v4152_v33 = vpack.c.bf16 %v4139_v43, %v4138_v19  ;;  %v12815_v62 = vpop.eup %12814  ;;  %v4141_v24 = vmul.f32 %v12813_v8, %v15332_v57 }
0x1005   : > { %v4140_v2 = vmul.f32 %v12815_v62, %v15327_v22 }
0x1006   : > { %4424 = vmatmul.mubr.bf16.gmra.mrb[88].mxu1 %v4152_v33  ;;  %4537 = vmatmul.mubr.bf16.gmra.mrb[120].mxu0 %v4152_v33 }
0x1007   : > { %4433 = vmatprep.mubr.bf16.mxu1 %v17333_v56  ;;  %4546 = vmatprep.mubr.bf16.mxu0 %v17333_v56  ;;  %v4153_v21 = vpack.c.bf16 %v4141_v24, %v4140_v2 }
0x1008   : > { %11012 = vmatpush3.bf16.msra.mxu1 %v12330_v46  ;;  %11076 = vmatpush3.bf16.msra.mxu0 %v12331_v51 }
0x1009   : > { %11013 = vmatprep.subr.bf16.mxu1 %v12332_v10  ;;  %11077 = vmatprep.subr.bf16.mxu0 %v12333_v28 }
0x100b   : > { %v3959_v45 = vpop.xlane.xlu0 %3958 }
0x100c   : > { %v3982_v53 = vmul.f32 0.007874016, %v3959_v45 }
0x100d   : > { %v3961_v13 = vpop.xlane.xlu1 %3960 }
0x100e   : > { %12816 = vrsqrt.f32 %v3982_v53  ;;  %4434 = vmatmul.mubr.bf16.gmra.mrb[92].mxu1 %v4153_v21  ;;  %4547 = vmatmul.mubr.bf16.gmra.mrb[124].mxu0 %v4153_v21  ;;  %v3983_v11 = vmul.f32 0.007874016, %v3961_v13  ;;  %vm4048_vm9 = vcmp.eq.f32.partialorder %v3982_v53, inf  ;;  %v4051_v52 = vand.u32 2147483648, %v3982_v53 }
0x100f   : > { %v3963_v29 = vpop.xlane.xlu0 %3962  ;;  %4443 = vmatprep.mubr.bf16.mxu1 %v17333_v56  ;;  %4556 = vmatprep.mubr.bf16.mxu0 %v17333_v56  ;;  %vm4050_vm8 = vcmp.eq.f32.partialorder %v3982_v53, 0.0 }
0x1010   : > { %v3984_v41 = vmul.f32 0.007874016, %v3963_v29  ;;  %12818 = vrsqrt.f32 %v3983_v11  ;;  %vm4055_vm10 = vcmp.eq.f32.partialorder %v3983_v11, inf  ;;  %v4058_v0 = vand.u32 2147483648, %v3983_v11 }
0x1011   : > { %v3965_v57 = vpop.xlane.xlu1 %3964  ;;  %vm4057_vm11 = vcmp.eq.f32.partialorder %v3983_v11, 0.0 }
0x1012   : > { %12820 = vrsqrt.f32 %v3984_v41  ;;  %v3985_v54 = vmul.f32 0.007874016, %v3965_v57  ;;  %vm4062_vm12 = vcmp.eq.f32.partialorder %v3984_v41, inf  ;;  %v4065_v55 = vand.u32 2147483648, %v3984_v41 }
0x1013   : > { %vm4064_vm13 = vcmp.eq.f32.partialorder %v3984_v41, 0.0 }
0x1014   : > { %12822 = vrsqrt.f32 %v3985_v54  ;;  %vm4069_vm14 = vcmp.eq.f32.partialorder %v3985_v54, inf  ;;  %v4072_v46 = vand.u32 2147483648, %v3985_v54  ;;  %vm4071_vm15 = vcmp.eq.f32.partialorder %v3985_v54, 0.0 }
0x1018   : > { %v12817_v47 = vpop.eup %12816 }
0x1019   : > { %v4047_v22 = vmul.f32 %v12817_v47, %v3982_v53 }
0x101a   : > { %v12819_v31 = vpop.eup %12818 }
0x101b   : > { %v4049_v15 = vsel %vm4048_vm9, %v3982_v53, %v4047_v22  ;;  %v4054_v58 = vmul.f32 %v12819_v31, %v3983_v11 }
0x101c   : > { %v12821_v1 = vpop.eup %12820  ;;  %v4052_v61 = vsel %vm4050_vm8, %v4051_v52, %v4049_v15 }
0x101d   : > { %v4061_v36 = vmul.f32 %v12821_v1, %v3984_v41  ;;  %v4110_v42 = vadd.f32 1e-06, %v4052_v61  ;;  %v4056_v18 = vsel %vm4055_vm10, %v3983_v11, %v4054_v58 }
0x101e   : > { %v3967_v48 = vpop.xlane.xlu0 %3966  ;;  %v12823_v14 = vpop.eup %12822  ;;  %v4059_v12 = vsel %vm4057_vm11, %v4058_v0, %v4056_v18 }
0x101f   : > { %v4063_v5 = vsel %vm4062_vm12, %v3984_v41, %v4061_v36  ;;  %v3986_v37 = vmul.f32 0.007874016, %v3967_v48  ;;  %v4068_v3 = vmul.f32 %v12823_v14, %v3985_v54  ;;  %v4111_v43 = vadd.f32 1e-06, %v4059_v12 }
0x1020   : > { %v3969_v19 = vpop.xlane.xlu1 %3968  ;;  %12824 = vrcp.f32 %v4110_v42  ;;  %v4066_v33 = vsel %vm4064_vm13, %v4065_v55, %v4063_v5 }
0x1021   : > { %12826 = vrsqrt.f32 %v3986_v37  ;;  %v4070_v51 = vsel %vm4069_vm14, %v3985_v54, %v4068_v3  ;;  %v3987_v8 = vmul.f32 0.007874016, %v3969_v19  ;;  %v4112_v24 = vadd.f32 1e-06, %v4066_v33 }
0x1022   : > { %v3971_v10 = vpop.xlane.xlu0 %3970  ;;  %12828 = vrcp.f32 %v4111_v43  ;;  %v4073_v62 = vsel %vm4071_vm15, %v4072_v46, %v4070_v51  ;;  %vm4076_vm4 = vcmp.eq.f32.partialorder %v3986_v37, inf  ;;  %v4079_v41 = vand.u32 2147483648, %v3986_v37 }
0x1023   : > { %v3988_v28 = vmul.f32 0.007874016, %v3971_v10  ;;  %12830 = vrsqrt.f32 %v3987_v8  ;;  %v4113_v53 = vadd.f32 1e-06, %v4073_v62  ;;  %vm4078_vm6 = vcmp.eq.f32.partialorder %v3986_v37, 0.0 }
0x1024   : > { %v3973_v45 = vpop.xlane.xlu1 %3972  ;;  %vm4083_vm7 = vcmp.eq.f32.partialorder %v3987_v8, inf  ;;  %v4086_v58 = vand.u32 2147483648, %v3987_v8  ;;  %vm4085_vm5 = vcmp.eq.f32.partialorder %v3987_v8, 0.0 }
0x1025   : > { %12832 = vrsqrt.f32 %v3988_v28  ;;  %v3989_v2 = vmul.f32 0.007874016, %v3973_v45  ;;  %vm4090_vm9 = vcmp.eq.f32.partialorder %v3988_v28, inf  ;;  %vm4092_vm8 = vcmp.eq.f32.partialorder %v3988_v28, 0.0 }
0x1026   : > { %12834 = vrcp.f32 %v4112_v24 }
0x1027   : > { %12836 = vrsqrt.f32 %v3989_v2  ;;  %vm4097_vm10 = vcmp.eq.f32.partialorder %v3989_v2, inf  ;;  %vm4099_vm11 = vcmp.eq.f32.partialorder %v3989_v2, 0.0 }
0x1028   : > { %12838 = vrcp.f32 %v4113_v53 }
0x102a   : > { %v12825_v21 = vpop.eup %12824 }
0x102b   : > { %v12827_v13 = vpop.eup %12826  ;;  %v4142_v57 = vmul.f32 %v12825_v21, %v15339_v35 }
0x102c   : > { %v12829_v11 = vpop.eup %12828  ;;  %v4075_v29 = vmul.f32 %v12827_v13, %v3986_v37  ;;  %v12334_v13 = vld [vmem:[#allocation14 + $0x28] sm:$0xff]  }
0x102d   : > { %v4143_v54 = vmul.f32 %v12829_v11, %v15342_v23  ;;  %v12831_v47 = vpop.eup %12830  ;;  %v4093_v23 = vand.u32 2147483648, %v3988_v28  ;;  %v12335_v11 = vld [vmem:[#allocation14 + $0xa8] sm:$0xff]   ;;  %11014 = vmatpush3.bf16.msra.mxu1 %v12334_v13 }
0x102e   : > { %v4077_v22 = vsel %vm4076_vm4, %v3986_v37, %v4075_v29  ;;  %v4082_v31 = vmul.f32 %v12831_v47, %v3987_v8  ;;  %v4100_v37 = vand.u32 2147483648, %v3989_v2  ;;  %11078 = vmatpush3.bf16.msra.mxu0 %v12335_v11  ;;  %v12338_v29 = vld [vmem:[#allocation14 + $0x30] sm:$0xff]   ;;  %v446_v47 = vld [vmem:[%s17258_s6] sm:$0xf] }
0x102f   : > { %v12833_v52 = vpop.eup %12832  ;;  %v4154_v15 = vpack.c.bf16 %v4143_v54, %v4142_v57  ;;  %v4080_v1 = vsel %vm4078_vm6, %v4079_v41, %v4077_v22  ;;  %v12339_v41 = vld [vmem:[#allocation14 + $0xb0] sm:$0xff]   ;;  %v12340_v57 = vld [vmem:[#allocation14 + $0x78] sm:$0xff]   ;;  %v17340_v22 = vld [vmem:[#allocation22_spill] sm:$0xff] }
0x1030   : > { %v4089_v61 = vmul.f32 %v12833_v52, %v3988_v28  ;;  %v4114_v0 = vadd.f32 1e-06, %v4080_v1  ;;  %v12835_v36 = vpop.eup %12834  ;;  %v4084_v42 = vsel %vm4083_vm7, %v3987_v8, %v4082_v31  ;;  %v12341_v54 = vld [vmem:[#allocation14 + $0xf8] sm:$0xff]   ;;  %v4205_v52 = vsub.s32 3, %v17340_v22 }
0x1031   : > { %4444 = vmatmul.mubr.bf16.gmra.mrb[96].mxu1 %v4154_v15  ;;  %4557 = vmatmul.mubr.bf16.gmra.mrb[128].mxu0 %v4154_v15  ;;  %v12837_v35 = vpop.eup %12836  ;;  %v4087_v55 = vsel %vm4085_vm5, %v4086_v58, %v4084_v42  ;;  %v4144_v43 = vmul.f32 %v12835_v36, %v15347_v20  ;;  %v17341_v31 = vsub.s32 0, %v17340_v22  ;;  %v17343_v1 = vsub.s32 2, %v17340_v22 }
0x1032   : > { %v4091_v18 = vsel %vm4090_vm9, %v3988_v28, %v4089_v61  ;;  %4453 = vmatprep.mubr.bf16.mxu1 %v17333_v56  ;;  %4566 = vmatprep.mubr.bf16.mxu0 %v17333_v56  ;;  %v12839_v48 = vpop.eup %12838  ;;  %v4096_v14 = vmul.f32 %v12837_v35, %v3989_v2  ;;  %v4115_v5 = vadd.f32 1e-06, %v4087_v55  ;;  %12840 = vrcp.f32 %v4114_v0 }
0x1033   : > { %v4145_v12 = vmul.f32 %v12839_v48, %v15352_v59  ;;  %v4094_v3 = vsel %vm4092_vm8, %v4093_v23, %v4091_v18  ;;  %v15424_v15 = vrot.slane %v446_v47, %v17341_v31  ;;  %v15428_v58 = vrot.slane %v446_v47, %v17343_v1 }
0x1034   : > { %v4098_v19 = vsel %vm4097_vm10, %v3989_v2, %v4096_v14  ;;  %12842 = vrcp.f32 %v4115_v5  ;;  %v4116_v51 = vadd.f32 1e-06, %v4094_v3  ;;  %v17345_v61 = vsub.s32 1, %v17340_v22 }
0x1035   : > { %v4101_v33 = vsel %vm4099_vm11, %v4100_v37, %v4098_v19  ;;  %v4155_v46 = vpack.c.bf16 %v4145_v12, %v4144_v43  ;;  %17342 = vst [vmem:[#allocation26_spill] sm:$0xff] %v15424_v15  ;;  %17344 = vst [vmem:[#allocation27_spill] sm:$0xff] %v15428_v58  ;;  %v15434_v36 = vrot.slane %v446_v47, %v4205_v52 }
0x1036   : > { %v4117_v8 = vadd.f32 1e-06, %v4101_v33  ;;  %v15432_v0 = vrot.slane %v446_v47, %v17345_v61 }
0x1037   : > { %17347 = vst [vmem:[#allocation31_spill] sm:$0xff] %v15434_v36 }
0x1038   : > { %12844 = vrcp.f32 %v4117_v8  ;;  %17346 = vst [vmem:[#allocation29_spill] sm:$0xff] %v15432_v0 }
0x1039   : > { %4454 = vmatmul.mubr.bf16.gmra.mrb[100].mxu1 %v4155_v46  ;;  %4567 = vmatmul.mubr.bf16.gmra.mrb[132].mxu0 %v4155_v46  ;;  %12846 = vrcp.f32 %v4116_v51 }
0x103a   : > { %4463 = vmatprep.mubr.bf16.mxu1 %v17333_v56  ;;  %4576 = vmatprep.mubr.bf16.mxu0 %v17333_v56 }
0x103c   : > { %v12841_v10 = vpop.eup %12840 }
0x103d   : > { %v4146_v28 = vmul.f32 %v12841_v10, %v15359_v60  ;;  %v12336_v60 = vld [vmem:[#allocation14 + $0x70] sm:$0xff]  }
0x103e   : > { %v12843_v59 = vpop.eup %12842  ;;  %11015 = vmatprep.subr.bf16.mxu1 %v12336_v60 }
0x103f   : > { %v4147_v62 = vmul.f32 %v12843_v59, %v15362_v49  ;;  %v12337_v49 = vld [vmem:[#allocation14 + $0xf0] sm:$0xff]   ;;  %11016 = vmatpush3.bf16.msra.mxu1 %v12338_v29 }
0x1040   : > { %11079 = vmatprep.subr.bf16.mxu0 %v12337_v49  ;;  %11017 = vmatprep.subr.bf16.mxu1 %v12340_v57 }
0x1041   : > { %v4156_v20 = vpack.c.bf16 %v4147_v62, %v4146_v28  ;;  %11080 = vmatpush3.bf16.msra.mxu0 %v12339_v41 }
0x1042   : > { %v12845_v24 = vpop.eup %12844  ;;  %11081 = vmatprep.subr.bf16.mxu0 %v12341_v54 }
0x1043   : > { %4464 = vmatmul.mubr.bf16.gmra.mrb[104].mxu1 %v4156_v20  ;;  %4577 = vmatmul.mubr.bf16.gmra.mrb[136].mxu0 %v4156_v20  ;;  %v12847_v45 = vpop.eup %12846  ;;  %v4149_v2 = vmul.f32 %v12845_v24, %v15372_v44  ;;  %v12343_v44 = vld [vmem:[#allocation14 + $0xb8] sm:$0xff]  }
0x1044   : > { %4473 = vmatprep.mubr.bf16.mxu1 %v17333_v56  ;;  %4586 = vmatprep.mubr.bf16.mxu0 %v17333_v56  ;;  %v4148_v53 = vmul.f32 %v12847_v45, %v15367_v34  ;;  %v12342_v34 = vld [vmem:[#allocation14 + $0x38] sm:$0xff]  }
0x1045   : > { %11018 = vmatpush3.bf16.msra.mxu1 %v12342_v34  ;;  %11082 = vmatpush3.bf16.msra.mxu0 %v12343_v44 }
0x1046   : > { %v4157_v21 = vpack.c.bf16 %v4149_v2, %v4148_v53 }
0x104b   : > { %4474 = vmatmul.mubr.bf16.gmra.mrb[108].mxu1 %v4157_v21  ;;  %4587 = vmatmul.mubr.bf16.gmra.mrb[140].mxu0 %v4157_v21 }
0x10c7   : > { %v4405_v42 = vpop.f32.mrb[80].mxu1  ;;  %v4518_v35 = vpop.f32.mrb[112].mxu0 }
0x10c8   : > { %v4406_v18 = vadd.f32 %v4405_v42, %v15424_v15  ;;  %v4519_v23 = vadd.f32 %v4518_v35, %v15428_v58  ;;  %v4407_v55 = vpop.f32.mrb[81].mxu1  ;;  %v4520_v48 = vpop.f32.mrb[113].mxu0 }
0x10c9   : > { %v4408_v14 = vadd.f32 %v4407_v55, %v15432_v0  ;;  %v4521_v5 = vadd.f32 %v4520_v48, %v15434_v36  ;;  %v4409_v37 = vpop.f32.mrb[82].mxu1  ;;  %v4522_v12 = vpop.f32.mrb[114].mxu0 }
0x10ca   : > { %v4410_v3 = vadd.f32 %v4409_v37, %v15424_v15  ;;  %v4523_v19 = vadd.f32 %v4522_v12, %v15428_v58  ;;  %v4411_v43 = vpop.f32.mrb[83].mxu1  ;;  %v4524_v33 = vpop.f32.mrb[115].mxu0  ;;  %v4597_v8 = vmax.f32 %v4406_v18, 0.0  ;;  %v4599_v10 = vmax.f32 %v4519_v23, 0.0 }
0x10cb   : > { %v4412_v46 = vadd.f32 %v4411_v43, %v15432_v0  ;;  %v4525_v51 = vadd.f32 %v4524_v33, %v15434_v36  ;;  %v4598_v62 = vmax.f32 %v4408_v14, 0.0  ;;  %v4600_v20 = vmax.f32 %v4521_v5, 0.0 }
0x10cc   : > { %v4601_v59 = vmax.f32 %v4410_v3, 0.0  ;;  %v4603_v28 = vmax.f32 %v4523_v19, 0.0 }
0x10cd   : > { %v4602_v24 = vmax.f32 %v4412_v46, 0.0  ;;  %v4604_v45 = vmax.f32 %v4525_v51, 0.0 }
0x10ce   : > { %v4789_v2 = vpack.c.bf16 %v4601_v59, %v4597_v8  ;;  %v4791_v53 = vpack.c.bf16 %v4603_v28, %v4599_v10 }
0x10cf   : > { %v4790_v21 = vpack.c.bf16 %v4602_v24, %v4598_v62  ;;  %v4792_v13 = vpack.c.bf16 %v4604_v45, %v4600_v20  ;;  %v4415_v11 = vpop.f32.mrb[84].mxu1  ;;  %v4528_v60 = vpop.f32.mrb[116].mxu0 }
0x10d0   : > { %v4416_v49 = vadd.f32 %v4415_v11, %v15424_v15  ;;  %v4529_v29 = vadd.f32 %v4528_v60, %v15428_v58  ;;  %v4417_v41 = vpop.f32.mrb[85].mxu1  ;;  %v4530_v57 = vpop.f32.mrb[117].mxu0 }
0x10d1   : > { %v4418_v54 = vadd.f32 %v4417_v41, %v15432_v0  ;;  %v4531_v34 = vadd.f32 %v4530_v57, %v15434_v36  ;;  %v4419_v44 = vpop.f32.mrb[86].mxu1  ;;  %v4532_v47 = vpop.f32.mrb[118].mxu0  ;;  %5115 = vmatprep.mubr.bf16.mxu1 %v4790_v21  ;;  %5212 = vmatprep.mubr.bf16.mxu0 %v4792_v13 }
0x10d2   : > { %v4420_v22 = vadd.f32 %v4419_v44, %v15424_v15  ;;  %v4533_v52 = vadd.f32 %v4532_v47, %v15428_v58  ;;  %v4421_v31 = vpop.f32.mrb[87].mxu1  ;;  %v4534_v1 = vpop.f32.mrb[119].mxu0  ;;  %5116 = vmatmul.mubr.bf16.vlgmr.msra.gmra.mrb[112].mxu1 %v4789_v2  ;;  %5213 = vmatmul.mubr.bf16.vlgmr.msra.gmra.mrb[144].mxu0 %v4791_v53  ;;  %v4605_v35 = vmax.f32 %v4416_v49, 0.0  ;;  %v4607_v18 = vmax.f32 %v4529_v29, 0.0 }
0x10d3   : > { %v4422_v61 = vadd.f32 %v4421_v31, %v15432_v0  ;;  %v4535_v42 = vadd.f32 %v4534_v1, %v15434_v36  ;;  %v4606_v48 = vmax.f32 %v4418_v54, 0.0  ;;  %v4608_v14 = vmax.f32 %v4531_v34, 0.0 }
0x10d4   : > { %v4609_v23 = vmax.f32 %v4420_v22, 0.0  ;;  %v4611_v55 = vmax.f32 %v4533_v52, 0.0 }
0x10d5   : > { %v4610_v5 = vmax.f32 %v4422_v61, 0.0  ;;  %v4612_v37 = vmax.f32 %v4535_v42, 0.0 }
0x10d6   : > { %v4793_v12 = vpack.c.bf16 %v4609_v23, %v4605_v35  ;;  %v4795_v3 = vpack.c.bf16 %v4611_v55, %v4607_v18 }
0x10d7   : > { %v4794_v19 = vpack.c.bf16 %v4610_v5, %v4606_v48  ;;  %v4796_v43 = vpack.c.bf16 %v4612_v37, %v4608_v14 }
0x10d9   : > { %v4425_v33 = vpop.f32.mrb[88].mxu1  ;;  %v4538_v46 = vpop.f32.mrb[120].mxu0  ;;  %5123 = vmatprep.mubr.bf16.mxu1 %v4794_v19  ;;  %5220 = vmatprep.mubr.bf16.mxu0 %v4796_v43 }
0x10da   : > { %v4426_v51 = vadd.f32 %v4425_v33, %v15424_v15  ;;  %v4539_v8 = vadd.f32 %v4538_v46, %v15428_v58  ;;  %v4427_v10 = vpop.f32.mrb[89].mxu1  ;;  %v4540_v59 = vpop.f32.mrb[121].mxu0  ;;  %5124 = vmatmul.mubr.bf16.gmra.mrb[116].mxu1 %v4793_v12  ;;  %5221 = vmatmul.mubr.bf16.gmra.mrb[148].mxu0 %v4795_v3 }
0x10db   : > { %v4428_v28 = vadd.f32 %v4427_v10, %v15432_v0  ;;  %v4541_v62 = vadd.f32 %v4540_v59, %v15434_v36  ;;  %v4429_v20 = vpop.f32.mrb[90].mxu1  ;;  %v4542_v24 = vpop.f32.mrb[122].mxu0 }
0x10dc   : > { %v4430_v45 = vadd.f32 %v4429_v20, %v15424_v15  ;;  %v4543_v2 = vadd.f32 %v4542_v24, %v15428_v58  ;;  %v4431_v53 = vpop.f32.mrb[91].mxu1  ;;  %v4544_v21 = vpop.f32.mrb[123].mxu0  ;;  %v4613_v60 = vmax.f32 %v4426_v51, 0.0  ;;  %v4615_v49 = vmax.f32 %v4539_v8, 0.0 }
0x10dd   : > { %v4432_v13 = vadd.f32 %v4431_v53, %v15432_v0  ;;  %v4545_v11 = vadd.f32 %v4544_v21, %v15434_v36  ;;  %v4614_v57 = vmax.f32 %v4428_v28, 0.0  ;;  %v4616_v54 = vmax.f32 %v4541_v62, 0.0 }
0x10de   : > { %v4617_v29 = vmax.f32 %v4430_v45, 0.0  ;;  %v4619_v41 = vmax.f32 %v4543_v2, 0.0 }
0x10df   : > { %v4618_v34 = vmax.f32 %v4432_v13, 0.0  ;;  %v4620_v44 = vmax.f32 %v4545_v11, 0.0 }
0x10e0   : > { %v4797_v47 = vpack.c.bf16 %v4617_v29, %v4613_v60  ;;  %v4799_v22 = vpack.c.bf16 %v4619_v41, %v4615_v49 }
0x10e1   : > { %v4798_v52 = vpack.c.bf16 %v4618_v34, %v4614_v57  ;;  %v4800_v31 = vpack.c.bf16 %v4620_v44, %v4616_v54  ;;  %v4435_v1 = vpop.f32.mrb[92].mxu1  ;;  %v4548_v61 = vpop.f32.mrb[124].mxu0 }
0x10e2   : > { %v4436_v42 = vadd.f32 %v4435_v1, %v15424_v15  ;;  %v4549_v35 = vadd.f32 %v4548_v61, %v15428_v58  ;;  %v4437_v18 = vpop.f32.mrb[93].mxu1  ;;  %v4550_v23 = vpop.f32.mrb[125].mxu0 }
0x10e3   : > { %v4438_v55 = vadd.f32 %v4437_v18, %v15432_v0  ;;  %v4551_v48 = vadd.f32 %v4550_v23, %v15434_v36  ;;  %v4439_v14 = vpop.f32.mrb[94].mxu1  ;;  %v4552_v5 = vpop.f32.mrb[126].mxu0  ;;  %5131 = vmatprep.mubr.bf16.mxu1 %v4798_v52  ;;  %5228 = vmatprep.mubr.bf16.mxu0 %v4800_v31 }
0x10e4   : > { %v4440_v37 = vadd.f32 %v4439_v14, %v15424_v15  ;;  %v4553_v12 = vadd.f32 %v4552_v5, %v15428_v58  ;;  %v4441_v3 = vpop.f32.mrb[95].mxu1  ;;  %v4554_v19 = vpop.f32.mrb[127].mxu0  ;;  %5132 = vmatmul.mubr.bf16.gmra.mrb[120].mxu1 %v4797_v47  ;;  %5229 = vmatmul.mubr.bf16.gmra.mrb[152].mxu0 %v4799_v22  ;;  %v4621_v46 = vmax.f32 %v4436_v42, 0.0  ;;  %v4623_v51 = vmax.f32 %v4549_v35, 0.0 }
0x10e5   : > { %v4442_v43 = vadd.f32 %v4441_v3, %v15432_v0  ;;  %v4555_v33 = vadd.f32 %v4554_v19, %v15434_v36  ;;  %v4622_v59 = vmax.f32 %v4438_v55, 0.0  ;;  %v4624_v28 = vmax.f32 %v4551_v48, 0.0 }
0x10e6   : > { %v4625_v8 = vmax.f32 %v4440_v37, 0.0  ;;  %v4627_v10 = vmax.f32 %v4553_v12, 0.0 }
0x10e7   : > { %v4626_v62 = vmax.f32 %v4442_v43, 0.0  ;;  %v4628_v20 = vmax.f32 %v4555_v33, 0.0 }
0x10e8   : > { %v4801_v24 = vpack.c.bf16 %v4625_v8, %v4621_v46  ;;  %v4803_v45 = vpack.c.bf16 %v4627_v10, %v4623_v51 }
0x10e9   : > { %v4802_v2 = vpack.c.bf16 %v4626_v62, %v4622_v59  ;;  %v4804_v53 = vpack.c.bf16 %v4628_v20, %v4624_v28 }
0x10eb   : > { %5139 = vmatprep.mubr.bf16.mxu1 %v4802_v2  ;;  %5236 = vmatprep.mubr.bf16.mxu0 %v4804_v53 }
0x10ec   : > { %5140 = vmatmul.mubr.bf16.gmra.mrb[124].mxu1 %v4801_v24  ;;  %5237 = vmatmul.mubr.bf16.gmra.mrb[156].mxu0 %v4803_v45 }
0x1104   : > { %v4445_v21 = vpop.f32.mrb[96].mxu1  ;;  %v4558_v13 = vpop.f32.mrb[128].mxu0 }
0x1105   : > { %v4446_v11 = vadd.f32 %v4445_v21, %v15424_v15  ;;  %v4559_v60 = vadd.f32 %v4558_v13, %v15428_v58  ;;  %v4447_v49 = vpop.f32.mrb[97].mxu1  ;;  %v4560_v29 = vpop.f32.mrb[129].mxu0 }
0x1106   : > { %v4448_v41 = vadd.f32 %v4447_v49, %v15432_v0  ;;  %v4561_v57 = vadd.f32 %v4560_v29, %v15434_v36  ;;  %v4449_v54 = vpop.f32.mrb[98].mxu1  ;;  %v4562_v34 = vpop.f32.mrb[130].mxu0 }
0x1107   : > { %v4450_v44 = vadd.f32 %v4449_v54, %v15424_v15  ;;  %v4563_v47 = vadd.f32 %v4562_v34, %v15428_v58  ;;  %v4451_v22 = vpop.f32.mrb[99].mxu1  ;;  %v4564_v52 = vpop.f32.mrb[131].mxu0  ;;  %v4629_v61 = vmax.f32 %v4446_v11, 0.0  ;;  %v4631_v42 = vmax.f32 %v4559_v60, 0.0 }
0x1108   : > { %v4452_v31 = vadd.f32 %v4451_v22, %v15432_v0  ;;  %v4565_v1 = vadd.f32 %v4564_v52, %v15434_v36  ;;  %v4630_v23 = vmax.f32 %v4448_v41, 0.0  ;;  %v4632_v55 = vmax.f32 %v4561_v57, 0.0 }
0x1109   : > { %v4633_v35 = vmax.f32 %v4450_v44, 0.0  ;;  %v4635_v18 = vmax.f32 %v4563_v47, 0.0 }
0x110a   : > { %v4634_v48 = vmax.f32 %v4452_v31, 0.0  ;;  %v4636_v14 = vmax.f32 %v4565_v1, 0.0 }
0x110b   : > { %v4805_v5 = vpack.c.bf16 %v4633_v35, %v4629_v61  ;;  %v4807_v37 = vpack.c.bf16 %v4635_v18, %v4631_v42 }
0x110c   : > { %v4806_v12 = vpack.c.bf16 %v4634_v48, %v4630_v23  ;;  %v4808_v3 = vpack.c.bf16 %v4636_v14, %v4632_v55  ;;  %v4455_v19 = vpop.f32.mrb[100].mxu1  ;;  %v4568_v43 = vpop.f32.mrb[132].mxu0 }
0x110d   : > { %v4456_v33 = vadd.f32 %v4455_v19, %v15424_v15  ;;  %v4569_v46 = vadd.f32 %v4568_v43, %v15428_v58  ;;  %v4457_v51 = vpop.f32.mrb[101].mxu1  ;;  %v4570_v8 = vpop.f32.mrb[133].mxu0 }
0x110e   : > { %v4458_v10 = vadd.f32 %v4457_v51, %v15432_v0  ;;  %v4571_v59 = vadd.f32 %v4570_v8, %v15434_v36  ;;  %v4459_v28 = vpop.f32.mrb[102].mxu1  ;;  %v4572_v62 = vpop.f32.mrb[134].mxu0  ;;  %5147 = vmatprep.mubr.bf16.mxu1 %v4806_v12  ;;  %5244 = vmatprep.mubr.bf16.mxu0 %v4808_v3 }
0x110f   : > { %v4460_v20 = vadd.f32 %v4459_v28, %v15424_v15  ;;  %v4573_v24 = vadd.f32 %v4572_v62, %v15428_v58  ;;  %v4461_v45 = vpop.f32.mrb[103].mxu1  ;;  %v4574_v2 = vpop.f32.mrb[135].mxu0  ;;  %5148 = vmatmul.mubr.bf16.gmra.mrb[128].mxu1 %v4805_v5  ;;  %5245 = vmatmul.mubr.bf16.gmra.mrb[160].mxu0 %v4807_v37  ;;  %v4637_v13 = vmax.f32 %v4456_v33, 0.0  ;;  %v4639_v11 = vmax.f32 %v4569_v46, 0.0 }
0x1110   : > { %v4462_v53 = vadd.f32 %v4461_v45, %v15432_v0  ;;  %v4575_v21 = vadd.f32 %v4574_v2, %v15434_v36  ;;  %v4638_v29 = vmax.f32 %v4458_v10, 0.0  ;;  %v4640_v41 = vmax.f32 %v4571_v59, 0.0 }
0x1111   : > { %v4641_v60 = vmax.f32 %v4460_v20, 0.0  ;;  %v4643_v49 = vmax.f32 %v4573_v24, 0.0 }
0x1112   : > { %v4642_v57 = vmax.f32 %v4462_v53, 0.0  ;;  %v4644_v54 = vmax.f32 %v4575_v21, 0.0 }
0x1113   : > { %v4809_v34 = vpack.c.bf16 %v4641_v60, %v4637_v13  ;;  %v4811_v44 = vpack.c.bf16 %v4643_v49, %v4639_v11 }
0x1114   : > { %v4810_v47 = vpack.c.bf16 %v4642_v57, %v4638_v29  ;;  %v4812_v22 = vpack.c.bf16 %v4644_v54, %v4640_v41 }
0x1116   : > { %5155 = vmatprep.mubr.bf16.mxu1 %v4810_v47  ;;  %5252 = vmatprep.mubr.bf16.mxu0 %v4812_v22  ;;  %v4465_v52 = vpop.f32.mrb[104].mxu1  ;;  %v4578_v31 = vpop.f32.mrb[136].mxu0 }
0x1117   : > { %5156 = vmatmul.mubr.bf16.gmra.mrb[132].mxu1 %v4809_v34  ;;  %5253 = vmatmul.mubr.bf16.gmra.mrb[164].mxu0 %v4811_v44  ;;  %v4466_v1 = vadd.f32 %v4465_v52, %v15424_v15  ;;  %v4579_v61 = vadd.f32 %v4578_v31, %v15428_v58  ;;  %v4467_v42 = vpop.f32.mrb[105].mxu1  ;;  %v4580_v35 = vpop.f32.mrb[137].mxu0 }
0x1118   : > { %v4468_v18 = vadd.f32 %v4467_v42, %v15432_v0  ;;  %v4581_v23 = vadd.f32 %v4580_v35, %v15434_v36  ;;  %v4469_v55 = vpop.f32.mrb[106].mxu1  ;;  %v4582_v48 = vpop.f32.mrb[138].mxu0 }
0x1119   : > { %v4470_v14 = vadd.f32 %v4469_v55, %v15424_v15  ;;  %v4583_v5 = vadd.f32 %v4582_v48, %v15428_v58  ;;  %v4471_v37 = vpop.f32.mrb[107].mxu1  ;;  %v4584_v12 = vpop.f32.mrb[139].mxu0  ;;  %v4645_v43 = vmax.f32 %v4466_v1, 0.0  ;;  %v4647_v33 = vmax.f32 %v4579_v61, 0.0 }
0x111a   : > { %v4472_v3 = vadd.f32 %v4471_v37, %v15432_v0  ;;  %v4585_v19 = vadd.f32 %v4584_v12, %v15434_v36  ;;  %v4646_v8 = vmax.f32 %v4468_v18, 0.0  ;;  %v4648_v10 = vmax.f32 %v4581_v23, 0.0 }
0x111b   : > { %v4649_v46 = vmax.f32 %v4470_v14, 0.0  ;;  %v4651_v51 = vmax.f32 %v4583_v5, 0.0 }
0x111c   : > { %v4650_v59 = vmax.f32 %v4472_v3, 0.0  ;;  %v4652_v28 = vmax.f32 %v4585_v19, 0.0  ;;  %v15504_v19 = vld [vmem:[%s17260_s8] ss:$0 sm:$0xff] }
0x111d   : > { %v4813_v62 = vpack.c.bf16 %v4649_v46, %v4645_v43  ;;  %v4815_v20 = vpack.c.bf16 %v4651_v51, %v4647_v33 }
0x111e   : > { %v4814_v24 = vpack.c.bf16 %v4650_v59, %v4646_v8  ;;  %v4816_v45 = vpack.c.bf16 %v4652_v28, %v4648_v10  ;;  %v4475_v2 = vpop.f32.mrb[108].mxu1  ;;  %v4588_v53 = vpop.f32.mrb[140].mxu0 }
0x111f   : > { %v4476_v21 = vadd.f32 %v4475_v2, %v15424_v15  ;;  %v4589_v13 = vadd.f32 %v4588_v53, %v15428_v58  ;;  %v4477_v11 = vpop.f32.mrb[109].mxu1  ;;  %v4590_v60 = vpop.f32.mrb[141].mxu0 }
0x1120   : > { %v4478_v49 = vadd.f32 %v4477_v11, %v15432_v0  ;;  %v4591_v29 = vadd.f32 %v4590_v60, %v15434_v36  ;;  %v4479_v41 = vpop.f32.mrb[110].mxu1  ;;  %v4592_v57 = vpop.f32.mrb[142].mxu0  ;;  %5163 = vmatprep.mubr.bf16.mxu1 %v4814_v24  ;;  %5260 = vmatprep.mubr.bf16.mxu0 %v4816_v45 }
0x1121   : > { %v4480_v54 = vadd.f32 %v4479_v41, %v15424_v15  ;;  %v4593_v34 = vadd.f32 %v4592_v57, %v15428_v58  ;;  %v4481_v44 = vpop.f32.mrb[111].mxu1  ;;  %v4594_v47 = vpop.f32.mrb[143].mxu0  ;;  %5164 = vmatmul.mubr.bf16.gmra.mrb[136].mxu1 %v4813_v62  ;;  %5261 = vmatmul.mubr.bf16.gmra.mrb[168].mxu0 %v4815_v20  ;;  %v4653_v31 = vmax.f32 %v4476_v21, 0.0  ;;  %v4655_v1 = vmax.f32 %v4589_v13, 0.0 }
0x1122   : > { %v4482_v22 = vadd.f32 %v4481_v44, %v15432_v0  ;;  %v4595_v52 = vadd.f32 %v4594_v47, %v15434_v36  ;;  %v4654_v35 = vmax.f32 %v4478_v49, 0.0  ;;  %v4656_v18 = vmax.f32 %v4591_v29, 0.0 }
0x1123   : > { %v4657_v61 = vmax.f32 %v4480_v54, 0.0  ;;  %v4659_v42 = vmax.f32 %v4593_v34, 0.0 }
0x1124   : > { %v4658_v23 = vmax.f32 %v4482_v22, 0.0  ;;  %v4660_v55 = vmax.f32 %v4595_v52, 0.0 }
0x1125   : > { %v4817_v48 = vpack.c.bf16 %v4657_v61, %v4653_v31  ;;  %v4819_v14 = vpack.c.bf16 %v4659_v42, %v4655_v1 }
0x1126   : > { %v4818_v5 = vpack.c.bf16 %v4658_v23, %v4654_v35  ;;  %v4820_v37 = vpack.c.bf16 %v4660_v55, %v4656_v18 }
0x1128   : > { %5171 = vmatprep.mubr.bf16.mxu1 %v4818_v5  ;;  %5268 = vmatprep.mubr.bf16.mxu0 %v4820_v37 }
0x1129   : > { %5172 = vmatmul.mubr.bf16.gmra.mrb[140].mxu1 %v4817_v48  ;;  %5269 = vmatmul.mubr.bf16.gmra.mrb[172].mxu0 %v4819_v14 }
0x112a   : > { %5813 = vmatprep.mubr.bf16.mxu1 %v17333_v56 }
0x11a5   : > { %v11019_v12 = vpop.f32.mrb[112].mxu1  ;;  %v11083_v3 = vpop.f32.mrb[144].mxu0 }
0x11a6   : > { %v11020_v43 = vpop.f32.mrb[113].mxu1  ;;  %v11084_v33 = vpop.f32.mrb[145].mxu0 }
0x11a7   : > { %v11021_v46 = vadd.f32 %v11020_v43, %v11019_v12  ;;  %v11085_v51 = vadd.f32 %v11084_v33, %v11083_v3  ;;  %v11022_v8 = vpop.f32.mrb[114].mxu1  ;;  %v11086_v10 = vpop.f32.mrb[146].mxu0 }
0x11a8   : > { %v11023_v59 = vpop.f32.mrb[115].mxu1  ;;  %v11087_v28 = vpop.f32.mrb[147].mxu0 }
0x11a9   : > { %v5118_v62 = vadd.f32 %v11021_v46, %v15504_v19  ;;  %v11024_v20 = vadd.f32 %v11023_v59, %v11022_v8  ;;  %v11088_v24 = vadd.f32 %v11087_v28, %v11086_v10 }
0x11ab   : > { %v5215_v45 = vadd.f32 %v11085_v51, %v5118_v62  ;;  %v5121_v2 = vadd.f32 %v11024_v20, %v15504_v19 }
0x11ad   : > { %v5218_v53 = vadd.f32 %v11088_v24, %v5121_v2  ;;  %v11025_v21 = vpop.f32.mrb[116].mxu1  ;;  %v11089_v13 = vpop.f32.mrb[148].mxu0  ;;  %v15509_v11 = vadd.f32 %v5215_v45, %v15221_v39 }
0x11ae   : > { %v11026_v60 = vpop.f32.mrb[117].mxu1  ;;  %v11090_v49 = vpop.f32.mrb[149].mxu0 }
0x11af   : > { %17348 = vst [vmem:[#allocation28_spill] sm:$0xff] %v15509_v11  ;;  %v11027_v29 = vadd.f32 %v11026_v60, %v11025_v21  ;;  %v11091_v41 = vadd.f32 %v11090_v49, %v11089_v13  ;;  %v11028_v57 = vpop.f32.mrb[118].mxu1  ;;  %v11092_v54 = vpop.f32.mrb[150].mxu0  ;;  %5325 = vadd.xlane.f32.xlu0 %v15509_v11  ;;  %v15513_v34 = vadd.f32 %v5218_v53, %v15225_v63 }
0x11b0   : > { %v11029_v44 = vpop.f32.mrb[119].mxu1  ;;  %v11093_v47 = vpop.f32.mrb[151].mxu0 }
0x11b1   : > { %17349 = vst [vmem:[#allocation30_spill] sm:$0xff] %v15513_v34  ;;  %v5126_v22 = vadd.f32 %v11027_v29, %v15504_v19  ;;  %v11030_v52 = vadd.f32 %v11029_v44, %v11028_v57  ;;  %v11094_v31 = vadd.f32 %v11093_v47, %v11092_v54  ;;  %5327 = vadd.xlane.f32.xlu1 %v15513_v34 }
0x11b3   : > { %v5223_v39 = vadd.f32 %v11091_v41, %v5126_v22  ;;  %v5129_v1 = vadd.f32 %v11030_v52, %v15504_v19 }
0x11b5   : > { %v5226_v61 = vadd.f32 %v11094_v31, %v5129_v1  ;;  %v15519_v42 = vadd.f32 %v5223_v39, %v15229_v50 }
0x11b7   : > { %17350 = vst [vmem:[#allocation22_spill] sm:$0xff] %v15519_v42  ;;  %v11031_v35 = vpop.f32.mrb[120].mxu1  ;;  %v11095_v18 = vpop.f32.mrb[152].mxu0  ;;  %5329 = vadd.xlane.f32.xlu0 %v15519_v42  ;;  %v15523_v63 = vadd.f32 %v5226_v61, %v15235_v16 }
0x11b8   : > { %v11032_v23 = vpop.f32.mrb[121].mxu1  ;;  %v11096_v55 = vpop.f32.mrb[153].mxu0 }
0x11b9   : > { %17351 = vst [vmem:[#allocation32_spill] sm:$0xff] %v15523_v63  ;;  %v11033_v48 = vadd.f32 %v11032_v23, %v11031_v35  ;;  %v11097_v14 = vadd.f32 %v11096_v55, %v11095_v18  ;;  %v11034_v5 = vpop.f32.mrb[122].mxu1  ;;  %v11098_v37 = vpop.f32.mrb[154].mxu0  ;;  %5331 = vadd.xlane.f32.xlu1 %v15523_v63 }
0x11ba   : > { %v11035_v12 = vpop.f32.mrb[123].mxu1  ;;  %v11099_v3 = vpop.f32.mrb[155].mxu0 }
0x11bb   : > { %v5134_v50 = vadd.f32 %v11033_v48, %v15504_v19  ;;  %v11036_v43 = vadd.f32 %v11035_v12, %v11034_v5  ;;  %v11100_v33 = vadd.f32 %v11099_v3, %v11098_v37 }
0x11bd   : > { %v5231_v46 = vadd.f32 %v11097_v14, %v5134_v50  ;;  %v5137_v51 = vadd.f32 %v11036_v43, %v15504_v19 }
0x11bf   : > { %v5234_v8 = vadd.f32 %v11100_v33, %v5137_v51  ;;  %v11037_v16 = vpop.f32.mrb[124].mxu1  ;;  %v11101_v10 = vpop.f32.mrb[156].mxu0  ;;  %v15529_v59 = vadd.f32 %v5231_v46, %v15241_v17 }
0x11c0   : > { %v11038_v28 = vpop.f32.mrb[125].mxu1  ;;  %v11102_v62 = vpop.f32.mrb[157].mxu0 }
0x11c1   : > { %17352 = vst [vmem:[#allocation33_spill] sm:$0xff] %v15529_v59  ;;  %v11039_v20 = vadd.f32 %v11038_v28, %v11037_v16  ;;  %v11103_v24 = vadd.f32 %v11102_v62, %v11101_v10  ;;  %v11040_v45 = vpop.f32.mrb[126].mxu1  ;;  %v11104_v2 = vpop.f32.mrb[158].mxu0  ;;  %5333 = vadd.xlane.f32.xlu0 %v15529_v59  ;;  %v15533_v53 = vadd.f32 %v5234_v8, %v15246_v40 }
0x11c2   : > { %v11041_v21 = vpop.f32.mrb[127].mxu1  ;;  %v11105_v13 = vpop.f32.mrb[159].mxu0 }
0x11c3   : > { %17353 = vst [vmem:[#allocation34_spill] sm:$0xff] %v15533_v53  ;;  %v5142_v60 = vadd.f32 %v11039_v20, %v15504_v19  ;;  %v11042_v49 = vadd.f32 %v11041_v21, %v11040_v45  ;;  %v11106_v29 = vadd.f32 %v11105_v13, %v11104_v2  ;;  %5335 = vadd.xlane.f32.xlu1 %v15533_v53 }
0x11c5   : > { %v5239_v17 = vadd.f32 %v11103_v24, %v5142_v60  ;;  %v5145_v41 = vadd.f32 %v11042_v49, %v15504_v19 }
0x11c7   : > { %v5242_v57 = vadd.f32 %v11106_v29, %v5145_v41  ;;  %v15539_v54 = vadd.f32 %v5239_v17, %v15250_v4 }
0x11c9   : > { %17354 = vst [vmem:[#allocation35_spill] sm:$0xff] %v15539_v54  ;;  %5337 = vadd.xlane.f32.xlu0 %v15539_v54  ;;  %v15543_v40 = vadd.f32 %v5242_v57, %v15254_v30 }
0x11cb   : > { %17355 = vst [vmem:[#allocation36_spill] sm:$0xff] %v15543_v40  ;;  %5339 = vadd.xlane.f32.xlu1 %v15543_v40 }
0x11e2   : > { %v11043_v44 = vpop.f32.mrb[128].mxu1  ;;  %v11107_v47 = vpop.f32.mrb[160].mxu0 }
0x11e3   : > { %v11044_v22 = vpop.f32.mrb[129].mxu1  ;;  %v11108_v52 = vpop.f32.mrb[161].mxu0 }
0x11e4   : > { %v11045_v31 = vadd.f32 %v11044_v22, %v11043_v44  ;;  %v11109_v39 = vadd.f32 %v11108_v52, %v11107_v47  ;;  %v11046_v1 = vpop.f32.mrb[130].mxu1  ;;  %v11110_v61 = vpop.f32.mrb[162].mxu0 }
0x11e5   : > { %v11047_v35 = vpop.f32.mrb[131].mxu1  ;;  %v11111_v18 = vpop.f32.mrb[163].mxu0 }
0x11e6   : > { %v5150_v4 = vadd.f32 %v11045_v31, %v15504_v19  ;;  %v11048_v23 = vadd.f32 %v11047_v35, %v11046_v1  ;;  %v11112_v55 = vadd.f32 %v11111_v18, %v11110_v61 }
0x11e8   : > { %v5247_v48 = vadd.f32 %v11109_v39, %v5150_v4  ;;  %v5153_v30 = vadd.f32 %v11048_v23, %v15504_v19 }
0x11ea   : > { %v5250_v14 = vadd.f32 %v11112_v55, %v5153_v30  ;;  %v11049_v5 = vpop.f32.mrb[132].mxu1  ;;  %v11113_v37 = vpop.f32.mrb[164].mxu0  ;;  %v15549_v12 = vadd.f32 %v5247_v48, %v15261_v9 }
0x11eb   : > { %v11050_v3 = vpop.f32.mrb[133].mxu1  ;;  %v11114_v50 = vpop.f32.mrb[165].mxu0 }
0x11ec   : > { %17356 = vst [vmem:[#allocation37_spill] sm:$0xff] %v15549_v12  ;;  %v11051_v43 = vadd.f32 %v11050_v3, %v11049_v5  ;;  %v11115_v33 = vadd.f32 %v11114_v50, %v11113_v37  ;;  %v11052_v46 = vpop.f32.mrb[134].mxu1  ;;  %v11116_v51 = vpop.f32.mrb[166].mxu0  ;;  %5341 = vadd.xlane.f32.xlu0 %v15549_v12  ;;  %v15553_v8 = vadd.f32 %v5250_v14, %v15266_v6 }
0x11ed   : > { %v11053_v16 = vpop.f32.mrb[135].mxu1  ;;  %v11117_v10 = vpop.f32.mrb[167].mxu0 }
0x11ee   : > { %17357 = vst [vmem:[#allocation38_spill] sm:$0xff] %v15553_v8  ;;  %v5158_v28 = vadd.f32 %v11051_v43, %v15504_v19  ;;  %v11054_v62 = vadd.f32 %v11053_v16, %v11052_v46  ;;  %v11118_v20 = vadd.f32 %v11117_v10, %v11116_v51  ;;  %5343 = vadd.xlane.f32.xlu1 %v15553_v8 }
0x11f0   : > { %v5255_v9 = vadd.f32 %v11115_v33, %v5158_v28  ;;  %v5161_v24 = vadd.f32 %v11054_v62, %v15504_v19 }
0x11f2   : > { %v5258_v45 = vadd.f32 %v11118_v20, %v5161_v24  ;;  %v15559_v2 = vadd.f32 %v5255_v9, %v15270_v26 }
0x11f4   : > { %17358 = vst [vmem:[#allocation39_spill] sm:$0xff] %v15559_v2  ;;  %5345 = vadd.xlane.f32.xlu0 %v15559_v2  ;;  %v15563_v6 = vadd.f32 %v5258_v45, %v15274_v7  ;;  %v11055_v21 = vpop.f32.mrb[136].mxu1  ;;  %v11119_v13 = vpop.f32.mrb[168].mxu0 }
0x11f5   : > { %v11056_v60 = vpop.f32.mrb[137].mxu1  ;;  %v11120_v49 = vpop.f32.mrb[169].mxu0 }
0x11f6   : > { %17359 = vst [vmem:[#allocation40_spill] sm:$0xff] %v15563_v6  ;;  %5347 = vadd.xlane.f32.xlu1 %v15563_v6  ;;  %v11057_v29 = vadd.f32 %v11056_v60, %v11055_v21  ;;  %v11121_v17 = vadd.f32 %v11120_v49, %v11119_v13  ;;  %v11058_v41 = vpop.f32.mrb[138].mxu1  ;;  %v11122_v57 = vpop.f32.mrb[170].mxu0 }
0x11f7   : > { %v11059_v44 = vpop.f32.mrb[139].mxu1  ;;  %v11123_v47 = vpop.f32.mrb[171].mxu0 }
0x11f8   : > { %v5166_v26 = vadd.f32 %v11057_v29, %v15504_v19  ;;  %v11060_v22 = vadd.f32 %v11059_v44, %v11058_v41  ;;  %v11124_v52 = vadd.f32 %v11123_v47, %v11122_v57 }
0x11fa   : > { %v5263_v31 = vadd.f32 %v11121_v17, %v5166_v26  ;;  %v5169_v7 = vadd.f32 %v11060_v22, %v15504_v19 }
0x11fc   : > { %v5266_v39 = vadd.f32 %v11124_v52, %v5169_v7  ;;  %v11061_v1 = vpop.f32.mrb[140].mxu1  ;;  %v11125_v61 = vpop.f32.mrb[172].mxu0  ;;  %v15569_v35 = vadd.f32 %v5263_v31, %v15281_v38 }
0x11fd   : > { %v11062_v18 = vpop.f32.mrb[141].mxu1  ;;  %v11126_v4 = vpop.f32.mrb[173].mxu0 }
0x11fe   : > { %17360 = vst [vmem:[#allocation41_spill] sm:$0xff] %v15569_v35  ;;  %v11063_v23 = vadd.f32 %v11062_v18, %v11061_v1  ;;  %v11127_v55 = vadd.f32 %v11126_v4, %v11125_v61  ;;  %v11128_v48 = vpop.f32.mrb[174].mxu0  ;;  %5349 = vadd.xlane.f32.xlu0 %v15569_v35  ;;  %v11064_v30 = vpop.f32.mrb[142].mxu1  ;;  %v15573_v14 = vadd.f32 %v5266_v39, %v15286_v25  ;;  %v12346_v39 = vld [vmem:[#allocation9 + $0x4] ss:$12 sps:$4 sm:$0xff]  }
0x11ff   : > { %v11065_v5 = vpop.f32.mrb[143].mxu1  ;;  %v11129_v37 = vpop.f32.mrb[175].mxu0  ;;  %v12344_v61 = vld [vmem:[#allocation9] ss:$12 sps:$4 sm:$0xff]   ;;  %5781 = vmatprep.subr.bf16.mxu1 %v12346_v39 }
0x1200   : > { %17361 = vst [vmem:[#allocation42_spill] sm:$0xff] %v15573_v14  ;;  %v5174_v3 = vadd.f32 %v11063_v23, %v15504_v19  ;;  %v11066_v50 = vadd.f32 %v11065_v5, %v11064_v30  ;;  %v11130_v43 = vadd.f32 %v11129_v37, %v11128_v48  ;;  %5351 = vadd.xlane.f32.xlu1 %v15573_v14  ;;  %v12349_v48 = vld [vmem:[#allocation9 + $0x1c] ss:$12 sps:$4 sm:$0xff]   ;;  %v12347_v30 = vld [vmem:[#allocation9 + $0x18] ss:$12 sps:$4 sm:$0xff]  }
0x1201   : > { %5782 = vmatpush1.bf16.msra.mxu1 %v12344_v61  ;;  %v12352_v37 = vld [vmem:[#allocation9 + $0x34] ss:$12 sps:$4 sm:$0xff]  }
0x1202   : > { %v5271_v38 = vadd.f32 %v11127_v55, %v5174_v3  ;;  %v5177_v33 = vadd.f32 %v11066_v50, %v15504_v19  ;;  %5783 = vmatprep.subr.bf16.mxu1 %v12349_v48  ;;  %v12353_v3 = vld [vmem:[#allocation9 + $0x8] ss:$12 sps:$4 sm:$0xff]   ;;  %v12350_v50 = vld [vmem:[#allocation9 + $0x30] ss:$12 sps:$4 sm:$0xff]  }
0x1203   : > { %11739 = vmatprep.subr.bf16.mxu0 %v12353_v3 }
0x1204   : > { %v5274_v46 = vadd.f32 %v11130_v43, %v5177_v33  ;;  %v15579_v51 = vadd.f32 %v5271_v38, %v15290_v32  ;;  %11740 = vmatpush3.bf16.msra.mxu0 %v12353_v3  ;;  %v12356_v43 = vld [vmem:[#allocation9 + $0x4c] ss:$12 sps:$4 sm:$0xff]   ;;  %v12354_v33 = vld [vmem:[#allocation9 + $0x48] ss:$12 sps:$4 sm:$0xff]  }
0x1205   : > { %5784 = vmatpush1.bf16.msra.mxu1 %v12347_v30  ;;  %v12357_v38 = vld [vmem:[#allocation9 + $0x20] ss:$12 sps:$4 sm:$0xff]  }
0x1206   : > { %17362 = vst [vmem:[#allocation43_spill] sm:$0xff] %v15579_v51  ;;  %5353 = vadd.xlane.f32.xlu0 %v15579_v51  ;;  %v15583_v25 = vadd.f32 %v5274_v46, %v15294_v27  ;;  %5785 = vmatprep.subr.bf16.mxu1 %v12352_v37  ;;  %v12360_v46 = vld [vmem:[#allocation9 + $0x64] ss:$12 sps:$4 sm:$0xff]  }
0x1207   : > { %11741 = vmatprep.subr.bf16.mxu0 %v12357_v38 }
0x1208   : > { %17363 = vst [vmem:[#allocation44_spill] sm:$0xff] %v15583_v25  ;;  %5355 = vadd.xlane.f32.xlu1 %v15583_v25  ;;  %11742 = vmatpush3.bf16.msra.mxu0 %v12357_v38 }
0x1209   : > { %5786 = vmatpush1.bf16.msra.mxu1 %v12350_v50 }
0x120a   : > { %5787 = vmatprep.subr.bf16.mxu1 %v12356_v43 }
0x120d   : > { %5788 = vmatpush1.bf16.msra.mxu1 %v12354_v33 }
0x120e   : > { %5789 = vmatprep.subr.bf16.mxu1 %v12360_v46 }
0x123c   : > { %v5326_v16 = vpop.xlane.xlu0 %5325 }
0x123d   : > { %v5357_v10 = vmul.f32 0.0078125, %v5326_v16  ;;  %v12361_v16 = vld [vmem:[#allocation9 + $0x38] ss:$12 sps:$4 sm:$0xff]  }
0x123e   : > { %v5328_v28 = vpop.xlane.xlu1 %5327  ;;  %11743 = vmatprep.subr.bf16.mxu0 %v12361_v16 }
0x123f   : > { %v15587_v62 = vsub.f32 %v15509_v11, %v5357_v10  ;;  %v5358_v20 = vmul.f32 0.0078125, %v5328_v28  ;;  %v12358_v10 = vld [vmem:[#allocation9 + $0x60] ss:$12 sps:$4 sm:$0xff]   ;;  %11744 = vmatpush3.bf16.msra.mxu0 %v12361_v16  ;;  %v12364_v28 = vld [vmem:[#allocation9 + $0x7c] ss:$12 sps:$4 sm:$0xff]  }
0x1240   : > { %5790 = vmatpush1.bf16.msra.mxu1 %v12358_v10 }
0x1241   : > { %v15590_v19 = vsub.f32 %v15513_v34, %v5358_v20  ;;  %v5389_v32 = vmul.f32 %v15587_v62, %v15587_v62  ;;  %v12365_v20 = vld [vmem:[#allocation9 + $0x50] ss:$12 sps:$4 sm:$0xff]   ;;  %5791 = vmatprep.subr.bf16.mxu1 %v12364_v28 }
0x1242   : > { %11745 = vmatprep.subr.bf16.mxu0 %v12365_v20 }
0x1243   : > { %5405 = vadd.xlane.f32.xlu0 %v5389_v32  ;;  %v5390_v27 = vmul.f32 %v15590_v19, %v15590_v19  ;;  %v12362_v32 = vld [vmem:[#allocation9 + $0x78] ss:$12 sps:$4 sm:$0xff]   ;;  %11746 = vmatpush3.bf16.msra.mxu0 %v12365_v20 }
0x1244   : > { %v5330_v9 = vpop.xlane.xlu0 %5329  ;;  %5792 = vmatpush1.bf16.msra.mxu1 %v12362_v32 }
0x1245   : > { %v5359_v24 = vmul.f32 0.0078125, %v5330_v9  ;;  %5407 = vadd.xlane.f32.xlu1 %v5390_v27  ;;  %v12368_v27 = vld [vmem:[#allocation9 + $0x94] ss:$12 sps:$4 sm:$0xff]  }
0x1246   : > { %v5332_v45 = vpop.xlane.xlu1 %5331  ;;  %v12369_v9 = vld [vmem:[#allocation9 + $0x68] ss:$12 sps:$4 sm:$0xff]   ;;  %5793 = vmatprep.subr.bf16.mxu1 %v12368_v27 }
0x1247   : > { %v15597_v21 = vsub.f32 %v15519_v42, %v5359_v24  ;;  %v5360_v13 = vmul.f32 0.0078125, %v5332_v45  ;;  %v12366_v24 = vld [vmem:[#allocation9 + $0x90] ss:$12 sps:$4 sm:$0xff]   ;;  %11747 = vmatprep.subr.bf16.mxu0 %v12369_v9  ;;  %v12372_v45 = vld [vmem:[#allocation9 + $0xac] ss:$12 sps:$4 sm:$0xff]  }
0x1248   : > { %5794 = vmatpush1.bf16.msra.mxu1 %v12366_v24  ;;  %11748 = vmatpush3.bf16.msra.mxu0 %v12369_v9 }
0x1249   : > { %v15600_v60 = vsub.f32 %v15523_v63, %v5360_v13  ;;  %v5391_v49 = vmul.f32 %v15597_v21, %v15597_v21  ;;  %v12373_v13 = vld [vmem:[#allocation9 + $0x80] ss:$12 sps:$4 sm:$0xff]   ;;  %5795 = vmatprep.subr.bf16.mxu1 %v12372_v45 }
0x124a   : > { %11749 = vmatprep.subr.bf16.mxu0 %v12373_v13 }
0x124b   : > { %5409 = vadd.xlane.f32.xlu0 %v5391_v49  ;;  %v5392_v29 = vmul.f32 %v15600_v60, %v15600_v60  ;;  %v12370_v49 = vld [vmem:[#allocation9 + $0xa8] ss:$12 sps:$4 sm:$0xff]  }
0x124c   : > { %5796 = vmatpush1.bf16.msra.mxu1 %v12370_v49  ;;  %11750 = vmatpush3.bf16.msra.mxu0 %v12373_v13 }
0x124d   : > { %5411 = vadd.xlane.f32.xlu1 %v5392_v29  ;;  %v12374_v29 = vld [vmem:[#allocation9 + $0x98] ss:$12 sps:$4 sm:$0xff]  }
0x124e   : > { %v5334_v17 = vpop.xlane.xlu0 %5333  ;;  %11751 = vmatprep.subr.bf16.mxu0 %v12374_v29 }
0x124f   : > { %v5361_v41 = vmul.f32 0.0078125, %v5334_v17 }
0x1250   : > { %v5336_v57 = vpop.xlane.xlu1 %5335  ;;  %11752 = vmatpush3.bf16.msra.mxu0 %v12374_v29 }
0x1251   : > { %v15607_v44 = vsub.f32 %v15529_v59, %v5361_v41  ;;  %v5362_v47 = vmul.f32 0.0078125, %v5336_v57 }
0x1253   : > { %v15610_v26 = vsub.f32 %v15533_v53, %v5362_v47  ;;  %v5393_v22 = vmul.f32 %v15607_v44, %v15607_v44 }
0x1255   : > { %5413 = vadd.xlane.f32.xlu0 %v5393_v22  ;;  %v5394_v52 = vmul.f32 %v15610_v26, %v15610_v26 }
0x1256   : > { %v5338_v31 = vpop.xlane.xlu0 %5337 }
0x1257   : > { %v5363_v7 = vmul.f32 0.0078125, %v5338_v31  ;;  %5415 = vadd.xlane.f32.xlu1 %v5394_v52  ;;  %v12375_v52 = vld [vmem:[#allocation9 + $0xb0] ss:$12 sps:$4 sm:$0xff]  }
0x1258   : > { %v5340_v1 = vpop.xlane.xlu1 %5339  ;;  %11753 = vmatprep.subr.bf16.mxu0 %v12375_v52 }
0x1259   : > { %v15617_v18 = vsub.f32 %v15539_v54, %v5363_v7  ;;  %v5364_v4 = vmul.f32 0.0078125, %v5340_v1  ;;  %11754 = vmatpush3.bf16.msra.mxu0 %v12375_v52 }
0x125b   : > { %v15620_v23 = vsub.f32 %v15543_v40, %v5364_v4  ;;  %v5395_v55 = vmul.f32 %v15617_v18, %v15617_v18 }
0x125d   : > { %5417 = vadd.xlane.f32.xlu0 %v5395_v55  ;;  %v5396_v5 = vmul.f32 %v15620_v23, %v15620_v23 }
0x125f   : > { %5419 = vadd.xlane.f32.xlu1 %v5396_v5 }
0x1279   : > { %v5342_v17 = vpop.xlane.xlu0 %5341 }
0x127a   : > { %v5365_v41 = vmul.f32 0.0078125, %v5342_v17 }
0x127b   : > { %v5344_v57 = vpop.xlane.xlu1 %5343 }
0x127c   : > { %v15627_v47 = vsub.f32 %v15549_v12, %v5365_v41  ;;  %v5366_v22 = vmul.f32 0.0078125, %v5344_v57 }
0x127e   : > { %v15630_v31 = vsub.f32 %v15553_v8, %v5366_v22  ;;  %v5397_v7 = vmul.f32 %v15627_v47, %v15627_v47 }
0x1280   : > { %5421 = vadd.xlane.f32.xlu0 %v5397_v7  ;;  %v5398_v39 = vmul.f32 %v15630_v31, %v15630_v31 }
0x1281   : > { %v5346_v1 = vpop.xlane.xlu0 %5345 }
0x1282   : > { %v5367_v61 = vmul.f32 0.0078125, %v5346_v1  ;;  %5423 = vadd.xlane.f32.xlu1 %v5398_v39 }
0x1283   : > { %v5348_v4 = vpop.xlane.xlu1 %5347 }
0x1284   : > { %v15637_v55 = vsub.f32 %v15559_v2, %v5367_v61  ;;  %v5368_v48 = vmul.f32 0.0078125, %v5348_v4 }
0x1286   : > { %v15640_v30 = vsub.f32 %v15563_v6, %v5368_v48  ;;  %v5399_v5 = vmul.f32 %v15637_v55, %v15637_v55 }
0x1288   : > { %5425 = vadd.xlane.f32.xlu0 %v5399_v5  ;;  %v5400_v37 = vmul.f32 %v15640_v30, %v15640_v30 }
0x128a   : > { %5427 = vadd.xlane.f32.xlu1 %v5400_v37 }
0x128b   : > { %v5350_v3 = vpop.xlane.xlu0 %5349 }
0x128c   : > { %v5369_v50 = vmul.f32 0.0078125, %v5350_v3 }
0x128d   : > { %v5352_v43 = vpop.xlane.xlu1 %5351 }
0x128e   : > { %v15647_v38 = vsub.f32 %v15569_v35, %v5369_v50  ;;  %v5370_v33 = vmul.f32 0.0078125, %v5352_v43 }
0x1290   : > { %v15650_v46 = vsub.f32 %v15573_v14, %v5370_v33  ;;  %v5401_v16 = vmul.f32 %v15647_v38, %v15647_v38 }
0x1292   : > { %5429 = vadd.xlane.f32.xlu0 %v5401_v16  ;;  %v5402_v10 = vmul.f32 %v15650_v46, %v15650_v46 }
0x1293   : > { %v5354_v28 = vpop.xlane.xlu0 %5353 }
0x1294   : > { %v5371_v20 = vmul.f32 0.0078125, %v5354_v28  ;;  %5431 = vadd.xlane.f32.xlu1 %v5402_v10 }
0x1295   : > { %v5356_v32 = vpop.xlane.xlu1 %5355 }
0x1296   : > { %v15657_v27 = vsub.f32 %v15579_v51, %v5371_v20  ;;  %v5372_v9 = vmul.f32 0.0078125, %v5356_v32 }
0x1298   : > { %v15660_v24 = vsub.f32 %v15583_v25, %v5372_v9  ;;  %v5403_v45 = vmul.f32 %v15657_v27, %v15657_v27 }
0x129a   : > { %5433 = vadd.xlane.f32.xlu0 %v5403_v45  ;;  %v5404_v13 = vmul.f32 %v15660_v24, %v15660_v24 }
0x129c   : > { %5435 = vadd.xlane.f32.xlu1 %v5404_v13 }
0x12d0   : > { %v5406_v49 = vpop.xlane.xlu0 %5405 }
0x12d1   : > { %v5437_v29 = vmul.f32 0.007874016, %v5406_v49 }
0x12d2   : > { %v5408_v17 = vpop.xlane.xlu1 %5407 }
0x12d3   : > { %12848 = vrsqrt.f32 %v5437_v29  ;;  %v5438_v41 = vmul.f32 0.007874016, %v5408_v17  ;;  %vm5455_vm12 = vcmp.eq.f32.partialorder %v5437_v29, inf  ;;  %v5458_v61 = vand.u32 2147483648, %v5437_v29 }
0x12d4   : > { %vm5457_vm13 = vcmp.eq.f32.partialorder %v5437_v29, 0.0 }
0x12d5   : > { %12850 = vrsqrt.f32 %v5438_v41  ;;  %vm5462_vm14 = vcmp.eq.f32.partialorder %v5438_v41, inf  ;;  %v5465_v50 = vand.u32 2147483648, %v5438_v41  ;;  %vm5464_vm15 = vcmp.eq.f32.partialorder %v5438_v41, 0.0 }
0x12d8   : > { %v5410_v57 = vpop.xlane.xlu0 %5409 }
0x12d9   : > { %v5439_v22 = vmul.f32 0.007874016, %v5410_v57 }
0x12da   : > { %v5412_v52 = vpop.xlane.xlu1 %5411 }
0x12db   : > { %12852 = vrsqrt.f32 %v5439_v22  ;;  %v5440_v7 = vmul.f32 0.007874016, %v5412_v52  ;;  %vm5469_vm4 = vcmp.eq.f32.partialorder %v5439_v22, inf  ;;  %v5472_v13 = vand.u32 2147483648, %v5439_v22 }
0x12dc   : > { %vm5471_vm6 = vcmp.eq.f32.partialorder %v5439_v22, 0.0 }
0x12dd   : > { %v12849_v39 = vpop.eup %12848  ;;  %12854 = vrsqrt.f32 %v5440_v7  ;;  %vm5476_vm7 = vcmp.eq.f32.partialorder %v5440_v7, inf  ;;  %vm5478_vm5 = vcmp.eq.f32.partialorder %v5440_v7, 0.0 }
0x12de   : > { %v5454_v1 = vmul.f32 %v12849_v39, %v5437_v29 }
0x12df   : > { %v12851_v4 = vpop.eup %12850 }
0x12e0   : > { %v5456_v48 = vsel %vm5455_vm12, %v5437_v29, %v5454_v1  ;;  %v5461_v37 = vmul.f32 %v12851_v4, %v5438_v41 }
0x12e1   : > { %v5459_v5 = vsel %vm5457_vm13, %v5458_v61, %v5456_v48 }
0x12e2   : > { %v5565_v3 = vadd.f32 1e-06, %v5459_v5  ;;  %v5414_v43 = vpop.xlane.xlu0 %5413  ;;  %v5463_v33 = vsel %vm5462_vm14, %v5438_v41, %v5461_v37  ;;  %v5479_v41 = vand.u32 2147483648, %v5440_v7 }
0x12e3   : > { %v5441_v16 = vmul.f32 0.007874016, %v5414_v43  ;;  %v5466_v10 = vsel %vm5464_vm15, %v5465_v50, %v5463_v33 }
0x12e4   : > { %12856 = vrcp.f32 %v5565_v3  ;;  %v5416_v28 = vpop.xlane.xlu1 %5415  ;;  %v5566_v32 = vadd.f32 1e-06, %v5466_v10 }
0x12e5   : > { %v12853_v20 = vpop.eup %12852  ;;  %12858 = vrsqrt.f32 %v5441_v16  ;;  %v5442_v45 = vmul.f32 0.007874016, %v5416_v28  ;;  %vm5483_vm9 = vcmp.eq.f32.partialorder %v5441_v16, inf  ;;  %v5486_v33 = vand.u32 2147483648, %v5441_v16 }
0x12e6   : > { %v5468_v9 = vmul.f32 %v12853_v20, %v5439_v22  ;;  %12860 = vrcp.f32 %v5566_v32  ;;  %vm5485_vm8 = vcmp.eq.f32.partialorder %v5441_v16, 0.0 }
0x12e7   : > { %v12855_v49 = vpop.eup %12854  ;;  %12862 = vrsqrt.f32 %v5442_v45  ;;  %vm5490_vm10 = vcmp.eq.f32.partialorder %v5442_v45, inf  ;;  %vm5492_vm11 = vcmp.eq.f32.partialorder %v5442_v45, 0.0 }
0x12e8   : > { %v5470_v29 = vsel %vm5469_vm4, %v5439_v22, %v5468_v9  ;;  %v5475_v17 = vmul.f32 %v12855_v49, %v5440_v7 }
0x12e9   : > { %v5473_v57 = vsel %vm5471_vm6, %v5472_v13, %v5470_v29  ;;  %v5493_v13 = vand.u32 2147483648, %v5442_v45 }
0x12ea   : > { %v5418_v52 = vpop.xlane.xlu0 %5417  ;;  %v5477_v39 = vsel %vm5476_vm7, %v5440_v7, %v5475_v17  ;;  %v5567_v61 = vadd.f32 1e-06, %v5473_v57 }
0x12eb   : > { %v5443_v1 = vmul.f32 0.007874016, %v5418_v52  ;;  %v5480_v48 = vsel %vm5478_vm5, %v5479_v41, %v5477_v39 }
0x12ec   : > { %v5420_v4 = vpop.xlane.xlu1 %5419  ;;  %v5568_v3 = vadd.f32 1e-06, %v5480_v48 }
0x12ed   : > { %12864 = vrsqrt.f32 %v5443_v1  ;;  %v5444_v37 = vmul.f32 0.007874016, %v5420_v4  ;;  %vm5497_vm12 = vcmp.eq.f32.partialorder %v5443_v1, inf  ;;  %vm5499_vm13 = vcmp.eq.f32.partialorder %v5443_v1, 0.0 }
0x12ee   : > { %v12857_v5 = vpop.eup %12856  ;;  %12866 = vrcp.f32 %v5567_v61 }
0x12ef   : > { %v12859_v50 = vpop.eup %12858  ;;  %12868 = vrsqrt.f32 %v5444_v37  ;;  %v5597_v7 = vmul.f32 %v12857_v5, %v15587_v62  ;;  %vm5504_vm14 = vcmp.eq.f32.partialorder %v5444_v37, inf  ;;  %v5507_v5 = vand.u32 2147483648, %v5444_v37 }
0x12f0   : > { %v5482_v43 = vmul.f32 %v12859_v50, %v5441_v16  ;;  %v12861_v22 = vpop.eup %12860  ;;  %12870 = vrcp.f32 %v5568_v3  ;;  %vm5506_vm15 = vcmp.eq.f32.partialorder %v5444_v37, 0.0 }
0x12f1   : > { %v12863_v10 = vpop.eup %12862  ;;  %v5598_v20 = vmul.f32 %v12861_v22, %v15590_v19  ;;  %v5500_v19 = vand.u32 2147483648, %v5443_v1 }
0x12f2   : > { %v5484_v28 = vsel %vm5483_vm9, %v5441_v16, %v5482_v43  ;;  %v5489_v32 = vmul.f32 %v12863_v10, %v5442_v45 }
0x12f3   : > { %v5487_v9 = vsel %vm5485_vm8, %v5486_v33, %v5484_v28  ;;  %v5613_v49 = vpack.c.bf16 %v5598_v20, %v5597_v7 }
0x12f4   : > { %v5569_v29 = vadd.f32 1e-06, %v5487_v9  ;;  %v5491_v17 = vsel %vm5490_vm10, %v5442_v45, %v5489_v32 }
0x12f5   : > { %5814 = vmatmul.mubr.bf16.vlgmr.msra.gmra.mrb[144].mxu1 %v5613_v49  ;;  %11755 = vmatprep.mubr.bf16.mxu0 %v5613_v49  ;;  %v5494_v57 = vsel %vm5492_vm11, %v5493_v13, %v5491_v17 }
0x12f6   : > { %5823 = vmatprep.mubr.bf16.mxu1 %v17333_v56  ;;  %v5570_v52 = vadd.f32 1e-06, %v5494_v57  ;;  %12872 = vrcp.f32 %v5569_v29 }
0x12f7   : > { %v12865_v41 = vpop.eup %12864 }
0x12f8   : > { %v5496_v16 = vmul.f32 %v12865_v41, %v5443_v1  ;;  %v12867_v62 = vpop.eup %12866  ;;  %12874 = vrcp.f32 %v5570_v52 }
0x12f9   : > { %v12869_v39 = vpop.eup %12868  ;;  %v5599_v3 = vmul.f32 %v12867_v62, %v15597_v21 }
0x12fa   : > { %v5498_v61 = vsel %vm5497_vm12, %v5443_v1, %v5496_v16  ;;  %v12871_v4 = vpop.eup %12870  ;;  %v5503_v48 = vmul.f32 %v12869_v39, %v5444_v37 }
0x12fb   : > { %v5501_v45 = vsel %vm5499_vm13, %v5500_v19, %v5498_v61  ;;  %v5600_v50 = vmul.f32 %v12871_v4, %v15600_v60 }
0x12fc   : > { %v5571_v43 = vadd.f32 1e-06, %v5501_v45  ;;  %v5505_v22 = vsel %vm5504_vm14, %v5444_v37, %v5503_v48 }
0x12fd   : > { %v5614_v33 = vpack.c.bf16 %v5600_v50, %v5599_v3  ;;  %v5508_v10 = vsel %vm5506_vm15, %v5507_v5, %v5505_v22 }
0x12fe   : > { %v5572_v28 = vadd.f32 1e-06, %v5508_v10  ;;  %12876 = vrcp.f32 %v5571_v43 }
0x12ff   : > { %5824 = vmatmul.mubr.bf16.gmra.mrb[148].mxu1 %v5614_v33  ;;  %11756 = vmatmul.mubr.bf16.vlgmr.msra.gmra.mrb[176].mxu0 %v5614_v33 }
0x1300   : > { %v12873_v7 = vpop.eup %12872  ;;  %5833 = vmatprep.mubr.bf16.mxu1 %v17333_v56  ;;  %12878 = vrcp.f32 %v5572_v28 }
0x1301   : > { %v5601_v20 = vmul.f32 %v12873_v7, %v15607_v44 }
0x1302   : > { %v12875_v1 = vpop.eup %12874 }
0x1303   : > { %v5602_v21 = vmul.f32 %v12875_v1, %v15610_v26 }
0x1305   : > { %v5615_v32 = vpack.c.bf16 %v5602_v21, %v5601_v20 }
0x1307   : > { %5834 = vmatmul.mubr.bf16.gmra.mrb[152].mxu1 %v5615_v32  ;;  %11759 = vmatprep.mubr.bf16.mxu0 %v5615_v32 }
0x1308   : > { %v12877_v60 = vpop.eup %12876  ;;  %5843 = vmatprep.mubr.bf16.mxu1 %v17333_v56 }
0x1309   : > { %v5603_v13 = vmul.f32 %v12877_v60, %v15617_v18 }
0x130a   : > { %v12879_v37 = vpop.eup %12878 }
0x130b   : > { %v5604_v49 = vmul.f32 %v12879_v37, %v15620_v23 }
0x130d   : > { %v5422_v9 = vpop.xlane.xlu0 %5421  ;;  %v5616_v17 = vpack.c.bf16 %v5604_v49, %v5603_v13 }
0x130e   : > { %v5445_v29 = vmul.f32 0.007874016, %v5422_v9 }
0x130f   : > { %v5424_v57 = vpop.xlane.xlu1 %5423  ;;  %5844 = vmatmul.mubr.bf16.gmra.mrb[156].mxu1 %v5616_v17  ;;  %11760 = vmatmul.mubr.bf16.gmra.mrb[180].mxu0 %v5616_v17 }
0x1310   : > { %12880 = vrsqrt.f32 %v5445_v29  ;;  %v5446_v44 = vmul.f32 0.007874016, %v5424_v57  ;;  %5853 = vmatprep.mubr.bf16.mxu1 %v17333_v56  ;;  %vm5511_vm4 = vcmp.eq.f32.partialorder %v5445_v29, inf  ;;  %v5514_v18 = vand.u32 2147483648, %v5445_v29 }
0x1311   : > { %vm5513_vm6 = vcmp.eq.f32.partialorder %v5445_v29, 0.0 }
0x1312   : > { %12882 = vrsqrt.f32 %v5446_v44  ;;  %vm5518_vm7 = vcmp.eq.f32.partialorder %v5446_v44, inf  ;;  %v5521_v48 = vand.u32 2147483648, %v5446_v44  ;;  %vm5520_vm5 = vcmp.eq.f32.partialorder %v5446_v44, 0.0 }
0x1315   : > { %v5426_v26 = vpop.xlane.xlu0 %5425 }
0x1316   : > { %v5447_v41 = vmul.f32 0.007874016, %v5426_v26 }
0x1317   : > { %v5428_v52 = vpop.xlane.xlu1 %5427 }
0x1318   : > { %12884 = vrsqrt.f32 %v5447_v41  ;;  %v5448_v16 = vmul.f32 0.007874016, %v5428_v52  ;;  %vm5525_vm9 = vcmp.eq.f32.partialorder %v5447_v41, inf  ;;  %v5528_v21 = vand.u32 2147483648, %v5447_v41 }
0x1319   : > { %vm5527_vm8 = vcmp.eq.f32.partialorder %v5447_v41, 0.0 }
0x131a   : > { %v12881_v62 = vpop.eup %12880  ;;  %12886 = vrsqrt.f32 %v5448_v16  ;;  %vm5532_vm10 = vcmp.eq.f32.partialorder %v5448_v16, inf  ;;  %v5535_v60 = vand.u32 2147483648, %v5448_v16  ;;  %vm5534_vm11 = vcmp.eq.f32.partialorder %v5448_v16, 0.0 }
0x131b   : > { %v5510_v19 = vmul.f32 %v12881_v62, %v5445_v29 }
0x131c   : > { %v12883_v23 = vpop.eup %12882 }
0x131d   : > { %v5512_v39 = vsel %vm5511_vm4, %v5445_v29, %v5510_v19  ;;  %v5517_v61 = vmul.f32 %v12883_v23, %v5446_v44 }
0x131e   : > { %v5515_v4 = vsel %vm5513_vm6, %v5514_v18, %v5512_v39 }
0x131f   : > { %v5573_v45 = vadd.f32 1e-06, %v5515_v4  ;;  %v5519_v5 = vsel %vm5518_vm7, %v5446_v44, %v5517_v61  ;;  %v5430_v3 = vpop.xlane.xlu0 %5429 }
0x1320   : > { %v5449_v50 = vmul.f32 0.007874016, %v5430_v3  ;;  %v5522_v43 = vsel %vm5520_vm5, %v5521_v48, %v5519_v5 }
0x1321   : > { %v5432_v33 = vpop.xlane.xlu1 %5431  ;;  %v5574_v10 = vadd.f32 1e-06, %v5522_v43  ;;  %12888 = vrcp.f32 %v5573_v45 }
0x1322   : > { %v12885_v22 = vpop.eup %12884  ;;  %12890 = vrsqrt.f32 %v5449_v50  ;;  %v5450_v7 = vmul.f32 0.007874016, %v5432_v33  ;;  %vm5539_vm12 = vcmp.eq.f32.partialorder %v5449_v50, inf  ;;  %v5542_v18 = vand.u32 2147483648, %v5449_v50 }
0x1323   : > { %v5524_v28 = vmul.f32 %v12885_v22, %v5447_v41  ;;  %12892 = vrcp.f32 %v5574_v10  ;;  %vm5541_vm13 = vcmp.eq.f32.partialorder %v5449_v50, 0.0 }
0x1324   : > { %v12887_v1 = vpop.eup %12886  ;;  %12894 = vrsqrt.f32 %v5450_v7  ;;  %vm5546_vm14 = vcmp.eq.f32.partialorder %v5450_v7, inf  ;;  %v5549_v5 = vand.u32 2147483648, %v5450_v7  ;;  %vm5548_vm15 = vcmp.eq.f32.partialorder %v5450_v7, 0.0 }
0x1325   : > { %v5526_v20 = vsel %vm5525_vm9, %v5447_v41, %v5524_v28  ;;  %v5531_v32 = vmul.f32 %v12887_v1, %v5448_v16 }
0x1326   : > { %v5529_v37 = vsel %vm5527_vm8, %v5528_v21, %v5526_v20 }
0x1327   : > { %v5533_v9 = vsel %vm5532_vm10, %v5448_v16, %v5531_v32  ;;  %v5434_v13 = vpop.xlane.xlu0 %5433  ;;  %v5575_v49 = vadd.f32 1e-06, %v5529_v37 }
0x1328   : > { %v5451_v29 = vmul.f32 0.007874016, %v5434_v13  ;;  %v5536_v17 = vsel %vm5534_vm11, %v5535_v60, %v5533_v9 }
0x1329   : > { %v5436_v57 = vpop.xlane.xlu1 %5435  ;;  %v5576_v44 = vadd.f32 1e-06, %v5536_v17  ;;  %12896 = vrcp.f32 %v5575_v49 }
0x132a   : > { %12898 = vrsqrt.f32 %v5451_v29  ;;  %v5452_v52 = vmul.f32 0.007874016, %v5436_v57  ;;  %vm5553_vm4 = vcmp.eq.f32.partialorder %v5451_v29, inf  ;;  %vm5555_vm6 = vcmp.eq.f32.partialorder %v5451_v29, 0.0 }
0x132b   : > { %v12889_v26 = vpop.eup %12888  ;;  %12900 = vrcp.f32 %v5576_v44 }
0x132c   : > { %v12891_v62 = vpop.eup %12890  ;;  %12902 = vrsqrt.f32 %v5452_v52  ;;  %v5605_v23 = vmul.f32 %v12889_v26, %v15627_v47  ;;  %vm5560_vm7 = vcmp.eq.f32.partialorder %v5452_v52, inf  ;;  %v5563_v9 = vand.u32 2147483648, %v5452_v52 }
0x132d   : > { %v12893_v41 = vpop.eup %12892  ;;  %v5538_v19 = vmul.f32 %v12891_v62, %v5449_v50  ;;  %vm5562_vm5 = vcmp.eq.f32.partialorder %v5452_v52, 0.0 }
0x132e   : > { %v5606_v16 = vmul.f32 %v12893_v41, %v15630_v31  ;;  %v12895_v39 = vpop.eup %12894 }
0x132f   : > { %v5540_v61 = vsel %vm5539_vm12, %v5449_v50, %v5538_v19  ;;  %v5545_v4 = vmul.f32 %v12895_v39, %v5450_v7  ;;  %v5556_v50 = vand.u32 2147483648, %v5451_v29 }
0x1330   : > { %v5617_v48 = vpack.c.bf16 %v5606_v16, %v5605_v23  ;;  %v5543_v45 = vsel %vm5541_vm13, %v5542_v18, %v5540_v61 }
0x1331   : > { %v5577_v3 = vadd.f32 1e-06, %v5543_v45  ;;  %v5547_v43 = vsel %vm5546_vm14, %v5450_v7, %v5545_v4 }
0x1332   : > { %5854 = vmatmul.mubr.bf16.gmra.mrb[160].mxu1 %v5617_v48  ;;  %11763 = vmatprep.mubr.bf16.mxu0 %v5617_v48  ;;  %v5550_v33 = vsel %vm5548_vm15, %v5549_v5, %v5547_v43  ;;  %v17365_v48 = vld [vmem:[#allocation24_spill] sm:$0xff] }
0x1333   : > { %v12897_v22 = vpop.eup %12896  ;;  %5863 = vmatprep.mubr.bf16.mxu1 %v17333_v56  ;;  %v5578_v10 = vadd.f32 1e-06, %v5550_v33  ;;  %12904 = vrcp.f32 %v5577_v3 }
0x1334   : > { %v12899_v47 = vpop.eup %12898  ;;  %v5607_v1 = vmul.f32 %v12897_v22, %v15637_v55 }
0x1335   : > { %v12901_v31 = vpop.eup %12900  ;;  %v5552_v28 = vmul.f32 %v12899_v47, %v5451_v29  ;;  %12906 = vrcp.f32 %v5578_v10 }
0x1336   : > { %v5608_v20 = vmul.f32 %v12901_v31, %v15640_v30  ;;  %v12903_v21 = vpop.eup %12902 }
0x1337   : > { %v5554_v7 = vsel %vm5553_vm4, %v5451_v29, %v5552_v28  ;;  %v5559_v32 = vmul.f32 %v12903_v21, %v5452_v52 }
0x1338   : > { %v5618_v60 = vpack.c.bf16 %v5608_v20, %v5607_v1  ;;  %v5557_v37 = vsel %vm5555_vm6, %v5556_v50, %v5554_v7  ;;  %v17366_v50 = vld [vmem:[#allocation25_spill] sm:$0xff] }
0x1339   : > { %v5579_v13 = vadd.f32 1e-06, %v5557_v37  ;;  %v5561_v49 = vsel %vm5560_vm7, %v5452_v52, %v5559_v32 }
0x133a   : > { %5864 = vmatmul.mubr.bf16.gmra.mrb[164].mxu1 %v5618_v60  ;;  %11764 = vmatmul.mubr.bf16.gmra.mrb[184].mxu0 %v5618_v60  ;;  %v5564_v17 = vsel %vm5562_vm5, %v5563_v9, %v5561_v49 }
0x133b   : > { %5873 = vmatprep.mubr.bf16.mxu1 %v17333_v56  ;;  %v5580_v55 = vadd.f32 1e-06, %v5564_v17  ;;  %12908 = vrcp.f32 %v5579_v13 }
0x133d   : > { %v12905_v30 = vpop.eup %12904  ;;  %12910 = vrcp.f32 %v5580_v55 }
0x133e   : > { %v5609_v29 = vmul.f32 %v12905_v30, %v15647_v38  ;;  %v17364_v38 = vld [vmem:[#allocation23_spill] sm:$0xff] }
0x133f   : > { %v12907_v57 = vpop.eup %12906 }
0x1340   : > { %v5610_v44 = vmul.f32 %v12907_v57, %v15650_v46 }
0x1342   : > { %v5619_v26 = vpack.c.bf16 %v5610_v44, %v5609_v29 }
0x1344   : > { %5874 = vmatmul.mubr.bf16.gmra.mrb[168].mxu1 %v5619_v26  ;;  %11767 = vmatprep.mubr.bf16.mxu0 %v5619_v26 }
0x1345   : > { %v12909_v62 = vpop.eup %12908  ;;  %5883 = vmatprep.mubr.bf16.mxu1 %v17333_v56 }
0x1346   : > { %v5611_v41 = vmul.f32 %v12909_v62, %v15657_v27 }
0x1347   : > { %v12911_v52 = vpop.eup %12910 }
0x1348   : > { %v5612_v19 = vmul.f32 %v12911_v52, %v15660_v24 }
0x134a   : > { %v5620_v18 = vpack.c.bf16 %v5612_v19, %v5611_v41 }
0x134c   : > { %5884 = vmatmul.mubr.bf16.gmra.mrb[172].mxu1 %v5620_v18  ;;  %11768 = vmatmul.mubr.bf16.gmra.mrb[188].mxu0 %v5620_v18 }
0x13c8   : > { %v5815_v23 = vpop.f32.mrb[144].mxu1 }
0x13c9   : > { %v5817_v16 = vpop.f32.mrb[145].mxu1  ;;  %v5816_v61 = vadd.f32 %v5815_v23, %v17364_v38 }
0x13ca   : > { %v5819_v39 = vpop.f32.mrb[146].mxu1  ;;  %v5818_v45 = vadd.f32 %v5817_v16, %v17365_v48 }
0x13cb   : > { %v5820_v46 = vadd.f32 %v5819_v39, %v17364_v38  ;;  %v5821_v4 = vpop.f32.mrb[147].mxu1 }
0x13cc   : > { %v5822_v5 = vadd.f32 %v5821_v4, %v17365_v48 }
0x13cd   : > { %v15693_v3 = vpack.c.bf16 %v5820_v46, %v5816_v61 }
0x13ce   : > { %v15695_v27 = vpack.c.bf16 %v5822_v5, %v5818_v45 }
0x13cf   : > { %11787 = vmatprep.mubr.msk.bf16.mxu1 %vm1267_vm0, %v15693_v3 }
0x13d0   : > { %6641 = vrot.lane.b32.xlu0 %v15695_v27, %s13546_s18  ;;  %12091 = vmatprep.subr.msk.bf16.mxu1 %vm1267_vm0, %v15695_v27  ;;  %v6136_v24 = vsel %vm1267_vm0, %v15695_v27, 0 }
0x13d1   : > { %11772 = vmatpush3.bf16.xpose.msra.mxu1 %v6136_v24 }
0x13d2   : > { %v5825_v43 = vpop.f32.mrb[148].mxu1  ;;  %v11757_v22 = vpop.f32.mrb[176].mxu0 }
0x13d3   : > { %v5827_v33 = vpop.f32.mrb[149].mxu1  ;;  %v5928_v47 = vpop.f32.mrb[177].mxu0  ;;  %v5826_v28 = vadd.f32 %v5825_v43, %v17364_v38  ;;  %v5937_v1 = vadd.f32 %v11757_v22, %v17366_v50 }
0x13d4   : > { %v5829_v10 = vpop.f32.mrb[150].mxu1  ;;  %v11758_v31 = vpop.f32.mrb[178].mxu0  ;;  %v5828_v60 = vadd.f32 %v5827_v33, %v17365_v48  ;;  %v5929_v37 = vadd.f32 %v5928_v47, %v17366_v50 }
0x13d5   : > { %v5830_v20 = vadd.f32 %v5829_v10, %v17364_v38  ;;  %v5940_v21 = vadd.f32 %v11758_v31, %v17366_v50  ;;  %v5831_v7 = vpop.f32.mrb[151].mxu1  ;;  %v5931_v32 = vpop.f32.mrb[179].mxu0 }
0x13d6   : > { %v5832_v9 = vadd.f32 %v5831_v7, %v17365_v48  ;;  %v5932_v13 = vadd.f32 %v5931_v32, %v17366_v50 }
0x13d7   : > { %v15713_v49 = vpack.c.bf16 %v5830_v20, %v5826_v28  ;;  %v15715_v17 = vpack.c.bf16 %v5940_v21, %v5937_v1 }
0x13d8   : > { %v15717_v55 = vpack.c.bf16 %v5832_v9, %v5828_v60  ;;  %v15719_v30 = vpack.c.bf16 %v5932_v13, %v5929_v37 }
0x13da   : > { %11803 = vmatprep.subr.bf16.mxu0 %v15719_v30  ;;  %6643 = vrot.lane.b32.xlu1 %v15717_v55, %s13546_s18  ;;  %v5835_v57 = vpop.f32.mrb[152].mxu1  ;;  %v6139_v29 = vsel %vm1267_vm0, %v15717_v55, 0 }
0x13db   : > { %12092 = vmatprep.subr.msk.bf16.mxu1 %vm1267_vm0, %v15717_v55  ;;  %v5837_v44 = vpop.f32.mrb[153].mxu1  ;;  %11804 = vmatpush3.bf16.msra.mxu0 %v15719_v30  ;;  %v5836_v62 = vadd.f32 %v5835_v57, %v17364_v38 }
0x13dc   : > { %11774 = vmatpush3.bf16.xpose.msra.mxu1 %v6139_v29  ;;  %v5839_v26 = vpop.f32.mrb[154].mxu1  ;;  %11805 = vmatprep.subr.bf16.mxu0 %v15715_v17  ;;  %v5838_v19 = vadd.f32 %v5837_v44, %v17365_v48 }
0x13dd   : > { %v5840_v52 = vadd.f32 %v5839_v26, %v17364_v38  ;;  %v5841_v41 = vpop.f32.mrb[155].mxu1 }
0x13de   : > { %v5842_v18 = vadd.f32 %v5841_v41, %v17365_v48 }
0x13df   : > { %v15734_v23 = vpack.c.bf16 %v5840_v52, %v5836_v62  ;;  %11806 = vmatpush3.bf16.msra.mxu0 %v15715_v17 }
0x13e0   : > { %v15737_v16 = vpack.c.bf16 %v5842_v18, %v5838_v19 }
0x13e2   : > { %v5845_v39 = vpop.f32.mrb[156].mxu1  ;;  %v11761_v61 = vpop.f32.mrb[180].mxu0  ;;  %12093 = vmatprep.subr.msk.bf16.mxu1 %vm1267_vm0, %v15737_v16  ;;  %v6142_v46 = vsel %vm1267_vm0, %v15737_v16, 0 }
0x13e3   : > { %v5847_v4 = vpop.f32.mrb[157].mxu1  ;;  %v5944_v45 = vpop.f32.mrb[181].mxu0  ;;  %v5846_v43 = vadd.f32 %v5845_v39, %v17364_v38  ;;  %v5953_v22 = vadd.f32 %v11761_v61, %v17366_v50 }
0x13e4   : > { %11776 = vmatpush3.bf16.xpose.msra.mxu1 %v6142_v46  ;;  %v5849_v5 = vpop.f32.mrb[158].mxu1  ;;  %v11762_v24 = vpop.f32.mrb[182].mxu0  ;;  %v5848_v28 = vadd.f32 %v5847_v4, %v17365_v48  ;;  %v5945_v1 = vadd.f32 %v5944_v45, %v17366_v50 }
0x13e5   : > { %v5850_v33 = vadd.f32 %v5849_v5, %v17364_v38  ;;  %v5956_v47 = vadd.f32 %v11762_v24, %v17366_v50  ;;  %v5851_v10 = vpop.f32.mrb[159].mxu1  ;;  %v5947_v31 = vpop.f32.mrb[183].mxu0 }
0x13e6   : > { %v5852_v20 = vadd.f32 %v5851_v10, %v17365_v48  ;;  %v5948_v21 = vadd.f32 %v5947_v31, %v17366_v50 }
0x13e7   : > { %v15751_v7 = vpack.c.bf16 %v5850_v33, %v5846_v43  ;;  %v15753_v32 = vpack.c.bf16 %v5956_v47, %v5953_v22 }
0x13e8   : > { %v15755_v60 = vpack.c.bf16 %v5852_v20, %v5848_v28  ;;  %v15757_v37 = vpack.c.bf16 %v5948_v21, %v5945_v1 }
0x13ea   : > { %12094 = vmatprep.subr.msk.bf16.mxu1 %vm1267_vm0, %v15755_v60  ;;  %11807 = vmatprep.subr.bf16.mxu0 %v15757_v37  ;;  %v6145_v9 = vsel %vm1267_vm0, %v15755_v60, 0 }
0x13eb   : > { %11808 = vmatpush3.bf16.msra.mxu0 %v15757_v37 }
0x13ec   : > { %11778 = vmatpush3.bf16.xpose.msra.mxu1 %v6145_v9  ;;  %11809 = vmatprep.subr.bf16.mxu0 %v15753_v32 }
0x13ef   : > { %11810 = vmatpush3.bf16.msra.mxu0 %v15753_v32 }
0x1405   : > { %v5855_v13 = vpop.f32.mrb[160].mxu1 }
0x1406   : > { %v5857_v57 = vpop.f32.mrb[161].mxu1  ;;  %v5856_v44 = vadd.f32 %v5855_v13, %v17364_v38 }
0x1407   : > { %v5859_v29 = vpop.f32.mrb[162].mxu1  ;;  %v5858_v52 = vadd.f32 %v5857_v57, %v17365_v48 }
0x1408   : > { %v5860_v26 = vadd.f32 %v5859_v29, %v17364_v38  ;;  %v5861_v62 = vpop.f32.mrb[163].mxu1 }
0x1409   : > { %v5862_v41 = vadd.f32 %v5861_v62, %v17365_v48 }
0x140a   : > { %v15771_v19 = vpack.c.bf16 %v5860_v26, %v5856_v44 }
0x140b   : > { %v15773_v18 = vpack.c.bf16 %v5862_v41, %v5858_v52 }
0x140d   : > { %v5865_v39 = vpop.f32.mrb[164].mxu1  ;;  %v11765_v61 = vpop.f32.mrb[184].mxu0  ;;  %12095 = vmatprep.subr.msk.bf16.mxu1 %vm1267_vm0, %v15773_v18  ;;  %v6148_v46 = vsel %vm1267_vm0, %v15773_v18, 0 }
0x140e   : > { %v5867_v4 = vpop.f32.mrb[165].mxu1  ;;  %v5960_v45 = vpop.f32.mrb[185].mxu0  ;;  %11780 = vmatpush3.bf16.xpose.msra.mxu1 %v6148_v46  ;;  %v5866_v43 = vadd.f32 %v5865_v39, %v17364_v38  ;;  %v5969_v22 = vadd.f32 %v11765_v61, %v17366_v50 }
0x140f   : > { %v5869_v5 = vpop.f32.mrb[166].mxu1  ;;  %v11766_v24 = vpop.f32.mrb[186].mxu0  ;;  %v5868_v28 = vadd.f32 %v5867_v4, %v17365_v48  ;;  %v5961_v1 = vadd.f32 %v5960_v45, %v17366_v50 }
0x1410   : > { %v5870_v33 = vadd.f32 %v5869_v5, %v17364_v38  ;;  %v5972_v47 = vadd.f32 %v11766_v24, %v17366_v50  ;;  %v5871_v10 = vpop.f32.mrb[167].mxu1  ;;  %v5963_v31 = vpop.f32.mrb[187].mxu0 }
0x1411   : > { %v5872_v20 = vadd.f32 %v5871_v10, %v17365_v48  ;;  %v5964_v21 = vadd.f32 %v5963_v31, %v17366_v50 }
0x1412   : > { %v15787_v9 = vpack.c.bf16 %v5870_v33, %v5866_v43  ;;  %v15789_v13 = vpack.c.bf16 %v5972_v47, %v5969_v22 }
0x1413   : > { %v15791_v57 = vpack.c.bf16 %v5872_v20, %v5868_v28  ;;  %v15793_v29 = vpack.c.bf16 %v5964_v21, %v5961_v1 }
0x1415   : > { %12096 = vmatprep.subr.msk.bf16.mxu1 %vm1267_vm0, %v15791_v57  ;;  %11811 = vmatprep.subr.bf16.mxu0 %v15793_v29  ;;  %v6151_v44 = vsel %vm1267_vm0, %v15791_v57, 0 }
0x1416   : > { %11782 = vmatpush3.bf16.xpose.msra.mxu1 %v6151_v44  ;;  %11812 = vmatpush3.bf16.msra.mxu0 %v15793_v29 }
0x1417   : > { %11813 = vmatprep.subr.bf16.mxu0 %v15789_v13  ;;  %v5875_v26 = vpop.f32.mrb[168].mxu1 }
0x1418   : > { %v5877_v62 = vpop.f32.mrb[169].mxu1  ;;  %v5876_v41 = vadd.f32 %v5875_v26, %v17364_v38 }
0x1419   : > { %v5879_v52 = vpop.f32.mrb[170].mxu1  ;;  %v5878_v46 = vadd.f32 %v5877_v62, %v17365_v48 }
0x141a   : > { %11814 = vmatpush3.bf16.msra.mxu0 %v15789_v13  ;;  %v5880_v39 = vadd.f32 %v5879_v52, %v17364_v38  ;;  %v5881_v61 = vpop.f32.mrb[171].mxu1 }
0x141b   : > { %v5882_v4 = vadd.f32 %v5881_v61, %v17365_v48 }
0x141c   : > { %v15807_v45 = vpack.c.bf16 %v5880_v39, %v5876_v41 }
0x141d   : > { %v15809_v5 = vpack.c.bf16 %v5882_v4, %v5878_v46 }
0x141f   : > { %v5885_v24 = vpop.f32.mrb[172].mxu1  ;;  %v11769_v43 = vpop.f32.mrb[188].mxu0  ;;  %12097 = vmatprep.subr.msk.bf16.mxu1 %vm1267_vm0, %v15809_v5  ;;  %v6154_v22 = vsel %vm1267_vm0, %v15809_v5, 0 }
0x1420   : > { %v5887_v33 = vpop.f32.mrb[173].mxu1  ;;  %v5976_v47 = vpop.f32.mrb[189].mxu0  ;;  %11784 = vmatpush3.bf16.xpose.msra.mxu1 %v6154_v22  ;;  %v5886_v28 = vadd.f32 %v5885_v24, %v17364_v38  ;;  %v5985_v1 = vadd.f32 %v11769_v43, %v17366_v50 }
0x1421   : > { %v5889_v10 = vpop.f32.mrb[174].mxu1  ;;  %v11770_v31 = vpop.f32.mrb[190].mxu0  ;;  %v5888_v62 = vadd.f32 %v5887_v33, %v17365_v48  ;;  %v5977_v52 = vadd.f32 %v5976_v47, %v17366_v50 }
0x1422   : > { %v5890_v20 = vadd.f32 %v5889_v10, %v17364_v38  ;;  %v5988_v21 = vadd.f32 %v11770_v31, %v17366_v50  ;;  %v5891_v44 = vpop.f32.mrb[175].mxu1  ;;  %v5979_v26 = vpop.f32.mrb[191].mxu0 }
0x1423   : > { %v5892_v41 = vadd.f32 %v5891_v44, %v17365_v48  ;;  %v5980_v39 = vadd.f32 %v5979_v26, %v17366_v50 }
0x1424   : > { %v15823_v61 = vpack.c.bf16 %v5890_v20, %v5886_v28  ;;  %v15825_v46 = vpack.c.bf16 %v5988_v21, %v5985_v1 }
0x1425   : > { %v15827_v4 = vpack.c.bf16 %v5892_v41, %v5888_v62  ;;  %v15829_v24 = vpack.c.bf16 %v5980_v39, %v5977_v52 }
0x1427   : > { %12098 = vmatprep.subr.msk.bf16.mxu1 %vm1267_vm0, %v15827_v4  ;;  %11815 = vmatprep.subr.bf16.mxu0 %v15829_v24  ;;  %v6157_v38 = vsel %vm1267_vm0, %v15827_v4, 0 }
0x1428   : > { %11786 = vmatpush3.bf16.xpose.msra.mxu1 %v6157_v38  ;;  %11816 = vmatpush3.bf16.msra.mxu0 %v15829_v24 }
0x1429   : > { %11817 = vmatprep.subr.bf16.mxu0 %v15825_v46 }
0x142c   : > { %11818 = vmatpush3.bf16.msra.mxu0 %v15825_v46 }
0x142f   : > { %11788 = vmatmul.mubr.msk.bf16.vlgmr.msra.gmra.mrb[176].mxu1 %vm1267_vm0, %v15713_v49 }
0x1430   : > { %11791 = vmatprep.mubr.msk.bf16.mxu1 %vm1267_vm0, %v15734_v23 }
0x1437   : > { %11792 = vmatmul.mubr.msk.bf16.gmra.mrb[180].mxu1 %vm1267_vm0, %v15751_v7 }
0x1438   : > { %11795 = vmatprep.mubr.msk.bf16.mxu1 %vm1267_vm0, %v15771_v19 }
0x143f   : > { %11796 = vmatmul.mubr.msk.bf16.gmra.mrb[184].mxu1 %vm1267_vm0, %v15787_v9 }
0x1440   : > { %11799 = vmatprep.mubr.msk.bf16.mxu1 %vm1267_vm0, %v15807_v45 }
0x1442   : > { %v15851_v48 = vpop.permute.xlu0 %6641 }
0x1443   : > { %12099 = vmatprep.subr.msk.bf16.mxu0 %vm1267_vm0, %v15851_v48 }
0x1447   : > { %11800 = vmatmul.mubr.msk.bf16.gmra.mrb[188].mxu1 %vm1267_vm0, %v15823_v61 }
0x1502   : > { %v11789_v50 = vpop.f32.mrb[176].mxu1 }
0x1503   : > { %v6258_v43 = vmul.f32 0.17677669, %v11789_v50  ;;  %v6193_v22 = vpop.f32.mrb[177].mxu1 }
0x1504   : > { %v11790_v33 = vpop.f32.mrb[178].mxu1  ;;  %v6256_v31 = vmul.f32 0.17677669, %v6193_v22 }
0x1505   : > { %v6259_v47 = vmul.f32 0.17677669, %v11790_v33  ;;  %6276 = vmax.xlane.f32.xlu0 %v6258_v43  ;;  %v6196_v10 = vpop.f32.mrb[179].mxu1 }
0x1506   : > { %v6257_v28 = vmul.f32 0.17677669, %v6196_v10 }
0x1507   : > { %6278 = vmax.xlane.f32.xlu1 %v6259_v47 }
0x1509   : > { %6272 = vmax.xlane.f32.xlu0 %v6256_v31 }
0x150a   : > { %v11793_v1 = vpop.f32.mrb[180].mxu1 }
0x150b   : > { %v15857_v20 = vmul.f32 0.17677669, %v11793_v1  ;;  %6274 = vmax.xlane.f32.xlu1 %v6257_v28  ;;  %v6209_v21 = vpop.f32.mrb[181].mxu1 }
0x150c   : > { %v11794_v44 = vpop.f32.mrb[182].mxu1  ;;  %v15862_v52 = vmul.f32 0.17677669, %v6209_v21 }
0x150d   : > { %v15859_v26 = vmul.f32 0.17677669, %v11794_v44  ;;  %6284 = vmax.xlane.f32.xlu0 %v15857_v20  ;;  %v6212_v62 = vpop.f32.mrb[183].mxu1 }
0x150e   : > { %v15865_v41 = vmul.f32 0.17677669, %v6212_v62 }
0x150f   : > { %6286 = vmax.xlane.f32.xlu1 %v15859_v26 }
0x1511   : > { %6280 = vmax.xlane.f32.xlu0 %v15862_v52 }
0x1512   : > { %v11797_v39 = vpop.f32.mrb[184].mxu1 }
0x1513   : > { %v15868_v38 = vmul.f32 0.17677669, %v11797_v39  ;;  %6282 = vmax.xlane.f32.xlu1 %v15865_v41  ;;  %v6225_v50 = vpop.f32.mrb[185].mxu1 }
0x1514   : > { %v11798_v22 = vpop.f32.mrb[186].mxu1  ;;  %v15874_v1 = vmul.f32 0.17677669, %v6225_v50 }
0x1515   : > { %v15871_v33 = vmul.f32 0.17677669, %v11798_v22  ;;  %6292 = vmax.xlane.f32.xlu0 %v15868_v38  ;;  %v6228_v10 = vpop.f32.mrb[187].mxu1 }
0x1516   : > { %v15877_v21 = vmul.f32 0.17677669, %v6228_v10 }
0x1517   : > { %6294 = vmax.xlane.f32.xlu1 %v15871_v33 }
0x1519   : > { %6288 = vmax.xlane.f32.xlu0 %v15874_v1 }
0x151a   : > { %v11801_v44 = vpop.f32.mrb[188].mxu1 }
0x151b   : > { %v15880_v62 = vmul.f32 0.17677669, %v11801_v44  ;;  %6290 = vmax.xlane.f32.xlu1 %v15877_v21  ;;  %v6241_v39 = vpop.f32.mrb[189].mxu1  ;;  %v15897_v44 = vpop.permute.xlu1 %6643 }
0x151c   : > { %v11802_v36 = vpop.f32.mrb[190].mxu1  ;;  %v15884_v0 = vmul.f32 0.17677669, %v6241_v39 }
0x151d   : > { %6300 = vmax.xlane.f32.xlu0 %v15880_v62  ;;  %v6244_v22 = vpop.f32.mrb[191].mxu1  ;;  %v15891_v50 = vmul.f32 0.17677669, %v11802_v36 }
0x151e   : > { %v15894_v10 = vmul.f32 0.17677669, %v6244_v22 }
0x1521   : > { %6296 = vmax.xlane.f32.xlu0 %v15884_v0 }
0x152c   : > { %6647 = vrot.lane.b32.xlu1 %v15755_v60, %s13546_s18 }
0x1537   : > { %6645 = vrot.lane.b32.xlu0 %v15737_v16, %s13546_s18 }
0x1550   : > { %6302 = vmax.xlane.f32.xlu1 %v15891_v50 }
0x1554   : > { %6298 = vmax.xlane.f32.xlu1 %v15894_v10 }
0x1592   : > { %v6277_v39 = vpop.xlane.xlu0 %6276 }
0x1593   : > { %v6306_v58 = vsub.f32 %v6258_v43, %v6277_v39 }
0x1594   : > { %v6279_v15 = vpop.xlane.xlu1 %6278 }
0x1595   : > { %v6324_v25 = vmul.f32 1.442695, %v6306_v58  ;;  %v6307_v51 = vsub.f32 %v6259_v47, %v6279_v15 }
0x1596   : > { %v6273_v14 = vpop.xlane.xlu0 %6272 }
0x1597   : > { %12912 = vpow2.f32 %v6324_v25  ;;  %v6326_v35 = vmul.f32 1.442695, %v6307_v51  ;;  %v6304_v6 = vsub.f32 %v6256_v31, %v6273_v14 }
0x1598   : > { %v6275_v2 = vpop.xlane.xlu1 %6274 }
0x1599   : > { %12914 = vpow2.f32 %v6326_v35  ;;  %v6320_v36 = vmul.f32 1.442695, %v6304_v6  ;;  %v6305_v8 = vsub.f32 %v6257_v28, %v6275_v2 }
0x159a   : > { %v6285_v2 = vpop.xlane.xlu0 %6284 }
0x159b   : > { %12916 = vpow2.f32 %v6320_v36  ;;  %v6322_v22 = vmul.f32 1.442695, %v6305_v8  ;;  %v6310_v25 = vsub.f32 %v15857_v20, %v6285_v2 }
0x159c   : > { %v6287_v35 = vpop.xlane.xlu1 %6286 }
0x159d   : > { %12918 = vpow2.f32 %v6322_v22  ;;  %v6332_v31 = vmul.f32 1.442695, %v6310_v25  ;;  %v6311_v36 = vsub.f32 %v15859_v26, %v6287_v35 }
0x159e   : > { %v6281_v6 = vpop.xlane.xlu0 %6280 }
0x159f   : > { %v6308_v43 = vsub.f32 %v15862_v52, %v6281_v6  ;;  %12920 = vpow2.f32 %v6332_v31  ;;  %v6334_v63 = vmul.f32 1.442695, %v6311_v36 }
0x15a0   : > { %v6283_v51 = vpop.xlane.xlu1 %6282 }
0x15a1   : > { %v15899_v12 = vpop.eup %12912  ;;  %v6309_v28 = vsub.f32 %v15865_v41, %v6283_v51  ;;  %v6328_v22 = vmul.f32 1.442695, %v6308_v43 }
0x15a2   : > { %6356 = vadd.xlane.f32.xlu0 %v15899_v12  ;;  %v6293_v8 = vpop.xlane.xlu0 %6292 }
0x15a3   : > { %v15902_v40 = vpop.eup %12914  ;;  %v6330_v54 = vmul.f32 1.442695, %v6309_v28  ;;  %12922 = vpow2.f32 %v6328_v22  ;;  %v6314_v42 = vsub.f32 %v15868_v38, %v6293_v8 }
0x15a4   : > { %6358 = vadd.xlane.f32.xlu1 %v15902_v40  ;;  %v6295_v39 = vpop.xlane.xlu1 %6294 }
0x15a5   : > { %v15905_v15 = vpop.eup %12916  ;;  %12924 = vpow2.f32 %v6330_v54  ;;  %v6340_v41 = vmul.f32 1.442695, %v6314_v42  ;;  %v6315_v35 = vsub.f32 %v15871_v33, %v6295_v39 }
0x15a6   : > { %6352 = vadd.xlane.f32.xlu0 %v15905_v15  ;;  %v6289_v14 = vpop.xlane.xlu0 %6288  ;;  %12926 = vpow2.f32 %v6334_v63 }
0x15a7   : > { %v15908_v58 = vpop.eup %12918  ;;  %v6312_v6 = vsub.f32 %v15874_v1, %v6289_v14 }
0x15a8   : > { %6354 = vadd.xlane.f32.xlu1 %v15908_v58  ;;  %v6291_v20 = vpop.xlane.xlu1 %6290 }
0x15a9   : > { %v6336_v25 = vmul.f32 1.442695, %v6312_v6 }
0x15aa   : > { %v6301_v47 = vpop.xlane.xlu0 %6300 }
0x15ab   : > { %v6318_v53 = vsub.f32 %v15880_v62, %v6301_v47  ;;  %v15926_v62 = vpop.eup %12920 }
0x15ac   : > { %v15924_v51 = vpop.permute.xlu1 %6647 }
0x15ad   : > { %v6348_v52 = vmul.f32 1.442695, %v6318_v53  ;;  %v15929_v54 = vpop.eup %12922 }
0x15ae   : > { %v6297_v59 = vpop.xlane.xlu0 %6296 }
0x15af   : > { %v6316_v2 = vsub.f32 %v15884_v0, %v6297_v59  ;;  %12928 = vpow2.f32 %v6348_v52  ;;  %v6342_v0 = vmul.f32 1.442695, %v6315_v35  ;;  %v15932_v42 = vpop.eup %12924  ;;  %v6313_v59 = vsub.f32 %v15877_v21, %v6291_v20 }
0x15b0   : > { %12930 = vpow2.f32 %v6340_v41  ;;  %v15937_v38 = vpop.eup %12926 }
0x15b1   : > { %v6344_v26 = vmul.f32 1.442695, %v6316_v2  ;;  %v6338_v14 = vmul.f32 1.442695, %v6313_v59 }
0x15b2   : > { %v6646_v22 = vpop.permute.xlu0 %6645 }
0x15b3   : > { %12932 = vpow2.f32 %v6344_v26 }
0x15b4   : > { %12934 = vpow2.f32 %v6336_v25 }
0x15b5   : > { %12936 = vpow2.f32 %v6342_v0 }
0x15b9   : > { %6651 = vrot.lane.b32.xlu1 %v15791_v57, %s13546_s18  ;;  %v15940_v8 = vpop.eup %12928 }
0x15ba   : > { %v15944_v21 = vpop.eup %12930 }
0x15bc   : > { %6649 = vrot.lane.b32.xlu0 %v15773_v18, %s13546_s18 }
0x15db   : > { %6364 = vadd.xlane.f32.xlu0 %v15926_v62 }
0x15dd   : > { %v6303_v63 = vpop.xlane.xlu1 %6302  ;;  %6360 = vadd.xlane.f32.xlu1 %v15929_v54 }
0x15de   : > { %v6319_v53 = vsub.f32 %v15891_v50, %v6303_v63  ;;  %v15947_v50 = vpop.eup %12932 }
0x15df   : > { %6362 = vadd.xlane.f32.xlu0 %v15932_v42  ;;  %v15950_v31 = vpop.eup %12934 }
0x15e0   : > { %v6350_v33 = vmul.f32 1.442695, %v6319_v53  ;;  %v15953_v28 = vpop.eup %12936 }
0x15e1   : > { %v6299_v1 = vpop.xlane.xlu1 %6298  ;;  %6366 = vadd.xlane.f32.xlu1 %v15937_v38 }
0x15e2   : > { %12938 = vpow2.f32 %v6350_v33  ;;  %v6317_v43 = vsub.f32 %v15894_v10, %v6299_v1 }
0x15e3   : > { %6380 = vadd.xlane.f32.xlu0 %v15940_v8  ;;  %12940 = vpow2.f32 %v6338_v14  ;;  %v6682_v14 = vsel %vm1267_vm0, %v15851_v48, 0 }
0x15e4   : > { %v6346_v47 = vmul.f32 1.442695, %v6317_v43 }
0x15e5   : > { %6372 = vadd.xlane.f32.xlu1 %v15944_v21 }
0x15e6   : > { %12942 = vpow2.f32 %v6346_v47 }
0x15e7   : > { %6376 = vadd.xlane.f32.xlu0 %v15947_v50 }
0x15e9   : > { %6368 = vadd.xlane.f32.xlu1 %v15950_v31 }
0x15ec   : > { %v15955_v10 = vpop.eup %12938 }
0x15ed   : > { %6374 = vadd.xlane.f32.xlu1 %v15953_v28  ;;  %6382 = vadd.xlane.f32.xlu0 %v15955_v10  ;;  %v15959_v39 = vpop.eup %12940 }
0x15f0   : > { %v15962_v36 = vpop.eup %12942 }
0x15f1   : > { %6370 = vadd.xlane.f32.xlu1 %v15959_v39 }
0x15f5   : > { %6378 = vadd.xlane.f32.xlu1 %v15962_v36 }
0x1603   : > { %6653 = vrot.lane.b32.xlu0 %v15809_v5, %s13546_s18 }
0x1606   : > { %6655 = vrot.lane.b32.xlu1 %v15827_v4, %s13546_s18 }
0x1607   : > { %6617 = vrot.lane.b32.xlu0 %v15693_v3, %s13546_s18 }
0x160a   : > { %6619 = vrot.lane.b32.xlu1 %v15713_v49, %s13546_s18 }
0x160b   : > { %6621 = vrot.lane.b32.xlu0 %v15734_v23, %s13546_s18 }
0x160e   : > { %6623 = vrot.lane.b32.xlu1 %v15751_v7, %s13546_s18 }
0x160f   : > { %6625 = vrot.lane.b32.xlu0 %v15771_v19, %s13546_s18 }
0x1612   : > { %6627 = vrot.lane.b32.xlu1 %v15787_v9, %s13546_s18 }
0x1613   : > { %6629 = vrot.lane.b32.xlu0 %v15807_v45, %s13546_s18 }
0x1616   : > { %6631 = vrot.lane.b32.xlu1 %v15823_v61, %s13546_s18 }
0x1617   : > { %6978 = vrot.lane.b32.xlu0 %v15719_v30, %s13546_s18 }
0x161a   : > { %6980 = vrot.lane.b32.xlu1 %v15715_v17, %s13546_s18 }
0x161b   : > { %6982 = vrot.lane.b32.xlu0 %v15757_v37, %s13546_s18 }
0x161e   : > { %6984 = vrot.lane.b32.xlu1 %v15753_v32, %s13546_s18 }
0x161f   : > { %6986 = vrot.lane.b32.xlu0 %v15793_v29, %s13546_s18 }
0x1622   : > { %6988 = vrot.lane.b32.xlu1 %v15789_v13, %s13546_s18 }
0x1623   : > { %6990 = vrot.lane.b32.xlu0 %v15829_v24, %s13546_s18 }
0x1626   : > { %6992 = vrot.lane.b32.xlu1 %v15825_v46, %s13546_s18 }
0x1627   : > { %7283 = vrot.lane.b32.xlu0 %v15695_v27, %s13547_s22 }
0x162a   : > { %7285 = vrot.lane.b32.xlu1 %v15717_v55, %s13547_s22 }
0x162f   : > { %v6357_v20 = vpop.xlane.xlu0 %6356 }
0x1631   : > { %v6359_v52 = vpop.xlane.xlu1 %6358 }
0x1632   : > { %12944 = vrcp.f32 %v6359_v52 }
0x1633   : > { %v6353_v2 = vpop.xlane.xlu0 %6352 }
0x1634   : > { %12946 = vrcp.f32 %v6353_v2 }
0x1635   : > { %12948 = vrcp.f32 %v6357_v20  ;;  %v6355_v41 = vpop.xlane.xlu1 %6354 }
0x1636   : > { %12950 = vrcp.f32 %v6355_v41 }
0x1637   : > { %v6650_v48 = vpop.permute.xlu0 %6649 }
0x1638   : > { %v6694_v43 = vsel %vm1267_vm0, %v6650_v48, 0 }
0x163c   : > { %v12945_v6 = vpop.eup %12944 }
0x163d   : > { %v6403_v0 = vmul.f32 %v12945_v6, %v15902_v40  ;;  %v6685_v40 = vsel %vm1267_vm0, %v15897_v44, 0 }
0x163e   : > { %v12947_v26 = vpop.eup %12946 }
0x163f   : > { %v12949_v35 = vpop.eup %12948  ;;  %v6400_v63 = vmul.f32 %v12947_v26, %v15905_v15  ;;  %v6688_v15 = vsel %vm1267_vm0, %v6646_v22, 0 }
0x1640   : > { %v12951_v25 = vpop.eup %12950  ;;  %v6402_v53 = vmul.f32 %v12949_v35, %v15899_v12  ;;  %v6691_v12 = vsel %vm1267_vm0, %v15924_v51, 0 }
0x1641   : > { %v6401_v59 = vmul.f32 %v12951_v25, %v15908_v58  ;;  %v6652_v58 = vpop.permute.xlu1 %6651 }
0x1642   : > { %v6417_v1 = vpack.c.bf16 %v6403_v0, %v6402_v53  ;;  %v6697_v52 = vsel %vm1267_vm0, %v6652_v58, 0 }
0x1643   : > { %v6416_v33 = vpack.c.bf16 %v6401_v59, %v6400_v63 }
0x1645   : > { %11819 = vmatprep.mubr.bf16.mxu0 %v6416_v33 }
0x1646   : > { %11820 = vmatmul.mubr.bf16.vlgmr.msra.gmra.mrb[192].mxu0 %v6417_v1 }
0x1647   : > { %11836 = vmatpush3.bf16.xpose.msra.mxu0 %v6682_v14 }
0x1648   : > { %12100 = vmatprep.subr.msk.bf16.mxu0 %vm1267_vm0, %v15897_v44 }
0x164f   : > { %11838 = vmatpush3.bf16.xpose.msra.mxu0 %v6685_v40 }
0x1650   : > { %12101 = vmatprep.subr.msk.bf16.mxu0 %vm1267_vm0, %v6646_v22 }
0x1657   : > { %11840 = vmatpush3.bf16.xpose.msra.mxu0 %v6688_v15 }
0x1658   : > { %12102 = vmatprep.subr.msk.bf16.mxu0 %vm1267_vm0, %v15924_v51 }
0x165f   : > { %11842 = vmatpush3.bf16.xpose.msra.mxu0 %v6691_v12 }
0x1660   : > { %12103 = vmatprep.subr.msk.bf16.mxu0 %vm1267_vm0, %v6650_v48 }
0x1667   : > { %11844 = vmatpush3.bf16.xpose.msra.mxu0 %v6694_v43 }
0x1668   : > { %12104 = vmatprep.subr.msk.bf16.mxu0 %vm1267_vm0, %v6652_v58  ;;  %v6365_v44 = vpop.xlane.xlu0 %6364 }
0x166a   : > { %v6361_v47 = vpop.xlane.xlu1 %6360 }
0x166b   : > { %12952 = vrcp.f32 %v6361_v47 }
0x166c   : > { %12954 = vrcp.f32 %v6365_v44  ;;  %v6363_v22 = vpop.xlane.xlu0 %6362 }
0x166d   : > { %12956 = vrcp.f32 %v6363_v22 }
0x166e   : > { %v6367_v20 = vpop.xlane.xlu1 %6366 }
0x166f   : > { %12958 = vrcp.f32 %v6367_v20  ;;  %11846 = vmatpush3.bf16.xpose.msra.mxu0 %v6697_v52 }
0x1670   : > { %v6381_v51 = vpop.xlane.xlu0 %6380 }
0x1672   : > { %v6373_v2 = vpop.xlane.xlu1 %6372 }
0x1674   : > { %v6377_v26 = vpop.xlane.xlu0 %6376 }
0x1675   : > { %v12953_v41 = vpop.eup %12952 }
0x1676   : > { %v12955_v6 = vpop.eup %12954  ;;  %v6369_v35 = vpop.xlane.xlu1 %6368  ;;  %v6404_v0 = vmul.f32 %v12953_v41, %v15929_v54 }
0x1677   : > { %v12957_v25 = vpop.eup %12956  ;;  %v6406_v14 = vmul.f32 %v12955_v6, %v15926_v62 }
0x1678   : > { %v6405_v63 = vmul.f32 %v12957_v25, %v15932_v42 }
0x1679   : > { %v12959_v59 = vpop.eup %12958 }
0x167a   : > { %v6375_v53 = vpop.xlane.xlu1 %6374  ;;  %v6383_v33 = vpop.xlane.xlu0 %6382  ;;  %v6418_v1 = vpack.c.bf16 %v6405_v63, %v6404_v0  ;;  %v6407_v40 = vmul.f32 %v12959_v59, %v15937_v38 }
0x167b   : > { %12960 = vrcp.f32 %v6375_v53 }
0x167c   : > { %11823 = vmatprep.mubr.bf16.mxu0 %v6418_v1  ;;  %v6419_v15 = vpack.c.bf16 %v6407_v40, %v6406_v14  ;;  %12962 = vrcp.f32 %v6369_v35 }
0x167d   : > { %12964 = vrcp.f32 %v6373_v2 }
0x167e   : > { %v6371_v12 = vpop.xlane.xlu1 %6370  ;;  %11824 = vmatmul.mubr.bf16.gmra.mrb[196].mxu0 %v6419_v15  ;;  %v6654_v48 = vpop.permute.xlu0 %6653 }
0x167f   : > { %12966 = vrcp.f32 %v6371_v12  ;;  %12105 = vmatprep.subr.msk.bf16.mxu0 %vm1267_vm0, %v6654_v48  ;;  %v6700_v54 = vsel %vm1267_vm0, %v6654_v48, 0 }
0x1680   : > { %11848 = vmatpush3.bf16.xpose.msra.mxu0 %v6700_v54  ;;  %12968 = vrcp.f32 %v6377_v26 }
0x1682   : > { %v6379_v42 = vpop.xlane.xlu1 %6378  ;;  %v6618_v58 = vpop.permute.xlu0 %6617 }
0x1683   : > { %12970 = vrcp.f32 %v6379_v42 }
0x1684   : > { %12972 = vrcp.f32 %v6383_v33 }
0x1685   : > { %v12961_v62 = vpop.eup %12960  ;;  %12974 = vrcp.f32 %v6381_v51 }
0x1686   : > { %v6656_v38 = vpop.permute.xlu1 %6655  ;;  %v6622_v43 = vpop.permute.xlu0 %6621  ;;  %v6411_v52 = vmul.f32 %v12961_v62, %v15953_v28 }
0x1687   : > { %v12963_v44 = vpop.eup %12962  ;;  %12106 = vmatprep.subr.msk.bf16.mxu0 %vm1267_vm0, %v6656_v38  ;;  %v6703_v47 = vsel %vm1267_vm0, %v6656_v38, 0 }
0x1688   : > { %v12965_v22 = vpop.eup %12964  ;;  %11850 = vmatpush3.bf16.xpose.msra.mxu0 %v6703_v47  ;;  %v6408_v6 = vmul.f32 %v12963_v44, %v15950_v31 }
0x1689   : > { %v12967_v20 = vpop.eup %12966  ;;  %v6410_v51 = vmul.f32 %v12965_v22, %v15944_v21 }
0x168a   : > { %v6620_v2 = vpop.permute.xlu1 %6619  ;;  %v6626_v41 = vpop.permute.xlu0 %6625  ;;  %v6409_v26 = vmul.f32 %v12967_v20, %v15959_v39 }
0x168b   : > { %v12969_v35 = vpop.eup %12968  ;;  %v6421_v63 = vpack.c.bf16 %v6411_v52, %v6410_v51 }
0x168c   : > { %v6420_v25 = vpack.c.bf16 %v6409_v26, %v6408_v6  ;;  %v6412_v1 = vmul.f32 %v12969_v35, %v15947_v50 }
0x168d   : > { %v12971_v0 = vpop.eup %12970 }
0x168e   : > { %v12973_v59 = vpop.eup %12972  ;;  %v6624_v53 = vpop.permute.xlu1 %6623  ;;  %11827 = vmatprep.mubr.bf16.mxu0 %v6420_v25  ;;  %v6413_v28 = vmul.f32 %v12971_v0, %v15962_v36 }
0x168f   : > { %v6630_v33 = vpop.permute.xlu0 %6629  ;;  %11828 = vmatmul.mubr.bf16.gmra.mrb[200].mxu0 %v6421_v63  ;;  %v12975_v14 = vpop.eup %12974  ;;  %v6415_v31 = vmul.f32 %v12973_v59, %v15955_v10 }
0x1690   : > { %v6422_v40 = vpack.c.bf16 %v6413_v28, %v6412_v1  ;;  %v6414_v21 = vmul.f32 %v12975_v14, %v15940_v8 }
0x1692   : > { %v6628_v39 = vpop.permute.xlu1 %6627  ;;  %11831 = vmatprep.mubr.bf16.mxu0 %v6422_v40  ;;  %v6423_v12 = vpack.c.bf16 %v6415_v31, %v6414_v21 }
0x1693   : > { %v6979_v15 = vpop.permute.xlu0 %6978 }
0x1694   : > { %11867 = vmatprep.subr.bf16.mxu1 %v6979_v15 }
0x1695   : > { %11868 = vmatpush3.bf16.msra.mxu1 %v6979_v15 }
0x1696   : > { %v6632_v48 = vpop.permute.xlu1 %6631 }
0x1697   : > { %11832 = vmatmul.mubr.bf16.gmra.mrb[204].mxu0 %v6423_v12  ;;  %v6983_v36 = vpop.permute.xlu0 %6982 }
0x1698   : > { %11851 = vmatprep.mubr.msk.bf16.mxu0 %vm1267_vm0, %v6618_v58 }
0x169a   : > { %v6981_v50 = vpop.permute.xlu1 %6980 }
0x169b   : > { %11869 = vmatprep.subr.bf16.mxu1 %v6981_v50  ;;  %v6987_v54 = vpop.permute.xlu0 %6986 }
0x169c   : > { %11870 = vmatpush3.bf16.msra.mxu1 %v6981_v50 }
0x169d   : > { %11871 = vmatprep.subr.bf16.mxu1 %v6983_v36 }
0x169e   : > { %v6985_v10 = vpop.permute.xlu1 %6984 }
0x169f   : > { %11852 = vmatmul.mubr.msk.bf16.vlgmr.msra.gmra.mrb[208].mxu0 %vm1267_vm0, %v6620_v2  ;;  %v6991_v42 = vpop.permute.xlu0 %6990 }
0x16a0   : > { %11855 = vmatprep.mubr.msk.bf16.mxu0 %vm1267_vm0, %v6622_v43  ;;  %11872 = vmatpush3.bf16.msra.mxu1 %v6983_v36 }
0x16a1   : > { %11873 = vmatprep.subr.bf16.mxu1 %v6985_v10 }
0x16a2   : > { %v6989_v8 = vpop.permute.xlu1 %6988 }
0x16a3   : > { %v16048_v62 = vpop.permute.xlu0 %7283 }
0x16a4   : > { %11874 = vmatpush3.bf16.msra.mxu1 %v6985_v10 }
0x16a5   : > { %11875 = vmatprep.subr.bf16.mxu1 %v6987_v54 }
0x16a6   : > { %v6993_v58 = vpop.permute.xlu1 %6992 }
0x16a7   : > { %11856 = vmatmul.mubr.msk.bf16.gmra.mrb[212].mxu0 %vm1267_vm0, %v6624_v53 }
0x16a8   : > { %11859 = vmatprep.mubr.msk.bf16.mxu0 %vm1267_vm0, %v6626_v41  ;;  %11876 = vmatpush3.bf16.msra.mxu1 %v6987_v54 }
0x16a9   : > { %11877 = vmatprep.subr.bf16.mxu1 %v6989_v8 }
0x16ac   : > { %11878 = vmatpush3.bf16.msra.mxu1 %v6989_v8 }
0x16ad   : > { %11879 = vmatprep.subr.bf16.mxu1 %v6991_v42 }
0x16af   : > { %11860 = vmatmul.mubr.msk.bf16.gmra.mrb[216].mxu0 %vm1267_vm0, %v6628_v39 }
0x16b0   : > { %11863 = vmatprep.mubr.msk.bf16.mxu0 %vm1267_vm0, %v6630_v33  ;;  %11880 = vmatpush3.bf16.msra.mxu1 %v6991_v42 }
0x16b1   : > { %11881 = vmatprep.subr.bf16.mxu1 %v6993_v58 }
0x16b4   : > { %11882 = vmatpush3.bf16.msra.mxu1 %v6993_v58 }
0x16b5   : > { %12107 = vmatprep.subr.msk.bf16.mxu1 %vm1267_vm0, %v16048_v62 }
0x16b7   : > { %11864 = vmatmul.mubr.msk.bf16.gmra.mrb[220].mxu0 %vm1267_vm0, %v6632_v48 }
0x1719   : > { %v11821_v38 = vpop.f32.mrb[192].mxu0 }
0x171a   : > { %6523 = vst.msk [vmem:[#allocation4 + $0x10] sm:$0xff] %vm1267_vm0, %v11821_v38  ;;  %v6458_v43 = vpop.f32.mrb[193].mxu0 }
0x171b   : > { %6521 = vst.msk [vmem:[#allocation4] sm:$0xff] %vm1267_vm0, %v6458_v43  ;;  %v11822_v44 = vpop.f32.mrb[194].mxu0 }
0x171c   : > { %6524 = vst.msk [vmem:[#allocation4 + $0x18] sm:$0xff] %vm1267_vm0, %v11822_v44  ;;  %v6461_v47 = vpop.f32.mrb[195].mxu0 }
0x171d   : > { %6522 = vst.msk [vmem:[#allocation4 + $0x8] sm:$0xff] %vm1267_vm0, %v6461_v47 }
0x1751   : > { %v11825_v22 = vpop.f32.mrb[196].mxu0 }
0x1752   : > { %6527 = vst.msk [vmem:[#allocation4 + $0x30] sm:$0xff] %vm1267_vm0, %v11825_v22  ;;  %v6474_v20 = vpop.f32.mrb[197].mxu0 }
0x1753   : > { %6525 = vst.msk [vmem:[#allocation4 + $0x20] sm:$0xff] %vm1267_vm0, %v6474_v20  ;;  %v11826_v52 = vpop.f32.mrb[198].mxu0 }
0x1754   : > { %6528 = vst.msk [vmem:[#allocation4 + $0x38] sm:$0xff] %vm1267_vm0, %v11826_v52  ;;  %v6477_v2 = vpop.f32.mrb[199].mxu0 }
0x1755   : > { %6526 = vst.msk [vmem:[#allocation4 + $0x28] sm:$0xff] %vm1267_vm0, %v6477_v2 }
0x1762   : > { %v11829_v41 = vpop.f32.mrb[200].mxu0 }
0x1763   : > { %6531 = vst.msk [vmem:[#allocation4 + $0x50] sm:$0xff] %vm1267_vm0, %v11829_v41  ;;  %v6490_v6 = vpop.f32.mrb[201].mxu0 }
0x1764   : > { %6529 = vst.msk [vmem:[#allocation4 + $0x40] sm:$0xff] %vm1267_vm0, %v6490_v6  ;;  %v11830_v26 = vpop.f32.mrb[202].mxu0 }
0x1765   : > { %6532 = vst.msk [vmem:[#allocation4 + $0x58] sm:$0xff] %vm1267_vm0, %v11830_v26  ;;  %v6493_v35 = vpop.f32.mrb[203].mxu0 }
0x1766   : > { %6530 = vst.msk [vmem:[#allocation4 + $0x48] sm:$0xff] %vm1267_vm0, %v6493_v35 }
0x176a   : > { %v11833_v51 = vpop.f32.mrb[204].mxu0 }
0x176b   : > { %6535 = vst.msk [vmem:[#allocation4 + $0x70] sm:$0xff] %vm1267_vm0, %v11833_v51  ;;  %v6506_v25 = vpop.f32.mrb[205].mxu0  ;;  %v16109_v51 = vpop.permute.xlu1 %7285 }
0x176c   : > { %6533 = vst.msk [vmem:[#allocation4 + $0x60] sm:$0xff] %vm1267_vm0, %v6506_v25  ;;  %v11834_v0 = vpop.f32.mrb[206].mxu0 }
0x176d   : > { %6536 = vst.msk [vmem:[#allocation4 + $0x78] sm:$0xff] %vm1267_vm0, %v11834_v0  ;;  %v6509_v63 = vpop.f32.mrb[207].mxu0 }
0x176e   : > { %6534 = vst.msk [vmem:[#allocation4 + $0x68] sm:$0xff] %vm1267_vm0, %v6509_v63 }
0x1772   : > { %v11853_v59 = vpop.f32.mrb[208].mxu0 }
0x1773   : > { %v6804_v53 = vmul.f32 0.17677669, %v11853_v59  ;;  %v6739_v33 = vpop.f32.mrb[209].mxu0 }
0x1774   : > { %v11854_v1 = vpop.f32.mrb[210].mxu0  ;;  %v6802_v40 = vmul.f32 0.17677669, %v6739_v33 }
0x1775   : > { %6822 = vmax.xlane.f32.xlu0 %v6804_v53  ;;  %v6742_v28 = vpop.f32.mrb[211].mxu0  ;;  %v6805_v39 = vmul.f32 0.17677669, %v11854_v1 }
0x1776   : > { %v6803_v14 = vmul.f32 0.17677669, %v6742_v28 }
0x1778   : > { %6820 = vmax.xlane.f32.xlu1 %v6803_v14 }
0x1779   : > { %6818 = vmax.xlane.f32.xlu0 %v6802_v40 }
0x177a   : > { %v11857_v31 = vpop.f32.mrb[212].mxu0 }
0x177b   : > { %v6755_v15 = vpop.f32.mrb[213].mxu0  ;;  %v16071_v50 = vmul.f32 0.17677669, %v11857_v31 }
0x177c   : > { %v11858_v21 = vpop.f32.mrb[214].mxu0  ;;  %v16077_v54 = vmul.f32 0.17677669, %v6755_v15 }
0x177d   : > { %v16069_v12 = vmul.f32 0.17677669, %v11858_v21  ;;  %6824 = vmax.xlane.f32.xlu0 %v6805_v39  ;;  %v6758_v48 = vpop.f32.mrb[215].mxu0 }
0x177e   : > { %v16074_v36 = vmul.f32 0.17677669, %v6758_v48 }
0x177f   : > { %6832 = vmax.xlane.f32.xlu1 %v16069_v12 }
0x1781   : > { %6830 = vmax.xlane.f32.xlu0 %v16071_v50 }
0x1782   : > { %v11861_v10 = vpop.f32.mrb[216].mxu0 }
0x1783   : > { %6828 = vmax.xlane.f32.xlu1 %v16074_v36  ;;  %v6771_v8 = vpop.f32.mrb[217].mxu0  ;;  %v16083_v43 = vmul.f32 0.17677669, %v11861_v10 }
0x1784   : > { %v11862_v42 = vpop.f32.mrb[218].mxu0  ;;  %v16089_v22 = vmul.f32 0.17677669, %v6771_v8 }
0x1785   : > { %v16080_v58 = vmul.f32 0.17677669, %v11862_v42  ;;  %6826 = vmax.xlane.f32.xlu0 %v16077_v54  ;;  %v6774_v38 = vpop.f32.mrb[219].mxu0 }
0x1786   : > { %v16086_v44 = vmul.f32 0.17677669, %v6774_v38 }
0x1787   : > { %6840 = vmax.xlane.f32.xlu1 %v16080_v58 }
0x1789   : > { %6838 = vmax.xlane.f32.xlu0 %v16083_v43 }
0x178a   : > { %v11865_v47 = vpop.f32.mrb[220].mxu0 }
0x178b   : > { %6836 = vmax.xlane.f32.xlu1 %v16086_v44  ;;  %v6787_v20 = vpop.f32.mrb[221].mxu0  ;;  %v16093_v41 = vmul.f32 0.17677669, %v11865_v47 }
0x178c   : > { %v11866_v52 = vpop.f32.mrb[222].mxu0  ;;  %v16096_v6 = vmul.f32 0.17677669, %v6787_v20 }
0x178d   : > { %6834 = vmax.xlane.f32.xlu0 %v16089_v22  ;;  %v6790_v2 = vpop.f32.mrb[223].mxu0  ;;  %v16103_v26 = vmul.f32 0.17677669, %v11866_v52 }
0x178e   : > { %v16106_v35 = vmul.f32 0.17677669, %v6790_v2 }
0x1791   : > { %6846 = vmax.xlane.f32.xlu0 %v16093_v41 }
0x1795   : > { %6842 = vmax.xlane.f32.xlu0 %v16096_v6 }
0x179c   : > { %7289 = vrot.lane.b32.xlu1 %v15755_v60, %s13547_s22 }
0x17ab   : > { %7287 = vrot.lane.b32.xlu0 %v15737_v16, %s13547_s22 }
0x17c0   : > { %6848 = vmax.xlane.f32.xlu1 %v16103_v26 }
0x17c4   : > { %6844 = vmax.xlane.f32.xlu1 %v16106_v35 }
0x1802   : > { %v6823_v25 = vpop.xlane.xlu0 %6822 }
0x1803   : > { %v6852_v0 = vsub.f32 %v6804_v53, %v6823_v25 }
0x1805   : > { %v6870_v63 = vmul.f32 1.442695, %v6852_v0  ;;  %v6821_v59 = vpop.xlane.xlu1 %6820 }
0x1806   : > { %v6851_v33 = vsub.f32 %v6803_v14, %v6821_v59  ;;  %v6819_v1 = vpop.xlane.xlu0 %6818 }
0x1807   : > { %12976 = vpow2.f32 %v6870_v63  ;;  %v6850_v28 = vsub.f32 %v6802_v40, %v6819_v1 }
0x1808   : > { %v6868_v31 = vmul.f32 1.442695, %v6851_v33 }
0x1809   : > { %v6866_v15 = vmul.f32 1.442695, %v6850_v28 }
0x180a   : > { %12978 = vpow2.f32 %v6868_v31  ;;  %v6825_v21 = vpop.xlane.xlu0 %6824 }
0x180b   : > { %12980 = vpow2.f32 %v6866_v15  ;;  %v6853_v48 = vsub.f32 %v6805_v39, %v6825_v21 }
0x180c   : > { %v6833_v38 = vpop.xlane.xlu1 %6832 }
0x180d   : > { %v6872_v10 = vmul.f32 1.442695, %v6853_v48  ;;  %v6857_v1 = vsub.f32 %v16069_v12, %v6833_v38 }
0x180e   : > { %v6831_v40 = vpop.xlane.xlu0 %6830 }
0x180f   : > { %12982 = vpow2.f32 %v6872_v10  ;;  %v6856_v20 = vsub.f32 %v16071_v50, %v6831_v40  ;;  %v6880_v21 = vmul.f32 1.442695, %v6857_v1 }
0x1810   : > { %v6829_v52 = vpop.xlane.xlu1 %6828 }
0x1811   : > { %v16111_v8 = vpop.eup %12976  ;;  %v6878_v25 = vmul.f32 1.442695, %v6856_v20  ;;  %v6855_v63 = vsub.f32 %v16074_v36, %v6829_v52 }
0x1812   : > { %6902 = vadd.xlane.f32.xlu1 %v16111_v8  ;;  %v6827_v39 = vpop.xlane.xlu0 %6826 }
0x1813   : > { %v6854_v0 = vsub.f32 %v16077_v54, %v6827_v39  ;;  %12984 = vpow2.f32 %v6878_v25  ;;  %v6876_v31 = vmul.f32 1.442695, %v6855_v63 }
0x1814   : > { %v16114_v42 = vpop.eup %12978  ;;  %v6841_v59 = vpop.xlane.xlu1 %6840 }
0x1815   : > { %v16116_v53 = vpop.eup %12980  ;;  %6900 = vadd.xlane.f32.xlu0 %v16114_v42  ;;  %v6874_v28 = vmul.f32 1.442695, %v6854_v0  ;;  %v6861_v12 = vsub.f32 %v16080_v58, %v6841_v59 }
0x1816   : > { %6898 = vadd.xlane.f32.xlu1 %v16116_v53  ;;  %v6839_v47 = vpop.xlane.xlu0 %6838 }
0x1817   : > { %v6860_v15 = vsub.f32 %v16083_v43, %v6839_v47  ;;  %12986 = vpow2.f32 %v6874_v28  ;;  %v6888_v47 = vmul.f32 1.442695, %v6861_v12 }
0x1818   : > { %v6837_v48 = vpop.xlane.xlu1 %6836  ;;  %12988 = vpow2.f32 %v6876_v31 }
0x1819   : > { %v16120_v14 = vpop.eup %12982  ;;  %v6886_v10 = vmul.f32 1.442695, %v6860_v15  ;;  %12990 = vpow2.f32 %v6880_v21 }
0x181a   : > { %6904 = vadd.xlane.f32.xlu1 %v16120_v14  ;;  %v6835_v2 = vpop.xlane.xlu0 %6834 }
0x181b   : > { %v6858_v54 = vsub.f32 %v16089_v22, %v6835_v2  ;;  %12992 = vpow2.f32 %v6886_v10  ;;  %v6859_v22 = vsub.f32 %v16086_v44, %v6837_v48 }
0x181c   : > { %v16138_v43 = vpop.permute.xlu1 %7289 }
0x181d   : > { %v6882_v38 = vmul.f32 1.442695, %v6858_v54  ;;  %v16136_v20 = vpop.eup %12984  ;;  %v6884_v25 = vmul.f32 1.442695, %v6859_v22 }
0x181e   : > { %v6847_v33 = vpop.xlane.xlu0 %6846 }
0x181f   : > { %v6864_v50 = vsub.f32 %v16093_v41, %v6847_v33 }
0x1821   : > { %v6894_v36 = vmul.f32 1.442695, %v6864_v50  ;;  %v16142_v52 = vpop.eup %12986 }
0x1822   : > { %v6843_v40 = vpop.xlane.xlu0 %6842 }
0x1823   : > { %v6862_v39 = vsub.f32 %v16096_v6, %v6843_v40  ;;  %12994 = vpow2.f32 %v6894_v36  ;;  %v16144_v6 = vpop.eup %12988 }
0x1824   : > { %12996 = vpow2.f32 %v6882_v38  ;;  %v16149_v63 = vpop.eup %12990 }
0x1825   : > { %v6890_v41 = vmul.f32 1.442695, %v6862_v39  ;;  %v16151_v44 = vpop.eup %12992 }
0x1826   : > { %v7288_v50 = vpop.permute.xlu0 %7287 }
0x1827   : > { %12998 = vpow2.f32 %v6890_v41 }
0x1828   : > { %13000 = vpow2.f32 %v6888_v47 }
0x182b   : > { %7291 = vrot.lane.b32.xlu0 %v15773_v18, %s13547_s22  ;;  %7293 = vrot.lane.b32.xlu1 %v15791_v57, %s13547_s22 }
0x182d   : > { %v16156_v1 = vpop.eup %12994 }
0x182e   : > { %v16158_v28 = vpop.eup %12996 }
0x1831   : > { %v16162_v31 = vpop.eup %12998 }
0x1832   : > { %v16164_v15 = vpop.eup %13000 }
0x184a   : > { %6910 = vadd.xlane.f32.xlu0 %v16136_v20 }
0x184d   : > { %v6849_v2 = vpop.xlane.xlu1 %6848 }
0x184e   : > { %v6865_v58 = vsub.f32 %v16103_v26, %v6849_v2  ;;  %6906 = vadd.xlane.f32.xlu0 %v16142_v52 }
0x184f   : > { %6908 = vadd.xlane.f32.xlu1 %v16144_v6 }
0x1850   : > { %v6896_v0 = vmul.f32 1.442695, %v6865_v58 }
0x1851   : > { %v6845_v59 = vpop.xlane.xlu1 %6844 }
0x1852   : > { %13002 = vpow2.f32 %v6896_v0  ;;  %v6863_v33 = vsub.f32 %v16106_v35, %v6845_v59  ;;  %6912 = vadd.xlane.f32.xlu0 %v16149_v63 }
0x1853   : > { %6918 = vadd.xlane.f32.xlu1 %v16151_v44  ;;  %13004 = vpow2.f32 %v6884_v25  ;;  %v7324_v25 = vsel %vm1267_vm0, %v16048_v62, 0 }
0x1854   : > { %v6892_v26 = vmul.f32 1.442695, %v6863_v33 }
0x1856   : > { %6926 = vadd.xlane.f32.xlu0 %v16156_v1  ;;  %13006 = vpow2.f32 %v6892_v26 }
0x1857   : > { %6914 = vadd.xlane.f32.xlu1 %v16158_v28 }
0x185a   : > { %6922 = vadd.xlane.f32.xlu0 %v16162_v31 }
0x185b   : > { %6920 = vadd.xlane.f32.xlu1 %v16164_v15 }
0x185c   : > { %v16168_v35 = vpop.eup %13002 }
0x185d   : > { %v16170_v21 = vpop.eup %13004 }
0x185e   : > { %6928 = vadd.xlane.f32.xlu0 %v16168_v35 }
0x185f   : > { %6916 = vadd.xlane.f32.xlu1 %v16170_v21 }
0x1860   : > { %v16174_v48 = vpop.eup %13006 }
0x1863   : > { %6924 = vadd.xlane.f32.xlu1 %v16174_v48 }
0x1874   : > { %7297 = vrot.lane.b32.xlu1 %v15827_v4, %s13547_s22  ;;  %7295 = vrot.lane.b32.xlu0 %v15809_v5, %s13547_s22 }
0x1878   : > { %7261 = vrot.lane.b32.xlu1 %v15713_v49, %s13547_s22  ;;  %7259 = vrot.lane.b32.xlu0 %v15693_v3, %s13547_s22 }
0x187c   : > { %7265 = vrot.lane.b32.xlu1 %v15751_v7, %s13547_s22  ;;  %7263 = vrot.lane.b32.xlu0 %v15734_v23, %s13547_s22 }
0x1880   : > { %7269 = vrot.lane.b32.xlu1 %v15787_v9, %s13547_s22  ;;  %7267 = vrot.lane.b32.xlu0 %v15771_v19, %s13547_s22 }
0x1884   : > { %7273 = vrot.lane.b32.xlu1 %v15823_v61, %s13547_s22  ;;  %7271 = vrot.lane.b32.xlu0 %v15807_v45, %s13547_s22 }
0x1888   : > { %7622 = vrot.lane.b32.xlu1 %v15715_v17, %s13547_s22  ;;  %7620 = vrot.lane.b32.xlu0 %v15719_v30, %s13547_s22 }
0x188c   : > { %7626 = vrot.lane.b32.xlu1 %v15753_v32, %s13547_s22  ;;  %7624 = vrot.lane.b32.xlu0 %v15757_v37, %s13547_s22 }
0x1890   : > { %7630 = vrot.lane.b32.xlu1 %v15789_v13, %s13547_s22  ;;  %7628 = vrot.lane.b32.xlu0 %v15793_v29, %s13547_s22 }
0x1894   : > { %7634 = vrot.lane.b32.xlu1 %v15825_v46, %s13547_s22  ;;  %7632 = vrot.lane.b32.xlu0 %v15829_v24, %s13547_s22 }
0x1898   : > { %7927 = vrot.lane.b32.xlu1 %v15717_v55, %s13548_s25  ;;  %7925 = vrot.lane.b32.xlu0 %v15695_v27, %s13548_s25 }
0x189f   : > { %v6903_v10 = vpop.xlane.xlu1 %6902 }
0x18a2   : > { %v6901_v54 = vpop.xlane.xlu0 %6900 }
0x18a3   : > { %13008 = vrcp.f32 %v6901_v54  ;;  %v6899_v40 = vpop.xlane.xlu1 %6898 }
0x18a4   : > { %13010 = vrcp.f32 %v6899_v40 }
0x18a5   : > { %13012 = vrcp.f32 %v6903_v10 }
0x18a6   : > { %v7292_v62 = vpop.permute.xlu0 %7291 }
0x18a7   : > { %v6905_v36 = vpop.xlane.xlu1 %6904 }
0x18a8   : > { %13014 = vrcp.f32 %v6905_v36 }
0x18ad   : > { %v13009_v39 = vpop.eup %13008 }
0x18ae   : > { %v13011_v12 = vpop.eup %13010  ;;  %v6947_v38 = vmul.f32 %v13009_v39, %v16114_v42  ;;  %v7327_v42 = vsel %vm1267_vm0, %v16109_v51, 0 }
0x18af   : > { %v6946_v41 = vmul.f32 %v13011_v12, %v16116_v53  ;;  %v13013_v47 = vpop.eup %13012  ;;  %v7333_v53 = vsel %vm1267_vm0, %v16138_v43, 0 }
0x18b0   : > { %v6948_v27 = vmul.f32 %v13013_v47, %v16111_v8  ;;  %v7330_v8 = vsel %vm1267_vm0, %v7288_v50, 0 }
0x18b1   : > { %v6962_v55 = vpack.c.bf16 %v6947_v38, %v6946_v41 }
0x18b2   : > { %v13015_v22 = vpop.eup %13014 }
0x18b3   : > { %v6949_v2 = vmul.f32 %v13015_v22, %v16120_v14  ;;  %11883 = vmatprep.mubr.bf16.mxu1 %v6962_v55  ;;  %v7336_v14 = vsel %vm1267_vm0, %v7292_v62, 0 }
0x18b5   : > { %v6963_v58 = vpack.c.bf16 %v6949_v2, %v6948_v27 }
0x18b7   : > { %11884 = vmatmul.mubr.bf16.vlgmr.msra.gmra.mrb[192].mxu1 %v6963_v58 }
0x18b8   : > { %11900 = vmatpush3.bf16.xpose.msra.mxu1 %v7324_v25 }
0x18b9   : > { %12108 = vmatprep.subr.msk.bf16.mxu1 %vm1267_vm0, %v16109_v51  ;;  %v7294_v51 = vpop.permute.xlu1 %7293 }
0x18ba   : > { %v7339_v26 = vsel %vm1267_vm0, %v7294_v51, 0 }
0x18c0   : > { %11902 = vmatpush3.bf16.xpose.msra.mxu1 %v7327_v42 }
0x18c1   : > { %12109 = vmatprep.subr.msk.bf16.mxu1 %vm1267_vm0, %v7288_v50 }
0x18c8   : > { %11904 = vmatpush3.bf16.xpose.msra.mxu1 %v7330_v8 }
0x18c9   : > { %12110 = vmatprep.subr.msk.bf16.mxu1 %vm1267_vm0, %v16138_v43 }
0x18d0   : > { %11906 = vmatpush3.bf16.xpose.msra.mxu1 %v7333_v53 }
0x18d1   : > { %12111 = vmatprep.subr.msk.bf16.mxu1 %vm1267_vm0, %v7292_v62 }
0x18d7   : > { %v6911_v0 = vpop.xlane.xlu0 %6910 }
0x18d8   : > { %11908 = vmatpush3.bf16.xpose.msra.mxu1 %v7336_v14 }
0x18d9   : > { %12112 = vmatprep.subr.msk.bf16.mxu1 %vm1267_vm0, %v7294_v51 }
0x18db   : > { %v6907_v59 = vpop.xlane.xlu0 %6906 }
0x18dc   : > { %13016 = vrcp.f32 %v6907_v59  ;;  %v6909_v33 = vpop.xlane.xlu1 %6908 }
0x18dd   : > { %13018 = vrcp.f32 %v6909_v33 }
0x18de   : > { %13020 = vrcp.f32 %v6911_v0 }
0x18df   : > { %v6913_v50 = vpop.xlane.xlu0 %6912 }
0x18e0   : > { %11910 = vmatpush3.bf16.xpose.msra.mxu1 %v7339_v26  ;;  %13022 = vrcp.f32 %v6913_v50  ;;  %v6919_v43 = vpop.xlane.xlu1 %6918 }
0x18e3   : > { %v6927_v10 = vpop.xlane.xlu0 %6926 }
0x18e4   : > { %v6915_v54 = vpop.xlane.xlu1 %6914 }
0x18e6   : > { %v13017_v40 = vpop.eup %13016 }
0x18e7   : > { %v13019_v36 = vpop.eup %13018  ;;  %v6923_v39 = vpop.xlane.xlu0 %6922  ;;  %v6950_v12 = vmul.f32 %v13017_v40, %v16142_v52 }
0x18e8   : > { %v13021_v38 = vpop.eup %13020  ;;  %v6921_v41 = vpop.xlane.xlu1 %6920  ;;  %v6951_v47 = vmul.f32 %v13019_v36, %v16144_v6 }
0x18e9   : > { %13024 = vrcp.f32 %v6921_v41  ;;  %v6952_v2 = vmul.f32 %v13021_v38, %v16136_v20 }
0x18ea   : > { %v13023_v55 = vpop.eup %13022  ;;  %v6964_v22 = vpack.c.bf16 %v6951_v47, %v6950_v12  ;;  %13026 = vrcp.f32 %v6915_v54 }
0x18eb   : > { %v6929_v27 = vpop.xlane.xlu0 %6928  ;;  %v6953_v58 = vmul.f32 %v13023_v55, %v16149_v63  ;;  %13028 = vrcp.f32 %v6919_v43 }
0x18ec   : > { %v6917_v25 = vpop.xlane.xlu1 %6916  ;;  %11887 = vmatprep.mubr.bf16.mxu1 %v6964_v22 }
0x18ed   : > { %13030 = vrcp.f32 %v6917_v25  ;;  %v6965_v42 = vpack.c.bf16 %v6953_v58, %v6952_v2 }
0x18ee   : > { %13032 = vrcp.f32 %v6923_v39 }
0x18ef   : > { %11888 = vmatmul.mubr.bf16.gmra.mrb[196].mxu1 %v6965_v42  ;;  %v7296_v52 = vpop.permute.xlu0 %7295 }
0x18f0   : > { %v6925_v8 = vpop.xlane.xlu1 %6924  ;;  %12113 = vmatprep.subr.msk.bf16.mxu1 %vm1267_vm0, %v7296_v52  ;;  %v7342_v6 = vsel %vm1267_vm0, %v7296_v52, 0 }
0x18f1   : > { %13034 = vrcp.f32 %v6925_v8  ;;  %11912 = vmatpush3.bf16.xpose.msra.mxu1 %v7342_v6 }
0x18f2   : > { %13036 = vrcp.f32 %v6929_v27 }
0x18f3   : > { %v7260_v53 = vpop.permute.xlu0 %7259  ;;  %v13025_v20 = vpop.eup %13024  ;;  %13038 = vrcp.f32 %v6927_v10 }
0x18f4   : > { %v7298_v63 = vpop.permute.xlu1 %7297  ;;  %v13027_v62 = vpop.eup %13026  ;;  %v6957_v59 = vmul.f32 %v13025_v20, %v16164_v15 }
0x18f5   : > { %12114 = vmatprep.subr.msk.bf16.mxu1 %vm1267_vm0, %v7298_v63  ;;  %v13029_v14 = vpop.eup %13028  ;;  %v7345_v26 = vsel %vm1267_vm0, %v7298_v63, 0  ;;  %v6954_v50 = vmul.f32 %v13027_v62, %v16158_v28 }
0x18f6   : > { %v6956_v10 = vmul.f32 %v13029_v14, %v16151_v44 }
0x18f7   : > { %v13031_v0 = vpop.eup %13030  ;;  %v7264_v51 = vpop.permute.xlu0 %7263 }
0x18f8   : > { %v7262_v33 = vpop.permute.xlu1 %7261  ;;  %v6955_v43 = vmul.f32 %v13031_v0, %v16170_v21  ;;  %v13033_v54 = vpop.eup %13032  ;;  %v6967_v12 = vpack.c.bf16 %v6957_v59, %v6956_v10 }
0x18f9   : > { %11914 = vmatpush3.bf16.xpose.msra.mxu1 %v7345_v26  ;;  %v6958_v15 = vmul.f32 %v13033_v54, %v16162_v31 }
0x18fa   : > { %v6966_v40 = vpack.c.bf16 %v6955_v43, %v6954_v50 }
0x18fb   : > { %v13035_v36 = vpop.eup %13034  ;;  %v7268_v39 = vpop.permute.xlu0 %7267 }
0x18fc   : > { %v13037_v38 = vpop.eup %13036  ;;  %v7266_v41 = vpop.permute.xlu1 %7265  ;;  %11891 = vmatprep.mubr.bf16.mxu1 %v6966_v40  ;;  %v6959_v47 = vmul.f32 %v13035_v36, %v16174_v48 }
0x18fd   : > { %11892 = vmatmul.mubr.bf16.gmra.mrb[200].mxu1 %v6967_v12  ;;  %v13039_v55 = vpop.eup %13038  ;;  %v6961_v21 = vmul.f32 %v13037_v38, %v16168_v35 }
0x18fe   : > { %v6968_v28 = vpack.c.bf16 %v6959_v47, %v6958_v15  ;;  %v6960_v44 = vmul.f32 %v13039_v55, %v16156_v1 }
0x18ff   : > { %v7272_v22 = vpop.permute.xlu0 %7271 }
0x1900   : > { %v7270_v27 = vpop.permute.xlu1 %7269  ;;  %11895 = vmatprep.mubr.bf16.mxu1 %v6968_v28  ;;  %v6969_v58 = vpack.c.bf16 %v6961_v21, %v6960_v44 }
0x1903   : > { %v7621_v2 = vpop.permute.xlu0 %7620 }
0x1904   : > { %v7274_v25 = vpop.permute.xlu1 %7273  ;;  %11931 = vmatprep.subr.bf16.mxu0 %v7621_v2 }
0x1905   : > { %11896 = vmatmul.mubr.bf16.gmra.mrb[204].mxu1 %v6969_v58  ;;  %11932 = vmatpush3.bf16.msra.mxu0 %v7621_v2 }
0x1906   : > { %11915 = vmatprep.mubr.msk.bf16.mxu1 %vm1267_vm0, %v7260_v53 }
0x1907   : > { %v7625_v48 = vpop.permute.xlu0 %7624 }
0x1908   : > { %v7623_v31 = vpop.permute.xlu1 %7622 }
0x1909   : > { %11933 = vmatprep.subr.bf16.mxu0 %v7623_v31 }
0x190a   : > { %11934 = vmatpush3.bf16.msra.mxu0 %v7623_v31 }
0x190b   : > { %11935 = vmatprep.subr.bf16.mxu0 %v7625_v48  ;;  %v7629_v1 = vpop.permute.xlu0 %7628 }
0x190c   : > { %v7627_v35 = vpop.permute.xlu1 %7626 }
0x190d   : > { %11916 = vmatmul.mubr.msk.bf16.vlgmr.msra.gmra.mrb[208].mxu1 %vm1267_vm0, %v7262_v33 }
0x190e   : > { %11919 = vmatprep.mubr.msk.bf16.mxu1 %vm1267_vm0, %v7264_v51  ;;  %11936 = vmatpush3.bf16.msra.mxu0 %v7625_v48 }
0x190f   : > { %11937 = vmatprep.subr.bf16.mxu0 %v7627_v35  ;;  %v7633_v52 = vpop.permute.xlu0 %7632 }
0x1910   : > { %v7631_v42 = vpop.permute.xlu1 %7630 }
0x1912   : > { %11938 = vmatpush3.bf16.msra.mxu0 %v7627_v35 }
0x1913   : > { %11939 = vmatprep.subr.bf16.mxu0 %v7629_v1  ;;  %v16260_v6 = vpop.permute.xlu0 %7925 }
0x1914   : > { %v7635_v8 = vpop.permute.xlu1 %7634 }
0x1915   : > { %11920 = vmatmul.mubr.msk.bf16.gmra.mrb[212].mxu1 %vm1267_vm0, %v7266_v41 }
0x1916   : > { %11923 = vmatprep.mubr.msk.bf16.mxu1 %vm1267_vm0, %v7268_v39  ;;  %11940 = vmatpush3.bf16.msra.mxu0 %v7629_v1 }
0x1917   : > { %11941 = vmatprep.subr.bf16.mxu0 %v7631_v42 }
0x191a   : > { %11942 = vmatpush3.bf16.msra.mxu0 %v7631_v42 }
0x191b   : > { %11943 = vmatprep.subr.bf16.mxu0 %v7633_v52 }
0x191d   : > { %11924 = vmatmul.mubr.msk.bf16.gmra.mrb[216].mxu1 %vm1267_vm0, %v7270_v27 }
0x191e   : > { %11927 = vmatprep.mubr.msk.bf16.mxu1 %vm1267_vm0, %v7272_v22  ;;  %11944 = vmatpush3.bf16.msra.mxu0 %v7633_v52 }
0x191f   : > { %11945 = vmatprep.subr.bf16.mxu0 %v7635_v8 }
0x1922   : > { %11946 = vmatpush3.bf16.msra.mxu0 %v7635_v8 }
0x1923   : > { %12115 = vmatprep.subr.msk.bf16.mxu0 %vm1267_vm0, %v16260_v6 }
0x1925   : > { %11928 = vmatmul.mubr.msk.bf16.gmra.mrb[220].mxu1 %vm1267_vm0, %v7274_v25 }
0x198a   : > { %v16265_v53 = vpop.f32.mrb[192].mxu1 }
0x198b   : > { %v16267_v20 = vpop.f32.mrb[193].mxu1 }
0x198c   : > { %v16269_v63 = vpop.f32.mrb[194].mxu1 }
0x198d   : > { %v16271_v62 = vpop.f32.mrb[195].mxu1 }
0x19c2   : > { %v16273_v14 = vpop.f32.mrb[196].mxu1 }
0x19c3   : > { %v16275_v0 = vpop.f32.mrb[197].mxu1 }
0x19c4   : > { %v16277_v51 = vpop.f32.mrb[198].mxu1 }
0x19c5   : > { %v16279_v59 = vpop.f32.mrb[199].mxu1 }
0x19d0   : > { %v16281_v33 = vpop.f32.mrb[200].mxu1 }
0x19d1   : > { %17367 = vst [vmem:[#allocation23_spill] sm:$0xff] %v16281_v33  ;;  %v16283_v26 = vpop.f32.mrb[201].mxu1 }
0x19d2   : > { %v16285_v50 = vpop.f32.mrb[202].mxu1 }
0x19d3   : > { %17368 = vst [vmem:[#allocation24_spill] sm:$0xff] %v16285_v50  ;;  %v16287_v43 = vpop.f32.mrb[203].mxu1 }
0x19d4   : > { %17369 = vst [vmem:[#allocation25_spill] sm:$0xff] %v16287_v43 }
0x19d8   : > { %v16289_v54 = vpop.f32.mrb[204].mxu1 }
0x19d9   : > { %17370 = vst [vmem:[#allocation45_spill] sm:$0xff] %v16289_v54  ;;  %v16291_v10 = vpop.f32.mrb[205].mxu1 }
0x19da   : > { %17371 = vst [vmem:[#allocation46_spill] sm:$0xff] %v16291_v10  ;;  %v16293_v40 = vpop.f32.mrb[206].mxu1 }
0x19db   : > { %17372 = vst [vmem:[#allocation47_spill] sm:$0xff] %v16293_v40  ;;  %v16295_v36 = vpop.f32.mrb[207].mxu1 }
0x19dc   : > { %17373 = vst [vmem:[#allocation48_spill] sm:$0xff] %v16295_v36 }
0x19e0   : > { %v11917_v39 = vpop.f32.mrb[208].mxu1 }
0x19e1   : > { %v7446_v12 = vmul.f32 0.17677669, %v11917_v39  ;;  %v7381_v38 = vpop.f32.mrb[209].mxu1 }
0x19e2   : > { %v11918_v41 = vpop.f32.mrb[210].mxu1  ;;  %v7444_v55 = vmul.f32 0.17677669, %v7381_v38 }
0x19e3   : > { %7464 = vmax.xlane.f32.xlu0 %v7446_v12  ;;  %v7384_v15 = vpop.f32.mrb[211].mxu1  ;;  %v7447_v22 = vmul.f32 0.17677669, %v11918_v41 }
0x19e4   : > { %v7445_v47 = vmul.f32 0.17677669, %v7384_v15 }
0x19e6   : > { %7462 = vmax.xlane.f32.xlu1 %v7445_v47 }
0x19e7   : > { %7460 = vmax.xlane.f32.xlu0 %v7444_v55 }
0x19e8   : > { %v11921_v28 = vpop.f32.mrb[212].mxu1 }
0x19e9   : > { %v7397_v21 = vpop.f32.mrb[213].mxu1  ;;  %v16299_v58 = vmul.f32 0.17677669, %v11921_v28 }
0x19ea   : > { %v11922_v27 = vpop.f32.mrb[214].mxu1  ;;  %v16305_v48 = vmul.f32 0.17677669, %v7397_v21 }
0x19eb   : > { %v16297_v44 = vmul.f32 0.17677669, %v11922_v27  ;;  %7466 = vmax.xlane.f32.xlu0 %v7447_v22  ;;  %v7400_v2 = vpop.f32.mrb[215].mxu1 }
0x19ec   : > { %v16302_v25 = vmul.f32 0.17677669, %v7400_v2 }
0x19ed   : > { %7474 = vmax.xlane.f32.xlu1 %v16297_v44 }
0x19ef   : > { %7472 = vmax.xlane.f32.xlu0 %v16299_v58 }
0x19f0   : > { %v11925_v31 = vpop.f32.mrb[216].mxu1 }
0x19f1   : > { %7470 = vmax.xlane.f32.xlu1 %v16302_v25  ;;  %v7413_v35 = vpop.f32.mrb[217].mxu1  ;;  %v16311_v8 = vmul.f32 0.17677669, %v11925_v31 }
0x19f2   : > { %v11926_v1 = vpop.f32.mrb[218].mxu1  ;;  %v16317_v41 = vmul.f32 0.17677669, %v7413_v35 }
0x19f3   : > { %v16308_v42 = vmul.f32 0.17677669, %v11926_v1  ;;  %7468 = vmax.xlane.f32.xlu0 %v16305_v48  ;;  %v7416_v52 = vpop.f32.mrb[219].mxu1  ;;  %v16337_v1 = vpop.permute.xlu1 %7927 }
0x19f4   : > { %v16314_v39 = vmul.f32 0.17677669, %v7416_v52 }
0x19f5   : > { %7482 = vmax.xlane.f32.xlu1 %v16308_v42 }
0x19f7   : > { %7480 = vmax.xlane.f32.xlu0 %v16311_v8 }
0x19f8   : > { %v11929_v38 = vpop.f32.mrb[220].mxu1 }
0x19f9   : > { %7478 = vmax.xlane.f32.xlu1 %v16314_v39  ;;  %v7429_v15 = vpop.f32.mrb[221].mxu1  ;;  %v16321_v27 = vmul.f32 0.17677669, %v11929_v38 }
0x19fa   : > { %v11930_v28 = vpop.f32.mrb[222].mxu1  ;;  %v16324_v2 = vmul.f32 0.17677669, %v7429_v15 }
0x19fb   : > { %7476 = vmax.xlane.f32.xlu0 %v16317_v41  ;;  %v7432_v21 = vpop.f32.mrb[223].mxu1  ;;  %v16331_v31 = vmul.f32 0.17677669, %v11930_v28 }
0x19fc   : > { %v16334_v35 = vmul.f32 0.17677669, %v7432_v21 }
0x19ff   : > { %7488 = vmax.xlane.f32.xlu0 %v16321_v27 }
0x1a03   : > { %7484 = vmax.xlane.f32.xlu0 %v16324_v2 }
0x1a0a   : > { %7931 = vrot.lane.b32.xlu1 %v15755_v60, %s13548_s25 }
0x1a19   : > { %7929 = vrot.lane.b32.xlu0 %v15737_v16, %s13548_s25 }
0x1a2e   : > { %7490 = vmax.xlane.f32.xlu1 %v16331_v31 }
0x1a32   : > { %7486 = vmax.xlane.f32.xlu1 %v16334_v35 }
0x1a70   : > { %v7465_v52 = vpop.xlane.xlu0 %7464 }
0x1a71   : > { %v7494_v38 = vsub.f32 %v7446_v12, %v7465_v52 }
0x1a73   : > { %v7512_v15 = vmul.f32 1.442695, %v7494_v38  ;;  %v7463_v34 = vpop.xlane.xlu1 %7462 }
0x1a74   : > { %v7493_v11 = vsub.f32 %v7445_v47, %v7463_v34  ;;  %v7461_v40 = vpop.xlane.xlu0 %7460 }
0x1a75   : > { %13040 = vpow2.f32 %v7512_v15  ;;  %v7492_v60 = vsub.f32 %v7444_v55, %v7461_v40 }
0x1a76   : > { %v7510_v54 = vmul.f32 1.442695, %v7493_v11 }
0x1a77   : > { %v7508_v16 = vmul.f32 1.442695, %v7492_v60 }
0x1a78   : > { %13042 = vpow2.f32 %v7510_v54  ;;  %v7467_v28 = vpop.xlane.xlu0 %7466 }
0x1a79   : > { %13044 = vpow2.f32 %v7508_v16  ;;  %v7495_v36 = vsub.f32 %v7447_v22, %v7467_v28 }
0x1a7a   : > { %v7475_v40 = vpop.xlane.xlu1 %7474 }
0x1a7b   : > { %v7514_v21 = vmul.f32 1.442695, %v7495_v36  ;;  %v7499_v28 = vsub.f32 %v16297_v44, %v7475_v40 }
0x1a7c   : > { %v7473_v34 = vpop.xlane.xlu0 %7472 }
0x1a7d   : > { %13046 = vpow2.f32 %v7514_v21  ;;  %v7498_v47 = vsub.f32 %v16299_v58, %v7473_v34  ;;  %v7522_v33 = vmul.f32 1.442695, %v7499_v28 }
0x1a7e   : > { %v7471_v55 = vpop.xlane.xlu1 %7470 }
0x1a7f   : > { %v16339_v10 = vpop.eup %13040  ;;  %v7520_v52 = vmul.f32 1.442695, %v7498_v47  ;;  %v7497_v15 = vsub.f32 %v16302_v25, %v7471_v55 }
0x1a80   : > { %7544 = vadd.xlane.f32.xlu1 %v16339_v10  ;;  %v7469_v54 = vpop.xlane.xlu0 %7468 }
0x1a81   : > { %v7496_v38 = vsub.f32 %v16305_v48, %v7469_v54  ;;  %13048 = vpow2.f32 %v7520_v52  ;;  %v7518_v21 = vmul.f32 1.442695, %v7497_v15 }
0x1a82   : > { %v16342_v50 = vpop.eup %13042  ;;  %v7483_v60 = vpop.xlane.xlu1 %7482 }
0x1a83   : > { %v16344_v12 = vpop.eup %13044  ;;  %7542 = vadd.xlane.f32.xlu0 %v16342_v50  ;;  %v7503_v44 = vsub.f32 %v16308_v42, %v7483_v60 }
0x1a84   : > { %7540 = vadd.xlane.f32.xlu1 %v16344_v12  ;;  %v7481_v36 = vpop.xlane.xlu0 %7480 }
0x1a86   : > { %v7479_v43 = vpop.xlane.xlu1 %7478 }
0x1a87   : > { %v16348_v11 = vpop.eup %13046 }
0x1a88   : > { %7546 = vadd.xlane.f32.xlu1 %v16348_v11  ;;  %v7477_v22 = vpop.xlane.xlu0 %7476 }
0x1a89   : > { %v7500_v48 = vsub.f32 %v16317_v41, %v7477_v22  ;;  %v7501_v41 = vsub.f32 %v16314_v39, %v7479_v43 }
0x1a8b   : > { %v7524_v40 = vmul.f32 1.442695, %v7500_v48  ;;  %v16364_v55 = vpop.eup %13048  ;;  %v7526_v52 = vmul.f32 1.442695, %v7501_v41  ;;  %v7966_v48 = vsel %vm1267_vm0, %v16260_v6, 0 }
0x1a8c   : > { %v7489_v16 = vpop.xlane.xlu0 %7488 }
0x1a8d   : > { %v7506_v58 = vsub.f32 %v16321_v27, %v7489_v16 }
0x1a8f   : > { %v7536_v25 = vmul.f32 1.442695, %v7506_v58 }
0x1a90   : > { %v7485_v54 = vpop.xlane.xlu0 %7484 }
0x1a91   : > { %v7504_v47 = vsub.f32 %v16324_v2, %v7485_v54 }
0x1a93   : > { %v7532_v27 = vmul.f32 1.442695, %v7504_v47 }
0x1a99   : > { %7933 = vrot.lane.b32.xlu0 %v15773_v18, %s13548_s25  ;;  %7935 = vrot.lane.b32.xlu1 %v15791_v57, %s13548_s25  ;;  %v7516_v18 = vmul.f32 1.442695, %v7496_v38  ;;  %v7502_v57 = vsub.f32 %v16311_v8, %v7481_v36  ;;  %v16366_v8 = vpop.permute.xlu1 %7931  ;;  %v7530_v36 = vmul.f32 1.442695, %v7503_v44 }
0x1a9b   : > { %13050 = vpow2.f32 %v7516_v18  ;;  %v7528_v34 = vmul.f32 1.442695, %v7502_v57 }
0x1a9c   : > { %13052 = vpow2.f32 %v7518_v21 }
0x1a9d   : > { %13054 = vpow2.f32 %v7522_v33 }
0x1a9e   : > { %13056 = vpow2.f32 %v7528_v34 }
0x1a9f   : > { %13058 = vpow2.f32 %v7536_v25 }
0x1aa0   : > { %13060 = vpow2.f32 %v7524_v40 }
0x1aa1   : > { %13062 = vpow2.f32 %v7532_v27 }
0x1aa2   : > { %13064 = vpow2.f32 %v7530_v36 }
0x1aa5   : > { %v16370_v33 = vpop.eup %13050 }
0x1aa6   : > { %v16372_v2 = vpop.eup %13052 }
0x1aa7   : > { %v16377_v15 = vpop.eup %13054 }
0x1aa8   : > { %v16379_v43 = vpop.eup %13056 }
0x1aa9   : > { %v16384_v16 = vpop.eup %13058 }
0x1aaa   : > { %v16386_v28 = vpop.eup %13060 }
0x1aab   : > { %v16390_v18 = vpop.eup %13062 }
0x1aac   : > { %v16392_v21 = vpop.eup %13064 }
0x1ab8   : > { %7552 = vadd.xlane.f32.xlu0 %v16364_v55 }
0x1abb   : > { %v7491_v22 = vpop.xlane.xlu1 %7490 }
0x1abc   : > { %v7507_v42 = vsub.f32 %v16331_v31, %v7491_v22  ;;  %7548 = vadd.xlane.f32.xlu0 %v16370_v33 }
0x1abd   : > { %7550 = vadd.xlane.f32.xlu1 %v16372_v2 }
0x1abe   : > { %v7538_v38 = vmul.f32 1.442695, %v7507_v42 }
0x1abf   : > { %v7487_v60 = vpop.xlane.xlu1 %7486 }
0x1ac0   : > { %13066 = vpow2.f32 %v7538_v38  ;;  %v7505_v39 = vsub.f32 %v16334_v35, %v7487_v60  ;;  %7554 = vadd.xlane.f32.xlu0 %v16377_v15 }
0x1ac1   : > { %7560 = vadd.xlane.f32.xlu1 %v16379_v43  ;;  %13068 = vpow2.f32 %v7526_v52 }
0x1ac2   : > { %v7534_v31 = vmul.f32 1.442695, %v7505_v39 }
0x1ac4   : > { %7568 = vadd.xlane.f32.xlu0 %v16384_v16  ;;  %13070 = vpow2.f32 %v7534_v31 }
0x1ac5   : > { %7556 = vadd.xlane.f32.xlu1 %v16386_v28 }
0x1ac8   : > { %7564 = vadd.xlane.f32.xlu0 %v16390_v18 }
0x1ac9   : > { %7562 = vadd.xlane.f32.xlu1 %v16392_v21 }
0x1aca   : > { %v16396_v35 = vpop.eup %13066 }
0x1acb   : > { %v16398_v57 = vpop.eup %13068 }
0x1acc   : > { %7570 = vadd.xlane.f32.xlu0 %v16396_v35 }
0x1acd   : > { %7558 = vadd.xlane.f32.xlu1 %v16398_v57 }
0x1ace   : > { %v16402_v58 = vpop.eup %13070 }
0x1ad1   : > { %7566 = vadd.xlane.f32.xlu1 %v16402_v58 }
0x1ae2   : > { %7939 = vrot.lane.b32.xlu1 %v15827_v4, %s13548_s25  ;;  %7937 = vrot.lane.b32.xlu0 %v15809_v5, %s13548_s25 }
0x1ae6   : > { %7903 = vrot.lane.b32.xlu1 %v15713_v49, %s13548_s25  ;;  %7901 = vrot.lane.b32.xlu0 %v15693_v3, %s13548_s25  ;;  %v7930_v3 = vpop.permute.xlu0 %7929 }
0x1aea   : > { %7907 = vrot.lane.b32.xlu1 %v15751_v7, %s13548_s25  ;;  %7905 = vrot.lane.b32.xlu0 %v15734_v23, %s13548_s25 }
0x1aee   : > { %7911 = vrot.lane.b32.xlu1 %v15787_v9, %s13548_s25  ;;  %7909 = vrot.lane.b32.xlu0 %v15771_v19, %s13548_s25 }
0x1af2   : > { %7915 = vrot.lane.b32.xlu1 %v15823_v61, %s13548_s25  ;;  %7913 = vrot.lane.b32.xlu0 %v15807_v45, %s13548_s25 }
0x1af6   : > { %8264 = vrot.lane.b32.xlu1 %v15715_v17, %s13548_s25  ;;  %8262 = vrot.lane.b32.xlu0 %v15719_v30, %s13548_s25 }
0x1afa   : > { %8266 = vrot.lane.b32.xlu0 %v15757_v37, %s13548_s25 }
0x1afe   : > { %8268 = vrot.lane.b32.xlu0 %v15753_v32, %s13548_s25 }
0x1b0d   : > { %v7545_v49 = vpop.xlane.xlu1 %7544 }
0x1b10   : > { %v7543_v23 = vpop.xlane.xlu0 %7542 }
0x1b11   : > { %13072 = vrcp.f32 %v7543_v23  ;;  %v7541_v7 = vpop.xlane.xlu1 %7540 }
0x1b12   : > { %13074 = vrcp.f32 %v7541_v7 }
0x1b13   : > { %13076 = vrcp.f32 %v7545_v49 }
0x1b14   : > { %v7934_v6 = vpop.permute.xlu0 %7933 }
0x1b15   : > { %v7547_v19 = vpop.xlane.xlu1 %7546 }
0x1b16   : > { %13078 = vrcp.f32 %v7547_v19 }
0x1b1b   : > { %v13073_v9 = vpop.eup %13072 }
0x1b1c   : > { %v13075_v17 = vpop.eup %13074  ;;  %v7589_v45 = vmul.f32 %v13073_v9, %v16342_v50  ;;  %v7969_v50 = vsel %vm1267_vm0, %v16337_v1, 0 }
0x1b1d   : > { %v7588_v30 = vmul.f32 %v13075_v17, %v16344_v12  ;;  %v13077_v5 = vpop.eup %13076  ;;  %v7975_v12 = vsel %vm1267_vm0, %v16366_v8, 0 }
0x1b1e   : > { %v7590_v32 = vmul.f32 %v13077_v5, %v16339_v10  ;;  %v7972_v10 = vsel %vm1267_vm0, %v7930_v3, 0 }
0x1b1f   : > { %v7604_v37 = vpack.c.bf16 %v7589_v45, %v7588_v30 }
0x1b20   : > { %v13079_v61 = vpop.eup %13078 }
0x1b21   : > { %v7591_v4 = vmul.f32 %v13079_v61, %v16348_v11  ;;  %11947 = vmatprep.mubr.bf16.mxu0 %v7604_v37  ;;  %v7978_v11 = vsel %vm1267_vm0, %v7934_v6, 0 }
0x1b23   : > { %v7605_v34 = vpack.c.bf16 %v7591_v4, %v7590_v32 }
0x1b25   : > { %11948 = vmatmul.mubr.bf16.vlgmr.msra.gmra.mrb[224].mxu0 %v7605_v34 }
0x1b26   : > { %11964 = vmatpush3.bf16.xpose.msra.mxu0 %v7966_v48 }
0x1b27   : > { %12116 = vmatprep.subr.msk.bf16.mxu0 %vm1267_vm0, %v16337_v1  ;;  %v7936_v1 = vpop.permute.xlu1 %7935 }
0x1b28   : > { %v7981_v44 = vsel %vm1267_vm0, %v7936_v1, 0 }
0x1b2e   : > { %11966 = vmatpush3.bf16.xpose.msra.mxu0 %v7969_v50 }
0x1b2f   : > { %12117 = vmatprep.subr.msk.bf16.mxu0 %vm1267_vm0, %v7930_v3 }
0x1b36   : > { %11968 = vmatpush3.bf16.xpose.msra.mxu0 %v7972_v10 }
0x1b37   : > { %12118 = vmatprep.subr.msk.bf16.mxu0 %vm1267_vm0, %v16366_v8 }
0x1b3e   : > { %11970 = vmatpush3.bf16.xpose.msra.mxu0 %v7975_v12 }
0x1b3f   : > { %12119 = vmatprep.subr.msk.bf16.mxu0 %vm1267_vm0, %v7934_v6 }
0x1b45   : > { %v7553_v54 = vpop.xlane.xlu0 %7552 }
0x1b46   : > { %11972 = vmatpush3.bf16.xpose.msra.mxu0 %v7978_v11 }
0x1b47   : > { %12120 = vmatprep.subr.msk.bf16.mxu0 %vm1267_vm0, %v7936_v1 }
0x1b49   : > { %v7549_v25 = vpop.xlane.xlu0 %7548 }
0x1b4a   : > { %13080 = vrcp.f32 %v7549_v25  ;;  %v7551_v47 = vpop.xlane.xlu1 %7550 }
0x1b4b   : > { %13082 = vrcp.f32 %v7551_v47 }
0x1b4c   : > { %13084 = vrcp.f32 %v7553_v54 }
0x1b4d   : > { %v7555_v40 = vpop.xlane.xlu0 %7554 }
0x1b4e   : > { %11974 = vmatpush3.bf16.xpose.msra.mxu0 %v7981_v44  ;;  %13086 = vrcp.f32 %v7555_v40  ;;  %v7561_v8 = vpop.xlane.xlu1 %7560 }
0x1b51   : > { %v7569_v27 = vpop.xlane.xlu0 %7568 }
0x1b52   : > { %v7557_v36 = vpop.xlane.xlu1 %7556 }
0x1b54   : > { %v13081_v41 = vpop.eup %13080 }
0x1b55   : > { %v13083_v22 = vpop.eup %13082  ;;  %v7565_v42 = vpop.xlane.xlu0 %7564  ;;  %v7592_v52 = vmul.f32 %v13081_v41, %v16370_v33 }
0x1b56   : > { %v13085_v38 = vpop.eup %13084  ;;  %v7563_v60 = vpop.xlane.xlu1 %7562  ;;  %v7593_v39 = vmul.f32 %v13083_v22, %v16372_v2 }
0x1b57   : > { %13088 = vrcp.f32 %v7563_v60  ;;  %v7594_v23 = vmul.f32 %v13085_v38, %v16364_v55 }
0x1b58   : > { %v13087_v31 = vpop.eup %13086  ;;  %v7606_v3 = vpack.c.bf16 %v7593_v39, %v7592_v52  ;;  %13090 = vrcp.f32 %v7557_v36 }
0x1b59   : > { %v7571_v49 = vpop.xlane.xlu0 %7570  ;;  %v7595_v7 = vmul.f32 %v13087_v31, %v16377_v15  ;;  %13092 = vrcp.f32 %v7561_v8 }
0x1b5a   : > { %v7559_v19 = vpop.xlane.xlu1 %7558  ;;  %11951 = vmatprep.mubr.bf16.mxu0 %v7606_v3 }
0x1b5b   : > { %13094 = vrcp.f32 %v7559_v19  ;;  %v7607_v9 = vpack.c.bf16 %v7595_v7, %v7594_v23 }
0x1b5c   : > { %13096 = vrcp.f32 %v7565_v42 }
0x1b5d   : > { %11952 = vmatmul.mubr.bf16.gmra.mrb[228].mxu0 %v7607_v9  ;;  %v7938_v33 = vpop.permute.xlu0 %7937 }
0x1b5e   : > { %v7567_v17 = vpop.xlane.xlu1 %7566  ;;  %12121 = vmatprep.subr.msk.bf16.mxu0 %vm1267_vm0, %v7938_v33  ;;  %v7984_v2 = vsel %vm1267_vm0, %v7938_v33, 0 }
0x1b5f   : > { %13098 = vrcp.f32 %v7567_v17  ;;  %11976 = vmatpush3.bf16.xpose.msra.mxu0 %v7984_v2 }
0x1b60   : > { %13100 = vrcp.f32 %v7571_v49 }
0x1b61   : > { %v7902_v45 = vpop.permute.xlu0 %7901  ;;  %v13089_v55 = vpop.eup %13088  ;;  %13102 = vrcp.f32 %v7569_v27 }
0x1b62   : > { %v7940_v15 = vpop.permute.xlu1 %7939  ;;  %v13091_v30 = vpop.eup %13090  ;;  %v7599_v32 = vmul.f32 %v13089_v55, %v16392_v21 }
0x1b63   : > { %12122 = vmatprep.subr.msk.bf16.mxu0 %vm1267_vm0, %v7940_v15  ;;  %v13093_v5 = vpop.eup %13092  ;;  %v7987_v34 = vsel %vm1267_vm0, %v7940_v15, 0  ;;  %v7596_v48 = vmul.f32 %v13091_v30, %v16386_v28 }
0x1b64   : > { %v7598_v12 = vmul.f32 %v13093_v5, %v16379_v43 }
0x1b65   : > { %v13095_v37 = vpop.eup %13094  ;;  %v7906_v61 = vpop.permute.xlu0 %7905 }
0x1b66   : > { %v7904_v4 = vpop.permute.xlu1 %7903  ;;  %v7597_v50 = vmul.f32 %v13095_v37, %v16398_v57  ;;  %v13097_v10 = vpop.eup %13096  ;;  %v7609_v1 = vpack.c.bf16 %v7599_v32, %v7598_v12 }
0x1b67   : > { %11978 = vmatpush3.bf16.xpose.msra.mxu0 %v7987_v34  ;;  %v7600_v21 = vmul.f32 %v13097_v10, %v16390_v18 }
0x1b68   : > { %v7608_v6 = vpack.c.bf16 %v7597_v50, %v7596_v48 }
0x1b69   : > { %v13099_v11 = vpop.eup %13098  ;;  %v7910_v54 = vpop.permute.xlu0 %7909 }
0x1b6a   : > { %v13101_v25 = vpop.eup %13100  ;;  %v7908_v47 = vpop.permute.xlu1 %7907  ;;  %11955 = vmatprep.mubr.bf16.mxu0 %v7608_v6  ;;  %v7601_v44 = vmul.f32 %v13099_v11, %v16402_v58 }
0x1b6b   : > { %11956 = vmatmul.mubr.bf16.gmra.mrb[232].mxu0 %v7609_v1  ;;  %v13103_v40 = vpop.eup %13102  ;;  %v7603_v57 = vmul.f32 %v13101_v25, %v16396_v35 }
0x1b6c   : > { %v7610_v28 = vpack.c.bf16 %v7601_v44, %v7600_v21  ;;  %v7602_v43 = vmul.f32 %v13103_v40, %v16384_v16 }
0x1b6d   : > { %v7914_v8 = vpop.permute.xlu0 %7913 }
0x1b6e   : > { %v7912_v27 = vpop.permute.xlu1 %7911  ;;  %11959 = vmatprep.mubr.bf16.mxu0 %v7610_v28  ;;  %v7611_v41 = vpack.c.bf16 %v7603_v57, %v7602_v43 }
0x1b71   : > { %v8263_v36 = vpop.permute.xlu0 %8262 }
0x1b72   : > { %v7916_v22 = vpop.permute.xlu1 %7915  ;;  %11995 = vmatprep.subr.bf16.mxu1 %v8263_v36 }
0x1b73   : > { %11960 = vmatmul.mubr.bf16.gmra.mrb[236].mxu0 %v7611_v41  ;;  %11996 = vmatpush3.bf16.msra.mxu1 %v8263_v36 }
0x1b74   : > { %11979 = vmatprep.mubr.msk.bf16.mxu0 %vm1267_vm0, %v7902_v45 }
0x1b75   : > { %v8267_v18 = vpop.permute.xlu0 %8266 }
0x1b76   : > { %v8265_v58 = vpop.permute.xlu1 %8264 }
0x1b77   : > { %11997 = vmatprep.subr.bf16.mxu1 %v8265_v58 }
0x1b78   : > { %11998 = vmatpush3.bf16.msra.mxu1 %v8265_v58 }
0x1b79   : > { %11999 = vmatprep.subr.bf16.mxu1 %v8267_v18  ;;  %v8269_v35 = vpop.permute.xlu0 %8268 }
0x1b7b   : > { %11980 = vmatmul.mubr.msk.bf16.vlgmr.msra.gmra.mrb[240].mxu0 %vm1267_vm0, %v7904_v4 }
0x1b7c   : > { %11983 = vmatprep.mubr.msk.bf16.mxu0 %vm1267_vm0, %v7906_v61  ;;  %12000 = vmatpush3.bf16.msra.mxu1 %v8267_v18 }
0x1b7d   : > { %12001 = vmatprep.subr.bf16.mxu1 %v8269_v35 }
0x1b80   : > { %12002 = vmatpush3.bf16.msra.mxu1 %v8269_v35 }
0x1b83   : > { %11984 = vmatmul.mubr.msk.bf16.gmra.mrb[244].mxu0 %vm1267_vm0, %v7908_v47 }
0x1b84   : > { %11987 = vmatprep.mubr.msk.bf16.mxu0 %vm1267_vm0, %v7910_v54 }
0x1b8b   : > { %11988 = vmatmul.mubr.msk.bf16.gmra.mrb[248].mxu0 %vm1267_vm0, %v7912_v27 }
0x1b8c   : > { %11991 = vmatprep.mubr.msk.bf16.mxu0 %vm1267_vm0, %v7914_v8 }
0x1b93   : > { %11992 = vmatmul.mubr.msk.bf16.gmra.mrb[252].mxu0 %vm1267_vm0, %v7916_v22 }
0x1b94   : > { %9216 = vmatprep.mubr.bf16.mxu0 %v17333_v56 }
0x1bf8   : > { %v16478_v16 = vpop.f32.mrb[224].mxu0 }
0x1bf9   : > { %v16480_v42 = vpop.f32.mrb[225].mxu0 }
0x1bfa   : > { %v16482_v52 = vpop.f32.mrb[226].mxu0 }
0x1bfb   : > { %v16484_v38 = vpop.f32.mrb[227].mxu0 }
0x1c30   : > { %v16486_v60 = vpop.f32.mrb[228].mxu0 }
0x1c31   : > { %v16488_v39 = vpop.f32.mrb[229].mxu0 }
0x1c32   : > { %v16490_v31 = vpop.f32.mrb[230].mxu0 }
0x1c33   : > { %v16492_v3 = vpop.f32.mrb[231].mxu0 }
0x1c3e   : > { %v16494_v49 = vpop.f32.mrb[232].mxu0 }
0x1c3f   : > { %v16496_v23 = vpop.f32.mrb[233].mxu0 }
0x1c40   : > { %v16498_v7 = vpop.f32.mrb[234].mxu0 }
0x1c41   : > { %v16500_v19 = vpop.f32.mrb[235].mxu0 }
0x1c46   : > { %v16502_v9 = vpop.f32.mrb[236].mxu0 }
0x1c47   : > { %v16504_v33 = vpop.f32.mrb[237].mxu0 }
0x1c48   : > { %v16506_v17 = vpop.f32.mrb[238].mxu0 }
0x1c49   : > { %v16508_v2 = vpop.f32.mrb[239].mxu0 }
0x1c4e   : > { %v11981_v45 = vpop.f32.mrb[240].mxu0 }
0x1c4f   : > { %v8088_v55 = vmul.f32 0.17677669, %v11981_v45  ;;  %v8023_v15 = vpop.f32.mrb[241].mxu0 }
0x1c50   : > { %v11982_v30 = vpop.f32.mrb[242].mxu0  ;;  %v8086_v61 = vmul.f32 0.17677669, %v8023_v15 }
0x1c51   : > { %8106 = vmax.xlane.f32.xlu0 %v8088_v55  ;;  %v8026_v5 = vpop.f32.mrb[243].mxu0  ;;  %v8089_v4 = vmul.f32 0.17677669, %v11982_v30 }
0x1c52   : > { %v8087_v37 = vmul.f32 0.17677669, %v8026_v5 }
0x1c54   : > { %8104 = vmax.xlane.f32.xlu1 %v8087_v37 }
0x1c55   : > { %8102 = vmax.xlane.f32.xlu0 %v8086_v61 }
0x1c56   : > { %v11985_v32 = vpop.f32.mrb[244].mxu0 }
0x1c57   : > { %v8039_v34 = vpop.f32.mrb[245].mxu0  ;;  %v8092_v12 = vmul.f32 0.17677669, %v11985_v32 }
0x1c58   : > { %v11986_v48 = vpop.f32.mrb[246].mxu0  ;;  %v8090_v54 = vmul.f32 0.17677669, %v8039_v34 }
0x1c59   : > { %v8093_v50 = vmul.f32 0.17677669, %v11986_v48  ;;  %8108 = vmax.xlane.f32.xlu0 %v8089_v4  ;;  %v8042_v10 = vpop.f32.mrb[247].mxu0 }
0x1c5a   : > { %v16510_v6 = vmul.f32 0.17677669, %v8042_v10 }
0x1c5b   : > { %8116 = vmax.xlane.f32.xlu1 %v8093_v50 }
0x1c5d   : > { %8114 = vmax.xlane.f32.xlu0 %v8092_v12 }
0x1c5e   : > { %v11989_v11 = vpop.f32.mrb[248].mxu0 }
0x1c5f   : > { %8112 = vmax.xlane.f32.xlu1 %v16510_v6  ;;  %v8055_v1 = vpop.f32.mrb[249].mxu0  ;;  %v16515_v44 = vmul.f32 0.17677669, %v11989_v11 }
0x1c60   : > { %v11990_v25 = vpop.f32.mrb[250].mxu0  ;;  %v16521_v8 = vmul.f32 0.17677669, %v8055_v1 }
0x1c61   : > { %v16513_v47 = vmul.f32 0.17677669, %v11990_v25  ;;  %8110 = vmax.xlane.f32.xlu0 %v8090_v54  ;;  %v8058_v21 = vpop.f32.mrb[251].mxu0 }
0x1c62   : > { %v16518_v40 = vmul.f32 0.17677669, %v8058_v21 }
0x1c63   : > { %8124 = vmax.xlane.f32.xlu1 %v16513_v47 }
0x1c65   : > { %8122 = vmax.xlane.f32.xlu0 %v16515_v44 }
0x1c66   : > { %v11993_v28 = vpop.f32.mrb[252].mxu0 }
0x1c67   : > { %8120 = vmax.xlane.f32.xlu1 %v16518_v40  ;;  %v8071_v57 = vpop.f32.mrb[253].mxu0  ;;  %v16525_v36 = vmul.f32 0.17677669, %v11993_v28 }
0x1c68   : > { %v11994_v27 = vpop.f32.mrb[254].mxu0  ;;  %v16528_v41 = vmul.f32 0.17677669, %v8071_v57 }
0x1c69   : > { %8118 = vmax.xlane.f32.xlu0 %v16521_v8  ;;  %v8074_v43 = vpop.f32.mrb[255].mxu0  ;;  %v16535_v22 = vmul.f32 0.17677669, %v11994_v27 }
0x1c6a   : > { %v16538_v18 = vmul.f32 0.17677669, %v8074_v43 }
0x1c6d   : > { %8130 = vmax.xlane.f32.xlu0 %v16525_v36 }
0x1c71   : > { %8126 = vmax.xlane.f32.xlu0 %v16528_v41 }
0x1c78   : > { %8272 = vrot.lane.b32.xlu1 %v15789_v13, %s13548_s25 }
0x1c87   : > { %8270 = vrot.lane.b32.xlu0 %v15793_v29, %s13548_s25 }
0x1c9c   : > { %8132 = vmax.xlane.f32.xlu1 %v16535_v22 }
0x1ca0   : > { %8128 = vmax.xlane.f32.xlu1 %v16538_v18 }
0x1cde   : > { %v8107_v58 = vpop.xlane.xlu0 %8106 }
0x1cdf   : > { %v8136_v35 = vsub.f32 %v8088_v55, %v8107_v58 }
0x1ce1   : > { %v8154_v45 = vmul.f32 1.442695, %v8136_v35  ;;  %v8105_v30 = vpop.xlane.xlu1 %8104 }
0x1ce2   : > { %v8103_v15 = vpop.xlane.xlu0 %8102  ;;  %v8135_v13 = vsub.f32 %v8087_v37, %v8105_v30 }
0x1ce3   : > { %13104 = vpow2.f32 %v8154_v45  ;;  %v8134_v5 = vsub.f32 %v8086_v61, %v8103_v15 }
0x1ce4   : > { %v8152_v11 = vmul.f32 1.442695, %v8135_v13 }
0x1ce5   : > { %v8150_v32 = vmul.f32 1.442695, %v8134_v5 }
0x1ce6   : > { %v8109_v34 = vpop.xlane.xlu0 %8108 }
0x1ce7   : > { %13106 = vpow2.f32 %v8150_v32  ;;  %v8137_v29 = vsub.f32 %v8089_v4, %v8109_v34 }
0x1ce8   : > { %v8117_v48 = vpop.xlane.xlu1 %8116 }
0x1ce9   : > { %v8156_v10 = vmul.f32 1.442695, %v8137_v29  ;;  %v8141_v1 = vsub.f32 %v8093_v50, %v8117_v48 }
0x1cea   : > { %v8115_v25 = vpop.xlane.xlu0 %8114 }
0x1ceb   : > { %13108 = vpow2.f32 %v8156_v10  ;;  %v8140_v21 = vsub.f32 %v8092_v12, %v8115_v25  ;;  %v8164_v27 = vmul.f32 1.442695, %v8141_v1 }
0x1cec   : > { %v8113_v28 = vpop.xlane.xlu1 %8112  ;;  %13110 = vpow2.f32 %v8152_v11 }
0x1ced   : > { %v16541_v57 = vpop.eup %13104  ;;  %v8162_v55 = vmul.f32 1.442695, %v8140_v21  ;;  %v8139_v37 = vsub.f32 %v16510_v6, %v8113_v28 }
0x1cee   : > { %8186 = vadd.xlane.f32.xlu1 %v16541_v57  ;;  %v8111_v61 = vpop.xlane.xlu0 %8110 }
0x1cef   : > { %13112 = vpow2.f32 %v8162_v55  ;;  %v8138_v4 = vsub.f32 %v8090_v54, %v8111_v61  ;;  %v8160_v12 = vmul.f32 1.442695, %v8139_v37 }
0x1cf0   : > { %13114 = vpow2.f32 %v8164_v27  ;;  %v8125_v30 = vpop.xlane.xlu1 %8124 }
0x1cf1   : > { %v16545_v43 = vpop.eup %13106  ;;  %v8158_v58 = vmul.f32 1.442695, %v8138_v4  ;;  %v8145_v1 = vsub.f32 %v16513_v47, %v8125_v30 }
0x1cf2   : > { %8182 = vadd.xlane.f32.xlu1 %v16545_v43  ;;  %v8123_v50 = vpop.xlane.xlu0 %8122 }
0x1cf3   : > { %13116 = vpow2.f32 %v8158_v58  ;;  %v8172_v28 = vmul.f32 1.442695, %v8145_v1  ;;  %v8144_v55 = vsub.f32 %v16515_v44, %v8123_v50 }
0x1cf4   : > { %13118 = vpow2.f32 %v8160_v12  ;;  %v8121_v13 = vpop.xlane.xlu1 %8120 }
0x1cf5   : > { %v16548_v35 = vpop.eup %13108  ;;  %v8143_v25 = vsub.f32 %v16518_v40, %v8121_v13  ;;  %v8170_v37 = vmul.f32 1.442695, %v8144_v55 }
0x1cf6   : > { %8188 = vadd.xlane.f32.xlu1 %v16548_v35  ;;  %v8119_v45 = vpop.xlane.xlu0 %8118  ;;  %v16551_v15 = vpop.eup %13110 }
0x1cf7   : > { %v8142_v11 = vsub.f32 %v16521_v8, %v8119_v45  ;;  %v8168_v27 = vmul.f32 1.442695, %v8143_v25 }
0x1cf8   : > { %v8273_v10 = vpop.permute.xlu1 %8272 }
0x1cf9   : > { %v16553_v6 = vpop.eup %13112  ;;  %v8166_v21 = vmul.f32 1.442695, %v8142_v11 }
0x1cfa   : > { %8184 = vadd.xlane.f32.xlu1 %v16551_v15  ;;  %8194 = vadd.xlane.f32.xlu0 %v16553_v6  ;;  %v8131_v54 = vpop.xlane.xlu0 %8130  ;;  %v16557_v5 = vpop.eup %13114 }
0x1cfb   : > { %13120 = vpow2.f32 %v8166_v21  ;;  %v8148_v47 = vsub.f32 %v16525_v36, %v8131_v54 }
0x1cfc   : > { %13122 = vpow2.f32 %v8172_v28 }
0x1cfd   : > { %v16559_v32 = vpop.eup %13116  ;;  %13124 = vpow2.f32 %v8168_v27  ;;  %v8178_v50 = vmul.f32 1.442695, %v8148_v47 }
0x1cfe   : > { %8196 = vadd.xlane.f32.xlu0 %v16557_v5  ;;  %8190 = vadd.xlane.f32.xlu1 %v16559_v32  ;;  %v8127_v34 = vpop.xlane.xlu0 %8126  ;;  %v16563_v29 = vpop.eup %13118  ;;  %13126 = vpow2.f32 %v8170_v37 }
0x1d02   : > { %8192 = vadd.xlane.f32.xlu0 %v16563_v29  ;;  %v8271_v48 = vpop.permute.xlu0 %8270 }
0x1d03   : > { %12003 = vmatprep.subr.bf16.mxu1 %v8271_v48 }
0x1d04   : > { %12004 = vmatpush3.bf16.msra.mxu1 %v8271_v48 }
0x1d05   : > { %12005 = vmatprep.subr.bf16.mxu1 %v8273_v10  ;;  %v16578_v12 = vpop.eup %13120 }
0x1d06   : > { %v16581_v45 = vpop.eup %13122 }
0x1d08   : > { %12006 = vmatpush3.bf16.msra.mxu1 %v8273_v10 }
0x1d0f   : > { %8276 = vrot.lane.b32.xlu1 %v15825_v46, %s13548_s25  ;;  %v8146_v46 = vsub.f32 %v16528_v41, %v8127_v34  ;;  %v16583_v41 = vpop.eup %13124 }
0x1d10   : > { %v16587_v36 = vpop.eup %13126 }
0x1d11   : > { %v8174_v40 = vmul.f32 1.442695, %v8146_v46 }
0x1d18   : > { %8274 = vrot.lane.b32.xlu0 %v15829_v24, %s13548_s25 }
0x1d29   : > { %v8133_v61 = vpop.xlane.xlu1 %8132 }
0x1d2a   : > { %v8149_v24 = vsub.f32 %v16535_v22, %v8133_v61 }
0x1d2c   : > { %v8180_v44 = vmul.f32 1.442695, %v8149_v24 }
0x1d2d   : > { %v8129_v4 = vpop.xlane.xlu1 %8128 }
0x1d2e   : > { %v8147_v8 = vsub.f32 %v16538_v18, %v8129_v4 }
0x1d30   : > { %v8176_v58 = vmul.f32 1.442695, %v8147_v8 }
0x1d32   : > { %13128 = vpow2.f32 %v8176_v58 }
0x1d33   : > { %8198 = vadd.xlane.f32.xlu1 %v16578_v12  ;;  %13130 = vpow2.f32 %v8174_v40 }
0x1d34   : > { %13132 = vpow2.f32 %v8180_v44 }
0x1d35   : > { %13134 = vpow2.f32 %v8178_v50 }
0x1d37   : > { %8200 = vadd.xlane.f32.xlu0 %v16583_v41  ;;  %8204 = vadd.xlane.f32.xlu1 %v16581_v45 }
0x1d3b   : > { %8202 = vadd.xlane.f32.xlu0 %v16587_v36 }
0x1d3c   : > { %v16590_v22 = vpop.eup %13128 }
0x1d3d   : > { %8208 = vadd.xlane.f32.xlu1 %v16590_v22  ;;  %v16593_v18 = vpop.eup %13130 }
0x1d3e   : > { %v16596_v30 = vpop.eup %13132 }
0x1d3f   : > { %8206 = vadd.xlane.f32.xlu0 %v16593_v18  ;;  %v16599_v54 = vpop.eup %13134 }
0x1d41   : > { %8212 = vadd.xlane.f32.xlu1 %v16596_v30 }
0x1d43   : > { %8210 = vadd.xlane.f32.xlu0 %v16599_v54 }
0x1d52   : > { %7117 = vrot.lane.b32.xlu1 %v16271_v62, %s13548_s25 }
0x1d56   : > { %7119 = vrot.lane.b32.xlu1 %v16265_v53, %s13548_s25  ;;  %v17374_v53 = vld [vmem:[#allocation25_spill] sm:$0xff] }
0x1d59   : > { %7115 = vrot.lane.b32.xlu0 %v16267_v20, %s13548_s25 }
0x1d5a   : > { %7121 = vrot.lane.b32.xlu1 %v16269_v63, %s13548_s25 }
0x1d5d   : > { %7757 = vrot.lane.b32.xlu0 %v16480_v42, %s13547_s22 }
0x1d5e   : > { %7759 = vrot.lane.b32.xlu1 %v16484_v38, %s13547_s22 }
0x1d61   : > { %7761 = vrot.lane.b32.xlu0 %v16478_v16, %s13547_s22 }
0x1d62   : > { %7763 = vrot.lane.b32.xlu1 %v16482_v52, %s13547_s22 }
0x1d65   : > { %7123 = vrot.lane.b32.xlu0 %v16275_v0, %s13548_s25 }
0x1d66   : > { %7125 = vrot.lane.b32.xlu1 %v16279_v59, %s13548_s25 }
0x1d69   : > { %7127 = vrot.lane.b32.xlu0 %v16273_v14, %s13548_s25 }
0x1d6a   : > { %7129 = vrot.lane.b32.xlu1 %v16277_v51, %s13548_s25 }
0x1d6d   : > { %7765 = vrot.lane.b32.xlu0 %v16488_v39, %s13547_s22 }
0x1d6e   : > { %7767 = vrot.lane.b32.xlu1 %v16492_v3, %s13547_s22 }
0x1d71   : > { %7769 = vrot.lane.b32.xlu0 %v16486_v60, %s13547_s22 }
0x1d72   : > { %7771 = vrot.lane.b32.xlu1 %v16490_v31, %s13547_s22 }
0x1d75   : > { %7131 = vrot.lane.b32.xlu0 %v16283_v26, %s13548_s25 }
0x1d76   : > { %7133 = vrot.lane.b32.xlu1 %v17374_v53, %s13548_s25 }
0x1d7b   : > { %v8187_v20 = vpop.xlane.xlu1 %8186 }
0x1d7f   : > { %v8183_v63 = vpop.xlane.xlu1 %8182 }
0x1d80   : > { %13136 = vrcp.f32 %v8183_v63 }
0x1d83   : > { %v8189_v62 = vpop.xlane.xlu1 %8188 }
0x1d87   : > { %v8185_v14 = vpop.xlane.xlu1 %8184  ;;  %v8195_v0 = vpop.xlane.xlu0 %8194 }
0x1d88   : > { %13138 = vrcp.f32 %v8185_v14 }
0x1d89   : > { %13140 = vrcp.f32 %v8189_v62 }
0x1d8a   : > { %13142 = vrcp.f32 %v8187_v20  ;;  %v13137_v42 = vpop.eup %13136 }
0x1d8b   : > { %v8191_v51 = vpop.xlane.xlu1 %8190  ;;  %v8197_v59 = vpop.xlane.xlu0 %8196  ;;  %v8230_v60 = vmul.f32 %v13137_v42, %v16545_v43 }
0x1d8c   : > { %13144 = vrcp.f32 %v8191_v51 }
0x1d8f   : > { %v8193_v16 = vpop.xlane.xlu0 %8192  ;;  %v8277_v3 = vpop.permute.xlu1 %8276 }
0x1d90   : > { %13146 = vrcp.f32 %v8193_v16 }
0x1d91   : > { %13148 = vrcp.f32 %v8197_v59 }
0x1d92   : > { %v13139_v26 = vpop.eup %13138  ;;  %13150 = vrcp.f32 %v8195_v0 }
0x1d93   : > { %v13141_v52 = vpop.eup %13140  ;;  %v8275_v38 = vpop.permute.xlu0 %8274  ;;  %v8231_v39 = vmul.f32 %v13139_v26, %v16551_v15 }
0x1d94   : > { %12007 = vmatprep.subr.bf16.mxu1 %v8275_v38  ;;  %v13143_v31 = vpop.eup %13142  ;;  %v8233_v34 = vmul.f32 %v13141_v52, %v16548_v35 }
0x1d95   : > { %12008 = vmatpush3.bf16.msra.mxu1 %v8275_v38  ;;  %v8246_v13 = vpack.c.bf16 %v8231_v39, %v8230_v60  ;;  %v8232_v10 = vmul.f32 %v13143_v31, %v16541_v57 }
0x1d96   : > { %12009 = vmatprep.subr.bf16.mxu1 %v8277_v3  ;;  %v13145_v48 = vpop.eup %13144 }
0x1d97   : > { %12011 = vmatprep.mubr.bf16.mxu1 %v8246_v13  ;;  %v8247_v1 = vpack.c.bf16 %v8233_v34, %v8232_v10  ;;  %v8234_v43 = vmul.f32 %v13145_v48, %v16559_v32 }
0x1d99   : > { %12010 = vmatpush3.bf16.msra.mxu1 %v8277_v3 }
0x1d9a   : > { %v13147_v11 = vpop.eup %13146 }
0x1d9b   : > { %v13149_v25 = vpop.eup %13148  ;;  %v8235_v15 = vmul.f32 %v13147_v11, %v16563_v29 }
0x1d9c   : > { %12012 = vmatmul.mubr.bf16.vlgmr.msra.gmra.mrb[224].mxu1 %v8247_v1  ;;  %v13151_v21 = vpop.eup %13150  ;;  %v8237_v55 = vmul.f32 %v13149_v25, %v16557_v5  ;;  %v12376_v1 = vld [vmem:[#allocation11] sm:$0xff]   ;;  %v12377_v25 = vld [vmem:[#allocation11 + $0x8] sm:$0xff]  }
0x1d9d   : > { %v8248_v28 = vpack.c.bf16 %v8235_v15, %v8234_v43  ;;  %v8236_v35 = vmul.f32 %v13151_v21, %v16553_v6  ;;  %12027 = vmatprep.subr.bf16.mxu1 %v12376_v1  ;;  %v12378_v43 = vld [vmem:[#allocation11 + $0x10] sm:$0xff]   ;;  %v12379_v15 = vld [vmem:[#allocation11 + $0x18] sm:$0xff]   ;;  %v12380_v21 = vld [vmem:[#allocation11 + $0x20] sm:$0xff]  }
0x1d9e   : > { %12028 = vmatpush3.bf16.msra.mxu1 %v12376_v1 }
0x1d9f   : > { %12015 = vmatprep.mubr.bf16.mxu1 %v8248_v28  ;;  %v8249_v27 = vpack.c.bf16 %v8237_v55, %v8236_v35  ;;  %12029 = vmatprep.subr.bf16.mxu1 %v12377_v25  ;;  %v12381_v28 = vld [vmem:[#allocation11 + $0x28] sm:$0xff]   ;;  %v12382_v55 = vld [vmem:[#allocation11 + $0x30] sm:$0xff]  }
0x1da2   : > { %12030 = vmatpush3.bf16.msra.mxu1 %v12377_v25 }
0x1da3   : > { %12031 = vmatprep.subr.bf16.mxu1 %v12378_v43 }
0x1da4   : > { %12016 = vmatmul.mubr.bf16.gmra.mrb[228].mxu1 %v8249_v27  ;;  %v12383_v27 = vld [vmem:[#allocation11 + $0x38] sm:$0xff]  }
0x1da6   : > { %12032 = vmatpush3.bf16.msra.mxu1 %v12378_v43 }
0x1da7   : > { %12033 = vmatprep.subr.bf16.mxu1 %v12379_v15 }
0x1daa   : > { %12034 = vmatpush3.bf16.msra.mxu1 %v12379_v15 }
0x1dab   : > { %12035 = vmatprep.subr.bf16.mxu1 %v12380_v21 }
0x1dae   : > { %12036 = vmatpush3.bf16.msra.mxu1 %v12380_v21 }
0x1daf   : > { %12037 = vmatprep.subr.bf16.mxu1 %v12381_v28 }
0x1db2   : > { %12038 = vmatpush3.bf16.msra.mxu1 %v12381_v28 }
0x1db3   : > { %12039 = vmatprep.subr.bf16.mxu1 %v12382_v55 }
0x1db6   : > { %12040 = vmatpush3.bf16.msra.mxu1 %v12382_v55 }
0x1db7   : > { %12041 = vmatprep.subr.bf16.mxu1 %v12383_v27 }
0x1dba   : > { %12042 = vmatpush3.bf16.msra.mxu1 %v12383_v27 }
0x1dc0   : > { %v8199_v61 = vpop.xlane.xlu1 %8198 }
0x1dc1   : > { %13152 = vrcp.f32 %v8199_v61 }
0x1dc4   : > { %v8205_v57 = vpop.xlane.xlu1 %8204  ;;  %v8201_v37 = vpop.xlane.xlu0 %8200 }
0x1dc5   : > { %13154 = vrcp.f32 %v8201_v37 }
0x1dc6   : > { %13156 = vrcp.f32 %v8205_v57 }
0x1dc8   : > { %v8203_v46 = vpop.xlane.xlu0 %8202 }
0x1dc9   : > { %13158 = vrcp.f32 %v8203_v46 }
0x1dca   : > { %v8209_v32 = vpop.xlane.xlu1 %8208 }
0x1dcb   : > { %13160 = vrcp.f32 %v8209_v32  ;;  %v13153_v4 = vpop.eup %13152  ;;  %v17375_v32 = vld [vmem:[#allocation23_spill] sm:$0xff] }
0x1dcc   : > { %v8207_v29 = vpop.xlane.xlu0 %8206  ;;  %v8238_v47 = vmul.f32 %v13153_v4, %v16578_v12 }
0x1dcd   : > { %13162 = vrcp.f32 %v8207_v29 }
0x1dce   : > { %v8213_v24 = vpop.xlane.xlu1 %8212 }
0x1dcf   : > { %13164 = vrcp.f32 %v8213_v24  ;;  %v13155_v5 = vpop.eup %13154  ;;  %v17376_v24 = vld [vmem:[#allocation24_spill] sm:$0xff] }
0x1dd0   : > { %v8211_v8 = vpop.xlane.xlu0 %8210  ;;  %v13157_v6 = vpop.eup %13156  ;;  %v8239_v40 = vmul.f32 %v13155_v5, %v16583_v41 }
0x1dd1   : > { %13166 = vrcp.f32 %v8211_v8  ;;  %v8241_v63 = vmul.f32 %v13157_v6, %v16581_v45  ;;  %v17377_v8 = vld [vmem:[#allocation46_spill] sm:$0xff] }
0x1dd2   : > { %v7118_v58 = vpop.permute.xlu1 %7117  ;;  %v8250_v50 = vpack.c.bf16 %v8239_v40, %v8238_v47 }
0x1dd3   : > { %v13159_v44 = vpop.eup %13158  ;;  %7164 = vst.msk [vmem:[#allocation4 + $0x8] sm:$0xff] %vm2320_vm1, %v7118_v58 }
0x1dd4   : > { %v7116_v53 = vpop.permute.xlu0 %7115  ;;  %v8240_v20 = vmul.f32 %v13159_v44, %v16587_v36  ;;  %12019 = vmatprep.mubr.bf16.mxu1 %v8250_v50  ;;  %v17380_v50 = vld [vmem:[#allocation47_spill] sm:$0xff] }
0x1dd5   : > { %v13161_v62 = vpop.eup %13160  ;;  %7163 = vst.msk [vmem:[#allocation4] sm:$0xff] %vm2320_vm1, %v7116_v53 }
0x1dd6   : > { %v7120_v14 = vpop.permute.xlu1 %7119  ;;  %v8251_v0 = vpack.c.bf16 %v8241_v63, %v8240_v20  ;;  %v8243_v59 = vmul.f32 %v13161_v62, %v16590_v22 }
0x1dd7   : > { %v13163_v51 = vpop.eup %13162  ;;  %7165 = vst.msk [vmem:[#allocation4 + $0x10] sm:$0xff] %vm2320_vm1, %v7120_v14 }
0x1dd8   : > { %12020 = vmatmul.mubr.bf16.gmra.mrb[232].mxu1 %v8251_v0  ;;  %v7758_v12 = vpop.permute.xlu0 %7757  ;;  %v8242_v41 = vmul.f32 %v13163_v51, %v16593_v18 }
0x1dd9   : > { %v13165_v16 = vpop.eup %13164  ;;  %7805 = vst.msk [vmem:[#allocation4] sm:$0xff] %vm2963_vm2, %v7758_v12 }
0x1dda   : > { %v7122_v36 = vpop.permute.xlu1 %7121  ;;  %v8252_v45 = vpack.c.bf16 %v8243_v59, %v8242_v41  ;;  %v8245_v38 = vmul.f32 %v13165_v16, %v16596_v30 }
0x1ddb   : > { %v13167_v42 = vpop.eup %13166  ;;  %7166 = vst.msk [vmem:[#allocation4 + $0x18] sm:$0xff] %vm2320_vm1, %v7122_v36 }
0x1ddc   : > { %12023 = vmatprep.mubr.bf16.mxu1 %v8252_v45  ;;  %v7762_v26 = vpop.permute.xlu0 %7761  ;;  %v8244_v52 = vmul.f32 %v13167_v42, %v16599_v54 }
0x1ddd   : > { %7807 = vst.msk [vmem:[#allocation4 + $0x10] sm:$0xff] %vm2963_vm2, %v7762_v26 }
0x1dde   : > { %v7760_v60 = vpop.permute.xlu1 %7759  ;;  %v8253_v18 = vpack.c.bf16 %v8245_v38, %v8244_v52 }
0x1ddf   : > { %7806 = vst.msk [vmem:[#allocation4 + $0x8] sm:$0xff] %vm2963_vm2, %v7760_v60 }
0x1de0   : > { %12024 = vmatmul.mubr.bf16.gmra.mrb[236].mxu1 %v8253_v18  ;;  %v7124_v22 = vpop.permute.xlu0 %7123 }
0x1de1   : > { %7167 = vst.msk [vmem:[#allocation4 + $0x20] sm:$0xff] %vm2320_vm1, %v7124_v22 }
0x1de2   : > { %v7764_v39 = vpop.permute.xlu1 %7763 }
0x1de3   : > { %7808 = vst.msk [vmem:[#allocation4 + $0x18] sm:$0xff] %vm2963_vm2, %v7764_v39 }
0x1de4   : > { %v7128_v31 = vpop.permute.xlu0 %7127 }
0x1de5   : > { %7169 = vst.msk [vmem:[#allocation4 + $0x30] sm:$0xff] %vm2320_vm1, %v7128_v31 }
0x1de6   : > { %v7126_v3 = vpop.permute.xlu1 %7125 }
0x1de7   : > { %7168 = vst.msk [vmem:[#allocation4 + $0x28] sm:$0xff] %vm2320_vm1, %v7126_v3 }
0x1de8   : > { %v7766_v30 = vpop.permute.xlu0 %7765 }
0x1de9   : > { %7809 = vst.msk [vmem:[#allocation4 + $0x20] sm:$0xff] %vm2963_vm2, %v7766_v30 }
0x1dea   : > { %v7130_v54 = vpop.permute.xlu1 %7129 }
0x1deb   : > { %7170 = vst.msk [vmem:[#allocation4 + $0x38] sm:$0xff] %vm2320_vm1, %v7130_v54 }
0x1dec   : > { %v7770_v13 = vpop.permute.xlu0 %7769 }
0x1ded   : > { %7811 = vst.msk [vmem:[#allocation4 + $0x30] sm:$0xff] %vm2963_vm2, %v7770_v13 }
0x1dee   : > { %v7768_v34 = vpop.permute.xlu1 %7767 }
0x1def   : > { %7810 = vst.msk [vmem:[#allocation4 + $0x28] sm:$0xff] %vm2963_vm2, %v7768_v34 }
0x1df0   : > { %v7132_v48 = vpop.permute.xlu0 %7131 }
0x1df1   : > { %7171 = vst.msk [vmem:[#allocation4 + $0x40] sm:$0xff] %vm2320_vm1, %v7132_v48 }
0x1df2   : > { %v7772_v10 = vpop.permute.xlu1 %7771 }
0x1df3   : > { %7812 = vst.msk [vmem:[#allocation4 + $0x38] sm:$0xff] %vm2963_vm2, %v7772_v10 }
0x1df6   : > { %v7134_v11 = vpop.permute.xlu1 %7133 }
0x1df7   : > { %7172 = vst.msk [vmem:[#allocation4 + $0x48] sm:$0xff] %vm2320_vm1, %v7134_v11 }
0x1e6f   : > { %v12013_v35 = vpop.f32.mrb[224].mxu1 }
0x1e70   : > { %8403 = vrot.lane.b32.xlu0 %v12013_v35, %s13546_s18  ;;  %v8320_v61 = vpop.f32.mrb[225].mxu1 }
0x1e71   : > { %v12014_v57 = vpop.f32.mrb[226].mxu1 }
0x1e72   : > { %8405 = vrot.lane.b32.xlu1 %v12014_v57, %s13546_s18  ;;  %v8323_v37 = vpop.f32.mrb[227].mxu1 }
0x1e74   : > { %8399 = vrot.lane.b32.xlu0 %v8320_v61, %s13546_s18 }
0x1e76   : > { %8401 = vrot.lane.b32.xlu1 %v8323_v37, %s13546_s18 }
0x1e77   : > { %v12017_v46 = vpop.f32.mrb[228].mxu1 }
0x1e78   : > { %7135 = vrot.lane.b32.xlu0 %v17375_v32, %s13548_s25  ;;  %v8336_v29 = vpop.f32.mrb[229].mxu1 }
0x1e79   : > { %v12018_v4 = vpop.f32.mrb[230].mxu1 }
0x1e7a   : > { %7137 = vrot.lane.b32.xlu1 %v17376_v24, %s13548_s25  ;;  %v8339_v5 = vpop.f32.mrb[231].mxu1 }
0x1e7c   : > { %7773 = vrot.lane.b32.xlu0 %v16496_v23, %s13547_s22  ;;  %v17378_v23 = vld [vmem:[#allocation48_spill] sm:$0xff] }
0x1e7e   : > { %7775 = vrot.lane.b32.xlu1 %v16500_v19, %s13547_s22 }
0x1e80   : > { %8411 = vrot.lane.b32.xlu0 %v12017_v46, %s13546_s18 }
0x1e82   : > { %8413 = vrot.lane.b32.xlu1 %v12018_v4, %s13546_s18 }
0x1e84   : > { %8407 = vrot.lane.b32.xlu0 %v8336_v29, %s13546_s18 }
0x1e86   : > { %8409 = vrot.lane.b32.xlu1 %v8339_v5, %s13546_s18 }
0x1e88   : > { %7777 = vrot.lane.b32.xlu0 %v16494_v49, %s13547_s22 }
0x1e8a   : > { %7779 = vrot.lane.b32.xlu1 %v16498_v7, %s13547_s22  ;;  %v17379_v7 = vld [vmem:[#allocation45_spill] sm:$0xff] }
0x1e8c   : > { %7139 = vrot.lane.b32.xlu0 %v17377_v8, %s13548_s25 }
0x1e8e   : > { %7141 = vrot.lane.b32.xlu1 %v17378_v23, %s13548_s25 }
0x1eab   : > { %v12021_v19 = vpop.f32.mrb[232].mxu1 }
0x1eac   : > { %8419 = vrot.lane.b32.xlu0 %v12021_v19, %s13546_s18  ;;  %v8352_v6 = vpop.f32.mrb[233].mxu1 }
0x1ead   : > { %v12022_v47 = vpop.f32.mrb[234].mxu1 }
0x1eae   : > { %8421 = vrot.lane.b32.xlu1 %v12022_v47, %s13546_s18  ;;  %v8355_v40 = vpop.f32.mrb[235].mxu1 }
0x1eb0   : > { %8415 = vrot.lane.b32.xlu0 %v8352_v6, %s13546_s18 }
0x1eb2   : > { %8417 = vrot.lane.b32.xlu1 %v8355_v40, %s13546_s18  ;;  %v13312_v40 = vld [vmem:[%s17256_s4] ss:$0 sm:$0xff] }
0x1eb3   : > { %v12025_v49 = vpop.f32.mrb[236].mxu1 }
0x1eb4   : > { %7143 = vrot.lane.b32.xlu0 %v17379_v7, %s13548_s25  ;;  %v8368_v58 = vpop.f32.mrb[237].mxu1 }
0x1eb5   : > { %v12026_v44 = vpop.f32.mrb[238].mxu1 }
0x1eb6   : > { %7145 = vrot.lane.b32.xlu1 %v17380_v50, %s13548_s25  ;;  %v8371_v53 = vpop.f32.mrb[239].mxu1  ;;  %v17381_v50 = vld [vmem:[#allocation28_spill] sm:$0xff] }
0x1eb8   : > { %7781 = vrot.lane.b32.xlu0 %v16504_v33, %s13547_s22 }
0x1eba   : > { %7783 = vrot.lane.b32.xlu1 %v16508_v2, %s13547_s22 }
0x1ebc   : > { %7785 = vrot.lane.b32.xlu0 %v16502_v9, %s13547_s22 }
0x1ebe   : > { %7787 = vrot.lane.b32.xlu1 %v16506_v17, %s13547_s22 }
0x1ec0   : > { %8423 = vrot.lane.b32.xlu0 %v8368_v58, %s13546_s18 }
0x1ec2   : > { %8425 = vrot.lane.b32.xlu1 %v8371_v53, %s13546_s18 }
0x1ec4   : > { %8427 = vrot.lane.b32.xlu0 %v12025_v49, %s13546_s18 }
0x1ec6   : > { %8429 = vrot.lane.b32.xlu1 %v12026_v44, %s13546_s18  ;;  %s17168_s18 = scalar_lea.vmem [#allocation15], %s10572_s16  ;;  %s10842_s16 = sshll.u32 %s13623_s13, 11 }
0x1ec7   : > { %s10450_s22 = sshll.u32 %s17168_s18, 4  ;;  %s17204_s24 = scalar_lea.hbm %s17261_s9, %s10842_s16  ;;  %s17206_s22 = int_to_ptr.vmem [resolvable:$true] %s10450_s22 }
0x1ec8   : > { %s13456_s13 = scalar_lea.vmem %s17206_s22, 2048  ;;  %p13463_p12 = scmp.lt.s32.totalorder %s17206_s22, %s13461_s21 }
0x1ec9   : > { %p13457_p3 = scmp.ne.s32.totalorder %s17206_s22, %s13456_s13  ;;  %p13464_p2 = scmp.lt.s32.totalorder %s13462_s20, %s13456_s13 }
0x1ecb   : > { %p13458_p5 = pnand %p13457_p3, %p13758_p10  ;;  %p13465_p1 = por %p13464_p2, %p13463_p12 }
0x1ecd   : > { %p13459_p7 = pneg %p13458_p5 }
0x1ecf   : > { %p13466_p13 = pnand %p13465_p1, %p13459_p7 }
0x1ee2   : > { %v8404_v20 = vpop.permute.xlu0 %8403 }
0x1ee3   : > { %8449 = vst.msk [vmem:[#allocation4 + $0x10] sm:$0xff] %vm3606_vm3, %v8404_v20 }
0x1ee4   : > { %v8406_v33 = vpop.permute.xlu1 %8405 }
0x1ee5   : > { %8450 = vst.msk [vmem:[#allocation4 + $0x18] sm:$0xff] %vm3606_vm3, %v8406_v33  ;;  %v17382_v33 = vld [vmem:[#allocation30_spill] sm:$0xff] }
0x1ee6   : > { %v8400_v2 = vpop.permute.xlu0 %8399 }
0x1ee7   : > { %8447 = vst.msk [vmem:[#allocation4] sm:$0xff] %vm3606_vm3, %v8400_v2 }
0x1ee8   : > { %v8402_v9 = vpop.permute.xlu1 %8401 }
0x1ee9   : > { %8448 = vst.msk [vmem:[#allocation4 + $0x8] sm:$0xff] %vm3606_vm3, %v8402_v9  ;;  %v17383_v9 = vld [vmem:[#allocation22_spill] sm:$0xff] }
0x1eea   : > { %v7136_v17 = vpop.permute.xlu0 %7135  ;;  %v8465_v59 = vld [vmem:[#allocation4 + $0x10] sm:$0xff] }
0x1eeb   : > { %7173 = vst.msk [vmem:[#allocation4 + $0x50] sm:$0xff] %vm2320_vm1, %v7136_v17 }
0x1eec   : > { %v7138_v63 = vpop.permute.xlu1 %7137  ;;  %v8466_v14 = vld [vmem:[#allocation4 + $0x18] sm:$0xff] }
0x1eed   : > { %7174 = vst.msk [vmem:[#allocation4 + $0x58] sm:$0xff] %vm2320_vm1, %v7138_v63  ;;  %v8480_v36 = vpack.c.bf16 %v8466_v14, %v8465_v59 }
0x1eee   : > { %v7774_v62 = vpop.permute.xlu0 %7773  ;;  %v8463_v51 = vld [vmem:[#allocation4] sm:$0xff] }
0x1eef   : > { %7813 = vst.msk [vmem:[#allocation4 + $0x40] sm:$0xff] %vm2963_vm2, %v7774_v62  ;;  %v17384_v62 = vld [vmem:[#allocation32_spill] sm:$0xff] }
0x1ef0   : > { %v7776_v0 = vpop.permute.xlu1 %7775  ;;  %v8464_v12 = vld [vmem:[#allocation4 + $0x8] sm:$0xff] }
0x1ef1   : > { %7814 = vst.msk [vmem:[#allocation4 + $0x48] sm:$0xff] %vm2963_vm2, %v7776_v0  ;;  %v8479_v41 = vpack.c.bf16 %v8464_v12, %v8463_v51 }
0x1ef2   : > { %v8412_v16 = vpop.permute.xlu0 %8411 }
0x1ef3   : > { %8453 = vst.msk [vmem:[#allocation4 + $0x30] sm:$0xff] %vm3606_vm3, %v8412_v16  ;;  %12043 = vmatprep.mubr.bf16.mxu1 %v8479_v41 }
0x1ef4   : > { %v8414_v45 = vpop.permute.xlu1 %8413  ;;  %12044 = vmatmul.mubr.bf16.vlgmr.msra.gmra.mrb[240].mxu1 %v8480_v36  ;;  %v17385_v36 = vld [vmem:[#allocation33_spill] sm:$0xff] }
0x1ef5   : > { %8454 = vst.msk [vmem:[#allocation4 + $0x38] sm:$0xff] %vm3606_vm3, %v8414_v45 }
0x1ef6   : > { %v8408_v42 = vpop.permute.xlu0 %8407 }
0x1ef7   : > { %8451 = vst.msk [vmem:[#allocation4 + $0x20] sm:$0xff] %vm3606_vm3, %v8408_v42 }
0x1ef8   : > { %v8410_v26 = vpop.permute.xlu1 %8409 }
0x1ef9   : > { %8452 = vst.msk [vmem:[#allocation4 + $0x28] sm:$0xff] %vm3606_vm3, %v8410_v26 }
0x1efa   : > { %v7778_v52 = vpop.permute.xlu0 %7777  ;;  %v8469_v30 = vld [vmem:[#allocation4 + $0x30] sm:$0xff] }
0x1efb   : > { %7815 = vst.msk [vmem:[#allocation4 + $0x50] sm:$0xff] %vm2963_vm2, %v7778_v52  ;;  %v17386_v52 = vld [vmem:[#allocation34_spill] sm:$0xff] }
0x1efc   : > { %v7780_v38 = vpop.permute.xlu1 %7779  ;;  %v8470_v18 = vld [vmem:[#allocation4 + $0x38] sm:$0xff] }
0x1efd   : > { %7816 = vst.msk [vmem:[#allocation4 + $0x58] sm:$0xff] %vm2963_vm2, %v7780_v38  ;;  %v8482_v54 = vpack.c.bf16 %v8470_v18, %v8469_v30 }
0x1efe   : > { %v7140_v60 = vpop.permute.xlu0 %7139  ;;  %v8467_v39 = vld [vmem:[#allocation4 + $0x20] sm:$0xff] }
0x1eff   : > { %7175 = vst.msk [vmem:[#allocation4 + $0x60] sm:$0xff] %vm2320_vm1, %v7140_v60  ;;  %v17387_v60 = vld [vmem:[#allocation35_spill] sm:$0xff] }
0x1f00   : > { %v7142_v22 = vpop.permute.xlu1 %7141  ;;  %v8468_v31 = vld [vmem:[#allocation4 + $0x28] sm:$0xff] }
0x1f01   : > { %7176 = vst.msk [vmem:[#allocation4 + $0x68] sm:$0xff] %vm2320_vm1, %v7142_v22  ;;  %v8481_v3 = vpack.c.bf16 %v8468_v31, %v8467_v39  ;;  %v17388_v22 = vld [vmem:[#allocation36_spill] sm:$0xff] }
0x1f03   : > { %12047 = vmatprep.mubr.bf16.mxu1 %v8481_v3 }
0x1f04   : > { %12048 = vmatmul.mubr.bf16.gmra.mrb[244].mxu1 %v8482_v54 }
0x1f1e   : > { %v8420_v13 = vpop.permute.xlu0 %8419 }
0x1f1f   : > { %8457 = vst.msk [vmem:[#allocation4 + $0x50] sm:$0xff] %vm3606_vm3, %v8420_v13 }
0x1f20   : > { %v8422_v34 = vpop.permute.xlu1 %8421 }
0x1f21   : > { %8458 = vst.msk [vmem:[#allocation4 + $0x58] sm:$0xff] %vm3606_vm3, %v8422_v34 }
0x1f22   : > { %v8416_v48 = vpop.permute.xlu0 %8415 }
0x1f23   : > { %8455 = vst.msk [vmem:[#allocation4 + $0x40] sm:$0xff] %vm3606_vm3, %v8416_v48  ;;  %v17389_v48 = vld [vmem:[#allocation37_spill] sm:$0xff] }
0x1f24   : > { %v8418_v10 = vpop.permute.xlu1 %8417 }
0x1f25   : > { %8456 = vst.msk [vmem:[#allocation4 + $0x48] sm:$0xff] %vm3606_vm3, %v8418_v10 }
0x1f26   : > { %v7144_v11 = vpop.permute.xlu0 %7143  ;;  %v8473_v35 = vld [vmem:[#allocation4 + $0x50] sm:$0xff] }
0x1f27   : > { %7177 = vst.msk [vmem:[#allocation4 + $0x70] sm:$0xff] %vm2320_vm1, %v7144_v11 }
0x1f28   : > { %v7146_v1 = vpop.permute.xlu1 %7145  ;;  %v8474_v43 = vld [vmem:[#allocation4 + $0x58] sm:$0xff] }
0x1f29   : > { %7178 = vst.msk [vmem:[#allocation4 + $0x78] sm:$0xff] %vm2320_vm1, %v7146_v1  ;;  %v8484_v61 = vpack.c.bf16 %v8474_v43, %v8473_v35 }
0x1f2a   : > { %v7782_v25 = vpop.permute.xlu0 %7781  ;;  %v8471_v21 = vld [vmem:[#allocation4 + $0x40] sm:$0xff] }
0x1f2b   : > { %7817 = vst.msk [vmem:[#allocation4 + $0x60] sm:$0xff] %vm2963_vm2, %v7782_v25  ;;  %v17390_v25 = vld [vmem:[#allocation38_spill] sm:$0xff] }
0x1f2c   : > { %v7784_v15 = vpop.permute.xlu1 %7783  ;;  %v8472_v28 = vld [vmem:[#allocation4 + $0x48] sm:$0xff] }
0x1f2d   : > { %7818 = vst.msk [vmem:[#allocation4 + $0x68] sm:$0xff] %vm2963_vm2, %v7784_v15  ;;  %v8483_v55 = vpack.c.bf16 %v8472_v28, %v8471_v21  ;;  %v17391_v15 = vld [vmem:[#allocation39_spill] sm:$0xff]  ;;  %v17392_v28 = vld [vmem:[#allocation40_spill] sm:$0xff] }
0x1f2e   : > { %v7786_v27 = vpop.permute.xlu0 %7785 }
0x1f2f   : > { %7819 = vst.msk [vmem:[#allocation4 + $0x70] sm:$0xff] %vm2963_vm2, %v7786_v27  ;;  %12051 = vmatprep.mubr.bf16.mxu1 %v8483_v55 }
0x1f30   : > { %v7788_v57 = vpop.permute.xlu1 %7787  ;;  %12052 = vmatmul.mubr.bf16.gmra.mrb[248].mxu1 %v8484_v61 }
0x1f31   : > { %7820 = vst.msk [vmem:[#allocation4 + $0x78] sm:$0xff] %vm2963_vm2, %v7788_v57 }
0x1f32   : > { %v8424_v37 = vpop.permute.xlu0 %8423 }
0x1f33   : > { %8459 = vst.msk [vmem:[#allocation4 + $0x60] sm:$0xff] %vm3606_vm3, %v8424_v37 }
0x1f34   : > { %v8426_v46 = vpop.permute.xlu1 %8425 }
0x1f35   : > { %8460 = vst.msk [vmem:[#allocation4 + $0x68] sm:$0xff] %vm3606_vm3, %v8426_v46 }
0x1f36   : > { %v8428_v32 = vpop.permute.xlu0 %8427 }
0x1f37   : > { %8461 = vst.msk [vmem:[#allocation4 + $0x70] sm:$0xff] %vm3606_vm3, %v8428_v32  ;;  %v17393_v32 = vld [vmem:[#allocation41_spill] sm:$0xff] }
0x1f38   : > { %v8430_v29 = vpop.permute.xlu1 %8429 }
0x1f39   : > { %8462 = vst.msk [vmem:[#allocation4 + $0x78] sm:$0xff] %vm3606_vm3, %v8430_v29 }
0x1f3a   : > { %v8475_v4 = vld [vmem:[#allocation4 + $0x60] sm:$0xff] }
0x1f3c   : > { %v8476_v24 = vld [vmem:[#allocation4 + $0x68] sm:$0xff] }
0x1f3d   : > { %v8485_v5 = vpack.c.bf16 %v8476_v24, %v8475_v4 }
0x1f3e   : > { %v8477_v8 = vld [vmem:[#allocation4 + $0x70] sm:$0xff] }
0x1f3f   : > { %12055 = vmatprep.mubr.bf16.mxu1 %v8485_v5  ;;  %v17394_v5 = vld [vmem:[#allocation42_spill] sm:$0xff] }
0x1f40   : > { %v8478_v23 = vld [vmem:[#allocation4 + $0x78] sm:$0xff] }
0x1f41   : > { %v8486_v19 = vpack.c.bf16 %v8478_v23, %v8477_v8  ;;  %v17395_v23 = vld [vmem:[#allocation43_spill] sm:$0xff] }
0x1f43   : > { %12056 = vmatmul.mubr.bf16.gmra.mrb[252].mxu1 %v8486_v19 }
0x1f44   : > { %9329 = vmatprep.mubr.bf16.mxu1 %v17333_v56 }
0x1fc7   : > { %v12045_v6 = vpop.f32.mrb[240].mxu1 }
0x1fc8   : > { %v8585_v47 = vpop.f32.mrb[241].mxu1  ;;  %v8594_v44 = vadd.f32 %v13312_v40, %v12045_v6  ;;  %v17396_v6 = vld [vmem:[#allocation44_spill] sm:$0xff] }
0x1fc9   : > { %v8586_v49 = vadd.f32 %v13312_v40, %v8585_v47  ;;  %v12046_v7 = vpop.f32.mrb[242].mxu1 }
0x1fca   : > { %v8588_v58 = vpop.f32.mrb[243].mxu1  ;;  %v16758_v17 = vadd.f32 %v8594_v44, %v17383_v9  ;;  %v8597_v63 = vadd.f32 %v13312_v40, %v12046_v7 }
0x1fcb   : > { %v16751_v53 = vadd.f32 %v8586_v49, %v17381_v50  ;;  %v8589_v20 = vadd.f32 %v13312_v40, %v8588_v58 }
0x1fcc   : > { %v16763_v14 = vadd.f32 %v8597_v63, %v17384_v62 }
0x1fcd   : > { %v16754_v2 = vadd.f32 %v8589_v20, %v17382_v33  ;;  %8696 = vadd.xlane.f32.xlu0 %v16751_v53 }
0x1fcf   : > { %8698 = vadd.xlane.f32.xlu1 %v16754_v2 }
0x1fd1   : > { %8700 = vadd.xlane.f32.xlu0 %v16758_v17 }
0x1fd5   : > { %8702 = vadd.xlane.f32.xlu0 %v16763_v14 }
0x1fd7   : > { %v12049_v0 = vpop.f32.mrb[244].mxu1 }
0x1fd8   : > { %v8601_v51 = vpop.f32.mrb[245].mxu1  ;;  %v8610_v16 = vadd.f32 %v13312_v40, %v12049_v0 }
0x1fd9   : > { %v8602_v12 = vadd.f32 %v13312_v40, %v8601_v51  ;;  %v12050_v41 = vpop.f32.mrb[246].mxu1 }
0x1fda   : > { %v8604_v59 = vpop.f32.mrb[247].mxu1  ;;  %v8613_v26 = vadd.f32 %v13312_v40, %v12050_v41  ;;  %v16774_v18 = vadd.f32 %v8610_v16, %v17387_v60 }
0x1fdb   : > { %v16767_v45 = vadd.f32 %v8602_v12, %v17385_v36  ;;  %v8605_v42 = vadd.f32 %v13312_v40, %v8604_v59 }
0x1fdc   : > { %v16778_v39 = vadd.f32 %v8613_v26, %v17388_v22 }
0x1fdd   : > { %v16770_v38 = vadd.f32 %v8605_v42, %v17386_v52  ;;  %8704 = vadd.xlane.f32.xlu0 %v16767_v45 }
0x1fdf   : > { %8706 = vadd.xlane.f32.xlu1 %v16770_v38 }
0x1fe1   : > { %8708 = vadd.xlane.f32.xlu0 %v16774_v18 }
0x1fe3   : > { %8710 = vadd.xlane.f32.xlu1 %v16778_v39 }
0x2003   : > { %v12053_v31 = vpop.f32.mrb[248].mxu1 }
0x2004   : > { %v8617_v3 = vpop.f32.mrb[249].mxu1  ;;  %v8626_v34 = vadd.f32 %v13312_v40, %v12053_v31 }
0x2005   : > { %v8618_v30 = vadd.f32 %v13312_v40, %v8617_v3  ;;  %v12054_v54 = vpop.f32.mrb[250].mxu1 }
0x2006   : > { %v8620_v13 = vpop.f32.mrb[251].mxu1  ;;  %v8629_v1 = vadd.f32 %v13312_v40, %v12054_v54  ;;  %v16790_v21 = vadd.f32 %v8626_v34, %v17391_v15 }
0x2007   : > { %v16783_v10 = vadd.f32 %v8618_v30, %v17389_v48  ;;  %v8621_v11 = vadd.f32 %v13312_v40, %v8620_v13 }
0x2008   : > { %v16794_v55 = vadd.f32 %v8629_v1, %v17392_v28  ;;  %v12386_v1 = vld [vmem:[#allocation12 + $0x4] ss:$16 sps:$4 sm:$0xff]   ;;  %v12384_v28 = vld [vmem:[#allocation12] ss:$16 sps:$4 sm:$0xff]  }
0x2009   : > { %v16786_v43 = vadd.f32 %v8621_v11, %v17390_v25  ;;  %8712 = vadd.xlane.f32.xlu0 %v16783_v10  ;;  %v12389_v25 = vld [vmem:[#allocation12 + $0xc] ss:$16 sps:$4 sm:$0xff]   ;;  %9184 = vmatprep.subr.bf16.mxu0 %v12386_v1 }
0x200a   : > { %9297 = vmatprep.subr.bf16.mxu1 %v12389_v25  ;;  %9185 = vmatpush1.bf16.msra.mxu0 %v12384_v28 }
0x200b   : > { %8714 = vadd.xlane.f32.xlu1 %v16786_v43 }
0x200d   : > { %8716 = vadd.xlane.f32.xlu0 %v16790_v21 }
0x200f   : > { %8718 = vadd.xlane.f32.xlu1 %v16794_v55 }
0x2016   : > { %v12057_v35 = vpop.f32.mrb[252].mxu1 }
0x2017   : > { %v8633_v27 = vpop.f32.mrb[253].mxu1  ;;  %v8642_v46 = vadd.f32 %v13312_v40, %v12057_v35  ;;  %v12387_v35 = vld [vmem:[#allocation12 + $0x8] ss:$16 sps:$4 sm:$0xff]  }
0x2018   : > { %v8634_v61 = vadd.f32 %v13312_v40, %v8633_v27  ;;  %v12058_v57 = vpop.f32.mrb[254].mxu1  ;;  %9298 = vmatpush1.bf16.msra.mxu1 %v12387_v35  ;;  %v12392_v27 = vld [vmem:[#allocation12 + $0x24] ss:$16 sps:$4 sm:$0xff]  }
0x2019   : > { %v8636_v37 = vpop.f32.mrb[255].mxu1  ;;  %v8645_v24 = vadd.f32 %v13312_v40, %v12058_v57  ;;  %v16806_v19 = vadd.f32 %v8642_v46, %v17395_v23  ;;  %v12390_v57 = vld [vmem:[#allocation12 + $0x20] ss:$16 sps:$4 sm:$0xff]   ;;  %9186 = vmatprep.subr.bf16.mxu0 %v12392_v27  ;;  %v12398_v46 = vld [vmem:[#allocation12 + $0x44] ss:$16 sps:$4 sm:$0xff]  }
0x201a   : > { %v16799_v29 = vadd.f32 %v8634_v61, %v17393_v32  ;;  %v8637_v4 = vadd.f32 %v13312_v40, %v8636_v37  ;;  %v12395_v61 = vld [vmem:[#allocation12 + $0x2c] ss:$16 sps:$4 sm:$0xff]   ;;  %v12393_v37 = vld [vmem:[#allocation12 + $0x28] ss:$16 sps:$4 sm:$0xff]   ;;  %9187 = vmatpush1.bf16.msra.mxu0 %v12390_v57 }
0x201b   : > { %v16810_v47 = vadd.f32 %v8645_v24, %v17396_v6  ;;  %9299 = vmatprep.subr.bf16.mxu1 %v12395_v61  ;;  %v12401_v32 = vld [vmem:[#allocation12 + $0x4c] ss:$16 sps:$4 sm:$0xff]   ;;  %v12399_v24 = vld [vmem:[#allocation12 + $0x48] ss:$16 sps:$4 sm:$0xff]   ;;  %9188 = vmatprep.subr.bf16.mxu0 %v12398_v46  ;;  %v12402_v6 = vld [vmem:[#allocation12 + $0x60] ss:$16 sps:$4 sm:$0xff]  }
0x201c   : > { %v16802_v8 = vadd.f32 %v8637_v4, %v17394_v5  ;;  %8720 = vadd.xlane.f32.xlu0 %v16799_v29  ;;  %9300 = vmatpush1.bf16.msra.mxu1 %v12393_v37  ;;  %v12396_v4 = vld [vmem:[#allocation12 + $0x40] ss:$16 sps:$4 sm:$0xff]   ;;  %v12404_v5 = vld [vmem:[#allocation12 + $0x64] ss:$16 sps:$4 sm:$0xff]   ;;  %v12407_v23 = vld [vmem:[#allocation12 + $0x6c] ss:$16 sps:$4 sm:$0xff]  }
0x201d   : > { %9301 = vmatprep.subr.bf16.mxu1 %v12401_v32 }
0x201e   : > { %8722 = vadd.xlane.f32.xlu1 %v16802_v8  ;;  %9189 = vmatpush1.bf16.msra.mxu0 %v12396_v4 }
0x201f   : > { %9190 = vmatprep.subr.bf16.mxu0 %v12404_v5 }
0x2020   : > { %8724 = vadd.xlane.f32.xlu0 %v16806_v19  ;;  %9302 = vmatpush1.bf16.msra.mxu1 %v12399_v24 }
0x2021   : > { %9303 = vmatprep.subr.bf16.mxu1 %v12407_v23 }
0x2022   : > { %8726 = vadd.xlane.f32.xlu1 %v16810_v47  ;;  %9191 = vmatpush1.bf16.msra.mxu0 %v12402_v6 }
0x205a   : > { %v8697_v49 = vpop.xlane.xlu0 %8696 }
0x205b   : > { %v8728_v7 = vmul.f32 0.0078125, %v8697_v49  ;;  %v12405_v49 = vld [vmem:[#allocation12 + $0x68] ss:$16 sps:$4 sm:$0xff]  }
0x205c   : > { %v8699_v40 = vpop.xlane.xlu1 %8698  ;;  %9304 = vmatpush1.bf16.msra.mxu1 %v12405_v49 }
0x205d   : > { %v16815_v58 = vsub.f32 %v16751_v53, %v8728_v7  ;;  %v8729_v44 = vmul.f32 0.0078125, %v8699_v40  ;;  %v12410_v7 = vld [vmem:[#allocation12 + $0x84] ss:$16 sps:$4 sm:$0xff]   ;;  %v12413_v40 = vld [vmem:[#allocation12 + $0x8c] ss:$16 sps:$4 sm:$0xff]  }
0x205e   : > { %v8701_v50 = vpop.xlane.xlu0 %8700  ;;  %9192 = vmatprep.subr.bf16.mxu0 %v12410_v7  ;;  %9305 = vmatprep.subr.bf16.mxu1 %v12413_v40 }
0x205f   : > { %v16818_v20 = vsub.f32 %v16754_v2, %v8729_v44  ;;  %v8730_v33 = vmul.f32 0.0078125, %v8701_v50  ;;  %v8760_v9 = vmul.f32 %v16815_v58, %v16815_v58  ;;  %v12408_v44 = vld [vmem:[#allocation12 + $0x80] ss:$16 sps:$4 sm:$0xff]   ;;  %v12411_v50 = vld [vmem:[#allocation12 + $0x88] ss:$16 sps:$4 sm:$0xff]  }
0x2060   : > { %9193 = vmatpush1.bf16.msra.mxu0 %v12408_v44  ;;  %9306 = vmatpush1.bf16.msra.mxu1 %v12411_v50 }
0x2061   : > { %v16823_v63 = vsub.f32 %v16758_v17, %v8730_v33  ;;  %8776 = vadd.xlane.f32.xlu0 %v8760_v9  ;;  %v8761_v62 = vmul.f32 %v16818_v20, %v16818_v20  ;;  %v12416_v33 = vld [vmem:[#allocation12 + $0xa4] ss:$16 sps:$4 sm:$0xff]   ;;  %v12419_v9 = vld [vmem:[#allocation12 + $0xac] ss:$16 sps:$4 sm:$0xff]  }
0x2062   : > { %v8703_v0 = vpop.xlane.xlu0 %8702  ;;  %9194 = vmatprep.subr.bf16.mxu0 %v12416_v33  ;;  %9307 = vmatprep.subr.bf16.mxu1 %v12419_v9 }
0x2063   : > { %v8731_v51 = vmul.f32 0.0078125, %v8703_v0  ;;  %8778 = vadd.xlane.f32.xlu1 %v8761_v62  ;;  %v8762_v12 = vmul.f32 %v16823_v63, %v16823_v63  ;;  %v12414_v62 = vld [vmem:[#allocation12 + $0xa0] ss:$16 sps:$4 sm:$0xff]   ;;  %v12417_v0 = vld [vmem:[#allocation12 + $0xa8] ss:$16 sps:$4 sm:$0xff]  }
0x2064   : > { %9195 = vmatpush1.bf16.msra.mxu0 %v12414_v62  ;;  %9308 = vmatpush1.bf16.msra.mxu1 %v12417_v0 }
0x2065   : > { %v16830_v41 = vsub.f32 %v16763_v14, %v8731_v51  ;;  %8780 = vadd.xlane.f32.xlu0 %v8762_v12  ;;  %v12422_v51 = vld [vmem:[#allocation12 + $0xc4] ss:$16 sps:$4 sm:$0xff]   ;;  %v12425_v12 = vld [vmem:[#allocation12 + $0xcc] ss:$16 sps:$4 sm:$0xff]  }
0x2066   : > { %9196 = vmatprep.subr.bf16.mxu0 %v12422_v51  ;;  %9309 = vmatprep.subr.bf16.mxu1 %v12425_v12  ;;  %v12432_v12 = vld [vmem:[#allocation14 + $0x40] sm:$0xff]  }
0x2067   : > { %v8763_v59 = vmul.f32 %v16830_v41, %v16830_v41 }
0x2069   : > { %8782 = vadd.xlane.f32.xlu1 %v8763_v59  ;;  %v12420_v59 = vld [vmem:[#allocation12 + $0xc0] ss:$16 sps:$4 sm:$0xff]  }
0x206a   : > { %v8705_v16 = vpop.xlane.xlu0 %8704  ;;  %9197 = vmatpush1.bf16.msra.mxu0 %v12420_v59  ;;  %v12434_v59 = vld [vmem:[#allocation14 + $0xc0] sm:$0xff]  }
0x206b   : > { %v8732_v36 = vmul.f32 0.0078125, %v8705_v16  ;;  %v12423_v16 = vld [vmem:[#allocation12 + $0xc8] ss:$16 sps:$4 sm:$0xff]  }
0x206c   : > { %v8707_v42 = vpop.xlane.xlu1 %8706  ;;  %9310 = vmatpush1.bf16.msra.mxu1 %v12423_v16 }
0x206d   : > { %v16835_v26 = vsub.f32 %v16767_v45, %v8732_v36  ;;  %v8733_v52 = vmul.f32 0.0078125, %v8707_v42  ;;  %v12428_v36 = vld [vmem:[#allocation12 + $0xe4] ss:$16 sps:$4 sm:$0xff]   ;;  %v12431_v42 = vld [vmem:[#allocation12 + $0xec] ss:$16 sps:$4 sm:$0xff]  }
0x206e   : > { %v8709_v60 = vpop.xlane.xlu0 %8708  ;;  %9198 = vmatprep.subr.bf16.mxu0 %v12428_v36  ;;  %9311 = vmatprep.subr.bf16.mxu1 %v12431_v42 }
0x206f   : > { %v16838_v22 = vsub.f32 %v16770_v38, %v8733_v52  ;;  %v8734_v31 = vmul.f32 0.0078125, %v8709_v60  ;;  %v8764_v3 = vmul.f32 %v16835_v26, %v16835_v26  ;;  %v12426_v52 = vld [vmem:[#allocation12 + $0xe0] ss:$16 sps:$4 sm:$0xff]   ;;  %v12429_v60 = vld [vmem:[#allocation12 + $0xe8] ss:$16 sps:$4 sm:$0xff]  }
0x2070   : > { %v8711_v30 = vpop.xlane.xlu1 %8710  ;;  %9199 = vmatpush1.bf16.msra.mxu0 %v12426_v52  ;;  %9312 = vmatpush1.bf16.msra.mxu1 %v12429_v60 }
0x2071   : > { %v16843_v54 = vsub.f32 %v16774_v18, %v8734_v31  ;;  %v8735_v13 = vmul.f32 0.0078125, %v8711_v30  ;;  %8784 = vadd.xlane.f32.xlu0 %v8764_v3  ;;  %v8765_v34 = vmul.f32 %v16838_v22, %v16838_v22  ;;  %11291 = vmatprep.subr.bf16.mxu0 %v12432_v12 }
0x2072   : > { %11355 = vmatprep.subr.bf16.mxu1 %v12434_v59 }
0x2073   : > { %v16848_v48 = vsub.f32 %v16778_v39, %v8735_v13  ;;  %8786 = vadd.xlane.f32.xlu1 %v8765_v34  ;;  %v8766_v11 = vmul.f32 %v16843_v54, %v16843_v54 }
0x2075   : > { %8788 = vadd.xlane.f32.xlu0 %v8766_v11  ;;  %v8767_v15 = vmul.f32 %v16848_v48, %v16848_v48 }
0x2077   : > { %8790 = vadd.xlane.f32.xlu1 %v8767_v15 }
0x2096   : > { %v8713_v31 = vpop.xlane.xlu0 %8712 }
0x2097   : > { %v8736_v3 = vmul.f32 0.0078125, %v8713_v31 }
0x2098   : > { %v8715_v30 = vpop.xlane.xlu1 %8714 }
0x2099   : > { %v16855_v13 = vsub.f32 %v16783_v10, %v8736_v3  ;;  %v8737_v34 = vmul.f32 0.0078125, %v8715_v30 }
0x209a   : > { %v8717_v11 = vpop.xlane.xlu0 %8716 }
0x209b   : > { %v16858_v1 = vsub.f32 %v16786_v43, %v8737_v34  ;;  %v8738_v25 = vmul.f32 0.0078125, %v8717_v11  ;;  %v8768_v15 = vmul.f32 %v16855_v13, %v16855_v13 }
0x209c   : > { %v8719_v28 = vpop.xlane.xlu1 %8718 }
0x209d   : > { %v16863_v35 = vsub.f32 %v16790_v21, %v8738_v25  ;;  %v8739_v27 = vmul.f32 0.0078125, %v8719_v28  ;;  %8792 = vadd.xlane.f32.xlu0 %v8768_v15  ;;  %v8769_v61 = vmul.f32 %v16858_v1, %v16858_v1 }
0x209f   : > { %v16868_v57 = vsub.f32 %v16794_v55, %v8739_v27  ;;  %8794 = vadd.xlane.f32.xlu1 %v8769_v61  ;;  %v8770_v37 = vmul.f32 %v16863_v35, %v16863_v35 }
0x20a1   : > { %8796 = vadd.xlane.f32.xlu0 %v8770_v37  ;;  %v8771_v46 = vmul.f32 %v16868_v57, %v16868_v57 }
0x20a3   : > { %8798 = vadd.xlane.f32.xlu1 %v8771_v46 }
0x20a9   : > { %v8721_v32 = vpop.xlane.xlu0 %8720 }
0x20aa   : > { %v8740_v4 = vmul.f32 0.0078125, %v8721_v32 }
0x20ab   : > { %v8723_v24 = vpop.xlane.xlu1 %8722 }
0x20ac   : > { %v16875_v5 = vsub.f32 %v16799_v29, %v8740_v4  ;;  %v8741_v23 = vmul.f32 0.0078125, %v8723_v24 }
0x20ad   : > { %v8725_v6 = vpop.xlane.xlu0 %8724 }
0x20ae   : > { %v16878_v49 = vsub.f32 %v16802_v8, %v8741_v23  ;;  %v8742_v7 = vmul.f32 0.0078125, %v8725_v6  ;;  %v8772_v40 = vmul.f32 %v16875_v5, %v16875_v5 }
0x20af   : > { %v8727_v44 = vpop.xlane.xlu1 %8726 }
0x20b0   : > { %v16883_v50 = vsub.f32 %v16806_v19, %v8742_v7  ;;  %v8743_v33 = vmul.f32 0.0078125, %v8727_v44  ;;  %8800 = vadd.xlane.f32.xlu0 %v8772_v40  ;;  %v8773_v9 = vmul.f32 %v16878_v49, %v16878_v49 }
0x20b2   : > { %v16888_v62 = vsub.f32 %v16810_v47, %v8743_v33  ;;  %8802 = vadd.xlane.f32.xlu1 %v8773_v9  ;;  %v8774_v0 = vmul.f32 %v16883_v50, %v16883_v50 }
0x20b4   : > { %8804 = vadd.xlane.f32.xlu0 %v8774_v0  ;;  %v8775_v51 = vmul.f32 %v16888_v62, %v16888_v62 }
0x20b6   : > { %8806 = vadd.xlane.f32.xlu1 %v8775_v51 }
0x20ee   : > { %v8777_v16 = vpop.xlane.xlu0 %8776 }
0x20ef   : > { %v8808_v36 = vmul.f32 0.007874016, %v8777_v16 }
0x20f0   : > { %v8779_v42 = vpop.xlane.xlu1 %8778 }
0x20f1   : > { %13168 = vrsqrt.f32 %v8808_v36  ;;  %v8809_v52 = vmul.f32 0.007874016, %v8779_v42  ;;  %vm8826_vm0 = vcmp.eq.f32.partialorder %v8808_v36, inf  ;;  %v8829_v25 = vand.u32 2147483648, %v8808_v36 }
0x20f2   : > { %v8781_v60 = vpop.xlane.xlu0 %8780  ;;  %vm8828_vm1 = vcmp.eq.f32.partialorder %v8808_v36, 0.0 }
0x20f3   : > { %v8810_v31 = vmul.f32 0.007874016, %v8781_v60  ;;  %13170 = vrsqrt.f32 %v8809_v52  ;;  %vm8833_vm2 = vcmp.eq.f32.partialorder %v8809_v52, inf  ;;  %v8836_v24 = vand.u32 2147483648, %v8809_v52 }
0x20f4   : > { %vm8835_vm3 = vcmp.eq.f32.partialorder %v8809_v52, 0.0 }
0x20f5   : > { %13172 = vrsqrt.f32 %v8810_v31  ;;  %vm8840_vm9 = vcmp.eq.f32.partialorder %v8810_v31, inf  ;;  %v8843_v33 = vand.u32 2147483648, %v8810_v31  ;;  %vm8842_vm8 = vcmp.eq.f32.partialorder %v8810_v31, 0.0 }
0x20f6   : > { %v8783_v3 = vpop.xlane.xlu1 %8782 }
0x20f7   : > { %v8811_v30 = vmul.f32 0.007874016, %v8783_v3 }
0x20f9   : > { %13174 = vrsqrt.f32 %v8811_v30  ;;  %vm8847_vm10 = vcmp.eq.f32.partialorder %v8811_v30, inf  ;;  %v8850_v60 = vand.u32 2147483648, %v8811_v30  ;;  %vm8849_vm11 = vcmp.eq.f32.partialorder %v8811_v30, 0.0 }
0x20fb   : > { %v13169_v34 = vpop.eup %13168 }
0x20fc   : > { %v8825_v11 = vmul.f32 %v13169_v34, %v8808_v36 }
0x20fd   : > { %v13171_v15 = vpop.eup %13170 }
0x20fe   : > { %v8827_v28 = vsel %vm8826_vm0, %v8808_v36, %v8825_v11  ;;  %v8785_v27 = vpop.xlane.xlu0 %8784  ;;  %v8832_v46 = vmul.f32 %v13171_v15, %v8809_v52 }
0x20ff   : > { %v13173_v61 = vpop.eup %13172  ;;  %v8830_v37 = vsel %vm8828_vm1, %v8829_v25, %v8827_v28  ;;  %v8812_v32 = vmul.f32 0.007874016, %v8785_v27 }
0x2100   : > { %v8936_v4 = vadd.f32 1e-06, %v8830_v37  ;;  %v8839_v23 = vmul.f32 %v13173_v61, %v8810_v31  ;;  %v8787_v6 = vpop.xlane.xlu1 %8786  ;;  %v8834_v7 = vsel %vm8833_vm2, %v8809_v52, %v8832_v46 }
0x2101   : > { %13176 = vrsqrt.f32 %v8812_v32  ;;  %v8837_v40 = vsel %vm8835_vm3, %v8836_v24, %v8834_v7  ;;  %v8813_v12 = vmul.f32 0.007874016, %v8787_v6  ;;  %vm8854_vm12 = vcmp.eq.f32.partialorder %v8812_v32, inf }
0x2102   : > { %v8841_v44 = vsel %vm8840_vm9, %v8810_v31, %v8839_v23  ;;  %v8789_v9 = vpop.xlane.xlu0 %8788  ;;  %13178 = vrcp.f32 %v8936_v4  ;;  %v8937_v51 = vadd.f32 1e-06, %v8837_v40  ;;  %v8857_v27 = vand.u32 2147483648, %v8812_v32 }
0x2103   : > { %v13175_v0 = vpop.eup %13174  ;;  %v8844_v59 = vsel %vm8842_vm8, %v8843_v33, %v8841_v44  ;;  %v16894_v36 = vmul.f32 0.007874016, %v8789_v9  ;;  %vm8856_vm13 = vcmp.eq.f32.partialorder %v8812_v32, 0.0  ;;  %vm8861_vm14 = vcmp.eq.f32.partialorder %v8813_v12, inf  ;;  %v12433_v44 = vld [vmem:[#allocation14] sm:$0xff]  }
0x2104   : > { %v8846_v16 = vmul.f32 %v13175_v0, %v8811_v30  ;;  %v8791_v42 = vpop.xlane.xlu1 %8790  ;;  %13180 = vrcp.f32 %v8937_v51  ;;  %v8938_v3 = vadd.f32 1e-06, %v8844_v59  ;;  %vm8863_vm15 = vcmp.eq.f32.partialorder %v8813_v12, 0.0  ;;  %v12435_v33 = vld [vmem:[#allocation14 + $0x80] sm:$0xff]  }
0x2105   : > { %13182 = vrsqrt.f32 %v8813_v12  ;;  %v8815_v11 = vmul.f32 0.007874016, %v8791_v42  ;;  %v8864_v0 = vand.u32 2147483648, %v8813_v12  ;;  %vm8868_vm4 = vcmp.eq.f32.partialorder %v16894_v36, inf }
0x2106   : > { %v8848_v52 = vsel %vm8847_vm10, %v8811_v30, %v8846_v16  ;;  %13184 = vrsqrt.f32 %v16894_v36  ;;  %vm8870_vm6 = vcmp.eq.f32.partialorder %v16894_v36, 0.0  ;;  %v8871_v16 = vand.u32 2147483648, %v16894_v36 }
0x2107   : > { %v8851_v34 = vsel %vm8849_vm11, %v8850_v60, %v8848_v52  ;;  %13186 = vrsqrt.f32 %v8815_v11  ;;  %vm8875_vm7 = vcmp.eq.f32.partialorder %v8815_v11, inf  ;;  %vm8877_vm5 = vcmp.eq.f32.partialorder %v8815_v11, 0.0 }
0x2108   : > { %v8939_v25 = vadd.f32 1e-06, %v8851_v34  ;;  %v8878_v34 = vand.u32 2147483648, %v8815_v11 }
0x210a   : > { %13188 = vrcp.f32 %v8939_v25 }
0x210b   : > { %v13177_v31 = vpop.eup %13176  ;;  %13190 = vrcp.f32 %v8938_v3 }
0x210c   : > { %v8853_v15 = vmul.f32 %v13177_v31, %v8812_v32  ;;  %v13179_v28 = vpop.eup %13178 }
0x210d   : > { %v8968_v30 = vmul.f32 %v13179_v28, %v16815_v58  ;;  %v12436_v58 = vld [vmem:[#allocation14 + $0x48] sm:$0xff]  }
0x210e   : > { %v8855_v61 = vsel %vm8854_vm12, %v8812_v32, %v8853_v15  ;;  %v13181_v37 = vpop.eup %13180  ;;  %v12437_v32 = vld [vmem:[#allocation14 + $0xc8] sm:$0xff]  }
0x210f   : > { %v8858_v46 = vsel %vm8856_vm13, %v8857_v27, %v8855_v61  ;;  %v8969_v4 = vmul.f32 %v13181_v37, %v16818_v20  ;;  %v13183_v24 = vpop.eup %13182  ;;  %v12438_v28 = vld [vmem:[#allocation14 + $0x8] sm:$0xff]   ;;  %v12440_v37 = vld [vmem:[#allocation14 + $0x50] sm:$0xff]  }
0x2110   : > { %v13185_v23 = vpop.eup %13184  ;;  %v8940_v7 = vadd.f32 1e-06, %v8858_v46  ;;  %v8860_v40 = vmul.f32 %v13183_v24, %v8813_v12  ;;  %v12439_v27 = vld [vmem:[#allocation14 + $0x88] sm:$0xff]   ;;  %v12441_v46 = vld [vmem:[#allocation14 + $0xd0] sm:$0xff]  }
0x2111   : > { %v8984_v6 = vpack.c.bf16 %v8969_v4, %v8968_v30  ;;  %v13187_v9 = vpop.eup %13186  ;;  %v8867_v51 = vmul.f32 %v13185_v23, %v16894_v36  ;;  %v12443_v23 = vld [vmem:[#allocation14 + $0x90] sm:$0xff]  }
0x2112   : > { %v8862_v59 = vsel %vm8861_vm14, %v8813_v12, %v8860_v40  ;;  %v8874_v42 = vmul.f32 %v13187_v9, %v8815_v11  ;;  %13192 = vrcp.f32 %v8940_v7  ;;  %v12447_v7 = vld [vmem:[#allocation14 + $0x98] sm:$0xff]   ;;  %v12448_v40 = vld [vmem:[#allocation14 + $0x60] sm:$0xff]  }
0x2113   : > { %9217 = vmatmul.mubr.bf16.vlgmr.msra.gmra.mrb[0].mxu0 %v8984_v6  ;;  %9330 = vmatmul.mubr.bf16.vlgmr.msra.gmra.mrb[0].mxu1 %v8984_v6  ;;  %v8865_v52 = vsel %vm8863_vm15, %v8864_v0, %v8862_v59  ;;  %v8869_v3 = vsel %vm8868_vm4, %v16894_v36, %v8867_v51  ;;  %v12444_v6 = vld [vmem:[#allocation14 + $0x58] sm:$0xff]   ;;  %v12450_v0 = vld [vmem:[#allocation14 + $0x20] sm:$0xff]   ;;  %v12452_v59 = vld [vmem:[#allocation14 + $0x68] sm:$0xff]  }
0x2114   : > { %v13189_v20 = vpop.eup %13188  ;;  %9226 = vmatprep.mubr.bf16.mxu0 %v17333_v56  ;;  %9339 = vmatprep.mubr.bf16.mxu1 %v17333_v56  ;;  %v8941_v25 = vadd.f32 1e-06, %v8865_v52  ;;  %v8876_v31 = vsel %vm8875_vm7, %v8815_v11, %v8874_v42  ;;  %v8872_v12 = vsel %vm8870_vm6, %v8871_v16, %v8869_v3  ;;  %v12445_v36 = vld [vmem:[#allocation14 + $0xd8] sm:$0xff]   ;;  %v12451_v51 = vld [vmem:[#allocation14 + $0xa0] sm:$0xff]   ;;  %v12453_v16 = vld [vmem:[#allocation14 + $0xe8] sm:$0xff]  }
0x2115   : > { %v13191_v60 = vpop.eup %13190  ;;  %v8971_v15 = vmul.f32 %v13189_v20, %v16830_v41  ;;  %11292 = vmatpush3.bf16.msra.mxu0 %v12433_v44  ;;  %11356 = vmatpush3.bf16.msra.mxu1 %v12435_v33  ;;  %v8879_v61 = vsel %vm8877_vm5, %v8878_v34, %v8876_v31  ;;  %v8942_v24 = vadd.f32 1e-06, %v8872_v12  ;;  %v12442_v41 = vld [vmem:[#allocation14 + $0x10] sm:$0xff]   ;;  %v12449_v44 = vld [vmem:[#allocation14 + $0xe0] sm:$0xff]  }
0x2116   : > { %11293 = vmatprep.subr.bf16.mxu0 %v12436_v58  ;;  %11357 = vmatprep.subr.bf16.mxu1 %v12437_v32  ;;  %13194 = vrcp.f32 %v8941_v25  ;;  %v8943_v30 = vadd.f32 1e-06, %v8879_v61  ;;  %v8970_v4 = vmul.f32 %v13191_v60, %v16823_v63  ;;  %v12446_v63 = vld [vmem:[#allocation14 + $0x18] sm:$0xff]  }
0x2118   : > { %v8985_v11 = vpack.c.bf16 %v8971_v15, %v8970_v4  ;;  %13196 = vrcp.f32 %v8943_v30 }
0x2119   : > { %11294 = vmatpush3.bf16.msra.mxu0 %v12438_v28  ;;  %11358 = vmatpush3.bf16.msra.mxu1 %v12439_v27  ;;  %13198 = vrcp.f32 %v8942_v24 }
0x211a   : > { %11295 = vmatprep.subr.bf16.mxu0 %v12440_v37  ;;  %11359 = vmatprep.subr.bf16.mxu1 %v12441_v46 }
0x211b   : > { %9227 = vmatmul.mubr.bf16.gmra.mrb[4].mxu0 %v8985_v11  ;;  %9340 = vmatmul.mubr.bf16.gmra.mrb[4].mxu1 %v8985_v11 }
0x211c   : > { %9236 = vmatprep.mubr.bf16.mxu0 %v17333_v56  ;;  %9349 = vmatprep.mubr.bf16.mxu1 %v17333_v56  ;;  %v13193_v33 = vpop.eup %13192 }
0x211d   : > { %11296 = vmatpush3.bf16.msra.mxu0 %v12442_v41  ;;  %11360 = vmatpush3.bf16.msra.mxu1 %v12443_v23  ;;  %v8972_v58 = vmul.f32 %v13193_v33, %v16835_v26 }
0x211e   : > { %11297 = vmatprep.subr.bf16.mxu0 %v12444_v6  ;;  %11361 = vmatprep.subr.bf16.mxu1 %v12445_v36 }
0x2120   : > { %v13195_v9 = vpop.eup %13194 }
0x2121   : > { %11298 = vmatpush3.bf16.msra.mxu0 %v12446_v63  ;;  %11362 = vmatpush3.bf16.msra.mxu1 %v12447_v7  ;;  %v8973_v32 = vmul.f32 %v13195_v9, %v16838_v22 }
0x2122   : > { %11299 = vmatprep.subr.bf16.mxu0 %v12448_v40  ;;  %11363 = vmatprep.subr.bf16.mxu1 %v12449_v44  ;;  %v13197_v42 = vpop.eup %13196 }
0x2123   : > { %v8986_v20 = vpack.c.bf16 %v8973_v32, %v8972_v58  ;;  %v13199_v60 = vpop.eup %13198  ;;  %v8975_v52 = vmul.f32 %v13197_v42, %v16848_v48 }
0x2124   : > { %v8974_v3 = vmul.f32 %v13199_v60, %v16843_v54 }
0x2125   : > { %11300 = vmatpush3.bf16.msra.mxu0 %v12450_v0  ;;  %11364 = vmatpush3.bf16.msra.mxu1 %v12451_v51 }
0x2126   : > { %9237 = vmatmul.mubr.bf16.gmra.mrb[8].mxu0 %v8986_v20  ;;  %9350 = vmatmul.mubr.bf16.gmra.mrb[8].mxu1 %v8986_v20  ;;  %v8987_v25 = vpack.c.bf16 %v8975_v52, %v8974_v3 }
0x2127   : > { %9246 = vmatprep.mubr.bf16.mxu0 %v17333_v56  ;;  %9359 = vmatprep.mubr.bf16.mxu1 %v17333_v56 }
0x2128   : > { %11301 = vmatprep.subr.bf16.mxu0 %v12452_v59  ;;  %11365 = vmatprep.subr.bf16.mxu1 %v12453_v16 }
0x212a   : > { %v8793_v26 = vpop.xlane.xlu0 %8792 }
0x212b   : > { %v8816_v22 = vmul.f32 0.007874016, %v8793_v26 }
0x212c   : > { %v8795_v34 = vpop.xlane.xlu1 %8794 }
0x212d   : > { %13200 = vrsqrt.f32 %v8816_v22  ;;  %v8817_v31 = vmul.f32 0.007874016, %v8795_v34  ;;  %vm8882_vm0 = vcmp.eq.f32.partialorder %v8816_v22, inf  ;;  %v8885_v54 = vand.u32 2147483648, %v8816_v22 }
0x212e   : > { %v8797_v15 = vpop.xlane.xlu0 %8796  ;;  %9247 = vmatmul.mubr.bf16.gmra.mrb[12].mxu0 %v8987_v25  ;;  %9360 = vmatmul.mubr.bf16.gmra.mrb[12].mxu1 %v8987_v25  ;;  %vm8884_vm1 = vcmp.eq.f32.partialorder %v8816_v22, 0.0 }
0x212f   : > { %v8818_v28 = vmul.f32 0.007874016, %v8797_v15  ;;  %13202 = vrsqrt.f32 %v8817_v31  ;;  %9256 = vmatprep.mubr.bf16.mxu0 %v17333_v56  ;;  %9369 = vmatprep.mubr.bf16.mxu1 %v17333_v56  ;;  %vm8889_vm2 = vcmp.eq.f32.partialorder %v8817_v31, inf  ;;  %v8892_v41 = vand.u32 2147483648, %v8817_v31 }
0x2130   : > { %v8799_v27 = vpop.xlane.xlu1 %8798  ;;  %vm8891_vm3 = vcmp.eq.f32.partialorder %v8817_v31, 0.0 }
0x2131   : > { %13204 = vrsqrt.f32 %v8818_v28  ;;  %v8819_v48 = vmul.f32 0.007874016, %v8799_v27  ;;  %vm8896_vm9 = vcmp.eq.f32.partialorder %v8818_v28, inf  ;;  %v8899_v36 = vand.u32 2147483648, %v8818_v28 }
0x2132   : > { %vm8898_vm8 = vcmp.eq.f32.partialorder %v8818_v28, 0.0 }
0x2133   : > { %13206 = vrsqrt.f32 %v8819_v48  ;;  %vm8903_vm10 = vcmp.eq.f32.partialorder %v8819_v48, inf  ;;  %v8906_v32 = vand.u32 2147483648, %v8819_v48  ;;  %vm8905_vm11 = vcmp.eq.f32.partialorder %v8819_v48, 0.0 }
0x2137   : > { %v13201_v12 = vpop.eup %13200 }
0x2138   : > { %v8881_v61 = vmul.f32 %v13201_v12, %v8816_v22 }
0x2139   : > { %v13203_v37 = vpop.eup %13202 }
0x213a   : > { %v8883_v46 = vsel %vm8882_vm0, %v8816_v22, %v8881_v61  ;;  %v8888_v24 = vmul.f32 %v13203_v37, %v8817_v31 }
0x213b   : > { %v13205_v30 = vpop.eup %13204  ;;  %v8886_v4 = vsel %vm8884_vm1, %v8885_v54, %v8883_v46 }
0x213c   : > { %v8944_v11 = vadd.f32 1e-06, %v8886_v4  ;;  %v8895_v23 = vmul.f32 %v13205_v30, %v8818_v28  ;;  %v8890_v6 = vsel %vm8889_vm2, %v8817_v31, %v8888_v24 }
0x213d   : > { %v8801_v63 = vpop.xlane.xlu0 %8800  ;;  %v13207_v7 = vpop.eup %13206  ;;  %v8893_v40 = vsel %vm8891_vm3, %v8892_v41, %v8890_v6 }
0x213e   : > { %v8897_v44 = vsel %vm8896_vm9, %v8818_v28, %v8895_v23  ;;  %v8820_v33 = vmul.f32 0.007874016, %v8801_v63  ;;  %13208 = vrcp.f32 %v8944_v11  ;;  %v8945_v9 = vadd.f32 1e-06, %v8893_v40 }
0x213f   : > { %v8900_v0 = vsel %vm8898_vm8, %v8899_v36, %v8897_v44  ;;  %v8902_v51 = vmul.f32 %v13207_v7, %v8819_v48  ;;  %v8803_v58 = vpop.xlane.xlu1 %8802 }
0x2140   : > { %13210 = vrsqrt.f32 %v8820_v33  ;;  %v8821_v59 = vmul.f32 0.007874016, %v8803_v58  ;;  %v8946_v42 = vadd.f32 1e-06, %v8900_v0  ;;  %vm8910_vm12 = vcmp.eq.f32.partialorder %v8820_v33, inf }
0x2141   : > { %13212 = vrcp.f32 %v8945_v9  ;;  %v8904_v20 = vsel %vm8903_vm10, %v8819_v48, %v8902_v51  ;;  %v8805_v16 = vpop.xlane.xlu0 %8804  ;;  %v8913_v28 = vand.u32 2147483648, %v8820_v33  ;;  %vm8912_vm13 = vcmp.eq.f32.partialorder %v8820_v33, 0.0 }
0x2142   : > { %v8907_v60 = vsel %vm8905_vm11, %v8906_v32, %v8904_v20  ;;  %v8822_v52 = vmul.f32 0.007874016, %v8805_v16  ;;  %13214 = vrsqrt.f32 %v8821_v59  ;;  %vm8917_vm14 = vcmp.eq.f32.partialorder %v8821_v59, inf }
0x2143   : > { %v8947_v26 = vadd.f32 1e-06, %v8907_v60  ;;  %v8807_v22 = vpop.xlane.xlu1 %8806  ;;  %v8920_v11 = vand.u32 2147483648, %v8821_v59  ;;  %vm8919_vm15 = vcmp.eq.f32.partialorder %v8821_v59, 0.0 }
0x2144   : > { %13216 = vrsqrt.f32 %v8822_v52  ;;  %v8823_v3 = vmul.f32 0.007874016, %v8807_v22  ;;  %vm8924_vm4 = vcmp.eq.f32.partialorder %v8822_v52, inf  ;;  %vm8926_vm6 = vcmp.eq.f32.partialorder %v8822_v52, 0.0 }
0x2145   : > { %13218 = vrcp.f32 %v8947_v26  ;;  %v8927_v63 = vand.u32 2147483648, %v8822_v52 }
0x2146   : > { %13220 = vrcp.f32 %v8946_v42  ;;  %vm8931_vm7 = vcmp.eq.f32.partialorder %v8823_v3, inf  ;;  %v8934_v9 = vand.u32 2147483648, %v8823_v3  ;;  %vm8933_vm5 = vcmp.eq.f32.partialorder %v8823_v3, 0.0 }
0x2147   : > { %13222 = vrsqrt.f32 %v8823_v3 }
0x2148   : > { %v13209_v34 = vpop.eup %13208 }
0x2149   : > { %v8976_v27 = vmul.f32 %v13209_v34, %v16855_v13  ;;  %v12454_v34 = vld [vmem:[#allocation14 + $0x28] sm:$0xff]  }
0x214a   : > { %v13211_v25 = vpop.eup %13210  ;;  %11302 = vmatpush3.bf16.msra.mxu0 %v12454_v34 }
0x214b   : > { %v13213_v31 = vpop.eup %13212  ;;  %v8909_v15 = vmul.f32 %v13211_v25, %v8820_v33  ;;  %v12455_v25 = vld [vmem:[#allocation14 + $0xa8] sm:$0xff]  }
0x214c   : > { %v8977_v48 = vmul.f32 %v13213_v31, %v16858_v1  ;;  %v13215_v12 = vpop.eup %13214  ;;  %11366 = vmatpush3.bf16.msra.mxu1 %v12455_v25 }
0x214d   : > { %v8911_v61 = vsel %vm8910_vm12, %v8820_v33, %v8909_v15  ;;  %v8916_v46 = vmul.f32 %v13215_v12, %v8821_v59  ;;  %v12458_v15 = vld [vmem:[#allocation14 + $0x30] sm:$0xff]  }
0x214e   : > { %v13217_v54 = vpop.eup %13216  ;;  %v8914_v37 = vsel %vm8912_vm13, %v8913_v28, %v8911_v61  ;;  %v8988_v30 = vpack.c.bf16 %v8977_v48, %v8976_v27  ;;  %v12459_v28 = vld [vmem:[#allocation14 + $0xb0] sm:$0xff]   ;;  %v12461_v27 = vld [vmem:[#allocation14 + $0xf8] sm:$0xff]   ;;  %v17397_v61 = vld [vmem:[#allocation26_spill] sm:$0xff] }
0x214f   : > { %v13219_v4 = vpop.eup %13218  ;;  %v8948_v24 = vadd.f32 1e-06, %v8914_v37  ;;  %v8923_v41 = vmul.f32 %v13217_v54, %v8822_v52  ;;  %v8918_v6 = vsel %vm8917_vm14, %v8821_v59, %v8916_v46  ;;  %v12463_v48 = vld [vmem:[#allocation14 + $0xb8] sm:$0xff]   ;;  %v17398_v37 = vld [vmem:[#allocation27_spill] sm:$0xff] }
0x2150   : > { %v13221_v23 = vpop.eup %13220  ;;  %9257 = vmatmul.mubr.bf16.gmra.mrb[16].mxu0 %v8988_v30  ;;  %9370 = vmatmul.mubr.bf16.gmra.mrb[16].mxu1 %v8988_v30  ;;  %v8921_v1 = vsel %vm8919_vm15, %v8920_v11, %v8918_v6  ;;  %v8979_v44 = vmul.f32 %v13219_v4, %v16868_v57 }
0x2151   : > { %v13223_v13 = vpop.eup %13222  ;;  %v8925_v36 = vsel %vm8924_vm4, %v8822_v52, %v8923_v41  ;;  %9266 = vmatprep.mubr.bf16.mxu0 %v17333_v56  ;;  %9379 = vmatprep.mubr.bf16.mxu1 %v17333_v56  ;;  %13224 = vrcp.f32 %v8948_v24  ;;  %v8949_v7 = vadd.f32 1e-06, %v8921_v1  ;;  %v8978_v51 = vmul.f32 %v13221_v23, %v16863_v35  ;;  %v17399_v24 = vld [vmem:[#allocation29_spill] sm:$0xff]  ;;  %v17400_v41 = vld [vmem:[#allocation31_spill] sm:$0xff] }
0x2152   : > { %v8930_v40 = vmul.f32 %v13223_v13, %v8823_v3  ;;  %v8928_v33 = vsel %vm8926_vm6, %v8927_v63, %v8925_v36 }
0x2153   : > { %13226 = vrcp.f32 %v8949_v7  ;;  %v8950_v32 = vadd.f32 1e-06, %v8928_v33  ;;  %v8989_v59 = vpack.c.bf16 %v8979_v44, %v8978_v51 }
0x2154   : > { %v8932_v0 = vsel %vm8931_vm7, %v8823_v3, %v8930_v40 }
0x2155   : > { %v8935_v58 = vsel %vm8933_vm5, %v8934_v9, %v8932_v0 }
0x2156   : > { %v8951_v20 = vadd.f32 1e-06, %v8935_v58 }
0x2158   : > { %13228 = vrcp.f32 %v8951_v20  ;;  %9267 = vmatmul.mubr.bf16.gmra.mrb[20].mxu0 %v8989_v59  ;;  %9380 = vmatmul.mubr.bf16.gmra.mrb[20].mxu1 %v8989_v59 }
0x2159   : > { %9276 = vmatprep.mubr.bf16.mxu0 %v17333_v56  ;;  %9389 = vmatprep.mubr.bf16.mxu1 %v17333_v56  ;;  %13230 = vrcp.f32 %v8950_v32 }
0x215b   : > { %v13225_v57 = vpop.eup %13224 }
0x215c   : > { %v8980_v42 = vmul.f32 %v13225_v57, %v16875_v5  ;;  %v12456_v5 = vld [vmem:[#allocation14 + $0x70] sm:$0xff]  }
0x215d   : > { %v13227_v16 = vpop.eup %13226  ;;  %11303 = vmatprep.subr.bf16.mxu0 %v12456_v5 }
0x215e   : > { %v8981_v60 = vmul.f32 %v13227_v16, %v16878_v49  ;;  %v12457_v49 = vld [vmem:[#allocation14 + $0xf0] sm:$0xff]   ;;  %11304 = vmatpush3.bf16.msra.mxu0 %v12458_v15 }
0x215f   : > { %11367 = vmatprep.subr.bf16.mxu1 %v12457_v49 }
0x2160   : > { %v8990_v52 = vpack.c.bf16 %v8981_v60, %v8980_v42  ;;  %11368 = vmatpush3.bf16.msra.mxu1 %v12459_v28 }
0x2161   : > { %11369 = vmatprep.subr.bf16.mxu1 %v12461_v27 }
0x2162   : > { %v13229_v35 = vpop.eup %13228  ;;  %9277 = vmatmul.mubr.bf16.gmra.mrb[24].mxu0 %v8990_v52  ;;  %9390 = vmatmul.mubr.bf16.gmra.mrb[24].mxu1 %v8990_v52 }
0x2163   : > { %v13231_v26 = vpop.eup %13230  ;;  %9286 = vmatprep.mubr.bf16.mxu0 %v17333_v56  ;;  %9399 = vmatprep.mubr.bf16.mxu1 %v17333_v56  ;;  %v8983_v22 = vmul.f32 %v13229_v35, %v16888_v62  ;;  %v12460_v56 = vld [vmem:[#allocation14 + $0x78] sm:$0xff]  }
0x2164   : > { %v8982_v3 = vmul.f32 %v13231_v26, %v16883_v50  ;;  %v12462_v62 = vld [vmem:[#allocation14 + $0x38] sm:$0xff]   ;;  %11305 = vmatprep.subr.bf16.mxu0 %v12460_v56  ;;  %11370 = vmatpush3.bf16.msra.mxu1 %v12463_v48 }
0x2165   : > { %11306 = vmatpush3.bf16.msra.mxu0 %v12462_v62 }
0x2166   : > { %v8991_v31 = vpack.c.bf16 %v8983_v22, %v8982_v3 }
0x216a   : > { %9287 = vmatmul.mubr.bf16.gmra.mrb[28].mxu0 %v8991_v31  ;;  %9400 = vmatmul.mubr.bf16.gmra.mrb[28].mxu1 %v8991_v31 }
0x21e6   : > { %v9218_v50 = vpop.f32.mrb[0].mxu0  ;;  %v9331_v12 = vpop.f32.mrb[0].mxu1 }
0x21e7   : > { %v9219_v54 = vadd.f32 %v9218_v50, %v17397_v61  ;;  %v9332_v46 = vadd.f32 %v9331_v12, %v17398_v37  ;;  %v9220_v30 = vpop.f32.mrb[1].mxu0  ;;  %v9333_v4 = vpop.f32.mrb[1].mxu1 }
0x21e8   : > { %v9221_v11 = vadd.f32 %v9220_v30, %v17399_v24  ;;  %v9334_v23 = vadd.f32 %v9333_v4, %v17400_v41  ;;  %v9222_v6 = vpop.f32.mrb[2].mxu0  ;;  %v9335_v13 = vpop.f32.mrb[2].mxu1 }
0x21e9   : > { %v9223_v1 = vadd.f32 %v9222_v6, %v17397_v61  ;;  %v9336_v36 = vadd.f32 %v9335_v13, %v17398_v37  ;;  %v9224_v63 = vpop.f32.mrb[3].mxu0  ;;  %v9337_v7 = vpop.f32.mrb[3].mxu1  ;;  %v9410_v33 = vmax.f32 %v9219_v54, 0.0  ;;  %v9412_v9 = vmax.f32 %v9332_v46, 0.0 }
0x21ea   : > { %v9225_v40 = vadd.f32 %v9224_v63, %v17399_v24  ;;  %v9338_v44 = vadd.f32 %v9337_v7, %v17400_v41  ;;  %v9411_v58 = vmax.f32 %v9221_v11, 0.0  ;;  %v9413_v32 = vmax.f32 %v9334_v23, 0.0 }
0x21eb   : > { %v9414_v0 = vmax.f32 %v9223_v1, 0.0  ;;  %v9416_v51 = vmax.f32 %v9336_v36, 0.0 }
0x21ec   : > { %v9415_v20 = vmax.f32 %v9225_v40, 0.0  ;;  %v9417_v59 = vmax.f32 %v9338_v44, 0.0 }
0x21ed   : > { %v9602_v57 = vpack.c.bf16 %v9414_v0, %v9410_v33  ;;  %v9604_v16 = vpack.c.bf16 %v9416_v51, %v9412_v9 }
0x21ee   : > { %v9603_v42 = vpack.c.bf16 %v9415_v20, %v9411_v58  ;;  %v9605_v60 = vpack.c.bf16 %v9417_v59, %v9413_v32  ;;  %v9228_v52 = vpop.f32.mrb[4].mxu0  ;;  %v9341_v35 = vpop.f32.mrb[4].mxu1 }
0x21ef   : > { %v9229_v26 = vadd.f32 %v9228_v52, %v17397_v61  ;;  %v9342_v22 = vadd.f32 %v9341_v35, %v17398_v37  ;;  %v9230_v3 = vpop.f32.mrb[5].mxu0  ;;  %v9343_v34 = vpop.f32.mrb[5].mxu1 }
0x21f0   : > { %v9231_v25 = vadd.f32 %v9230_v3, %v17399_v24  ;;  %v9344_v31 = vadd.f32 %v9343_v34, %v17400_v41  ;;  %v9232_v5 = vpop.f32.mrb[6].mxu0  ;;  %v9345_v49 = vpop.f32.mrb[6].mxu1  ;;  %9922 = vmatprep.mubr.bf16.mxu0 %v9603_v42  ;;  %10019 = vmatprep.mubr.bf16.mxu1 %v9605_v60 }
0x21f1   : > { %v9233_v15 = vadd.f32 %v9232_v5, %v17397_v61  ;;  %v9346_v28 = vadd.f32 %v9345_v49, %v17398_v37  ;;  %v9234_v56 = vpop.f32.mrb[7].mxu0  ;;  %v9347_v27 = vpop.f32.mrb[7].mxu1  ;;  %9923 = vmatmul.mubr.bf16.vlgmr.msra.gmra.mrb[32].mxu0 %v9602_v57  ;;  %10020 = vmatmul.mubr.bf16.vlgmr.msra.gmra.mrb[32].mxu1 %v9604_v16  ;;  %v9418_v50 = vmax.f32 %v9229_v26, 0.0  ;;  %v9420_v12 = vmax.f32 %v9342_v22, 0.0 }
0x21f2   : > { %v9235_v62 = vadd.f32 %v9234_v56, %v17399_v24  ;;  %v9348_v48 = vadd.f32 %v9347_v27, %v17400_v41  ;;  %v9419_v30 = vmax.f32 %v9231_v25, 0.0  ;;  %v9421_v4 = vmax.f32 %v9344_v31, 0.0 }
0x21f3   : > { %v9422_v54 = vmax.f32 %v9233_v15, 0.0  ;;  %v9424_v46 = vmax.f32 %v9346_v28, 0.0 }
0x21f4   : > { %v9423_v11 = vmax.f32 %v9235_v62, 0.0  ;;  %v9425_v23 = vmax.f32 %v9348_v48, 0.0 }
0x21f5   : > { %v9606_v6 = vpack.c.bf16 %v9422_v54, %v9418_v50  ;;  %v9608_v13 = vpack.c.bf16 %v9424_v46, %v9420_v12 }
0x21f6   : > { %v9607_v1 = vpack.c.bf16 %v9423_v11, %v9419_v30  ;;  %v9609_v36 = vpack.c.bf16 %v9425_v23, %v9421_v4 }
0x21f8   : > { %9930 = vmatprep.mubr.bf16.mxu0 %v9607_v1  ;;  %10027 = vmatprep.mubr.bf16.mxu1 %v9609_v36 }
0x21f9   : > { %v9238_v63 = vpop.f32.mrb[8].mxu0  ;;  %v9351_v7 = vpop.f32.mrb[8].mxu1  ;;  %9931 = vmatmul.mubr.bf16.gmra.mrb[36].mxu0 %v9606_v6  ;;  %10028 = vmatmul.mubr.bf16.gmra.mrb[36].mxu1 %v9608_v13 }
0x21fa   : > { %v9239_v40 = vadd.f32 %v9238_v63, %v17397_v61  ;;  %v9352_v44 = vadd.f32 %v9351_v7, %v17398_v37  ;;  %v9240_v33 = vpop.f32.mrb[9].mxu0  ;;  %v9353_v9 = vpop.f32.mrb[9].mxu1 }
0x21fb   : > { %v9241_v0 = vadd.f32 %v9240_v33, %v17399_v24  ;;  %v9354_v51 = vadd.f32 %v9353_v9, %v17400_v41  ;;  %v9242_v58 = vpop.f32.mrb[10].mxu0  ;;  %v9355_v32 = vpop.f32.mrb[10].mxu1 }
0x21fc   : > { %v9243_v20 = vadd.f32 %v9242_v58, %v17397_v61  ;;  %v9356_v59 = vadd.f32 %v9355_v32, %v17398_v37  ;;  %v9244_v57 = vpop.f32.mrb[11].mxu0  ;;  %v9357_v16 = vpop.f32.mrb[11].mxu1  ;;  %v9426_v52 = vmax.f32 %v9239_v40, 0.0  ;;  %v9428_v35 = vmax.f32 %v9352_v44, 0.0 }
0x21fd   : > { %v9245_v42 = vadd.f32 %v9244_v57, %v17399_v24  ;;  %v9358_v60 = vadd.f32 %v9357_v16, %v17400_v41  ;;  %v9427_v3 = vmax.f32 %v9241_v0, 0.0  ;;  %v9429_v34 = vmax.f32 %v9354_v51, 0.0 }
0x21fe   : > { %v9430_v26 = vmax.f32 %v9243_v20, 0.0  ;;  %v9432_v22 = vmax.f32 %v9356_v59, 0.0 }
0x21ff   : > { %v9431_v25 = vmax.f32 %v9245_v42, 0.0  ;;  %v9433_v31 = vmax.f32 %v9358_v60, 0.0 }
0x2200   : > { %v9610_v5 = vpack.c.bf16 %v9430_v26, %v9426_v52  ;;  %v9612_v49 = vpack.c.bf16 %v9432_v22, %v9428_v35 }
0x2201   : > { %v9611_v15 = vpack.c.bf16 %v9431_v25, %v9427_v3  ;;  %v9613_v28 = vpack.c.bf16 %v9433_v31, %v9429_v34  ;;  %v9248_v56 = vpop.f32.mrb[12].mxu0  ;;  %v9361_v27 = vpop.f32.mrb[12].mxu1 }
0x2202   : > { %v9249_v62 = vadd.f32 %v9248_v56, %v17397_v61  ;;  %v9362_v48 = vadd.f32 %v9361_v27, %v17398_v37  ;;  %v9250_v50 = vpop.f32.mrb[13].mxu0  ;;  %v9363_v12 = vpop.f32.mrb[13].mxu1 }
0x2203   : > { %v9251_v54 = vadd.f32 %v9250_v50, %v17399_v24  ;;  %v9364_v46 = vadd.f32 %v9363_v12, %v17400_v41  ;;  %v9252_v30 = vpop.f32.mrb[14].mxu0  ;;  %v9365_v4 = vpop.f32.mrb[14].mxu1  ;;  %9938 = vmatprep.mubr.bf16.mxu0 %v9611_v15  ;;  %10035 = vmatprep.mubr.bf16.mxu1 %v9613_v28 }
0x2204   : > { %v9253_v11 = vadd.f32 %v9252_v30, %v17397_v61  ;;  %v9366_v23 = vadd.f32 %v9365_v4, %v17398_v37  ;;  %v9254_v6 = vpop.f32.mrb[15].mxu0  ;;  %v9367_v13 = vpop.f32.mrb[15].mxu1  ;;  %9939 = vmatmul.mubr.bf16.gmra.mrb[40].mxu0 %v9610_v5  ;;  %10036 = vmatmul.mubr.bf16.gmra.mrb[40].mxu1 %v9612_v49  ;;  %v9434_v63 = vmax.f32 %v9249_v62, 0.0  ;;  %v9436_v7 = vmax.f32 %v9362_v48, 0.0 }
0x2205   : > { %v9255_v1 = vadd.f32 %v9254_v6, %v17399_v24  ;;  %v9368_v36 = vadd.f32 %v9367_v13, %v17400_v41  ;;  %v9435_v33 = vmax.f32 %v9251_v54, 0.0  ;;  %v9437_v9 = vmax.f32 %v9364_v46, 0.0 }
0x2206   : > { %v9438_v40 = vmax.f32 %v9253_v11, 0.0  ;;  %v9440_v44 = vmax.f32 %v9366_v23, 0.0 }
0x2207   : > { %v9439_v0 = vmax.f32 %v9255_v1, 0.0  ;;  %v9441_v51 = vmax.f32 %v9368_v36, 0.0 }
0x2208   : > { %v9614_v58 = vpack.c.bf16 %v9438_v40, %v9434_v63  ;;  %v9616_v32 = vpack.c.bf16 %v9440_v44, %v9436_v7 }
0x2209   : > { %v9615_v20 = vpack.c.bf16 %v9439_v0, %v9435_v33  ;;  %v9617_v59 = vpack.c.bf16 %v9441_v51, %v9437_v9 }
0x220b   : > { %9946 = vmatprep.mubr.bf16.mxu0 %v9615_v20  ;;  %10043 = vmatprep.mubr.bf16.mxu1 %v9617_v59 }
0x220c   : > { %9947 = vmatmul.mubr.bf16.gmra.mrb[44].mxu0 %v9614_v58  ;;  %10044 = vmatmul.mubr.bf16.gmra.mrb[44].mxu1 %v9616_v32 }
0x2223   : > { %v9258_v57 = vpop.f32.mrb[16].mxu0  ;;  %v9371_v16 = vpop.f32.mrb[16].mxu1 }
0x2224   : > { %v9259_v42 = vadd.f32 %v9258_v57, %v17397_v61  ;;  %v9372_v60 = vadd.f32 %v9371_v16, %v17398_v37  ;;  %v9260_v52 = vpop.f32.mrb[17].mxu0  ;;  %v9373_v35 = vpop.f32.mrb[17].mxu1 }
0x2225   : > { %v9261_v26 = vadd.f32 %v9260_v52, %v17399_v24  ;;  %v9374_v22 = vadd.f32 %v9373_v35, %v17400_v41  ;;  %v9262_v3 = vpop.f32.mrb[18].mxu0  ;;  %v9375_v34 = vpop.f32.mrb[18].mxu1 }
0x2226   : > { %v9263_v25 = vadd.f32 %v9262_v3, %v17397_v61  ;;  %v9376_v31 = vadd.f32 %v9375_v34, %v17398_v37  ;;  %v9264_v5 = vpop.f32.mrb[19].mxu0  ;;  %v9377_v49 = vpop.f32.mrb[19].mxu1  ;;  %v9442_v56 = vmax.f32 %v9259_v42, 0.0  ;;  %v9444_v27 = vmax.f32 %v9372_v60, 0.0 }
0x2227   : > { %v9265_v15 = vadd.f32 %v9264_v5, %v17399_v24  ;;  %v9378_v28 = vadd.f32 %v9377_v49, %v17400_v41  ;;  %v9443_v50 = vmax.f32 %v9261_v26, 0.0  ;;  %v9445_v12 = vmax.f32 %v9374_v22, 0.0 }
0x2228   : > { %v9446_v62 = vmax.f32 %v9263_v25, 0.0  ;;  %v9448_v48 = vmax.f32 %v9376_v31, 0.0 }
0x2229   : > { %v9447_v54 = vmax.f32 %v9265_v15, 0.0  ;;  %v9449_v46 = vmax.f32 %v9378_v28, 0.0 }
0x222a   : > { %v9618_v30 = vpack.c.bf16 %v9446_v62, %v9442_v56  ;;  %v9620_v4 = vpack.c.bf16 %v9448_v48, %v9444_v27 }
0x222b   : > { %v9619_v11 = vpack.c.bf16 %v9447_v54, %v9443_v50  ;;  %v9621_v23 = vpack.c.bf16 %v9449_v46, %v9445_v12  ;;  %v9268_v6 = vpop.f32.mrb[20].mxu0  ;;  %v9381_v13 = vpop.f32.mrb[20].mxu1 }
0x222c   : > { %v9269_v1 = vadd.f32 %v9268_v6, %v17397_v61  ;;  %v9382_v36 = vadd.f32 %v9381_v13, %v17398_v37  ;;  %v9270_v63 = vpop.f32.mrb[21].mxu0  ;;  %v9383_v7 = vpop.f32.mrb[21].mxu1 }
0x222d   : > { %v9271_v40 = vadd.f32 %v9270_v63, %v17399_v24  ;;  %v9384_v44 = vadd.f32 %v9383_v7, %v17400_v41  ;;  %v9272_v33 = vpop.f32.mrb[22].mxu0  ;;  %v9385_v9 = vpop.f32.mrb[22].mxu1  ;;  %9954 = vmatprep.mubr.bf16.mxu0 %v9619_v11  ;;  %10051 = vmatprep.mubr.bf16.mxu1 %v9621_v23 }
0x222e   : > { %v9273_v0 = vadd.f32 %v9272_v33, %v17397_v61  ;;  %v9386_v51 = vadd.f32 %v9385_v9, %v17398_v37  ;;  %v9274_v58 = vpop.f32.mrb[23].mxu0  ;;  %v9387_v32 = vpop.f32.mrb[23].mxu1  ;;  %9955 = vmatmul.mubr.bf16.gmra.mrb[48].mxu0 %v9618_v30  ;;  %10052 = vmatmul.mubr.bf16.gmra.mrb[48].mxu1 %v9620_v4  ;;  %v9450_v57 = vmax.f32 %v9269_v1, 0.0  ;;  %v9452_v16 = vmax.f32 %v9382_v36, 0.0 }
0x222f   : > { %v9275_v20 = vadd.f32 %v9274_v58, %v17399_v24  ;;  %v9388_v59 = vadd.f32 %v9387_v32, %v17400_v41  ;;  %v9451_v52 = vmax.f32 %v9271_v40, 0.0  ;;  %v9453_v35 = vmax.f32 %v9384_v44, 0.0 }
0x2230   : > { %v9454_v42 = vmax.f32 %v9273_v0, 0.0  ;;  %v9456_v60 = vmax.f32 %v9386_v51, 0.0 }
0x2231   : > { %v9455_v26 = vmax.f32 %v9275_v20, 0.0  ;;  %v9457_v22 = vmax.f32 %v9388_v59, 0.0 }
0x2232   : > { %v9622_v3 = vpack.c.bf16 %v9454_v42, %v9450_v57  ;;  %v9624_v34 = vpack.c.bf16 %v9456_v60, %v9452_v16 }
0x2233   : > { %v9623_v25 = vpack.c.bf16 %v9455_v26, %v9451_v52  ;;  %v9625_v31 = vpack.c.bf16 %v9457_v22, %v9453_v35 }
0x2235   : > { %9962 = vmatprep.mubr.bf16.mxu0 %v9623_v25  ;;  %10059 = vmatprep.mubr.bf16.mxu1 %v9625_v31  ;;  %v9278_v5 = vpop.f32.mrb[24].mxu0  ;;  %v9391_v49 = vpop.f32.mrb[24].mxu1 }
0x2236   : > { %9963 = vmatmul.mubr.bf16.gmra.mrb[52].mxu0 %v9622_v3  ;;  %10060 = vmatmul.mubr.bf16.gmra.mrb[52].mxu1 %v9624_v34  ;;  %v9279_v15 = vadd.f32 %v9278_v5, %v17397_v61  ;;  %v9392_v28 = vadd.f32 %v9391_v49, %v17398_v37  ;;  %v9280_v56 = vpop.f32.mrb[25].mxu0  ;;  %v9393_v27 = vpop.f32.mrb[25].mxu1 }
0x2237   : > { %v9281_v62 = vadd.f32 %v9280_v56, %v17399_v24  ;;  %v9394_v48 = vadd.f32 %v9393_v27, %v17400_v41  ;;  %v9282_v50 = vpop.f32.mrb[26].mxu0  ;;  %v9395_v12 = vpop.f32.mrb[26].mxu1 }
0x2238   : > { %v9283_v54 = vadd.f32 %v9282_v50, %v17397_v61  ;;  %v9396_v46 = vadd.f32 %v9395_v12, %v17398_v37  ;;  %v9284_v30 = vpop.f32.mrb[27].mxu0  ;;  %v9397_v4 = vpop.f32.mrb[27].mxu1  ;;  %v9458_v6 = vmax.f32 %v9279_v15, 0.0  ;;  %v9460_v13 = vmax.f32 %v9392_v28, 0.0 }
0x2239   : > { %v9285_v11 = vadd.f32 %v9284_v30, %v17399_v24  ;;  %v9398_v23 = vadd.f32 %v9397_v4, %v17400_v41  ;;  %v9459_v63 = vmax.f32 %v9281_v62, 0.0  ;;  %v9461_v7 = vmax.f32 %v9394_v48, 0.0 }
0x223a   : > { %v9462_v1 = vmax.f32 %v9283_v54, 0.0  ;;  %v9464_v36 = vmax.f32 %v9396_v46, 0.0 }
0x223b   : > { %v9463_v40 = vmax.f32 %v9285_v11, 0.0  ;;  %v9465_v44 = vmax.f32 %v9398_v23, 0.0 }
0x223c   : > { %v9626_v33 = vpack.c.bf16 %v9462_v1, %v9458_v6  ;;  %v9628_v9 = vpack.c.bf16 %v9464_v36, %v9460_v13  ;;  %v17003_v1 = vld [vmem:[%s17260_s8] ss:$0 sm:$0xff] }
0x223d   : > { %v9627_v0 = vpack.c.bf16 %v9463_v40, %v9459_v63  ;;  %v9629_v51 = vpack.c.bf16 %v9465_v44, %v9461_v7  ;;  %v9288_v58 = vpop.f32.mrb[28].mxu0  ;;  %v9401_v32 = vpop.f32.mrb[28].mxu1 }
0x223e   : > { %v9289_v20 = vadd.f32 %v9288_v58, %v17397_v61  ;;  %v9402_v59 = vadd.f32 %v9401_v32, %v17398_v37  ;;  %v9290_v57 = vpop.f32.mrb[29].mxu0  ;;  %v9403_v16 = vpop.f32.mrb[29].mxu1 }
0x223f   : > { %v9291_v42 = vadd.f32 %v9290_v57, %v17399_v24  ;;  %v9404_v60 = vadd.f32 %v9403_v16, %v17400_v41  ;;  %v9292_v52 = vpop.f32.mrb[30].mxu0  ;;  %v9405_v35 = vpop.f32.mrb[30].mxu1  ;;  %9970 = vmatprep.mubr.bf16.mxu0 %v9627_v0  ;;  %10067 = vmatprep.mubr.bf16.mxu1 %v9629_v51 }
0x2240   : > { %v9293_v26 = vadd.f32 %v9292_v52, %v17397_v61  ;;  %v9406_v22 = vadd.f32 %v9405_v35, %v17398_v37  ;;  %v9294_v3 = vpop.f32.mrb[31].mxu0  ;;  %v9407_v34 = vpop.f32.mrb[31].mxu1  ;;  %9971 = vmatmul.mubr.bf16.gmra.mrb[56].mxu0 %v9626_v33  ;;  %10068 = vmatmul.mubr.bf16.gmra.mrb[56].mxu1 %v9628_v9  ;;  %v9466_v5 = vmax.f32 %v9289_v20, 0.0  ;;  %v9468_v49 = vmax.f32 %v9402_v59, 0.0 }
0x2241   : > { %v9295_v25 = vadd.f32 %v9294_v3, %v17399_v24  ;;  %v9408_v31 = vadd.f32 %v9407_v34, %v17400_v41  ;;  %v9467_v56 = vmax.f32 %v9291_v42, 0.0  ;;  %v9469_v27 = vmax.f32 %v9404_v60, 0.0 }
0x2242   : > { %v9470_v15 = vmax.f32 %v9293_v26, 0.0  ;;  %v9472_v28 = vmax.f32 %v9406_v22, 0.0 }
0x2243   : > { %v9471_v62 = vmax.f32 %v9295_v25, 0.0  ;;  %v9473_v48 = vmax.f32 %v9408_v31, 0.0 }
0x2244   : > { %v9630_v50 = vpack.c.bf16 %v9470_v15, %v9466_v5  ;;  %v9632_v61 = vpack.c.bf16 %v9472_v28, %v9468_v49 }
0x2245   : > { %v9631_v12 = vpack.c.bf16 %v9471_v62, %v9467_v56  ;;  %v9633_v37 = vpack.c.bf16 %v9473_v48, %v9469_v27 }
0x2247   : > { %9978 = vmatprep.mubr.bf16.mxu0 %v9631_v12  ;;  %10075 = vmatprep.mubr.bf16.mxu1 %v9633_v37 }
0x2248   : > { %9979 = vmatmul.mubr.bf16.gmra.mrb[60].mxu0 %v9630_v50  ;;  %10076 = vmatmul.mubr.bf16.gmra.mrb[60].mxu1 %v9632_v61 }
0x22c4   : > { %v11307_v54 = vpop.f32.mrb[32].mxu0  ;;  %v11371_v24 = vpop.f32.mrb[32].mxu1 }
0x22c5   : > { %v11308_v46 = vpop.f32.mrb[33].mxu0  ;;  %v11372_v41 = vpop.f32.mrb[33].mxu1 }
0x22c6   : > { %v11309_v30 = vadd.f32 %v11308_v46, %v11307_v54  ;;  %v11373_v4 = vadd.f32 %v11372_v41, %v11371_v24  ;;  %v11310_v11 = vpop.f32.mrb[34].mxu0  ;;  %v11374_v23 = vpop.f32.mrb[34].mxu1 }
0x22c7   : > { %v11311_v6 = vpop.f32.mrb[35].mxu0  ;;  %v11375_v13 = vpop.f32.mrb[35].mxu1 }
0x22c8   : > { %v9925_v36 = vadd.f32 %v17003_v1, %v11309_v30  ;;  %v11312_v63 = vadd.f32 %v11311_v6, %v11310_v11  ;;  %v11376_v7 = vadd.f32 %v11375_v13, %v11374_v23 }
0x22ca   : > { %v10022_v40 = vadd.f32 %v11373_v4, %v9925_v36  ;;  %v9928_v44 = vadd.f32 %v17003_v1, %v11312_v63 }
0x22cc   : > { %v10025_v33 = vadd.f32 %v11376_v7, %v9928_v44  ;;  %v11313_v9 = vpop.f32.mrb[36].mxu0  ;;  %v11377_v0 = vpop.f32.mrb[36].mxu1  ;;  %v17008_v51 = vadd.f32 %v10022_v40, %v16751_v53 }
0x22cd   : > { %v11314_v58 = vpop.f32.mrb[37].mxu0  ;;  %v11378_v32 = vpop.f32.mrb[37].mxu1 }
0x22ce   : > { %v11315_v20 = vadd.f32 %v11314_v58, %v11313_v9  ;;  %v11379_v59 = vadd.f32 %v11378_v32, %v11377_v0  ;;  %v11316_v57 = vpop.f32.mrb[38].mxu0  ;;  %v11380_v16 = vpop.f32.mrb[38].mxu1  ;;  %10132 = vadd.xlane.f32.xlu0 %v17008_v51  ;;  %v17012_v42 = vadd.f32 %v10025_v33, %v16754_v2 }
0x22cf   : > { %v11317_v60 = vpop.f32.mrb[39].mxu0  ;;  %v11381_v52 = vpop.f32.mrb[39].mxu1 }
0x22d0   : > { %v9933_v35 = vadd.f32 %v17003_v1, %v11315_v20  ;;  %v11318_v26 = vadd.f32 %v11317_v60, %v11316_v57  ;;  %v11382_v22 = vadd.f32 %v11381_v52, %v11380_v16  ;;  %10134 = vadd.xlane.f32.xlu1 %v17012_v42 }
0x22d2   : > { %v10030_v53 = vadd.f32 %v11379_v59, %v9933_v35  ;;  %v9936_v3 = vadd.f32 %v17003_v1, %v11318_v26 }
0x22d4   : > { %v10033_v34 = vadd.f32 %v11382_v22, %v9936_v3  ;;  %v17018_v25 = vadd.f32 %v10030_v53, %v16758_v17 }
0x22d6   : > { %10136 = vadd.xlane.f32.xlu0 %v17018_v25  ;;  %v17022_v2 = vadd.f32 %v10033_v34, %v16763_v14 }
0x22d7   : > { %v11319_v31 = vpop.f32.mrb[40].mxu0  ;;  %v11383_v5 = vpop.f32.mrb[40].mxu1 }
0x22d8   : > { %v11320_v49 = vpop.f32.mrb[41].mxu0  ;;  %v11384_v15 = vpop.f32.mrb[41].mxu1  ;;  %10138 = vadd.xlane.f32.xlu1 %v17022_v2 }
0x22d9   : > { %v11321_v28 = vadd.f32 %v11320_v49, %v11319_v31  ;;  %v11385_v56 = vadd.f32 %v11384_v15, %v11383_v5  ;;  %v11322_v27 = vpop.f32.mrb[42].mxu0  ;;  %v11386_v62 = vpop.f32.mrb[42].mxu1 }
0x22da   : > { %v11323_v48 = vpop.f32.mrb[43].mxu0  ;;  %v11387_v50 = vpop.f32.mrb[43].mxu1 }
0x22db   : > { %v9941_v17 = vadd.f32 %v17003_v1, %v11321_v28  ;;  %v11324_v61 = vadd.f32 %v11323_v48, %v11322_v27  ;;  %v11388_v12 = vadd.f32 %v11387_v50, %v11386_v62 }
0x22dd   : > { %v10038_v37 = vadd.f32 %v11385_v56, %v9941_v17  ;;  %v9944_v14 = vadd.f32 %v17003_v1, %v11324_v61 }
0x22df   : > { %v10041_v54 = vadd.f32 %v11388_v12, %v9944_v14  ;;  %v11325_v24 = vpop.f32.mrb[44].mxu0  ;;  %v11389_v46 = vpop.f32.mrb[44].mxu1  ;;  %v17028_v41 = vadd.f32 %v10038_v37, %v16767_v45 }
0x22e0   : > { %v11326_v30 = vpop.f32.mrb[45].mxu0  ;;  %v11390_v4 = vpop.f32.mrb[45].mxu1 }
0x22e1   : > { %v11327_v11 = vadd.f32 %v11326_v30, %v11325_v24  ;;  %v11391_v23 = vadd.f32 %v11390_v4, %v11389_v46  ;;  %v11328_v6 = vpop.f32.mrb[46].mxu0  ;;  %v11392_v13 = vpop.f32.mrb[46].mxu1  ;;  %10140 = vadd.xlane.f32.xlu0 %v17028_v41  ;;  %v17032_v36 = vadd.f32 %v10041_v54, %v16770_v38 }
0x22e2   : > { %v11329_v63 = vpop.f32.mrb[47].mxu0  ;;  %v11393_v7 = vpop.f32.mrb[47].mxu1 }
0x22e3   : > { %v9949_v40 = vadd.f32 %v17003_v1, %v11327_v11  ;;  %v11330_v44 = vadd.f32 %v11329_v63, %v11328_v6  ;;  %v11394_v33 = vadd.f32 %v11393_v7, %v11392_v13  ;;  %10142 = vadd.xlane.f32.xlu1 %v17032_v36 }
0x22e5   : > { %v10046_v45 = vadd.f32 %v11391_v23, %v9949_v40  ;;  %v9952_v9 = vadd.f32 %v17003_v1, %v11330_v44 }
0x22e7   : > { %v10049_v0 = vadd.f32 %v11394_v33, %v9952_v9  ;;  %v17038_v58 = vadd.f32 %v10046_v45, %v16774_v18 }
0x22e9   : > { %10144 = vadd.xlane.f32.xlu0 %v17038_v58  ;;  %v17042_v38 = vadd.f32 %v10049_v0, %v16778_v39 }
0x22eb   : > { %10146 = vadd.xlane.f32.xlu1 %v17042_v38 }
0x2301   : > { %v11331_v32 = vpop.f32.mrb[48].mxu0  ;;  %v11395_v20 = vpop.f32.mrb[48].mxu1 }
0x2302   : > { %v11332_v59 = vpop.f32.mrb[49].mxu0  ;;  %v11396_v57 = vpop.f32.mrb[49].mxu1 }
0x2303   : > { %v11333_v16 = vadd.f32 %v11332_v59, %v11331_v32  ;;  %v11397_v60 = vadd.f32 %v11396_v57, %v11395_v20  ;;  %v11334_v52 = vpop.f32.mrb[50].mxu0  ;;  %v11398_v35 = vpop.f32.mrb[50].mxu1 }
0x2304   : > { %v11335_v26 = vpop.f32.mrb[51].mxu0  ;;  %v11399_v22 = vpop.f32.mrb[51].mxu1 }
0x2305   : > { %v9957_v18 = vadd.f32 %v17003_v1, %v11333_v16  ;;  %v11336_v53 = vadd.f32 %v11335_v26, %v11334_v52  ;;  %v11400_v3 = vadd.f32 %v11399_v22, %v11398_v35 }
0x2307   : > { %v10054_v34 = vadd.f32 %v11397_v60, %v9957_v18  ;;  %v9960_v39 = vadd.f32 %v17003_v1, %v11336_v53 }
0x2309   : > { %v10057_v31 = vadd.f32 %v11400_v3, %v9960_v39  ;;  %v11337_v5 = vpop.f32.mrb[52].mxu0  ;;  %v11401_v49 = vpop.f32.mrb[52].mxu1  ;;  %v17048_v15 = vadd.f32 %v10054_v34, %v16783_v10 }
0x230a   : > { %v11338_v28 = vpop.f32.mrb[53].mxu0  ;;  %v11402_v56 = vpop.f32.mrb[53].mxu1 }
0x230b   : > { %v11339_v27 = vadd.f32 %v11338_v28, %v11337_v5  ;;  %v11403_v62 = vadd.f32 %v11402_v56, %v11401_v49  ;;  %v11340_v48 = vpop.f32.mrb[54].mxu0  ;;  %v11404_v50 = vpop.f32.mrb[54].mxu1  ;;  %10148 = vadd.xlane.f32.xlu0 %v17048_v15  ;;  %v17052_v17 = vadd.f32 %v10057_v31, %v16786_v43 }
0x230c   : > { %v11341_v61 = vpop.f32.mrb[55].mxu0  ;;  %v11405_v12 = vpop.f32.mrb[55].mxu1 }
0x230d   : > { %v9965_v37 = vadd.f32 %v17003_v1, %v11339_v27  ;;  %v11342_v14 = vadd.f32 %v11341_v61, %v11340_v48  ;;  %v11406_v54 = vadd.f32 %v11405_v12, %v11404_v50  ;;  %10150 = vadd.xlane.f32.xlu1 %v17052_v17 }
0x230f   : > { %v10062_v10 = vadd.f32 %v11403_v62, %v9965_v37  ;;  %v9968_v24 = vadd.f32 %v17003_v1, %v11342_v14 }
0x2311   : > { %v10065_v46 = vadd.f32 %v11406_v54, %v9968_v24  ;;  %v17058_v30 = vadd.f32 %v10062_v10, %v16790_v21 }
0x2313   : > { %10152 = vadd.xlane.f32.xlu0 %v17058_v30  ;;  %v17062_v43 = vadd.f32 %v10065_v46, %v16794_v55  ;;  %v11343_v4 = vpop.f32.mrb[56].mxu0  ;;  %v11407_v11 = vpop.f32.mrb[56].mxu1 }
0x2314   : > { %v11344_v23 = vpop.f32.mrb[57].mxu0  ;;  %v11408_v6 = vpop.f32.mrb[57].mxu1 }
0x2315   : > { %10154 = vadd.xlane.f32.xlu1 %v17062_v43  ;;  %v11345_v13 = vadd.f32 %v11344_v23, %v11343_v4  ;;  %v11409_v63 = vadd.f32 %v11408_v6, %v11407_v11  ;;  %v11346_v7 = vpop.f32.mrb[58].mxu0  ;;  %v11410_v40 = vpop.f32.mrb[58].mxu1 }
0x2316   : > { %v11347_v44 = vpop.f32.mrb[59].mxu0  ;;  %v11411_v33 = vpop.f32.mrb[59].mxu1 }
0x2317   : > { %v9973_v21 = vadd.f32 %v17003_v1, %v11345_v13  ;;  %v11348_v45 = vadd.f32 %v11347_v44, %v11346_v7  ;;  %v11412_v9 = vadd.f32 %v11411_v33, %v11410_v40 }
0x2319   : > { %v10070_v0 = vadd.f32 %v11409_v63, %v9973_v21  ;;  %v9976_v55 = vadd.f32 %v17003_v1, %v11348_v45 }
0x231b   : > { %v10073_v32 = vadd.f32 %v11412_v9, %v9976_v55  ;;  %v11349_v20 = vpop.f32.mrb[60].mxu0  ;;  %v11413_v59 = vpop.f32.mrb[60].mxu1  ;;  %v17068_v57 = vadd.f32 %v10070_v0, %v16799_v29 }
0x231c   : > { %v11350_v16 = vpop.f32.mrb[61].mxu0  ;;  %v11414_v60 = vpop.f32.mrb[61].mxu1 }
0x231d   : > { %v11351_v52 = vadd.f32 %v11350_v16, %v11349_v20  ;;  %v11415_v35 = vadd.f32 %v11414_v60, %v11413_v59  ;;  %v11416_v26 = vpop.f32.mrb[62].mxu1  ;;  %10156 = vadd.xlane.f32.xlu0 %v17068_v57  ;;  %v11352_v22 = vpop.f32.mrb[62].mxu0  ;;  %v17072_v18 = vadd.f32 %v10073_v32, %v16802_v8 }
0x231e   : > { %v11353_v53 = vpop.f32.mrb[63].mxu0  ;;  %v11417_v3 = vpop.f32.mrb[63].mxu1 }
0x231f   : > { %v9981_v34 = vadd.f32 %v17003_v1, %v11351_v52  ;;  %v11354_v39 = vadd.f32 %v11353_v53, %v11352_v22  ;;  %v11418_v31 = vadd.f32 %v11417_v3, %v11416_v26  ;;  %10158 = vadd.xlane.f32.xlu1 %v17072_v18 }
0x2321   : > { %v10078_v29 = vadd.f32 %v11415_v35, %v9981_v34  ;;  %v9984_v5 = vadd.f32 %v17003_v1, %v11354_v39 }
0x2323   : > { %v10081_v49 = vadd.f32 %v11418_v31, %v9984_v5  ;;  %v17078_v28 = vadd.f32 %v10078_v29, %v16806_v19 }
0x2325   : > { %10160 = vadd.xlane.f32.xlu0 %v17078_v28  ;;  %v17082_v8 = vadd.f32 %v10081_v49, %v16810_v47 }
0x2327   : > { %10162 = vadd.xlane.f32.xlu1 %v17082_v8 }
0x235b   : > { %v10133_v56 = vpop.xlane.xlu0 %10132 }
0x235c   : > { %v10164_v27 = vmul.f32 0.0078125, %v10133_v56 }
0x235d   : > { %v10135_v62 = vpop.xlane.xlu1 %10134 }
0x235e   : > { %v17086_v48 = vsub.f32 %v17008_v51, %v10164_v27  ;;  %v10165_v50 = vmul.f32 0.0078125, %v10135_v62 }
0x2360   : > { %v17089_v1 = vsub.f32 %v17012_v42, %v10165_v50  ;;  %v10196_v19 = vmul.f32 %v17086_v48, %v17086_v48 }
0x2362   : > { %10212 = vadd.xlane.f32.xlu0 %v10196_v19  ;;  %v10197_v47 = vmul.f32 %v17089_v1, %v17089_v1 }
0x2363   : > { %v10137_v61 = vpop.xlane.xlu0 %10136 }
0x2364   : > { %v10166_v12 = vmul.f32 0.0078125, %v10137_v61  ;;  %10214 = vadd.xlane.f32.xlu1 %v10197_v47 }
0x2365   : > { %v10139_v37 = vpop.xlane.xlu1 %10138 }
0x2366   : > { %v17096_v14 = vsub.f32 %v17018_v25, %v10166_v12  ;;  %v10167_v51 = vmul.f32 0.0078125, %v10139_v37 }
0x2368   : > { %v17099_v54 = vsub.f32 %v17022_v2, %v10167_v51  ;;  %v10198_v42 = vmul.f32 %v17096_v14, %v17096_v14 }
0x236a   : > { %10216 = vadd.xlane.f32.xlu0 %v10198_v42  ;;  %v10199_v10 = vmul.f32 %v17099_v54, %v17099_v54 }
0x236c   : > { %10218 = vadd.xlane.f32.xlu1 %v10199_v10 }
0x236e   : > { %v10141_v24 = vpop.xlane.xlu0 %10140 }
0x236f   : > { %v10168_v46 = vmul.f32 0.0078125, %v10141_v24 }
0x2370   : > { %v10143_v4 = vpop.xlane.xlu1 %10142 }
0x2371   : > { %v17106_v11 = vsub.f32 %v17028_v41, %v10168_v46  ;;  %v10169_v25 = vmul.f32 0.0078125, %v10143_v4 }
0x2373   : > { %v17109_v23 = vsub.f32 %v17032_v36, %v10169_v25  ;;  %v10200_v2 = vmul.f32 %v17106_v11, %v17106_v11 }
0x2375   : > { %10220 = vadd.xlane.f32.xlu0 %v10200_v2  ;;  %v10201_v6 = vmul.f32 %v17109_v23, %v17109_v23 }
0x2376   : > { %v10145_v13 = vpop.xlane.xlu0 %10144 }
0x2377   : > { %v10170_v63 = vmul.f32 0.0078125, %v10145_v13  ;;  %10222 = vadd.xlane.f32.xlu1 %v10201_v6 }
0x2378   : > { %v10147_v7 = vpop.xlane.xlu1 %10146 }
0x2379   : > { %v17116_v40 = vsub.f32 %v17038_v58, %v10170_v63  ;;  %v10171_v41 = vmul.f32 0.0078125, %v10147_v7 }
0x237b   : > { %v17119_v44 = vsub.f32 %v17042_v38, %v10171_v41  ;;  %v10202_v36 = vmul.f32 %v17116_v40, %v17116_v40 }
0x237d   : > { %10224 = vadd.xlane.f32.xlu0 %v10202_v36  ;;  %v10203_v33 = vmul.f32 %v17119_v44, %v17119_v44 }
0x237f   : > { %10226 = vadd.xlane.f32.xlu1 %v10203_v33 }
0x2398   : > { %v10149_v21 = vpop.xlane.xlu0 %10148 }
0x2399   : > { %v10172_v45 = vmul.f32 0.0078125, %v10149_v21 }
0x239a   : > { %v10151_v9 = vpop.xlane.xlu1 %10150 }
0x239b   : > { %v17126_v0 = vsub.f32 %v17048_v15, %v10172_v45  ;;  %v10173_v58 = vmul.f32 0.0078125, %v10151_v9 }
0x239d   : > { %v17129_v55 = vsub.f32 %v17052_v17, %v10173_v58  ;;  %v10204_v38 = vmul.f32 %v17126_v0, %v17126_v0 }
0x239f   : > { %10228 = vadd.xlane.f32.xlu0 %v10204_v38  ;;  %v10205_v32 = vmul.f32 %v17129_v55, %v17129_v55 }
0x23a0   : > { %v10153_v20 = vpop.xlane.xlu0 %10152 }
0x23a1   : > { %v10174_v59 = vmul.f32 0.0078125, %v10153_v20  ;;  %10230 = vadd.xlane.f32.xlu1 %v10205_v32 }
0x23a2   : > { %v10155_v16 = vpop.xlane.xlu1 %10154 }
0x23a3   : > { %v17136_v60 = vsub.f32 %v17058_v30, %v10174_v59  ;;  %v10175_v15 = vmul.f32 0.0078125, %v10155_v16 }
0x23a5   : > { %v17139_v52 = vsub.f32 %v17062_v43, %v10175_v15  ;;  %v10206_v17 = vmul.f32 %v17136_v60, %v17136_v60 }
0x23a7   : > { %10232 = vadd.xlane.f32.xlu0 %v10206_v17  ;;  %v10207_v35 = vmul.f32 %v17139_v52, %v17139_v52 }
0x23a9   : > { %10234 = vadd.xlane.f32.xlu1 %v10207_v35 }
0x23aa   : > { %v10157_v26 = vpop.xlane.xlu0 %10156 }
0x23ab   : > { %v10176_v22 = vmul.f32 0.0078125, %v10157_v26 }
0x23ac   : > { %v10159_v53 = vpop.xlane.xlu1 %10158 }
0x23ad   : > { %v17146_v3 = vsub.f32 %v17068_v57, %v10176_v22  ;;  %v10177_v30 = vmul.f32 0.0078125, %v10159_v53 }
0x23af   : > { %v17149_v34 = vsub.f32 %v17072_v18, %v10177_v30  ;;  %v10208_v43 = vmul.f32 %v17146_v3, %v17146_v3 }
0x23b1   : > { %10236 = vadd.xlane.f32.xlu0 %v10208_v43  ;;  %v10209_v39 = vmul.f32 %v17149_v34, %v17149_v34 }
0x23b2   : > { %v10161_v31 = vpop.xlane.xlu0 %10160 }
0x23b3   : > { %v10178_v29 = vmul.f32 0.0078125, %v10161_v31  ;;  %10238 = vadd.xlane.f32.xlu1 %v10209_v39 }
0x23b4   : > { %v10163_v5 = vpop.xlane.xlu1 %10162 }
0x23b5   : > { %v17156_v49 = vsub.f32 %v17078_v28, %v10178_v29  ;;  %v10179_v57 = vmul.f32 0.0078125, %v10163_v5 }
0x23b7   : > { %v17159_v56 = vsub.f32 %v17082_v8, %v10179_v57  ;;  %v10210_v18 = vmul.f32 %v17156_v49, %v17156_v49 }
0x23b9   : > { %10240 = vadd.xlane.f32.xlu0 %v10210_v18  ;;  %v10211_v27 = vmul.f32 %v17159_v56, %v17159_v56 }
0x23bb   : > { %10242 = vadd.xlane.f32.xlu1 %v10211_v27 }
0x23ef   : > { %v10213_v62 = vpop.xlane.xlu0 %10212 }
0x23f0   : > { %v10244_v50 = vmul.f32 0.007874016, %v10213_v62 }
0x23f1   : > { %v10215_v19 = vpop.xlane.xlu1 %10214 }
0x23f2   : > { %13232 = vrsqrt.f32 %v10244_v50  ;;  %v10245_v47 = vmul.f32 0.007874016, %v10215_v19  ;;  %vm10262_vm0 = vcmp.eq.f32.partialorder %v10244_v50, inf  ;;  %v10265_v42 = vand.u32 2147483648, %v10244_v50 }
0x23f3   : > { %vm10264_vm1 = vcmp.eq.f32.partialorder %v10244_v50, 0.0 }
0x23f4   : > { %13234 = vrsqrt.f32 %v10245_v47  ;;  %vm10269_vm2 = vcmp.eq.f32.partialorder %v10245_v47, inf  ;;  %v10272_v2 = vand.u32 2147483648, %v10245_v47  ;;  %vm10271_vm3 = vcmp.eq.f32.partialorder %v10245_v47, 0.0 }
0x23f7   : > { %v10217_v28 = vpop.xlane.xlu0 %10216 }
0x23f8   : > { %v10246_v61 = vmul.f32 0.007874016, %v10217_v28 }
0x23f9   : > { %v10219_v12 = vpop.xlane.xlu1 %10218 }
0x23fa   : > { %13236 = vrsqrt.f32 %v10246_v61  ;;  %v10247_v8 = vmul.f32 0.007874016, %v10219_v12  ;;  %vm10276_vm9 = vcmp.eq.f32.partialorder %v10246_v61, inf  ;;  %v10279_v45 = vand.u32 2147483648, %v10246_v61 }
0x23fb   : > { %vm10278_vm8 = vcmp.eq.f32.partialorder %v10246_v61, 0.0 }
0x23fc   : > { %v13233_v37 = vpop.eup %13232  ;;  %13238 = vrsqrt.f32 %v10247_v8  ;;  %vm10283_vm10 = vcmp.eq.f32.partialorder %v10247_v8, inf  ;;  %v10286_v16 = vand.u32 2147483648, %v10247_v8  ;;  %vm10285_vm11 = vcmp.eq.f32.partialorder %v10247_v8, 0.0 }
0x23fd   : > { %v10261_v51 = vmul.f32 %v13233_v37, %v10244_v50 }
0x23fe   : > { %v13235_v10 = vpop.eup %13234 }
0x23ff   : > { %v10263_v24 = vsel %vm10262_vm0, %v10244_v50, %v10261_v51  ;;  %v10268_v4 = vmul.f32 %v13235_v10, %v10245_v47 }
0x2400   : > { %v10266_v46 = vsel %vm10264_vm1, %v10265_v42, %v10263_v24 }
0x2401   : > { %v10372_v25 = vadd.f32 1e-06, %v10266_v46  ;;  %v10270_v6 = vsel %vm10269_vm2, %v10245_v47, %v10268_v4 }
0x2402   : > { %v10221_v13 = vpop.xlane.xlu0 %10220  ;;  %v10273_v63 = vsel %vm10271_vm3, %v10272_v2, %v10270_v6 }
0x2403   : > { %13240 = vrcp.f32 %v10372_v25  ;;  %v10248_v7 = vmul.f32 0.007874016, %v10221_v13  ;;  %v10373_v36 = vadd.f32 1e-06, %v10273_v63 }
0x2404   : > { %v13237_v41 = vpop.eup %13236  ;;  %v10223_v33 = vpop.xlane.xlu1 %10222 }
0x2405   : > { %v10275_v21 = vmul.f32 %v13237_v41, %v10246_v61  ;;  %13242 = vrsqrt.f32 %v10248_v7  ;;  %v10249_v9 = vmul.f32 0.007874016, %v10223_v33  ;;  %vm10290_vm12 = vcmp.eq.f32.partialorder %v10248_v7, inf }
0x2406   : > { %13244 = vrcp.f32 %v10373_v36  ;;  %v13239_v58 = vpop.eup %13238  ;;  %v10293_v18 = vand.u32 2147483648, %v10248_v7  ;;  %vm10292_vm13 = vcmp.eq.f32.partialorder %v10248_v7, 0.0 }
0x2407   : > { %v10277_v38 = vsel %vm10276_vm9, %v10246_v61, %v10275_v21  ;;  %v10282_v20 = vmul.f32 %v13239_v58, %v10247_v8  ;;  %13246 = vrsqrt.f32 %v10249_v9  ;;  %vm10297_vm14 = vcmp.eq.f32.partialorder %v10249_v9, inf }
0x2408   : > { %v10280_v32 = vsel %vm10278_vm8, %v10279_v45, %v10277_v38  ;;  %v10300_v47 = vand.u32 2147483648, %v10249_v9  ;;  %vm10299_vm15 = vcmp.eq.f32.partialorder %v10249_v9, 0.0 }
0x2409   : > { %v10374_v59 = vadd.f32 1e-06, %v10280_v32  ;;  %v10284_v15 = vsel %vm10283_vm10, %v10247_v8, %v10282_v20 }
0x240a   : > { %v10225_v17 = vpop.xlane.xlu0 %10224  ;;  %v10287_v35 = vsel %vm10285_vm11, %v10286_v16, %v10284_v15 }
0x240b   : > { %13248 = vrcp.f32 %v10374_v59  ;;  %v10250_v26 = vmul.f32 0.007874016, %v10225_v17  ;;  %v10375_v22 = vadd.f32 1e-06, %v10287_v35 }
0x240c   : > { %v10227_v53 = vpop.xlane.xlu1 %10226 }
0x240d   : > { %v13241_v30 = vpop.eup %13240  ;;  %13250 = vrsqrt.f32 %v10250_v26  ;;  %v10251_v39 = vmul.f32 0.007874016, %v10227_v53  ;;  %vm10304_vm4 = vcmp.eq.f32.partialorder %v10250_v26, inf  ;;  %v10307_v24 = vand.u32 2147483648, %v10250_v26 }
0x240e   : > { %v10404_v43 = vmul.f32 %v13241_v30, %v17086_v48  ;;  %13252 = vrcp.f32 %v10375_v22  ;;  %vm10306_vm6 = vcmp.eq.f32.partialorder %v10250_v26, 0.0 }
0x240f   : > { %v13243_v31 = vpop.eup %13242  ;;  %13254 = vrsqrt.f32 %v10251_v39  ;;  %vm10311_vm7 = vcmp.eq.f32.partialorder %v10251_v39, inf  ;;  %v10314_v6 = vand.u32 2147483648, %v10251_v39  ;;  %vm10313_vm5 = vcmp.eq.f32.partialorder %v10251_v39, 0.0 }
0x2410   : > { %v13245_v29 = vpop.eup %13244  ;;  %10420 = vst [vmem:[%s17168_s18] sm:$0xff] %v10404_v43  ;;  %v10289_v5 = vmul.f32 %v13243_v31, %v10248_v7 }
0x2411   : > { %v10405_v57 = vmul.f32 %v13245_v29, %v17089_v1  ;;  %v13247_v27 = vpop.eup %13246 }
0x2412   : > { %v10291_v62 = vsel %vm10290_vm12, %v10248_v7, %v10289_v5  ;;  %v10296_v50 = vmul.f32 %v13247_v27, %v10249_v9 }
0x2413   : > { %10421 = vst [vmem:[%s17168_s18 + $0x8] sm:$0xff] %v10405_v57  ;;  %v10294_v48 = vsel %vm10292_vm13, %v10293_v18, %v10291_v62 }
0x2414   : > { %v10376_v19 = vadd.f32 1e-06, %v10294_v48  ;;  %v10298_v61 = vsel %vm10297_vm14, %v10249_v9, %v10296_v50 }
0x2415   : > { %v13249_v28 = vpop.eup %13248  ;;  %v10301_v1 = vsel %vm10299_vm15, %v10300_v47, %v10298_v61 }
0x2416   : > { %v10406_v12 = vmul.f32 %v13249_v28, %v17096_v14  ;;  %13256 = vrcp.f32 %v10376_v19  ;;  %v10377_v37 = vadd.f32 1e-06, %v10301_v1 }
0x2417   : > { %v13251_v8 = vpop.eup %13250 }
0x2418   : > { %v13253_v51 = vpop.eup %13252  ;;  %10422 = vst [vmem:[%s17168_s18 + $0x10] sm:$0xff] %v10406_v12  ;;  %v10303_v42 = vmul.f32 %v13251_v8, %v10250_v26  ;;  %13258 = vrcp.f32 %v10377_v37 }
0x2419   : > { %v10407_v10 = vmul.f32 %v13253_v51, %v17099_v54  ;;  %v13255_v46 = vpop.eup %13254 }
0x241a   : > { %v10305_v4 = vsel %vm10304_vm4, %v10250_v26, %v10303_v42  ;;  %v10310_v14 = vmul.f32 %v13255_v46, %v10251_v39 }
0x241b   : > { %10423 = vst [vmem:[%s17168_s18 + $0x18] sm:$0xff] %v10407_v10  ;;  %v10308_v25 = vsel %vm10306_vm6, %v10307_v24, %v10305_v4 }
0x241c   : > { %v10378_v2 = vadd.f32 1e-06, %v10308_v25  ;;  %v10312_v13 = vsel %vm10311_vm7, %v10251_v39, %v10310_v14 }
0x241d   : > { %v10315_v63 = vsel %vm10313_vm5, %v10314_v6, %v10312_v13 }
0x241e   : > { %13260 = vrcp.f32 %v10378_v2  ;;  %v10379_v54 = vadd.f32 1e-06, %v10315_v63 }
0x2420   : > { %v13257_v7 = vpop.eup %13256  ;;  %13262 = vrcp.f32 %v10379_v54 }
0x2421   : > { %v10408_v41 = vmul.f32 %v13257_v7, %v17106_v11 }
0x2422   : > { %v13259_v36 = vpop.eup %13258 }
0x2423   : > { %10424 = vst [vmem:[%s17168_s18 + $0x20] sm:$0xff] %v10408_v41  ;;  %v10409_v33 = vmul.f32 %v13259_v36, %v17109_v23 }
0x2425   : > { %10425 = vst [vmem:[%s17168_s18 + $0x28] sm:$0xff] %v10409_v33 }
0x2428   : > { %v13261_v21 = vpop.eup %13260 }
0x2429   : > { %v10410_v45 = vmul.f32 %v13261_v21, %v17116_v40 }
0x242a   : > { %v13263_v9 = vpop.eup %13262 }
0x242b   : > { %10426 = vst [vmem:[%s17168_s18 + $0x30] sm:$0xff] %v10410_v45  ;;  %v10411_v38 = vmul.f32 %v13263_v9, %v17119_v44 }
0x242c   : > { %v10229_v58 = vpop.xlane.xlu0 %10228 }
0x242d   : > { %v10252_v32 = vmul.f32 0.007874016, %v10229_v58  ;;  %10427 = vst [vmem:[%s17168_s18 + $0x38] sm:$0xff] %v10411_v38 }
0x242e   : > { %v10231_v20 = vpop.xlane.xlu1 %10230 }
0x242f   : > { %13264 = vrsqrt.f32 %v10252_v32  ;;  %v10253_v59 = vmul.f32 0.007874016, %v10231_v20  ;;  %vm10318_vm0 = vcmp.eq.f32.partialorder %v10252_v32, inf  ;;  %v10321_v40 = vand.u32 2147483648, %v10252_v32 }
0x2430   : > { %vm10320_vm1 = vcmp.eq.f32.partialorder %v10252_v32, 0.0 }
0x2431   : > { %13266 = vrsqrt.f32 %v10253_v59  ;;  %vm10325_vm2 = vcmp.eq.f32.partialorder %v10253_v59, inf  ;;  %v10328_v43 = vand.u32 2147483648, %v10253_v59  ;;  %vm10327_vm3 = vcmp.eq.f32.partialorder %v10253_v59, 0.0 }
0x2434   : > { %v10233_v11 = vpop.xlane.xlu0 %10232 }
0x2435   : > { %v10254_v16 = vmul.f32 0.007874016, %v10233_v11 }
0x2436   : > { %v10235_v15 = vpop.xlane.xlu1 %10234 }
0x2437   : > { %13268 = vrsqrt.f32 %v10254_v16  ;;  %v10255_v23 = vmul.f32 0.007874016, %v10235_v15  ;;  %vm10332_vm9 = vcmp.eq.f32.partialorder %v10254_v16, inf  ;;  %v10335_v48 = vand.u32 2147483648, %v10254_v16 }
0x2438   : > { %vm10334_vm8 = vcmp.eq.f32.partialorder %v10254_v16, 0.0 }
0x2439   : > { %v13265_v17 = vpop.eup %13264  ;;  %13270 = vrsqrt.f32 %v10255_v23  ;;  %vm10339_vm10 = vcmp.eq.f32.partialorder %v10255_v23, inf  ;;  %v10342_v1 = vand.u32 2147483648, %v10255_v23  ;;  %vm10341_vm11 = vcmp.eq.f32.partialorder %v10255_v23, 0.0 }
0x243a   : > { %v10317_v35 = vmul.f32 %v13265_v17, %v10252_v32 }
0x243b   : > { %v13267_v26 = vpop.eup %13266 }
0x243c   : > { %v10319_v22 = vsel %vm10318_vm0, %v10252_v32, %v10317_v35  ;;  %v10324_v53 = vmul.f32 %v13267_v26, %v10253_v59 }
0x243d   : > { %v10322_v44 = vsel %vm10320_vm1, %v10321_v40, %v10319_v22 }
0x243e   : > { %v10380_v30 = vadd.f32 1e-06, %v10322_v44  ;;  %v10326_v39 = vsel %vm10325_vm2, %v10253_v59, %v10324_v53  ;;  %v10237_v31 = vpop.xlane.xlu0 %10236 }
0x243f   : > { %v10329_v29 = vsel %vm10327_vm3, %v10328_v43, %v10326_v39  ;;  %v10256_v5 = vmul.f32 0.007874016, %v10237_v31 }
0x2440   : > { %13272 = vrcp.f32 %v10380_v30  ;;  %v10381_v18 = vadd.f32 1e-06, %v10329_v29  ;;  %v10239_v27 = vpop.xlane.xlu1 %10238 }
0x2441   : > { %v13269_v57 = vpop.eup %13268  ;;  %13274 = vrsqrt.f32 %v10256_v5  ;;  %v10257_v50 = vmul.f32 0.007874016, %v10239_v27  ;;  %vm10346_vm12 = vcmp.eq.f32.partialorder %v10256_v5, inf  ;;  %v10349_v63 = vand.u32 2147483648, %v10256_v5 }
0x2442   : > { %v10331_v62 = vmul.f32 %v13269_v57, %v10254_v16  ;;  %13276 = vrcp.f32 %v10381_v18  ;;  %vm10348_vm13 = vcmp.eq.f32.partialorder %v10256_v5, 0.0 }
0x2443   : > { %v13271_v19 = vpop.eup %13270  ;;  %13278 = vrsqrt.f32 %v10257_v50  ;;  %vm10353_vm14 = vcmp.eq.f32.partialorder %v10257_v50, inf  ;;  %vm10355_vm15 = vcmp.eq.f32.partialorder %v10257_v50, 0.0 }
0x2444   : > { %v10333_v47 = vsel %vm10332_vm9, %v10254_v16, %v10331_v62  ;;  %v10338_v61 = vmul.f32 %v13271_v19, %v10255_v23 }
0x2445   : > { %v10336_v28 = vsel %vm10334_vm8, %v10335_v48, %v10333_v47 }
0x2446   : > { %v10382_v12 = vadd.f32 1e-06, %v10336_v28  ;;  %v10340_v8 = vsel %vm10339_vm10, %v10255_v23, %v10338_v61  ;;  %v10241_v37 = vpop.xlane.xlu0 %10240 }
0x2447   : > { %v10343_v51 = vsel %vm10341_vm11, %v10342_v1, %v10340_v8  ;;  %v10258_v42 = vmul.f32 0.007874016, %v10241_v37 }
0x2448   : > { %13280 = vrcp.f32 %v10382_v12  ;;  %v10383_v10 = vadd.f32 1e-06, %v10343_v51  ;;  %v10243_v24 = vpop.xlane.xlu1 %10242 }
0x2449   : > { %13282 = vrsqrt.f32 %v10258_v42  ;;  %v10259_v25 = vmul.f32 0.007874016, %v10243_v24  ;;  %vm10360_vm4 = vcmp.eq.f32.partialorder %v10258_v42, inf  ;;  %v10363_v11 = vand.u32 2147483648, %v10258_v42 }
0x244a   : > { %v13273_v46 = vpop.eup %13272  ;;  %13284 = vrcp.f32 %v10383_v10  ;;  %vm10362_vm6 = vcmp.eq.f32.partialorder %v10258_v42, 0.0 }
0x244b   : > { %v10412_v4 = vmul.f32 %v13273_v46, %v17126_v0  ;;  %v13275_v14 = vpop.eup %13274  ;;  %13286 = vrsqrt.f32 %v10259_v25  ;;  %v10356_v0 = vand.u32 2147483648, %v10257_v50  ;;  %vm10367_vm7 = vcmp.eq.f32.partialorder %v10259_v25, inf }
0x244c   : > { %v13277_v2 = vpop.eup %13276  ;;  %v10345_v6 = vmul.f32 %v13275_v14, %v10256_v5  ;;  %v10370_v35 = vand.u32 2147483648, %v10259_v25  ;;  %vm10369_vm5 = vcmp.eq.f32.partialorder %v10259_v25, 0.0 }
0x244d   : > { %10428 = vst [vmem:[%s17168_s18 + $0x40] sm:$0xff] %v10412_v4  ;;  %v10413_v13 = vmul.f32 %v13277_v2, %v17129_v55  ;;  %v13279_v54 = vpop.eup %13278 }
0x244e   : > { %v10347_v7 = vsel %vm10346_vm12, %v10256_v5, %v10345_v6  ;;  %v10352_v36 = vmul.f32 %v13279_v54, %v10257_v50 }
0x244f   : > { %10429 = vst [vmem:[%s17168_s18 + $0x48] sm:$0xff] %v10413_v13  ;;  %v10350_v41 = vsel %vm10348_vm13, %v10349_v63, %v10347_v7 }
0x2450   : > { %v10384_v33 = vadd.f32 1e-06, %v10350_v41  ;;  %v10354_v45 = vsel %vm10353_vm14, %v10257_v50, %v10352_v36 }
0x2451   : > { %v10357_v55 = vsel %vm10355_vm15, %v10356_v0, %v10354_v45 }
0x2452   : > { %v13281_v21 = vpop.eup %13280  ;;  %13288 = vrcp.f32 %v10384_v33  ;;  %v10385_v38 = vadd.f32 1e-06, %v10357_v55 }
0x2453   : > { %v10414_v9 = vmul.f32 %v13281_v21, %v17136_v60  ;;  %v13283_v58 = vpop.eup %13282 }
0x2454   : > { %v13285_v32 = vpop.eup %13284  ;;  %v10359_v20 = vmul.f32 %v13283_v58, %v10258_v42  ;;  %13290 = vrcp.f32 %v10385_v38 }
0x2455   : > { %10430 = vst [vmem:[%s17168_s18 + $0x50] sm:$0xff] %v10414_v9  ;;  %v10415_v59 = vmul.f32 %v13285_v32, %v17139_v52  ;;  %v13287_v16 = vpop.eup %13286 }
0x2456   : > { %v10361_v15 = vsel %vm10360_vm4, %v10258_v42, %v10359_v20  ;;  %v10366_v60 = vmul.f32 %v13287_v16, %v10259_v25 }
0x2457   : > { %10431 = vst [vmem:[%s17168_s18 + $0x58] sm:$0xff] %v10415_v59  ;;  %v10364_v23 = vsel %vm10362_vm6, %v10363_v11, %v10361_v15 }
0x2458   : > { %v10386_v17 = vadd.f32 1e-06, %v10364_v23  ;;  %v10368_v40 = vsel %vm10367_vm7, %v10259_v25, %v10366_v60 }
0x2459   : > { %v10371_v52 = vsel %vm10369_vm5, %v10370_v35, %v10368_v40 }
0x245a   : > { %13292 = vrcp.f32 %v10386_v17  ;;  %v10387_v26 = vadd.f32 1e-06, %v10371_v52 }
0x245c   : > { %v13289_v22 = vpop.eup %13288  ;;  %13294 = vrcp.f32 %v10387_v26 }
0x245d   : > { %v10416_v44 = vmul.f32 %v13289_v22, %v17146_v3 }
0x245e   : > { %v13291_v53 = vpop.eup %13290 }
0x245f   : > { %10432 = vst [vmem:[%s17168_s18 + $0x60] sm:$0xff] %v10416_v44  ;;  %v10417_v30 = vmul.f32 %v13291_v53, %v17149_v34 }
0x2461   : > { %10433 = vst [vmem:[%s17168_s18 + $0x68] sm:$0xff] %v10417_v30 }
0x2464   : > { %v13293_v43 = vpop.eup %13292 }
0x2465   : > { %v10418_v39 = vmul.f32 %v13293_v43, %v17156_v49 }
0x2466   : > { %v13295_v31 = vpop.eup %13294 }
0x2467   : > { %10434 = vst [vmem:[%s17168_s18 + $0x70] sm:$0xff] %v10418_v39  ;;  %v10419_v3 = vmul.f32 %v13295_v31, %v17159_v56 }
0x2469   : > { %10435 = vst [vmem:[%s17168_s18 + $0x78] sm:$0xff] %v10419_v3 }
0x246a   : > { %13469 = shalt.err (!%p13466_p13)
}
0x246b   : > { %s13470_s30 = scalar_lea.hbm %s17204_s24, 2048  ;;  %s13474_s17 = scalar_lea.hbm %s17261_s9, 4096 }
0x246c   : > { %p13471_p9 = scmp.ne.s32.totalorder %s17204_s24, %s13470_s30  ;;  %p13475_p4 = scmp.lt.u32.totalorder %s17204_s24, %s17261_s9 }
0x246d   : > { %p13476_p8 = scmp.lt.u32.totalorder %s13474_s17, %s13470_s30  ;;  %p13478_p3 = scmp.lt.u32.totalorder %s13470_s30, %s17204_s24 }
0x246e   : > { %p13472_p0 = pnand %p13471_p9, %p13758_p10 }
0x246f   : > { %p13477_p6 = por %p13476_p8, %p13475_p4 }
0x2470   : > { %p13473_p11 = pneg %p13472_p0 }
0x2471   : > { %p13479_p5 = por %p13478_p3, %p13477_p6 }
0x2473   : > { %p13480_p7 = pnand %p13479_p5, %p13473_p11 }
0x2475   : > { %13483 = shalt.err (!%p13480_p7)
}
0x2476   : > { %s13550_s25 = smov 128   ;;  %s13551_s1 = smov 8  }
0x2477   : > { %12141 = dma.vmem_to_hbm [thread:$0]  (%p13758_p10), %s17206_s22, 2048, %s17204_s24, %s10437_s19, %s13550_s25, %s13550_s25, %s13551_s1  }
0x2478 PF: > { %s17401_s13 = sld [smem:[#allocation20_spill]]  ;;  %s17402_s23 = sld [smem:[#allocation21_spill]] }
0x2479   : > { %p17404_p2 = scmp.ge.s32.totalorder %s13530_s12, 2 }
0x247e   : > { %s10465_s21 = sand.u32 1, %s17401_s13   ;;  %p17403_p12 = scmp.ne.s32.totalorder %s17402_s23, 0 }
0x247f   : > { %s10466_s20 = scalar_lea.sflag [#allocation8], %s10465_s21 }
0x2480   : > { %p12161_p1 = pnand %p17404_p2, %p17403_p12 }
0x2482   : > { %13513 = dma.done.wait (!%p12161_p1), %s10466_s20, 2048  }
0x2483   : > { %13515 = vsyncadd (!%p12161_p1), %s10466_s20, 4294965248  ;;  %p24_p13 = scmp.ge.s32.totalorder %s13748_s28, 4   ;;  %s17405_s30 = smov %s13522_s10 }
0x2484   : > { %s17406_s10 = smov %s13526_s11  ;;  %s17407_s11 = smov %s13764_s27 }
0x2485   : > { %s17408_s12 = smov %s13748_s28  ;;  %26 = sbr.rel (!%p24_p13) target bundleno = 9 (0x9), region = 117 }
0x248c   :  { %10471 = vsyncpa [#allocation7], 1 }
0x248d   :  { %10473 = vsyncpa [#allocation7 + $0x1], 1 }
0x248e   :  { %10474 = vsyncpa [#allocation10], 1 }
0x248f   :  { %10475 = vsyncpa [#allocation13], 1 }
0x2490   :  { %10476 = vsyncpa [#allocation8], 1 }
0x2491   :  { %10478 = vsyncpa [#allocation8 + $0x1], 1 }

</bundles_post_ra>
